<compile_context>
chip_gen: v6e
topology: v6e:2x2x1
jax: 0.10.0
libtpu: 0.0.40
codegen_flags: <defaults>
</compile_context>

<pallas_src>
import numpy as np
import jax
import jax.numpy as jnp
from jax.experimental import pallas as pl
from jax.experimental.pallas import tpu as pltpu

BN_EPS = 1e-5
# bf16 matmul operands, f32 accumulation / epilogue.
COMPUTE_DTYPE = jnp.bfloat16


def _round_up(v, m):
    return -(-v // m) * m


# ----------------------------- Pallas kernel --------------------------------

def _make_stem_kernel(k_tap, taps, n_planes, L, Wpl, Sp, imgs, ho, wo,
                      fuse, compact):
    """One grid step = one batch group.

      acc = sum_t slab_t @ W_t           (9 MXU matmuls; 1 for the prebuilt
                                           layer-1 patch matrix)
      y   = BN_eval(ReLU(acc + bias))     (f32 epilogue)
      y   = y @ W_1x1                     (only for the fused last layer)
      out = compaction of the valid rows  (lane-dense stores)
    """

    def kernel(*refs):
        planes = refs[:n_planes]
        rest = refs[n_planes:]
        if fuse:
            w_ref, eps_ref, w1_ref = rest[0], rest[1], rest[2]
            rest = rest[3:]
        else:
            w_ref, eps_ref = rest[0], rest[1]
            w1_ref = None
            rest = rest[2:]
        o_ref = rest[0]
        y_ref = rest[1] if compact else None

        # ---- tap-decomposed conv: contiguous 2-D slabs -> MXU matmuls ------
        acc = None
        for t, (p, off) in enumerate(taps):
            slab = planes[p][off:off + L, :]                  # (L, k_tap)
            part = jnp.dot(slab, w_ref[t * k_tap:(t + 1) * k_tap, :],
                           preferred_element_type=jnp.float32)
            acc = part if acc is None else acc + part

        # ---- fused bias + ReLU + BatchNorm(eval) affine (f32) --------------
        acc = jnp.maximum(acc + eps_ref[0:1, :], 0.0)          # conv bias+ReLU
        y = acc * eps_ref[1:2, :] + eps_ref[2:3, :]            # BN affine

        if fuse:                                               # fused 1x1 conv
            y = jnp.dot(y.astype(w1_ref.dtype), w1_ref[...],
                        preferred_element_type=jnp.float32)
        y = y.astype(o_ref.dtype)

        # ---- compaction: drop garbage columns, lane-dense row stores -------
        if not compact:
            o_ref[...] = y
        else:
            y_ref[...] = y
            # TODO(synk): switch to lax.fori_loop + pl.ds if imgs*ho gets big.
            for i in range(imgs):
                for oh in range(ho):
                    src = i * Sp + oh * Wpl
                    dst = (i * ho + oh) * wo
                    o_ref[dst:dst + wo, :] = y_ref[src:src + wo, :]

    return kernel


# ------------------------------- JAX wrapper ---------------------------------

def conv_layer_forward(x_nhwc, lp, w1x1=None, n_groups=1):
    """One ConvLayer (+ optionally the fused final 1x1 conv).  Returns NHWC."""
    n, h, w, c = x_nhwc.shape
    stride = int(lp["stride"])
    c_out = lp["w"].shape[0]
    c_pad = _round_up(c, 8)
    assert n % n_groups == 0
    imgs = n // n_groups

    if c_pad <= 16:
        # ---- layer-1 path: tiny c_in -> im2col in the XLA wrapper ----------
        ho = (h + 2 - 3) // stride + 1
        wo = (w + 2 - 3) // stride + 1
        xp = jnp.pad(x_nhwc.astype(COMPUTE_DTYPE),
                     ((0, 0), (1, 1), (1, 1), (0, c_pad - c)))
        cols = [xp[:, kh:kh + stride * (ho - 1) + 1:stride,
                   kw:kw + stride * (wo - 1) + 1:stride, :]
                for kh in range(3) for kw in range(3)]
        patches = jnp.concatenate(cols, axis=-1)        # (n, ho, wo, 9*c_pad)
        planes = [patches.reshape(n_groups, imgs * ho * wo, 9 * c_pad)]
        taps = [(0, 0)]
        k_tap = 9 * c_pad
        Wpl, Sp = wo, ho * wo
        compact = False
    else:
        # ---- layers 2-6: flattened-spatial planes, tap-decomposed conv -----
        k_tap = c_pad
        compact = True
        if stride == 1:
            ho, wo = h, w
            Wpl, Hpl = w + 2, h + 3            # 1 extra zero row for slab room
            xp = jnp.pad(x_nhwc.astype(COMPUTE_DTYPE),
                         ((0, 0), (1, 2), (1, 1), (0, c_pad - c)))
            Sp = Hpl * Wpl
            planes = [xp.reshape(n_groups, imgs * Sp, c_pad)]
            taps = [(0, kh * Wpl + kw) for kh in range(3) for kw in range(3)]
        else:
            assert h % 2 == 0 and w % 2 == 0, "stride-2 stem layer needs even H/W"
            ho, wo = h // 2, w // 2
            Wpl, Hpl = wo + 1, ho + 2
            xp = jnp.pad(x_nhwc.astype(COMPUTE_DTYPE),
                         ((0, 0), (1, 3), (1, 1), (0, c_pad - c)))
            Sp = Hpl * Wpl
            # Even/odd row AND column planes -> contiguous in-kernel slabs.
            planes = [xp[:, pr::2, pc::2, :].reshape(n_groups, imgs * Sp, c_pad)
                      for pr in range(2) for pc in range(2)]
            taps = [((kh % 2) * 2 + (kw % 2), (kh // 2) * Wpl + (kw // 2))
                    for kh in range(3) for kw in range(3)]

    L = (imgs - 1) * Sp + ho * Wpl
    m_valid = imgs * ho * wo

    # Weights: OIHW -> (kh, kw, c_in_pad, c_out) -> (9*c_in_pad, c_out).
    w4 = jnp.pad(lp["w"], ((0, 0), (0, c_pad - c), (0, 0), (0, 0)))
    w2d = jnp.transpose(w4, (2, 3, 1, 0)).reshape(9 * c_pad, c_out)
    w2d = w2d.astype(COMPUTE_DTYPE)

    # Packed epilogue operand: row 0 = conv bias, row 1 = BN scale, row 2 = BN shift.
    scale = (lp["gamma"] / jnp.sqrt(lp["rvar"] + BN_EPS)).astype(jnp.float32)
    shift = (lp["beta"] - lp["rmean"] * scale).astype(jnp.float32)
    eps_pack = jnp.zeros((8, c_out), jnp.float32)
    eps_pack = eps_pack.at[0].set(lp["b"].astype(jnp.float32))
    eps_pack = eps_pack.at[1].set(scale)
    eps_pack = eps_pack.at[2].set(shift)

    fuse = w1x1 is not None
    operands = list(planes) + [w2d, eps_pack]
    in_specs = [pl.BlockSpec((None,) + tuple(p.shape[1:]), lambda g: (g, 0, 0))
                for p in planes]
    in_specs += [pl.BlockSpec(tuple(w2d.shape), lambda g: (0, 0)),
                 pl.BlockSpec((8, c_out), lambda g: (0, 0))]
    if fuse:
        hid = w1x1.shape[0]
        hid_pad = _round_up(hid, 128)          # lane-dense final matmul/store
        w1 = jnp.transpose(w1x1[:, :, 0, 0], (1, 0)).astype(COMPUTE_DTYPE)
        w1 = jnp.pad(w1, ((0, 0), (0, hid_pad - hid)))
        operands.append(w1)
        in_specs.append(pl.BlockSpec((c_out, hid_pad), lambda g: (0, 0)))
        out_c, out_dtype = hid_pad, jnp.float32
    else:
        out_c, out_dtype = c_out, COMPUTE_DTYPE

    scratch_shapes = []
    if compact:
        scratch_shapes.append(pltpu.VMEM((L, out_c), out_dtype))

    # Derived VMEM budget (2x for double-buffered I/O blocks + slack),
    # floored at 16 MiB (safe on v5e/v6e/v7x) instead of a blanket 48 MiB.
    def _blk_bytes(a, per_group):
        shape = a.shape[1:] if per_group else a.shape
        return int(np.prod(shape)) * a.dtype.itemsize
    io_bytes = sum(_blk_bytes(p, True) for p in planes)
    io_bytes += _blk_bytes(w2d, False) + _blk_bytes(eps_pack, False)
    if fuse:
        io_bytes += _blk_bytes(w1, False)
    io_bytes += m_valid * out_c * jnp.dtype(out_dtype).itemsize
    scratch_bytes = L * out_c * jnp.dtype(out_dtype).itemsize if compact else 0
    vmem_limit = int(min(max(2 * io_bytes + scratch_bytes + (2 << 20),
                             16 << 20), 48 << 20))

    out = pl.pallas_call(
        _make_stem_kernel(k_tap, taps, len(planes), L, Wpl, Sp, imgs, ho, wo,
                          fuse, compact),
        out_shape=jax.ShapeDtypeStruct((n_groups, m_valid, out_c), out_dtype),
        grid=(n_groups,),
        in_specs=in_specs,
        out_specs=pl.BlockSpec((None, m_valid, out_c), lambda g: (g, 0, 0)),
        scratch_shapes=scratch_shapes,
        compiler_params=pltpu.CompilerParams(
            dimension_semantics=("parallel",),     # 2 groups -> both v7x cores
            vmem_limit_bytes=vmem_limit),
    )(*operands)
    return out.reshape(n, ho, wo, out_c)


def conv_patching_stem_forward(x_nchw, params):
    """NCHW -> NCHW forward of ConvPatchingStem: six fused ConvLayer kernels,
    the final 1x1 conv folded into the last one."""
    x = jnp.transpose(x_nchw, (0, 2, 3, 1))               # NCHW -> NHWC
    n = x.shape[0]
    n_groups = 2 if (n >= 2 and n % 2 == 0) else 1        # 2-way parallel grid
    layers = params["conv3x3layers"]
    for li, lp in enumerate(layers):
        is_last = li == len(layers) - 1
        x = conv_layer_forward(
            x, lp, w1x1=params["conv1x1_w"] if is_last else None,
            n_groups=n_groups)
    hid = params["conv1x1_w"].shape[0]
    x = x[..., :hid]                                       # drop 1x1 lane pad
    return jnp.transpose(x, (0, 3, 1, 2))                  # NHWC -> NCHW


# -------------------------- reference (pure XLA) -----------------------------

def reference_forward(x_nchw, params, compute_dtype=COMPUTE_DTYPE):
    """Pure-XLA reference with the same mixed-precision policy as the Pallas
    pipeline (matmul operands in `compute_dtype`, f32 accumulation and f32
    bias/ReLU/BN epilogue).  With compute_dtype=float32 this is exactly the
    original module's (eval-mode) forward."""
    x = x_nchw
    for lp in params["conv3x3layers"]:
        y = jax.lax.conv_general_dilated(
            x.astype(compute_dtype), lp["w"].astype(compute_dtype),
            (lp["stride"], lp["stride"]), [(1, 1), (1, 1)],
            dimension_numbers=("NCHW", "OIHW", "NCHW"),
            preferred_element_type=jnp.float32)
        y = jnp.maximum(y + lp["b"][None, :, None, None], 0.0)
        scale = lp["gamma"] / jnp.sqrt(lp["rvar"] + BN_EPS)
        shift = lp["beta"] - lp["rmean"] * scale
        x = y * scale[None, :, None, None] + shift[None, :, None, None]
    return jax.lax.conv_general_dilated(
        x.astype(compute_dtype), params["conv1x1_w"].astype(compute_dtype),
        (1, 1), [(0, 0), (0, 0)],
        dimension_numbers=("NCHW", "OIHW", "NCHW"),
        preferred_element_type=jnp.float32)


# ------------------------------ param init -----------------------------------

def init_params(key, num_channels, hidden_size):
    chans_in = [num_channels, 64, 128, 128, 256, 256]
    chans_out = [64, 128, 128, 256, 256, 512]
    layers = []
    for ci, co in zip(chans_in, chans_out):
        key, kw, kb, kg, kbe, km, kv = jax.random.split(key, 7)
        fan_in = ci * 9
        layers.append(dict(
            stride=1 if ci == co else 2,
            w=jax.random.normal(kw, (co, ci, 3, 3), jnp.float32) / np.sqrt(fan_in),
            b=jax.random.normal(kb, (co,), jnp.float32) * 0.1,
            gamma=1.0 + 0.1 * jax.random.normal(kg, (co,), jnp.float32),
            beta=0.1 * jax.random.normal(kbe, (co,), jnp.float32),
            rmean=0.1 * jax.random.normal(km, (co,), jnp.float32),
            rvar=jax.random.uniform(kv, (co,), jnp.float32, 0.5, 1.5),
        ))
    key, kw = jax.random.split(key)
    conv1x1_w = jax.random.normal(kw, (hidden_size, 512, 1, 1),
                                  jnp.float32) / np.sqrt(512.0)
    return dict(conv3x3layers=layers, conv1x1_w=conv1x1_w)


# ---------------------------------- main --------------------------------------

if __name__ == "__main__":
    key = jax.random.PRNGKey(0)
    key, kx, kp = jax.random.split(key, 3)

    batch, num_channels, spatial, hidden_size = 2, 4, 16, 32
    x = jax.random.normal(kx, (batch, num_channels, spatial, spatial),
                          jnp.float32)
    params = init_params(kp, num_channels, hidden_size)

    fwd = jax.jit(lambda inp: conv_patching_stem_forward(inp, params))
    out = jax.block_until_ready(fwd(x))

    ref = jax.block_until_ready(reference_forward(x, params))
    assert out.shape == ref.shape, (out.shape, ref.shape)
    # bf16 MXU operands -> looser tolerance; COMPUTE_DTYPE=f32 recovers 1e-4.
    tol = 1e-4 if COMPUTE_DTYPE == jnp.float32 else 2e-2
    np.testing.assert_allclose(np.asarray(out), np.asarray(ref),
                               rtol=tol, atol=tol)
    print("KERNEL_OK")
</pallas_src>

<mosaic_0001>
module attributes {stable_mosaic.version = 11 : i64} {
  func.func @kernel(%arg0: i32, %arg1: memref<1x64x72xbf16, #tpu.memory_space<vmem>>, %arg2: memref<72x64xbf16, #tpu.memory_space<vmem>>, %arg3: memref<8x64xf32, #tpu.memory_space<vmem>>, %arg4: memref<1x64x64xbf16, #tpu.memory_space<vmem>>) attributes {dimension_semantics = [#tpu.dimension_semantics<parallel>], iteration_bounds = array<i64: 2>, scalar_prefetch = 0 : i64, scratch_operands = 0 : i64, tpu.core_type = #tpu.core_type<tc>, window_params = [{transform_indices = @transform_0, window_bounds = array<i64: 1, 64, 72>}, {pipeline_mode = #tpu.pipeline_mode<synchronous>, transform_indices = @transform_1, window_bounds = array<i64: 72, 64>}, {pipeline_mode = #tpu.pipeline_mode<synchronous>, transform_indices = @transform_2, window_bounds = array<i64: 8, 64>}, {transform_indices = @transform_3, window_bounds = array<i64: 1, 64, 64>}]} {
    %c0 = arith.constant 0 : index
    %c0_0 = arith.constant 0 : index
    %c0_1 = arith.constant 0 : index
    %0 = vector.load %arg1[%c0, %c0_0, %c0_1] : memref<1x64x72xbf16, #tpu.memory_space<vmem>>, vector<1x64x72xbf16>
    %1 = vector.shape_cast %0 : vector<1x64x72xbf16> to vector<64x72xbf16>
    %c0_2 = arith.constant 0 : index
    %c0_3 = arith.constant 0 : index
    %2 = vector.load %arg2[%c0_2, %c0_3] : memref<72x64xbf16, #tpu.memory_space<vmem>>, vector<72x64xbf16>
    %cst = arith.constant dense<0.000000e+00> : vector<64x64xf32>
    %3 = tpu.matmul %1, %2, %cst {dimension_numbers = #tpu.dot_dimension_numbers<[1], [0], [0], [1], [0, 0, 1, 1], [], []>} : vector<64x72xbf16>, vector<72x64xbf16>, vector<64x64xf32> -> vector<64x64xf32>
    %c0_4 = arith.constant 0 : index
    %c0_5 = arith.constant 0 : index
    %4 = vector.load %arg3[%c0_4, %c0_5] : memref<8x64xf32, #tpu.memory_space<vmem>>, vector<1x64xf32>
    %5 = vector.broadcast %4 : vector<1x64xf32> to vector<64x64xf32>
    %6 = arith.addf %3, %5 : vector<64x64xf32>
    %cst_6 = arith.constant 0.000000e+00 : f32
    %7 = vector.broadcast %cst_6 : f32 to vector<64x64xf32>
    %8 = arith.maximumf %6, %7 : vector<64x64xf32>
    %c1 = arith.constant 1 : index
    %c0_7 = arith.constant 0 : index
    %9 = vector.load %arg3[%c1, %c0_7] : memref<8x64xf32, #tpu.memory_space<vmem>>, vector<1x64xf32>
    %10 = vector.broadcast %9 : vector<1x64xf32> to vector<64x64xf32>
    %11 = arith.mulf %8, %10 : vector<64x64xf32>
    %c2 = arith.constant 2 : index
    %c0_8 = arith.constant 0 : index
    %12 = vector.load %arg3[%c2, %c0_8] : memref<8x64xf32, #tpu.memory_space<vmem>>, vector<1x64xf32>
    %13 = vector.broadcast %12 : vector<1x64xf32> to vector<64x64xf32>
    %14 = arith.addf %11, %13 : vector<64x64xf32>
    %15 = arith.truncf %14 : vector<64x64xf32> to vector<64x64xbf16>
    %c0_9 = arith.constant 0 : index
    %c0_10 = arith.constant 0 : index
    %c0_11 = arith.constant 0 : index
    %16 = vector.load %arg4[%c0_9, %c0_10, %c0_11] : memref<1x64x64xbf16, #tpu.memory_space<vmem>>, vector<1x64x64xbf16>
    %17 = vector.shape_cast %16 : vector<1x64x64xbf16> to vector<64x64xbf16>
    %18 = vector.shape_cast %15 : vector<64x64xbf16> to vector<1x64x64xbf16>
    tpu.vector_store %arg4[%c0_9, %c0_10, %c0_11], %18 {strides = array<i32>} : memref<1x64x64xbf16, #tpu.memory_space<vmem>>, vector<1x64x64xbf16>,
    return
  }
  func.func @transform_0(%arg0: i32) -> (i32, i32, i32) {
    %c0_i32 = arith.constant 0 : i32
    %c0_i32_0 = arith.constant 0 : i32
    %c0_i32_1 = arith.constant 0 : i32
    return %arg0, %c0_i32, %c0_i32_0 : i32, i32, i32
  }
  func.func @transform_1(%arg0: i32) -> (i32, i32) {
    %c0_i32 = arith.constant 0 : i32
    %c0_i32_0 = arith.constant 0 : i32
    %c0_i32_1 = arith.constant 0 : i32
    return %c0_i32, %c0_i32_0 : i32, i32
  }
  func.func @transform_2(%arg0: i32) -> (i32, i32) {
    %c0_i32 = arith.constant 0 : i32
    %c0_i32_0 = arith.constant 0 : i32
    %c0_i32_1 = arith.constant 0 : i32
    return %c0_i32, %c0_i32_0 : i32, i32
  }
  func.func @transform_3(%arg0: i32) -> (i32, i32, i32) {
    %c0_i32 = arith.constant 0 : i32
    %c0_i32_0 = arith.constant 0 : i32
    %c0_i32_1 = arith.constant 0 : i32
    return %arg0, %c0_i32, %c0_i32_0 : i32, i32, i32
  }
}

module attributes {stable_mosaic.version = 11 : i64} {
  func.func @kernel(%arg0: i32, %arg1: memref<1x30x64xbf16, #tpu.memory_space<vmem>>, %arg2: memref<1x30x64xbf16, #tpu.memory_space<vmem>>, %arg3: memref<1x30x64xbf16, #tpu.memory_space<vmem>>, %arg4: memref<1x30x64xbf16, #tpu.memory_space<vmem>>, %arg5: memref<576x128xbf16, #tpu.memory_space<vmem>>, %arg6: memref<8x128xf32, #tpu.memory_space<vmem>>, %arg7: memref<1x16x128xbf16, #tpu.memory_space<vmem>>, %arg8: memref<20x128xbf16, #tpu.memory_space<vmem>>) attributes {dimension_semantics = [#tpu.dimension_semantics<parallel>], iteration_bounds = array<i64: 2>, scalar_prefetch = 0 : i64, scratch_operands = 1 : i64, tpu.core_type = #tpu.core_type<tc>, window_params = [{transform_indices = @transform_0, window_bounds = array<i64: 1, 30, 64>}, {transform_indices = @transform_1, window_bounds = array<i64: 1, 30, 64>}, {transform_indices = @transform_2, window_bounds = array<i64: 1, 30, 64>}, {transform_indices = @transform_3, window_bounds = array<i64: 1, 30, 64>}, {pipeline_mode = #tpu.pipeline_mode<synchronous>, transform_indices = @transform_4, window_bounds = array<i64: 576, 128>}, {pipeline_mode = #tpu.pipeline_mode<synchronous>, transform_indices = @transform_5, window_bounds = array<i64: 8, 128>}, {transform_indices = @transform_6, window_bounds = array<i64: 1, 16, 128>}]} {
    %c0 = arith.constant 0 : index
    %c0_0 = arith.constant 0 : index
    %c0_1 = arith.constant 0 : index
    %0 = vector.load %arg1[%c0, %c0_0, %c0_1] : memref<1x30x64xbf16, #tpu.memory_space<vmem>>, vector<1x20x64xbf16>
    %1 = vector.shape_cast %0 : vector<1x20x64xbf16> to vector<20x64xbf16>
    %c0_2 = arith.constant 0 : index
    %c0_3 = arith.constant 0 : index
    %2 = vector.load %arg5[%c0_2, %c0_3] : memref<576x128xbf16, #tpu.memory_space<vmem>>, vector<64x128xbf16>
    %cst = arith.constant dense<0.000000e+00> : vector<20x128xf32>
    %3 = tpu.matmul %1, %2, %cst {dimension_numbers = #tpu.dot_dimension_numbers<[1], [0], [0], [1], [0, 0, 1, 1], [], []>} : vector<20x64xbf16>, vector<64x128xbf16>, vector<20x128xf32> -> vector<20x128xf32>
    %c0_4 = arith.constant 0 : index
    %c0_5 = arith.constant 0 : index
    %c0_6 = arith.constant 0 : index
    %4 = vector.load %arg2[%c0_4, %c0_5, %c0_6] : memref<1x30x64xbf16, #tpu.memory_space<vmem>>, vector<1x20x64xbf16>
    %5 = vector.shape_cast %4 : vector<1x20x64xbf16> to vector<20x64xbf16>
    %c64 = arith.constant 64 : index
    %c0_7 = arith.constant 0 : index
    %6 = vector.load %arg5[%c64, %c0_7] : memref<576x128xbf16, #tpu.memory_space<vmem>>, vector<64x128xbf16>
    %cst_8 = arith.constant dense<0.000000e+00> : vector<20x128xf32>
    %7 = tpu.matmul %5, %6, %cst_8 {dimension_numbers = #tpu.dot_dimension_numbers<[1], [0], [0], [1], [0, 0, 1, 1], [], []>} : vector<20x64xbf16>, vector<64x128xbf16>, vector<20x128xf32> -> vector<20x128xf32>
    %8 = arith.addf %3, %7 : vector<20x128xf32>
    %c0_9 = arith.constant 0 : index
    %c1 = arith.constant 1 : index
    %c0_10 = arith.constant 0 : index
    %9 = vector.load %arg1[%c0_9, %c1, %c0_10] : memref<1x30x64xbf16, #tpu.memory_space<vmem>>, vector<1x20x64xbf16>
    %10 = vector.shape_cast %9 : vector<1x20x64xbf16> to vector<20x64xbf16>
    %c128 = arith.constant 128 : index
    %c0_11 = arith.constant 0 : index
    %11 = vector.load %arg5[%c128, %c0_11] : memref<576x128xbf16, #tpu.memory_space<vmem>>, vector<64x128xbf16>
    %cst_12 = arith.constant dense<0.000000e+00> : vector<20x128xf32>
    %12 = tpu.matmul %10, %11, %cst_12 {dimension_numbers = #tpu.dot_dimension_numbers<[1], [0], [0], [1], [0, 0, 1, 1], [], []>} : vector<20x64xbf16>, vector<64x128xbf16>, vector<20x128xf32> -> vector<20x128xf32>
    %13 = arith.addf %8, %12 : vector<20x128xf32>
    %c0_13 = arith.constant 0 : index
    %c0_14 = arith.constant 0 : index
    %c0_15 = arith.constant 0 : index
    %14 = vector.load %arg3[%c0_13, %c0_14, %c0_15] : memref<1x30x64xbf16, #tpu.memory_space<vmem>>, vector<1x20x64xbf16>
    %15 = vector.shape_cast %14 : vector<1x20x64xbf16> to vector<20x64xbf16>
    %c192 = arith.constant 192 : index
    %c0_16 = arith.constant 0 : index
    %16 = vector.load %arg5[%c192, %c0_16] : memref<576x128xbf16, #tpu.memory_space<vmem>>, vector<64x128xbf16>
    %cst_17 = arith.constant dense<0.000000e+00> : vector<20x128xf32>
    %17 = tpu.matmul %15, %16, %cst_17 {dimension_numbers = #tpu.dot_dimension_numbers<[1], [0], [0], [1], [0, 0, 1, 1], [], []>} : vector<20x64xbf16>, vector<64x128xbf16>, vector<20x128xf32> -> vector<20x128xf32>
    %18 = arith.addf %13, %17 : vector<20x128xf32>
    %c0_18 = arith.constant 0 : index
    %c0_19 = arith.constant 0 : index
    %c0_20 = arith.constant 0 : index
    %19 = vector.load %arg4[%c0_18, %c0_19, %c0_20] : memref<1x30x64xbf16, #tpu.memory_space<vmem>>, vector<1x20x64xbf16>
    %20 = vector.shape_cast %19 : vector<1x20x64xbf16> to vector<20x64xbf16>
    %c256 = arith.constant 256 : index
    %c0_21 = arith.constant 0 : index
    %21 = vector.load %arg5[%c256, %c0_21] : memref<576x128xbf16, #tpu.memory_space<vmem>>, vector<64x128xbf16>
    %cst_22 = arith.constant dense<0.000000e+00> : vector<20x128xf32>
    %22 = tpu.matmul %20, %21, %cst_22 {dimension_numbers = #tpu.dot_dimension_numbers<[1], [0], [0], [1], [0, 0, 1, 1], [], []>} : vector<20x64xbf16>, vector<64x128xbf16>, vector<20x128xf32> -> vector<20x128xf32>
    %23 = arith.addf %18, %22 : vector<20x128xf32>
    %c0_23 = arith.constant 0 : index
    %c1_24 = arith.constant 1 : index
    %c0_25 = arith.constant 0 : index
    %24 = vector.load %arg3[%c0_23, %c1_24, %c0_25] : memref<1x30x64xbf16, #tpu.memory_space<vmem>>, vector<1x20x64xbf16>
    %25 = vector.shape_cast %24 : vector<1x20x64xbf16> to vector<20x64xbf16>
    %c320 = arith.constant 320 : index
    %c0_26 = arith.constant 0 : index
    %26 = vector.load %arg5[%c320, %c0_26] : memref<576x128xbf16, #tpu.memory_space<vmem>>, vector<64x128xbf16>
    %cst_27 = arith.constant dense<0.000000e+00> : vector<20x128xf32>
    %27 = tpu.matmul %25, %26, %cst_27 {dimension_numbers = #tpu.dot_dimension_numbers<[1], [0], [0], [1], [0, 0, 1, 1], [], []>} : vector<20x64xbf16>, vector<64x128xbf16>, vector<20x128xf32> -> vector<20x128xf32>
    %28 = arith.addf %23, %27 : vector<20x128xf32>
    %c0_28 = arith.constant 0 : index
    %c5 = arith.constant 5 : index
    %c0_29 = arith.constant 0 : index
    %29 = vector.load %arg1[%c0_28, %c5, %c0_29] : memref<1x30x64xbf16, #tpu.memory_space<vmem>>, vector<1x20x64xbf16>
    %30 = vector.shape_cast %29 : vector<1x20x64xbf16> to vector<20x64xbf16>
    %c384 = arith.constant 384 : index
    %c0_30 = arith.constant 0 : index
    %31 = vector.load %arg5[%c384, %c0_30] : memref<576x128xbf16, #tpu.memory_space<vmem>>, vector<64x128xbf16>
    %cst_31 = arith.constant dense<0.000000e+00> : vector<20x128xf32>
    %32 = tpu.matmul %30, %31, %cst_31 {dimension_numbers = #tpu.dot_dimension_numbers<[1], [0], [0], [1], [0, 0, 1, 1], [], []>} : vector<20x64xbf16>, vector<64x128xbf16>, vector<20x128xf32> -> vector<20x128xf32>
    %33 = arith.addf %28, %32 : vector<20x128xf32>
    %c0_32 = arith.constant 0 : index
    %c5_33 = arith.constant 5 : index
    %c0_34 = arith.constant 0 : index
    %34 = vector.load %arg2[%c0_32, %c5_33, %c0_34] : memref<1x30x64xbf16, #tpu.memory_space<vmem>>, vector<1x20x64xbf16>
    %35 = vector.shape_cast %34 : vector<1x20x64xbf16> to vector<20x64xbf16>
    %c448 = arith.constant 448 : index
    %c0_35 = arith.constant 0 : index
    %36 = vector.load %arg5[%c448, %c0_35] : memref<576x128xbf16, #tpu.memory_space<vmem>>, vector<64x128xbf16>
    %cst_36 = arith.constant dense<0.000000e+00> : vector<20x128xf32>
    %37 = tpu.matmul %35, %36, %cst_36 {dimension_numbers = #tpu.dot_dimension_numbers<[1], [0], [0], [1], [0, 0, 1, 1], [], []>} : vector<20x64xbf16>, vector<64x128xbf16>, vector<20x128xf32> -> vector<20x128xf32>
    %38 = arith.addf %33, %37 : vector<20x128xf32>
    %c0_37 = arith.constant 0 : index
    %c6 = arith.constant 6 : index
    %c0_38 = arith.constant 0 : index
    %39 = vector.load %arg1[%c0_37, %c6, %c0_38] : memref<1x30x64xbf16, #tpu.memory_space<vmem>>, vector<1x20x64xbf16>
    %40 = vector.shape_cast %39 : vector<1x20x64xbf16> to vector<20x64xbf16>
    %c512 = arith.constant 512 : index
    %c0_39 = arith.constant 0 : index
    %41 = vector.load %arg5[%c512, %c0_39] : memref<576x128xbf16, #tpu.memory_space<vmem>>, vector<64x128xbf16>
    %cst_40 = arith.constant dense<0.000000e+00> : vector<20x128xf32>
    %42 = tpu.matmul %40, %41, %cst_40 {dimension_numbers = #tpu.dot_dimension_numbers<[1], [0], [0], [1], [0, 0, 1, 1], [], []>} : vector<20x64xbf16>, vector<64x128xbf16>, vector<20x128xf32> -> vector<20x128xf32>
    %43 = arith.addf %38, %42 : vector<20x128xf32>
    %c0_41 = arith.constant 0 : index
    %c0_42 = arith.constant 0 : index
    %44 = vector.load %arg6[%c0_41, %c0_42] : memref<8x128xf32, #tpu.memory_space<vmem>>, vector<1x128xf32>
    %45 = vector.broadcast %44 : vector<1x128xf32> to vector<20x128xf32>
    %46 = arith.addf %43, %45 : vector<20x128xf32>
    %cst_43 = arith.constant 0.000000e+00 : f32
    %47 = vector.broadcast %cst_43 : f32 to vector<20x128xf32>
    %48 = arith.maximumf %46, %47 : vector<20x128xf32>
    %c1_44 = arith.constant 1 : index
    %c0_45 = arith.constant 0 : index
    %49 = vector.load %arg6[%c1_44, %c0_45] : memref<8x128xf32, #tpu.memory_space<vmem>>, vector<1x128xf32>
    %50 = vector.broadcast %49 : vector<1x128xf32> to vector<20x128xf32>
    %51 = arith.mulf %48, %50 : vector<20x128xf32>
    %c2 = arith.constant 2 : index
    %c0_46 = arith.constant 0 : index
    %52 = vector.load %arg6[%c2, %c0_46] : memref<8x128xf32, #tpu.memory_space<vmem>>, vector<1x128xf32>
    %53 = vector.broadcast %52 : vector<1x128xf32> to vector<20x128xf32>
    %54 = arith.addf %51, %53 : vector<20x128xf32>
    %55 = arith.truncf %54 : vector<20x128xf32> to vector<20x128xbf16>
    %c0_47 = arith.constant 0 : index
    %c0_48 = arith.constant 0 : index
    %56 = vector.load %arg8[%c0_47, %c0_48] : memref<20x128xbf16, #tpu.memory_space<vmem>>, vector<20x128xbf16>
    tpu.vector_store %arg8[%c0_47, %c0_48], %55 {strides = array<i32>} : memref<20x128xbf16, #tpu.memory_space<vmem>>, vector<20x128xbf16>,
    %c0_49 = arith.constant 0 : index
    %c0_50 = arith.constant 0 : index
    %57 = vector.load %arg8[%c0_49, %c0_50] : memref<20x128xbf16, #tpu.memory_space<vmem>>, vector<4x128xbf16>
    %c0_51 = arith.constant 0 : index
    %c0_52 = arith.constant 0 : index
    %c0_53 = arith.constant 0 : index
    %58 = vector.load %arg7[%c0_51, %c0_52, %c0_53] : memref<1x16x128xbf16, #tpu.memory_space<vmem>>, vector<1x4x128xbf16>
    %59 = vector.shape_cast %58 : vector<1x4x128xbf16> to vector<4x128xbf16>
    %60 = vector.shape_cast %57 : vector<4x128xbf16> to vector<1x4x128xbf16>
    tpu.vector_store %arg7[%c0_51, %c0_52, %c0_53], %60 {strides = array<i32>} : memref<1x16x128xbf16, #tpu.memory_space<vmem>>, vector<1x4x128xbf16>,
    %c5_54 = arith.constant 5 : index
    %c0_55 = arith.constant 0 : index
    %61 = vector.load %arg8[%c5_54, %c0_55] : memref<20x128xbf16, #tpu.memory_space<vmem>>, vector<4x128xbf16>
    %c0_56 = arith.constant 0 : index
    %c4 = arith.constant 4 : index
    %c0_57 = arith.constant 0 : index
    %62 = vector.load %arg7[%c0_56, %c4, %c0_57] : memref<1x16x128xbf16, #tpu.memory_space<vmem>>, vector<1x4x128xbf16>
    %63 = vector.shape_cast %62 : vector<1x4x128xbf16> to vector<4x128xbf16>
    %64 = vector.shape_cast %61 : vector<4x128xbf16> to vector<1x4x128xbf16>
    tpu.vector_store %arg7[%c0_56, %c4, %c0_57], %64 {strides = array<i32>} : memref<1x16x128xbf16, #tpu.memory_space<vmem>>, vector<1x4x128xbf16>,
    %c10 = arith.constant 10 : index
    %c0_58 = arith.constant 0 : index
    %65 = vector.load %arg8[%c10, %c0_58] : memref<20x128xbf16, #tpu.memory_space<vmem>>, vector<4x128xbf16>
    %c0_59 = arith.constant 0 : index
    %c8 = arith.constant 8 : index
    %c0_60 = arith.constant 0 : index
    %66 = vector.load %arg7[%c0_59, %c8, %c0_60] : memref<1x16x128xbf16, #tpu.memory_space<vmem>>, vector<1x4x128xbf16>
    %67 = vector.shape_cast %66 : vector<1x4x128xbf16> to vector<4x128xbf16>
    %68 = vector.shape_cast %65 : vector<4x128xbf16> to vector<1x4x128xbf16>
    tpu.vector_store %arg7[%c0_59, %c8, %c0_60], %68 {strides = array<i32>} : memref<1x16x128xbf16, #tpu.memory_space<vmem>>, vector<1x4x128xbf16>,
    %c15 = arith.constant 15 : index
    %c0_61 = arith.constant 0 : index
    %69 = vector.load %arg8[%c15, %c0_61] : memref<20x128xbf16, #tpu.memory_space<vmem>>, vector<4x128xbf16>
    %c0_62 = arith.constant 0 : index
    %c12 = arith.constant 12 : index
    %c0_63 = arith.constant 0 : index
    %70 = vector.load %arg7[%c0_62, %c12, %c0_63] : memref<1x16x128xbf16, #tpu.memory_space<vmem>>, vector<1x4x128xbf16>
    %71 = vector.shape_cast %70 : vector<1x4x128xbf16> to vector<4x128xbf16>
    %72 = vector.shape_cast %69 : vector<4x128xbf16> to vector<1x4x128xbf16>
    tpu.vector_store %arg7[%c0_62, %c12, %c0_63], %72 {strides = array<i32>} : memref<1x16x128xbf16, #tpu.memory_space<vmem>>, vector<1x4x128xbf16>,
    return
  }
  func.func @transform_0(%arg0: i32) -> (i32, i32, i32) {
    %c0_i32 = arith.constant 0 : i32
    %c0_i32_0 = arith.constant 0 : i32
    %c0_i32_1 = arith.constant 0 : i32
    return %arg0, %c0_i32, %c0_i32_0 : i32, i32, i32
  }
  func.func @transform_1(%arg0: i32) -> (i32, i32, i32) {
    %c0_i32 = arith.constant 0 : i32
    %c0_i32_0 = arith.constant 0 : i32
    %c0_i32_1 = arith.constant 0 : i32
    return %arg0, %c0_i32, %c0_i32_0 : i32, i32, i32
  }
  func.func @transform_2(%arg0: i32) -> (i32, i32, i32) {
    %c0_i32 = arith.constant 0 : i32
    %c0_i32_0 = arith.constant 0 : i32
    %c0_i32_1 = arith.constant 0 : i32
    return %arg0, %c0_i32, %c0_i32_0 : i32, i32, i32
  }
  func.func @transform_3(%arg0: i32) -> (i32, i32, i32) {
    %c0_i32 = arith.constant 0 : i32
    %c0_i32_0 = arith.constant 0 : i32
    %c0_i32_1 = arith.constant 0 : i32
    return %arg0, %c0_i32, %c0_i32_0 : i32, i32, i32
  }
  func.func @transform_4(%arg0: i32) -> (i32, i32) {
    %c0_i32 = arith.constant 0 : i32
    %c0_i32_0 = arith.constant 0 : i32
    %c0_i32_1 = arith.constant 0 : i32
    return %c0_i32, %c0_i32_0 : i32, i32
  }
  func.func @transform_5(%arg0: i32) -> (i32, i32) {
    %c0_i32 = arith.constant 0 : i32
    %c0_i32_0 = arith.constant 0 : i32
    %c0_i32_1 = arith.constant 0 : i32
    return %c0_i32, %c0_i32_0 : i32, i32
  }
  func.func @transform_6(%arg0: i32) -> (i32, i32, i32) {
    %c0_i32 = arith.constant 0 : i32
    %c0_i32_0 = arith.constant 0 : i32
    %c0_i32_1 = arith.constant 0 : i32
    return %arg0, %c0_i32, %c0_i32_0 : i32, i32, i32
  }
}

module attributes {stable_mosaic.version = 11 : i64} {
  func.func @kernel(%arg0: i32, %arg1: memref<1x42x128xbf16, #tpu.memory_space<vmem>>, %arg2: memref<1152x128xbf16, #tpu.memory_space<vmem>>, %arg3: memref<8x128xf32, #tpu.memory_space<vmem>>, %arg4: memref<1x16x128xbf16, #tpu.memory_space<vmem>>, %arg5: memref<24x128xbf16, #tpu.memory_space<vmem>>) attributes {dimension_semantics = [#tpu.dimension_semantics<parallel>], iteration_bounds = array<i64: 2>, scalar_prefetch = 0 : i64, scratch_operands = 1 : i64, tpu.core_type = #tpu.core_type<tc>, window_params = [{transform_indices = @transform_0, window_bounds = array<i64: 1, 42, 128>}, {pipeline_mode = #tpu.pipeline_mode<synchronous>, transform_indices = @transform_1, window_bounds = array<i64: 1152, 128>}, {pipeline_mode = #tpu.pipeline_mode<synchronous>, transform_indices = @transform_2, window_bounds = array<i64: 8, 128>}, {transform_indices = @transform_3, window_bounds = array<i64: 1, 16, 128>}]} {
    %c0 = arith.constant 0 : index
    %c0_0 = arith.constant 0 : index
    %c0_1 = arith.constant 0 : index
    %0 = vector.load %arg1[%c0, %c0_0, %c0_1] : memref<1x42x128xbf16, #tpu.memory_space<vmem>>, vector<1x24x128xbf16>
    %1 = vector.shape_cast %0 : vector<1x24x128xbf16> to vector<24x128xbf16>
    %c0_2 = arith.constant 0 : index
    %c0_3 = arith.constant 0 : index
    %2 = vector.load %arg2[%c0_2, %c0_3] : memref<1152x128xbf16, #tpu.memory_space<vmem>>, vector<128x128xbf16>
    %cst = arith.constant dense<0.000000e+00> : vector<24x128xf32>
    %3 = tpu.matmul %1, %2, %cst {dimension_numbers = #tpu.dot_dimension_numbers<[1], [0], [0], [1], [0, 0, 1, 1], [], []>} : vector<24x128xbf16>, vector<128x128xbf16>, vector<24x128xf32> -> vector<24x128xf32>
    %c0_4 = arith.constant 0 : index
    %c1 = arith.constant 1 : index
    %c0_5 = arith.constant 0 : index
    %4 = vector.load %arg1[%c0_4, %c1, %c0_5] : memref<1x42x128xbf16, #tpu.memory_space<vmem>>, vector<1x24x128xbf16>
    %5 = vector.shape_cast %4 : vector<1x24x128xbf16> to vector<24x128xbf16>
    %c128 = arith.constant 128 : index
    %c0_6 = arith.constant 0 : index
    %6 = vector.load %arg2[%c128, %c0_6] : memref<1152x128xbf16, #tpu.memory_space<vmem>>, vector<128x128xbf16>
    %cst_7 = arith.constant dense<0.000000e+00> : vector<24x128xf32>
    %7 = tpu.matmul %5, %6, %cst_7 {dimension_numbers = #tpu.dot_dimension_numbers<[1], [0], [0], [1], [0, 0, 1, 1], [], []>} : vector<24x128xbf16>, vector<128x128xbf16>, vector<24x128xf32> -> vector<24x128xf32>
    %8 = arith.addf %3, %7 : vector<24x128xf32>
    %c0_8 = arith.constant 0 : index
    %c2 = arith.constant 2 : index
    %c0_9 = arith.constant 0 : index
    %9 = vector.load %arg1[%c0_8, %c2, %c0_9] : memref<1x42x128xbf16, #tpu.memory_space<vmem>>, vector<1x24x128xbf16>
    %10 = vector.shape_cast %9 : vector<1x24x128xbf16> to vector<24x128xbf16>
    %c256 = arith.constant 256 : index
    %c0_10 = arith.constant 0 : index
    %11 = vector.load %arg2[%c256, %c0_10] : memref<1152x128xbf16, #tpu.memory_space<vmem>>, vector<128x128xbf16>
    %cst_11 = arith.constant dense<0.000000e+00> : vector<24x128xf32>
    %12 = tpu.matmul %10, %11, %cst_11 {dimension_numbers = #tpu.dot_dimension_numbers<[1], [0], [0], [1], [0, 0, 1, 1], [], []>} : vector<24x128xbf16>, vector<128x128xbf16>, vector<24x128xf32> -> vector<24x128xf32>
    %13 = arith.addf %8, %12 : vector<24x128xf32>
    %c0_12 = arith.constant 0 : index
    %c6 = arith.constant 6 : index
    %c0_13 = arith.constant 0 : index
    %14 = vector.load %arg1[%c0_12, %c6, %c0_13] : memref<1x42x128xbf16, #tpu.memory_space<vmem>>, vector<1x24x128xbf16>
    %15 = vector.shape_cast %14 : vector<1x24x128xbf16> to vector<24x128xbf16>
    %c384 = arith.constant 384 : index
    %c0_14 = arith.constant 0 : index
    %16 = vector.load %arg2[%c384, %c0_14] : memref<1152x128xbf16, #tpu.memory_space<vmem>>, vector<128x128xbf16>
    %cst_15 = arith.constant dense<0.000000e+00> : vector<24x128xf32>
    %17 = tpu.matmul %15, %16, %cst_15 {dimension_numbers = #tpu.dot_dimension_numbers<[1], [0], [0], [1], [0, 0, 1, 1], [], []>} : vector<24x128xbf16>, vector<128x128xbf16>, vector<24x128xf32> -> vector<24x128xf32>
    %18 = arith.addf %13, %17 : vector<24x128xf32>
    %c0_16 = arith.constant 0 : index
    %c7 = arith.constant 7 : index
    %c0_17 = arith.constant 0 : index
    %19 = vector.load %arg1[%c0_16, %c7, %c0_17] : memref<1x42x128xbf16, #tpu.memory_space<vmem>>, vector<1x24x128xbf16>
    %20 = vector.shape_cast %19 : vector<1x24x128xbf16> to vector<24x128xbf16>
    %c512 = arith.constant 512 : index
    %c0_18 = arith.constant 0 : index
    %21 = vector.load %arg2[%c512, %c0_18] : memref<1152x128xbf16, #tpu.memory_space<vmem>>, vector<128x128xbf16>
    %cst_19 = arith.constant dense<0.000000e+00> : vector<24x128xf32>
    %22 = tpu.matmul %20, %21, %cst_19 {dimension_numbers = #tpu.dot_dimension_numbers<[1], [0], [0], [1], [0, 0, 1, 1], [], []>} : vector<24x128xbf16>, vector<128x128xbf16>, vector<24x128xf32> -> vector<24x128xf32>
    %23 = arith.addf %18, %22 : vector<24x128xf32>
    %c0_20 = arith.constant 0 : index
    %c8 = arith.constant 8 : index
    %c0_21 = arith.constant 0 : index
    %24 = vector.load %arg1[%c0_20, %c8, %c0_21] : memref<1x42x128xbf16, #tpu.memory_space<vmem>>, vector<1x24x128xbf16>
    %25 = vector.shape_cast %24 : vector<1x24x128xbf16> to vector<24x128xbf16>
    %c640 = arith.constant 640 : index
    %c0_22 = arith.constant 0 : index
    %26 = vector.load %arg2[%c640, %c0_22] : memref<1152x128xbf16, #tpu.memory_space<vmem>>, vector<128x128xbf16>
    %cst_23 = arith.constant dense<0.000000e+00> : vector<24x128xf32>
    %27 = tpu.matmul %25, %26, %cst_23 {dimension_numbers = #tpu.dot_dimension_numbers<[1], [0], [0], [1], [0, 0, 1, 1], [], []>} : vector<24x128xbf16>, vector<128x128xbf16>, vector<24x128xf32> -> vector<24x128xf32>
    %28 = arith.addf %23, %27 : vector<24x128xf32>
    %c0_24 = arith.constant 0 : index
    %c12 = arith.constant 12 : index
    %c0_25 = arith.constant 0 : index
    %29 = vector.load %arg1[%c0_24, %c12, %c0_25] : memref<1x42x128xbf16, #tpu.memory_space<vmem>>, vector<1x24x128xbf16>
    %30 = vector.shape_cast %29 : vector<1x24x128xbf16> to vector<24x128xbf16>
    %c768 = arith.constant 768 : index
    %c0_26 = arith.constant 0 : index
    %31 = vector.load %arg2[%c768, %c0_26] : memref<1152x128xbf16, #tpu.memory_space<vmem>>, vector<128x128xbf16>
    %cst_27 = arith.constant dense<0.000000e+00> : vector<24x128xf32>
    %32 = tpu.matmul %30, %31, %cst_27 {dimension_numbers = #tpu.dot_dimension_numbers<[1], [0], [0], [1], [0, 0, 1, 1], [], []>} : vector<24x128xbf16>, vector<128x128xbf16>, vector<24x128xf32> -> vector<24x128xf32>
    %33 = arith.addf %28, %32 : vector<24x128xf32>
    %c0_28 = arith.constant 0 : index
    %c13 = arith.constant 13 : index
    %c0_29 = arith.constant 0 : index
    %34 = vector.load %arg1[%c0_28, %c13, %c0_29] : memref<1x42x128xbf16, #tpu.memory_space<vmem>>, vector<1x24x128xbf16>
    %35 = vector.shape_cast %34 : vector<1x24x128xbf16> to vector<24x128xbf16>
    %c896 = arith.constant 896 : index
    %c0_30 = arith.constant 0 : index
    %36 = vector.load %arg2[%c896, %c0_30] : memref<1152x128xbf16, #tpu.memory_space<vmem>>, vector<128x128xbf16>
    %cst_31 = arith.constant dense<0.000000e+00> : vector<24x128xf32>
    %37 = tpu.matmul %35, %36, %cst_31 {dimension_numbers = #tpu.dot_dimension_numbers<[1], [0], [0], [1], [0, 0, 1, 1], [], []>} : vector<24x128xbf16>, vector<128x128xbf16>, vector<24x128xf32> -> vector<24x128xf32>
    %38 = arith.addf %33, %37 : vector<24x128xf32>
    %c0_32 = arith.constant 0 : index
    %c14 = arith.constant 14 : index
    %c0_33 = arith.constant 0 : index
    %39 = vector.load %arg1[%c0_32, %c14, %c0_33] : memref<1x42x128xbf16, #tpu.memory_space<vmem>>, vector<1x24x128xbf16>
    %40 = vector.shape_cast %39 : vector<1x24x128xbf16> to vector<24x128xbf16>
    %c1024 = arith.constant 1024 : index
    %c0_34 = arith.constant 0 : index
    %41 = vector.load %arg2[%c1024, %c0_34] : memref<1152x128xbf16, #tpu.memory_space<vmem>>, vector<128x128xbf16>
    %cst_35 = arith.constant dense<0.000000e+00> : vector<24x128xf32>
    %42 = tpu.matmul %40, %41, %cst_35 {dimension_numbers = #tpu.dot_dimension_numbers<[1], [0], [0], [1], [0, 0, 1, 1], [], []>} : vector<24x128xbf16>, vector<128x128xbf16>, vector<24x128xf32> -> vector<24x128xf32>
    %43 = arith.addf %38, %42 : vector<24x128xf32>
    %c0_36 = arith.constant 0 : index
    %c0_37 = arith.constant 0 : index
    %44 = vector.load %arg3[%c0_36, %c0_37] : memref<8x128xf32, #tpu.memory_space<vmem>>, vector<1x128xf32>
    %45 = vector.broadcast %44 : vector<1x128xf32> to vector<24x128xf32>
    %46 = arith.addf %43, %45 : vector<24x128xf32>
    %cst_38 = arith.constant 0.000000e+00 : f32
    %47 = vector.broadcast %cst_38 : f32 to vector<24x128xf32>
    %48 = arith.maximumf %46, %47 : vector<24x128xf32>
    %c1_39 = arith.constant 1 : index
    %c0_40 = arith.constant 0 : index
    %49 = vector.load %arg3[%c1_39, %c0_40] : memref<8x128xf32, #tpu.memory_space<vmem>>, vector<1x128xf32>
    %50 = vector.broadcast %49 : vector<1x128xf32> to vector<24x128xf32>
    %51 = arith.mulf %48, %50 : vector<24x128xf32>
    %c2_41 = arith.constant 2 : index
    %c0_42 = arith.constant 0 : index
    %52 = vector.load %arg3[%c2_41, %c0_42] : memref<8x128xf32, #tpu.memory_space<vmem>>, vector<1x128xf32>
    %53 = vector.broadcast %52 : vector<1x128xf32> to vector<24x128xf32>
    %54 = arith.addf %51, %53 : vector<24x128xf32>
    %55 = arith.truncf %54 : vector<24x128xf32> to vector<24x128xbf16>
    %c0_43 = arith.constant 0 : index
    %c0_44 = arith.constant 0 : index
    %56 = vector.load %arg5[%c0_43, %c0_44] : memref<24x128xbf16, #tpu.memory_space<vmem>>, vector<24x128xbf16>
    tpu.vector_store %arg5[%c0_43, %c0_44], %55 {strides = array<i32>} : memref<24x128xbf16, #tpu.memory_space<vmem>>, vector<24x128xbf16>,
    %c0_45 = arith.constant 0 : index
    %c0_46 = arith.constant 0 : index
    %57 = vector.load %arg5[%c0_45, %c0_46] : memref<24x128xbf16, #tpu.memory_space<vmem>>, vector<4x128xbf16>
    %c0_47 = arith.constant 0 : index
    %c0_48 = arith.constant 0 : index
    %c0_49 = arith.constant 0 : index
    %58 = vector.load %arg4[%c0_47, %c0_48, %c0_49] : memref<1x16x128xbf16, #tpu.memory_space<vmem>>, vector<1x4x128xbf16>
    %59 = vector.shape_cast %58 : vector<1x4x128xbf16> to vector<4x128xbf16>
    %60 = vector.shape_cast %57 : vector<4x128xbf16> to vector<1x4x128xbf16>
    tpu.vector_store %arg4[%c0_47, %c0_48, %c0_49], %60 {strides = array<i32>} : memref<1x16x128xbf16, #tpu.memory_space<vmem>>, vector<1x4x128xbf16>,
    %c6_50 = arith.constant 6 : index
    %c0_51 = arith.constant 0 : index
    %61 = vector.load %arg5[%c6_50, %c0_51] : memref<24x128xbf16, #tpu.memory_space<vmem>>, vector<4x128xbf16>
    %c0_52 = arith.constant 0 : index
    %c4 = arith.constant 4 : index
    %c0_53 = arith.constant 0 : index
    %62 = vector.load %arg4[%c0_52, %c4, %c0_53] : memref<1x16x128xbf16, #tpu.memory_space<vmem>>, vector<1x4x128xbf16>
    %63 = vector.shape_cast %62 : vector<1x4x128xbf16> to vector<4x128xbf16>
    %64 = vector.shape_cast %61 : vector<4x128xbf16> to vector<1x4x128xbf16>
    tpu.vector_store %arg4[%c0_52, %c4, %c0_53], %64 {strides = array<i32>} : memref<1x16x128xbf16, #tpu.memory_space<vmem>>, vector<1x4x128xbf16>,
    %c12_54 = arith.constant 12 : index
    %c0_55 = arith.constant 0 : index
    %65 = vector.load %arg5[%c12_54, %c0_55] : memref<24x128xbf16, #tpu.memory_space<vmem>>, vector<4x128xbf16>
    %c0_56 = arith.constant 0 : index
    %c8_57 = arith.constant 8 : index
    %c0_58 = arith.constant 0 : index
    %66 = vector.load %arg4[%c0_56, %c8_57, %c0_58] : memref<1x16x128xbf16, #tpu.memory_space<vmem>>, vector<1x4x128xbf16>
    %67 = vector.shape_cast %66 : vector<1x4x128xbf16> to vector<4x128xbf16>
    %68 = vector.shape_cast %65 : vector<4x128xbf16> to vector<1x4x128xbf16>
    tpu.vector_store %arg4[%c0_56, %c8_57, %c0_58], %68 {strides = array<i32>} : memref<1x16x128xbf16, #tpu.memory_space<vmem>>, vector<1x4x128xbf16>,
    %c18 = arith.constant 18 : index
    %c0_59 = arith.constant 0 : index
    %69 = vector.load %arg5[%c18, %c0_59] : memref<24x128xbf16, #tpu.memory_space<vmem>>, vector<4x128xbf16>
    %c0_60 = arith.constant 0 : index
    %c12_61 = arith.constant 12 : index
    %c0_62 = arith.constant 0 : index
    %70 = vector.load %arg4[%c0_60, %c12_61, %c0_62] : memref<1x16x128xbf16, #tpu.memory_space<vmem>>, vector<1x4x128xbf16>
    %71 = vector.shape_cast %70 : vector<1x4x128xbf16> to vector<4x128xbf16>
    %72 = vector.shape_cast %69 : vector<4x128xbf16> to vector<1x4x128xbf16>
    tpu.vector_store %arg4[%c0_60, %c12_61, %c0_62], %72 {strides = array<i32>} : memref<1x16x128xbf16, #tpu.memory_space<vmem>>, vector<1x4x128xbf16>,
    return
  }
  func.func @transform_0(%arg0: i32) -> (i32, i32, i32) {
    %c0_i32 = arith.constant 0 : i32
    %c0_i32_0 = arith.constant 0 : i32
    %c0_i32_1 = arith.constant 0 : i32
    return %arg0, %c0_i32, %c0_i32_0 : i32, i32, i32
  }
  func.func @transform_1(%arg0: i32) -> (i32, i32) {
    %c0_i32 = arith.constant 0 : i32
    %c0_i32_0 = arith.constant 0 : i32
    %c0_i32_1 = arith.constant 0 : i32
    return %c0_i32, %c0_i32_0 : i32, i32
  }
  func.func @transform_2(%arg0: i32) -> (i32, i32) {
    %c0_i32 = arith.constant 0 : i32
    %c0_i32_0 = arith.constant 0 : i32
    %c0_i32_1 = arith.constant 0 : i32
    return %c0_i32, %c0_i32_0 : i32, i32
  }
  func.func @transform_3(%arg0: i32) -> (i32, i32, i32) {
    %c0_i32 = arith.constant 0 : i32
    %c0_i32_0 = arith.constant 0 : i32
    %c0_i32_1 = arith.constant 0 : i32
    return %arg0, %c0_i32, %c0_i32_0 : i32, i32, i32
  }
}

module attributes {stable_mosaic.version = 11 : i64} {
  func.func @kernel(%arg0: i32, %arg1: memref<1x12x128xbf16, #tpu.memory_space<vmem>>, %arg2: memref<1x12x128xbf16, #tpu.memory_space<vmem>>, %arg3: memref<1x12x128xbf16, #tpu.memory_space<vmem>>, %arg4: memref<1x12x128xbf16, #tpu.memory_space<vmem>>, %arg5: memref<1152x256xbf16, #tpu.memory_space<vmem>>, %arg6: memref<8x256xf32, #tpu.memory_space<vmem>>, %arg7: memref<1x4x256xbf16, #tpu.memory_space<vmem>>, %arg8: memref<6x256xbf16, #tpu.memory_space<vmem>>) attributes {dimension_semantics = [#tpu.dimension_semantics<parallel>], iteration_bounds = array<i64: 2>, scalar_prefetch = 0 : i64, scratch_operands = 1 : i64, tpu.core_type = #tpu.core_type<tc>, window_params = [{transform_indices = @transform_0, window_bounds = array<i64: 1, 12, 128>}, {transform_indices = @transform_1, window_bounds = array<i64: 1, 12, 128>}, {transform_indices = @transform_2, window_bounds = array<i64: 1, 12, 128>}, {transform_indices = @transform_3, window_bounds = array<i64: 1, 12, 128>}, {pipeline_mode = #tpu.pipeline_mode<synchronous>, transform_indices = @transform_4, window_bounds = array<i64: 1152, 256>}, {pipeline_mode = #tpu.pipeline_mode<synchronous>, transform_indices = @transform_5, window_bounds = array<i64: 8, 256>}, {transform_indices = @transform_6, window_bounds = array<i64: 1, 4, 256>}]} {
    %c0 = arith.constant 0 : index
    %c0_0 = arith.constant 0 : index
    %c0_1 = arith.constant 0 : index
    %0 = vector.load %arg1[%c0, %c0_0, %c0_1] : memref<1x12x128xbf16, #tpu.memory_space<vmem>>, vector<1x6x128xbf16>
    %1 = vector.shape_cast %0 : vector<1x6x128xbf16> to vector<6x128xbf16>
    %c0_2 = arith.constant 0 : index
    %c0_3 = arith.constant 0 : index
    %2 = vector.load %arg5[%c0_2, %c0_3] : memref<1152x256xbf16, #tpu.memory_space<vmem>>, vector<128x256xbf16>
    %cst = arith.constant dense<0.000000e+00> : vector<6x256xf32>
    %3 = tpu.matmul %1, %2, %cst {dimension_numbers = #tpu.dot_dimension_numbers<[1], [0], [0], [1], [0, 0, 1, 1], [], []>} : vector<6x128xbf16>, vector<128x256xbf16>, vector<6x256xf32> -> vector<6x256xf32>
    %c0_4 = arith.constant 0 : index
    %c0_5 = arith.constant 0 : index
    %c0_6 = arith.constant 0 : index
    %4 = vector.load %arg2[%c0_4, %c0_5, %c0_6] : memref<1x12x128xbf16, #tpu.memory_space<vmem>>, vector<1x6x128xbf16>
    %5 = vector.shape_cast %4 : vector<1x6x128xbf16> to vector<6x128xbf16>
    %c128 = arith.constant 128 : index
    %c0_7 = arith.constant 0 : index
    %6 = vector.load %arg5[%c128, %c0_7] : memref<1152x256xbf16, #tpu.memory_space<vmem>>, vector<128x256xbf16>
    %cst_8 = arith.constant dense<0.000000e+00> : vector<6x256xf32>
    %7 = tpu.matmul %5, %6, %cst_8 {dimension_numbers = #tpu.dot_dimension_numbers<[1], [0], [0], [1], [0, 0, 1, 1], [], []>} : vector<6x128xbf16>, vector<128x256xbf16>, vector<6x256xf32> -> vector<6x256xf32>
    %8 = arith.addf %3, %7 : vector<6x256xf32>
    %c0_9 = arith.constant 0 : index
    %c1 = arith.constant 1 : index
    %c0_10 = arith.constant 0 : index
    %9 = vector.load %arg1[%c0_9, %c1, %c0_10] : memref<1x12x128xbf16, #tpu.memory_space<vmem>>, vector<1x6x128xbf16>
    %10 = vector.shape_cast %9 : vector<1x6x128xbf16> to vector<6x128xbf16>
    %c256 = arith.constant 256 : index
    %c0_11 = arith.constant 0 : index
    %11 = vector.load %arg5[%c256, %c0_11] : memref<1152x256xbf16, #tpu.memory_space<vmem>>, vector<128x256xbf16>
    %cst_12 = arith.constant dense<0.000000e+00> : vector<6x256xf32>
    %12 = tpu.matmul %10, %11, %cst_12 {dimension_numbers = #tpu.dot_dimension_numbers<[1], [0], [0], [1], [0, 0, 1, 1], [], []>} : vector<6x128xbf16>, vector<128x256xbf16>, vector<6x256xf32> -> vector<6x256xf32>
    %13 = arith.addf %8, %12 : vector<6x256xf32>
    %c0_13 = arith.constant 0 : index
    %c0_14 = arith.constant 0 : index
    %c0_15 = arith.constant 0 : index
    %14 = vector.load %arg3[%c0_13, %c0_14, %c0_15] : memref<1x12x128xbf16, #tpu.memory_space<vmem>>, vector<1x6x128xbf16>
    %15 = vector.shape_cast %14 : vector<1x6x128xbf16> to vector<6x128xbf16>
    %c384 = arith.constant 384 : index
    %c0_16 = arith.constant 0 : index
    %16 = vector.load %arg5[%c384, %c0_16] : memref<1152x256xbf16, #tpu.memory_space<vmem>>, vector<128x256xbf16>
    %cst_17 = arith.constant dense<0.000000e+00> : vector<6x256xf32>
    %17 = tpu.matmul %15, %16, %cst_17 {dimension_numbers = #tpu.dot_dimension_numbers<[1], [0], [0], [1], [0, 0, 1, 1], [], []>} : vector<6x128xbf16>, vector<128x256xbf16>, vector<6x256xf32> -> vector<6x256xf32>
    %18 = arith.addf %13, %17 : vector<6x256xf32>
    %c0_18 = arith.constant 0 : index
    %c0_19 = arith.constant 0 : index
    %c0_20 = arith.constant 0 : index
    %19 = vector.load %arg4[%c0_18, %c0_19, %c0_20] : memref<1x12x128xbf16, #tpu.memory_space<vmem>>, vector<1x6x128xbf16>
    %20 = vector.shape_cast %19 : vector<1x6x128xbf16> to vector<6x128xbf16>
    %c512 = arith.constant 512 : index
    %c0_21 = arith.constant 0 : index
    %21 = vector.load %arg5[%c512, %c0_21] : memref<1152x256xbf16, #tpu.memory_space<vmem>>, vector<128x256xbf16>
    %cst_22 = arith.constant dense<0.000000e+00> : vector<6x256xf32>
    %22 = tpu.matmul %20, %21, %cst_22 {dimension_numbers = #tpu.dot_dimension_numbers<[1], [0], [0], [1], [0, 0, 1, 1], [], []>} : vector<6x128xbf16>, vector<128x256xbf16>, vector<6x256xf32> -> vector<6x256xf32>
    %23 = arith.addf %18, %22 : vector<6x256xf32>
    %c0_23 = arith.constant 0 : index
    %c1_24 = arith.constant 1 : index
    %c0_25 = arith.constant 0 : index
    %24 = vector.load %arg3[%c0_23, %c1_24, %c0_25] : memref<1x12x128xbf16, #tpu.memory_space<vmem>>, vector<1x6x128xbf16>
    %25 = vector.shape_cast %24 : vector<1x6x128xbf16> to vector<6x128xbf16>
    %c640 = arith.constant 640 : index
    %c0_26 = arith.constant 0 : index
    %26 = vector.load %arg5[%c640, %c0_26] : memref<1152x256xbf16, #tpu.memory_space<vmem>>, vector<128x256xbf16>
    %cst_27 = arith.constant dense<0.000000e+00> : vector<6x256xf32>
    %27 = tpu.matmul %25, %26, %cst_27 {dimension_numbers = #tpu.dot_dimension_numbers<[1], [0], [0], [1], [0, 0, 1, 1], [], []>} : vector<6x128xbf16>, vector<128x256xbf16>, vector<6x256xf32> -> vector<6x256xf32>
    %28 = arith.addf %23, %27 : vector<6x256xf32>
    %c0_28 = arith.constant 0 : index
    %c3 = arith.constant 3 : index
    %c0_29 = arith.constant 0 : index
    %29 = vector.load %arg1[%c0_28, %c3, %c0_29] : memref<1x12x128xbf16, #tpu.memory_space<vmem>>, vector<1x6x128xbf16>
    %30 = vector.shape_cast %29 : vector<1x6x128xbf16> to vector<6x128xbf16>
    %c768 = arith.constant 768 : index
    %c0_30 = arith.constant 0 : index
    %31 = vector.load %arg5[%c768, %c0_30] : memref<1152x256xbf16, #tpu.memory_space<vmem>>, vector<128x256xbf16>
    %cst_31 = arith.constant dense<0.000000e+00> : vector<6x256xf32>
    %32 = tpu.matmul %30, %31, %cst_31 {dimension_numbers = #tpu.dot_dimension_numbers<[1], [0], [0], [1], [0, 0, 1, 1], [], []>} : vector<6x128xbf16>, vector<128x256xbf16>, vector<6x256xf32> -> vector<6x256xf32>
    %33 = arith.addf %28, %32 : vector<6x256xf32>
    %c0_32 = arith.constant 0 : index
    %c3_33 = arith.constant 3 : index
    %c0_34 = arith.constant 0 : index
    %34 = vector.load %arg2[%c0_32, %c3_33, %c0_34] : memref<1x12x128xbf16, #tpu.memory_space<vmem>>, vector<1x6x128xbf16>
    %35 = vector.shape_cast %34 : vector<1x6x128xbf16> to vector<6x128xbf16>
    %c896 = arith.constant 896 : index
    %c0_35 = arith.constant 0 : index
    %36 = vector.load %arg5[%c896, %c0_35] : memref<1152x256xbf16, #tpu.memory_space<vmem>>, vector<128x256xbf16>
    %cst_36 = arith.constant dense<0.000000e+00> : vector<6x256xf32>
    %37 = tpu.matmul %35, %36, %cst_36 {dimension_numbers = #tpu.dot_dimension_numbers<[1], [0], [0], [1], [0, 0, 1, 1], [], []>} : vector<6x128xbf16>, vector<128x256xbf16>, vector<6x256xf32> -> vector<6x256xf32>
    %38 = arith.addf %33, %37 : vector<6x256xf32>
    %c0_37 = arith.constant 0 : index
    %c4 = arith.constant 4 : index
    %c0_38 = arith.constant 0 : index
    %39 = vector.load %arg1[%c0_37, %c4, %c0_38] : memref<1x12x128xbf16, #tpu.memory_space<vmem>>, vector<1x6x128xbf16>
    %40 = vector.shape_cast %39 : vector<1x6x128xbf16> to vector<6x128xbf16>
    %c1024 = arith.constant 1024 : index
    %c0_39 = arith.constant 0 : index
    %41 = vector.load %arg5[%c1024, %c0_39] : memref<1152x256xbf16, #tpu.memory_space<vmem>>, vector<128x256xbf16>
    %cst_40 = arith.constant dense<0.000000e+00> : vector<6x256xf32>
    %42 = tpu.matmul %40, %41, %cst_40 {dimension_numbers = #tpu.dot_dimension_numbers<[1], [0], [0], [1], [0, 0, 1, 1], [], []>} : vector<6x128xbf16>, vector<128x256xbf16>, vector<6x256xf32> -> vector<6x256xf32>
    %43 = arith.addf %38, %42 : vector<6x256xf32>
    %c0_41 = arith.constant 0 : index
    %c0_42 = arith.constant 0 : index
    %44 = vector.load %arg6[%c0_41, %c0_42] : memref<8x256xf32, #tpu.memory_space<vmem>>, vector<1x256xf32>
    %45 = vector.broadcast %44 : vector<1x256xf32> to vector<6x256xf32>
    %46 = arith.addf %43, %45 : vector<6x256xf32>
    %cst_43 = arith.constant 0.000000e+00 : f32
    %47 = vector.broadcast %cst_43 : f32 to vector<6x256xf32>
    %48 = arith.maximumf %46, %47 : vector<6x256xf32>
    %c1_44 = arith.constant 1 : index
    %c0_45 = arith.constant 0 : index
    %49 = vector.load %arg6[%c1_44, %c0_45] : memref<8x256xf32, #tpu.memory_space<vmem>>, vector<1x256xf32>
    %50 = vector.broadcast %49 : vector<1x256xf32> to vector<6x256xf32>
    %51 = arith.mulf %48, %50 : vector<6x256xf32>
    %c2 = arith.constant 2 : index
    %c0_46 = arith.constant 0 : index
    %52 = vector.load %arg6[%c2, %c0_46] : memref<8x256xf32, #tpu.memory_space<vmem>>, vector<1x256xf32>
    %53 = vector.broadcast %52 : vector<1x256xf32> to vector<6x256xf32>
    %54 = arith.addf %51, %53 : vector<6x256xf32>
    %55 = arith.truncf %54 : vector<6x256xf32> to vector<6x256xbf16>
    %c0_47 = arith.constant 0 : index
    %c0_48 = arith.constant 0 : index
    %56 = vector.load %arg8[%c0_47, %c0_48] : memref<6x256xbf16, #tpu.memory_space<vmem>>, vector<6x256xbf16>
    tpu.vector_store %arg8[%c0_47, %c0_48], %55 {strides = array<i32>} : memref<6x256xbf16, #tpu.memory_space<vmem>>, vector<6x256xbf16>,
    %c0_49 = arith.constant 0 : index
    %c0_50 = arith.constant 0 : index
    %57 = vector.load %arg8[%c0_49, %c0_50] : memref<6x256xbf16, #tpu.memory_space<vmem>>, vector<2x256xbf16>
    %c0_51 = arith.constant 0 : index
    %c0_52 = arith.constant 0 : index
    %c0_53 = arith.constant 0 : index
    %58 = vector.load %arg7[%c0_51, %c0_52, %c0_53] : memref<1x4x256xbf16, #tpu.memory_space<vmem>>, vector<1x2x256xbf16>
    %59 = vector.shape_cast %58 : vector<1x2x256xbf16> to vector<2x256xbf16>
    %60 = vector.shape_cast %57 : vector<2x256xbf16> to vector<1x2x256xbf16>
    tpu.vector_store %arg7[%c0_51, %c0_52, %c0_53], %60 {strides = array<i32>} : memref<1x4x256xbf16, #tpu.memory_space<vmem>>, vector<1x2x256xbf16>,
    %c3_54 = arith.constant 3 : index
    %c0_55 = arith.constant 0 : index
    %61 = vector.load %arg8[%c3_54, %c0_55] : memref<6x256xbf16, #tpu.memory_space<vmem>>, vector<2x256xbf16>
    %c0_56 = arith.constant 0 : index
    %c2_57 = arith.constant 2 : index
    %c0_58 = arith.constant 0 : index
    %62 = vector.load %arg7[%c0_56, %c2_57, %c0_58] : memref<1x4x256xbf16, #tpu.memory_space<vmem>>, vector<1x2x256xbf16>
    %63 = vector.shape_cast %62 : vector<1x2x256xbf16> to vector<2x256xbf16>
    %64 = vector.shape_cast %61 : vector<2x256xbf16> to vector<1x2x256xbf16>
    tpu.vector_store %arg7[%c0_56, %c2_57, %c0_58], %64 {strides = array<i32>} : memref<1x4x256xbf16, #tpu.memory_space<vmem>>, vector<1x2x256xbf16>,
    return
  }
  func.func @transform_0(%arg0: i32) -> (i32, i32, i32) {
    %c0_i32 = arith.constant 0 : i32
    %c0_i32_0 = arith.constant 0 : i32
    %c0_i32_1 = arith.constant 0 : i32
    return %arg0, %c0_i32, %c0_i32_0 : i32, i32, i32
  }
  func.func @transform_1(%arg0: i32) -> (i32, i32, i32) {
    %c0_i32 = arith.constant 0 : i32
    %c0_i32_0 = arith.constant 0 : i32
    %c0_i32_1 = arith.constant 0 : i32
    return %arg0, %c0_i32, %c0_i32_0 : i32, i32, i32
  }
  func.func @transform_2(%arg0: i32) -> (i32, i32, i32) {
    %c0_i32 = arith.constant 0 : i32
    %c0_i32_0 = arith.constant 0 : i32
    %c0_i32_1 = arith.constant 0 : i32
    return %arg0, %c0_i32, %c0_i32_0 : i32, i32, i32
  }
  func.func @transform_3(%arg0: i32) -> (i32, i32, i32) {
    %c0_i32 = arith.constant 0 : i32
    %c0_i32_0 = arith.constant 0 : i32
    %c0_i32_1 = arith.constant 0 : i32
    return %arg0, %c0_i32, %c0_i32_0 : i32, i32, i32
  }
  func.func @transform_4(%arg0: i32) -> (i32, i32) {
    %c0_i32 = arith.constant 0 : i32
    %c0_i32_0 = arith.constant 0 : i32
    %c0_i32_1 = arith.constant 0 : i32
    return %c0_i32, %c0_i32_0 : i32, i32
  }
  func.func @transform_5(%arg0: i32) -> (i32, i32) {
    %c0_i32 = arith.constant 0 : i32
    %c0_i32_0 = arith.constant 0 : i32
    %c0_i32_1 = arith.constant 0 : i32
    return %c0_i32, %c0_i32_0 : i32, i32
  }
  func.func @transform_6(%arg0: i32) -> (i32, i32, i32) {
    %c0_i32 = arith.constant 0 : i32
    %c0_i32_0 = arith.constant 0 : i32
    %c0_i32_1 = arith.constant 0 : i32
    return %arg0, %c0_i32, %c0_i32_0 : i32, i32, i32
  }
}

module attributes {stable_mosaic.version = 11 : i64} {
  func.func @kernel(%arg0: i32, %arg1: memref<1x20x256xbf16, #tpu.memory_space<vmem>>, %arg2: memref<2304x256xbf16, #tpu.memory_space<vmem>>, %arg3: memref<8x256xf32, #tpu.memory_space<vmem>>, %arg4: memref<1x4x256xbf16, #tpu.memory_space<vmem>>, %arg5: memref<8x256xbf16, #tpu.memory_space<vmem>>) attributes {dimension_semantics = [#tpu.dimension_semantics<parallel>], iteration_bounds = array<i64: 2>, scalar_prefetch = 0 : i64, scratch_operands = 1 : i64, tpu.core_type = #tpu.core_type<tc>, window_params = [{transform_indices = @transform_0, window_bounds = array<i64: 1, 20, 256>}, {pipeline_mode = #tpu.pipeline_mode<synchronous>, transform_indices = @transform_1, window_bounds = array<i64: 2304, 256>}, {pipeline_mode = #tpu.pipeline_mode<synchronous>, transform_indices = @transform_2, window_bounds = array<i64: 8, 256>}, {transform_indices = @transform_3, window_bounds = array<i64: 1, 4, 256>}]} {
    %c0 = arith.constant 0 : index
    %c0_0 = arith.constant 0 : index
    %c0_1 = arith.constant 0 : index
    %0 = vector.load %arg1[%c0, %c0_0, %c0_1] : memref<1x20x256xbf16, #tpu.memory_space<vmem>>, vector<1x8x256xbf16>
    %1 = vector.shape_cast %0 : vector<1x8x256xbf16> to vector<8x256xbf16>
    %c0_2 = arith.constant 0 : index
    %c0_3 = arith.constant 0 : index
    %2 = vector.load %arg2[%c0_2, %c0_3] : memref<2304x256xbf16, #tpu.memory_space<vmem>>, vector<256x256xbf16>
    %cst = arith.constant dense<0.000000e+00> : vector<8x256xf32>
    %3 = tpu.matmul %1, %2, %cst {dimension_numbers = #tpu.dot_dimension_numbers<[1], [0], [0], [1], [0, 0, 1, 1], [], []>} : vector<8x256xbf16>, vector<256x256xbf16>, vector<8x256xf32> -> vector<8x256xf32>
    %c0_4 = arith.constant 0 : index
    %c1 = arith.constant 1 : index
    %c0_5 = arith.constant 0 : index
    %4 = vector.load %arg1[%c0_4, %c1, %c0_5] : memref<1x20x256xbf16, #tpu.memory_space<vmem>>, vector<1x8x256xbf16>
    %5 = vector.shape_cast %4 : vector<1x8x256xbf16> to vector<8x256xbf16>
    %c256 = arith.constant 256 : index
    %c0_6 = arith.constant 0 : index
    %6 = vector.load %arg2[%c256, %c0_6] : memref<2304x256xbf16, #tpu.memory_space<vmem>>, vector<256x256xbf16>
    %cst_7 = arith.constant dense<0.000000e+00> : vector<8x256xf32>
    %7 = tpu.matmul %5, %6, %cst_7 {dimension_numbers = #tpu.dot_dimension_numbers<[1], [0], [0], [1], [0, 0, 1, 1], [], []>} : vector<8x256xbf16>, vector<256x256xbf16>, vector<8x256xf32> -> vector<8x256xf32>
    %8 = arith.addf %3, %7 : vector<8x256xf32>
    %c0_8 = arith.constant 0 : index
    %c2 = arith.constant 2 : index
    %c0_9 = arith.constant 0 : index
    %9 = vector.load %arg1[%c0_8, %c2, %c0_9] : memref<1x20x256xbf16, #tpu.memory_space<vmem>>, vector<1x8x256xbf16>
    %10 = vector.shape_cast %9 : vector<1x8x256xbf16> to vector<8x256xbf16>
    %c512 = arith.constant 512 : index
    %c0_10 = arith.constant 0 : index
    %11 = vector.load %arg2[%c512, %c0_10] : memref<2304x256xbf16, #tpu.memory_space<vmem>>, vector<256x256xbf16>
    %cst_11 = arith.constant dense<0.000000e+00> : vector<8x256xf32>
    %12 = tpu.matmul %10, %11, %cst_11 {dimension_numbers = #tpu.dot_dimension_numbers<[1], [0], [0], [1], [0, 0, 1, 1], [], []>} : vector<8x256xbf16>, vector<256x256xbf16>, vector<8x256xf32> -> vector<8x256xf32>
    %13 = arith.addf %8, %12 : vector<8x256xf32>
    %c0_12 = arith.constant 0 : index
    %c4 = arith.constant 4 : index
    %c0_13 = arith.constant 0 : index
    %14 = vector.load %arg1[%c0_12, %c4, %c0_13] : memref<1x20x256xbf16, #tpu.memory_space<vmem>>, vector<1x8x256xbf16>
    %15 = vector.shape_cast %14 : vector<1x8x256xbf16> to vector<8x256xbf16>
    %c768 = arith.constant 768 : index
    %c0_14 = arith.constant 0 : index
    %16 = vector.load %arg2[%c768, %c0_14] : memref<2304x256xbf16, #tpu.memory_space<vmem>>, vector<256x256xbf16>
    %cst_15 = arith.constant dense<0.000000e+00> : vector<8x256xf32>
    %17 = tpu.matmul %15, %16, %cst_15 {dimension_numbers = #tpu.dot_dimension_numbers<[1], [0], [0], [1], [0, 0, 1, 1], [], []>} : vector<8x256xbf16>, vector<256x256xbf16>, vector<8x256xf32> -> vector<8x256xf32>
    %18 = arith.addf %13, %17 : vector<8x256xf32>
    %c0_16 = arith.constant 0 : index
    %c5 = arith.constant 5 : index
    %c0_17 = arith.constant 0 : index
    %19 = vector.load %arg1[%c0_16, %c5, %c0_17] : memref<1x20x256xbf16, #tpu.memory_space<vmem>>, vector<1x8x256xbf16>
    %20 = vector.shape_cast %19 : vector<1x8x256xbf16> to vector<8x256xbf16>
    %c1024 = arith.constant 1024 : index
    %c0_18 = arith.constant 0 : index
    %21 = vector.load %arg2[%c1024, %c0_18] : memref<2304x256xbf16, #tpu.memory_space<vmem>>, vector<256x256xbf16>
    %cst_19 = arith.constant dense<0.000000e+00> : vector<8x256xf32>
    %22 = tpu.matmul %20, %21, %cst_19 {dimension_numbers = #tpu.dot_dimension_numbers<[1], [0], [0], [1], [0, 0, 1, 1], [], []>} : vector<8x256xbf16>, vector<256x256xbf16>, vector<8x256xf32> -> vector<8x256xf32>
    %23 = arith.addf %18, %22 : vector<8x256xf32>
    %c0_20 = arith.constant 0 : index
    %c6 = arith.constant 6 : index
    %c0_21 = arith.constant 0 : index
    %24 = vector.load %arg1[%c0_20, %c6, %c0_21] : memref<1x20x256xbf16, #tpu.memory_space<vmem>>, vector<1x8x256xbf16>
    %25 = vector.shape_cast %24 : vector<1x8x256xbf16> to vector<8x256xbf16>
    %c1280 = arith.constant 1280 : index
    %c0_22 = arith.constant 0 : index
    %26 = vector.load %arg2[%c1280, %c0_22] : memref<2304x256xbf16, #tpu.memory_space<vmem>>, vector<256x256xbf16>
    %cst_23 = arith.constant dense<0.000000e+00> : vector<8x256xf32>
    %27 = tpu.matmul %25, %26, %cst_23 {dimension_numbers = #tpu.dot_dimension_numbers<[1], [0], [0], [1], [0, 0, 1, 1], [], []>} : vector<8x256xbf16>, vector<256x256xbf16>, vector<8x256xf32> -> vector<8x256xf32>
    %28 = arith.addf %23, %27 : vector<8x256xf32>
    %c0_24 = arith.constant 0 : index
    %c8 = arith.constant 8 : index
    %c0_25 = arith.constant 0 : index
    %29 = vector.load %arg1[%c0_24, %c8, %c0_25] : memref<1x20x256xbf16, #tpu.memory_space<vmem>>, vector<1x8x256xbf16>
    %30 = vector.shape_cast %29 : vector<1x8x256xbf16> to vector<8x256xbf16>
    %c1536 = arith.constant 1536 : index
    %c0_26 = arith.constant 0 : index
    %31 = vector.load %arg2[%c1536, %c0_26] : memref<2304x256xbf16, #tpu.memory_space<vmem>>, vector<256x256xbf16>
    %cst_27 = arith.constant dense<0.000000e+00> : vector<8x256xf32>
    %32 = tpu.matmul %30, %31, %cst_27 {dimension_numbers = #tpu.dot_dimension_numbers<[1], [0], [0], [1], [0, 0, 1, 1], [], []>} : vector<8x256xbf16>, vector<256x256xbf16>, vector<8x256xf32> -> vector<8x256xf32>
    %33 = arith.addf %28, %32 : vector<8x256xf32>
    %c0_28 = arith.constant 0 : index
    %c9 = arith.constant 9 : index
    %c0_29 = arith.constant 0 : index
    %34 = vector.load %arg1[%c0_28, %c9, %c0_29] : memref<1x20x256xbf16, #tpu.memory_space<vmem>>, vector<1x8x256xbf16>
    %35 = vector.shape_cast %34 : vector<1x8x256xbf16> to vector<8x256xbf16>
    %c1792 = arith.constant 1792 : index
    %c0_30 = arith.constant 0 : index
    %36 = vector.load %arg2[%c1792, %c0_30] : memref<2304x256xbf16, #tpu.memory_space<vmem>>, vector<256x256xbf16>
    %cst_31 = arith.constant dense<0.000000e+00> : vector<8x256xf32>
    %37 = tpu.matmul %35, %36, %cst_31 {dimension_numbers = #tpu.dot_dimension_numbers<[1], [0], [0], [1], [0, 0, 1, 1], [], []>} : vector<8x256xbf16>, vector<256x256xbf16>, vector<8x256xf32> -> vector<8x256xf32>
    %38 = arith.addf %33, %37 : vector<8x256xf32>
    %c0_32 = arith.constant 0 : index
    %c10 = arith.constant 10 : index
    %c0_33 = arith.constant 0 : index
    %39 = vector.load %arg1[%c0_32, %c10, %c0_33] : memref<1x20x256xbf16, #tpu.memory_space<vmem>>, vector<1x8x256xbf16>
    %40 = vector.shape_cast %39 : vector<1x8x256xbf16> to vector<8x256xbf16>
    %c2048 = arith.constant 2048 : index
    %c0_34 = arith.constant 0 : index
    %41 = vector.load %arg2[%c2048, %c0_34] : memref<2304x256xbf16, #tpu.memory_space<vmem>>, vector<256x256xbf16>
    %cst_35 = arith.constant dense<0.000000e+00> : vector<8x256xf32>
    %42 = tpu.matmul %40, %41, %cst_35 {dimension_numbers = #tpu.dot_dimension_numbers<[1], [0], [0], [1], [0, 0, 1, 1], [], []>} : vector<8x256xbf16>, vector<256x256xbf16>, vector<8x256xf32> -> vector<8x256xf32>
    %43 = arith.addf %38, %42 : vector<8x256xf32>
    %c0_36 = arith.constant 0 : index
    %c0_37 = arith.constant 0 : index
    %44 = vector.load %arg3[%c0_36, %c0_37] : memref<8x256xf32, #tpu.memory_space<vmem>>, vector<1x256xf32>
    %45 = vector.broadcast %44 : vector<1x256xf32> to vector<8x256xf32>
    %46 = arith.addf %43, %45 : vector<8x256xf32>
    %cst_38 = arith.constant 0.000000e+00 : f32
    %47 = vector.broadcast %cst_38 : f32 to vector<8x256xf32>
    %48 = arith.maximumf %46, %47 : vector<8x256xf32>
    %c1_39 = arith.constant 1 : index
    %c0_40 = arith.constant 0 : index
    %49 = vector.load %arg3[%c1_39, %c0_40] : memref<8x256xf32, #tpu.memory_space<vmem>>, vector<1x256xf32>
    %50 = vector.broadcast %49 : vector<1x256xf32> to vector<8x256xf32>
    %51 = arith.mulf %48, %50 : vector<8x256xf32>
    %c2_41 = arith.constant 2 : index
    %c0_42 = arith.constant 0 : index
    %52 = vector.load %arg3[%c2_41, %c0_42] : memref<8x256xf32, #tpu.memory_space<vmem>>, vector<1x256xf32>
    %53 = vector.broadcast %52 : vector<1x256xf32> to vector<8x256xf32>
    %54 = arith.addf %51, %53 : vector<8x256xf32>
    %55 = arith.truncf %54 : vector<8x256xf32> to vector<8x256xbf16>
    %c0_43 = arith.constant 0 : index
    %c0_44 = arith.constant 0 : index
    %56 = vector.load %arg5[%c0_43, %c0_44] : memref<8x256xbf16, #tpu.memory_space<vmem>>, vector<8x256xbf16>
    tpu.vector_store %arg5[%c0_43, %c0_44], %55 {strides = array<i32>} : memref<8x256xbf16, #tpu.memory_space<vmem>>, vector<8x256xbf16>,
    %c0_45 = arith.constant 0 : index
    %c0_46 = arith.constant 0 : index
    %57 = vector.load %arg5[%c0_45, %c0_46] : memref<8x256xbf16, #tpu.memory_space<vmem>>, vector<2x256xbf16>
    %c0_47 = arith.constant 0 : index
    %c0_48 = arith.constant 0 : index
    %c0_49 = arith.constant 0 : index
    %58 = vector.load %arg4[%c0_47, %c0_48, %c0_49] : memref<1x4x256xbf16, #tpu.memory_space<vmem>>, vector<1x2x256xbf16>
    %59 = vector.shape_cast %58 : vector<1x2x256xbf16> to vector<2x256xbf16>
    %60 = vector.shape_cast %57 : vector<2x256xbf16> to vector<1x2x256xbf16>
    tpu.vector_store %arg4[%c0_47, %c0_48, %c0_49], %60 {strides = array<i32>} : memref<1x4x256xbf16, #tpu.memory_space<vmem>>, vector<1x2x256xbf16>,
    %c4_50 = arith.constant 4 : index
    %c0_51 = arith.constant 0 : index
    %61 = vector.load %arg5[%c4_50, %c0_51] : memref<8x256xbf16, #tpu.memory_space<vmem>>, vector<2x256xbf16>
    %c0_52 = arith.constant 0 : index
    %c2_53 = arith.constant 2 : index
    %c0_54 = arith.constant 0 : index
    %62 = vector.load %arg4[%c0_52, %c2_53, %c0_54] : memref<1x4x256xbf16, #tpu.memory_space<vmem>>, vector<1x2x256xbf16>
    %63 = vector.shape_cast %62 : vector<1x2x256xbf16> to vector<2x256xbf16>
    %64 = vector.shape_cast %61 : vector<2x256xbf16> to vector<1x2x256xbf16>
    tpu.vector_store %arg4[%c0_52, %c2_53, %c0_54], %64 {strides = array<i32>} : memref<1x4x256xbf16, #tpu.memory_space<vmem>>, vector<1x2x256xbf16>,
    return
  }
  func.func @transform_0(%arg0: i32) -> (i32, i32, i32) {
    %c0_i32 = arith.constant 0 : i32
    %c0_i32_0 = arith.constant 0 : i32
    %c0_i32_1 = arith.constant 0 : i32
    return %arg0, %c0_i32, %c0_i32_0 : i32, i32, i32
  }
  func.func @transform_1(%arg0: i32) -> (i32, i32) {
    %c0_i32 = arith.constant 0 : i32
    %c0_i32_0 = arith.constant 0 : i32
    %c0_i32_1 = arith.constant 0 : i32
    return %c0_i32, %c0_i32_0 : i32, i32
  }
  func.func @transform_2(%arg0: i32) -> (i32, i32) {
    %c0_i32 = arith.constant 0 : i32
    %c0_i32_0 = arith.constant 0 : i32
    %c0_i32_1 = arith.constant 0 : i32
    return %c0_i32, %c0_i32_0 : i32, i32
  }
  func.func @transform_3(%arg0: i32) -> (i32, i32, i32) {
    %c0_i32 = arith.constant 0 : i32
    %c0_i32_0 = arith.constant 0 : i32
    %c0_i32_1 = arith.constant 0 : i32
    return %arg0, %c0_i32, %c0_i32_0 : i32, i32, i32
  }
}

module attributes {stable_mosaic.version = 11 : i64} {
  func.func @kernel(%arg0: i32, %arg1: memref<1x6x256xbf16, #tpu.memory_space<vmem>>, %arg2: memref<1x6x256xbf16, #tpu.memory_space<vmem>>, %arg3: memref<1x6x256xbf16, #tpu.memory_space<vmem>>, %arg4: memref<1x6x256xbf16, #tpu.memory_space<vmem>>, %arg5: memref<2304x512xbf16, #tpu.memory_space<vmem>>, %arg6: memref<8x512xf32, #tpu.memory_space<vmem>>, %arg7: memref<512x128xbf16, #tpu.memory_space<vmem>>, %arg8: memref<1x1x128xf32, #tpu.memory_space<vmem>>, %arg9: memref<2x128xf32, #tpu.memory_space<vmem>>) attributes {dimension_semantics = [#tpu.dimension_semantics<parallel>], iteration_bounds = array<i64: 2>, scalar_prefetch = 0 : i64, scratch_operands = 1 : i64, tpu.core_type = #tpu.core_type<tc>, window_params = [{transform_indices = @transform_0, window_bounds = array<i64: 1, 6, 256>}, {transform_indices = @transform_1, window_bounds = array<i64: 1, 6, 256>}, {transform_indices = @transform_2, window_bounds = array<i64: 1, 6, 256>}, {transform_indices = @transform_3, window_bounds = array<i64: 1, 6, 256>}, {pipeline_mode = #tpu.pipeline_mode<synchronous>, transform_indices = @transform_4, window_bounds = array<i64: 2304, 512>}, {pipeline_mode = #tpu.pipeline_mode<synchronous>, transform_indices = @transform_5, window_bounds = array<i64: 8, 512>}, {pipeline_mode = #tpu.pipeline_mode<synchronous>, transform_indices = @transform_6, window_bounds = array<i64: 512, 128>}, {transform_indices = @transform_7, window_bounds = array<i64: 1, 1, 128>}]} {
    %c0 = arith.constant 0 : index
    %c0_0 = arith.constant 0 : index
    %c0_1 = arith.constant 0 : index
    %0 = vector.load %arg1[%c0, %c0_0, %c0_1] : memref<1x6x256xbf16, #tpu.memory_space<vmem>>, vector<1x2x256xbf16>
    %1 = vector.shape_cast %0 : vector<1x2x256xbf16> to vector<2x256xbf16>
    %c0_2 = arith.constant 0 : index
    %c0_3 = arith.constant 0 : index
    %2 = vector.load %arg5[%c0_2, %c0_3] : memref<2304x512xbf16, #tpu.memory_space<vmem>>, vector<256x512xbf16>
    %cst = arith.constant dense<0.000000e+00> : vector<2x512xf32>
    %3 = tpu.matmul %1, %2, %cst {dimension_numbers = #tpu.dot_dimension_numbers<[1], [0], [0], [1], [0, 0, 1, 1], [], []>} : vector<2x256xbf16>, vector<256x512xbf16>, vector<2x512xf32> -> vector<2x512xf32>
    %c0_4 = arith.constant 0 : index
    %c0_5 = arith.constant 0 : index
    %c0_6 = arith.constant 0 : index
    %4 = vector.load %arg2[%c0_4, %c0_5, %c0_6] : memref<1x6x256xbf16, #tpu.memory_space<vmem>>, vector<1x2x256xbf16>
    %5 = vector.shape_cast %4 : vector<1x2x256xbf16> to vector<2x256xbf16>
    %c256 = arith.constant 256 : index
    %c0_7 = arith.constant 0 : index
    %6 = vector.load %arg5[%c256, %c0_7] : memref<2304x512xbf16, #tpu.memory_space<vmem>>, vector<256x512xbf16>
    %cst_8 = arith.constant dense<0.000000e+00> : vector<2x512xf32>
    %7 = tpu.matmul %5, %6, %cst_8 {dimension_numbers = #tpu.dot_dimension_numbers<[1], [0], [0], [1], [0, 0, 1, 1], [], []>} : vector<2x256xbf16>, vector<256x512xbf16>, vector<2x512xf32> -> vector<2x512xf32>
    %8 = arith.addf %3, %7 : vector<2x512xf32>
    %c0_9 = arith.constant 0 : index
    %c1 = arith.constant 1 : index
    %c0_10 = arith.constant 0 : index
    %9 = vector.load %arg1[%c0_9, %c1, %c0_10] : memref<1x6x256xbf16, #tpu.memory_space<vmem>>, vector<1x2x256xbf16>
    %10 = vector.shape_cast %9 : vector<1x2x256xbf16> to vector<2x256xbf16>
    %c512 = arith.constant 512 : index
    %c0_11 = arith.constant 0 : index
    %11 = vector.load %arg5[%c512, %c0_11] : memref<2304x512xbf16, #tpu.memory_space<vmem>>, vector<256x512xbf16>
    %cst_12 = arith.constant dense<0.000000e+00> : vector<2x512xf32>
    %12 = tpu.matmul %10, %11, %cst_12 {dimension_numbers = #tpu.dot_dimension_numbers<[1], [0], [0], [1], [0, 0, 1, 1], [], []>} : vector<2x256xbf16>, vector<256x512xbf16>, vector<2x512xf32> -> vector<2x512xf32>
    %13 = arith.addf %8, %12 : vector<2x512xf32>
    %c0_13 = arith.constant 0 : index
    %c0_14 = arith.constant 0 : index
    %c0_15 = arith.constant 0 : index
    %14 = vector.load %arg3[%c0_13, %c0_14, %c0_15] : memref<1x6x256xbf16, #tpu.memory_space<vmem>>, vector<1x2x256xbf16>
    %15 = vector.shape_cast %14 : vector<1x2x256xbf16> to vector<2x256xbf16>
    %c768 = arith.constant 768 : index
    %c0_16 = arith.constant 0 : index
    %16 = vector.load %arg5[%c768, %c0_16] : memref<2304x512xbf16, #tpu.memory_space<vmem>>, vector<256x512xbf16>
    %cst_17 = arith.constant dense<0.000000e+00> : vector<2x512xf32>
    %17 = tpu.matmul %15, %16, %cst_17 {dimension_numbers = #tpu.dot_dimension_numbers<[1], [0], [0], [1], [0, 0, 1, 1], [], []>} : vector<2x256xbf16>, vector<256x512xbf16>, vector<2x512xf32> -> vector<2x512xf32>
    %18 = arith.addf %13, %17 : vector<2x512xf32>
    %c0_18 = arith.constant 0 : index
    %c0_19 = arith.constant 0 : index
    %c0_20 = arith.constant 0 : index
    %19 = vector.load %arg4[%c0_18, %c0_19, %c0_20] : memref<1x6x256xbf16, #tpu.memory_space<vmem>>, vector<1x2x256xbf16>
    %20 = vector.shape_cast %19 : vector<1x2x256xbf16> to vector<2x256xbf16>
    %c1024 = arith.constant 1024 : index
    %c0_21 = arith.constant 0 : index
    %21 = vector.load %arg5[%c1024, %c0_21] : memref<2304x512xbf16, #tpu.memory_space<vmem>>, vector<256x512xbf16>
    %cst_22 = arith.constant dense<0.000000e+00> : vector<2x512xf32>
    %22 = tpu.matmul %20, %21, %cst_22 {dimension_numbers = #tpu.dot_dimension_numbers<[1], [0], [0], [1], [0, 0, 1, 1], [], []>} : vector<2x256xbf16>, vector<256x512xbf16>, vector<2x512xf32> -> vector<2x512xf32>
    %23 = arith.addf %18, %22 : vector<2x512xf32>
    %c0_23 = arith.constant 0 : index
    %c1_24 = arith.constant 1 : index
    %c0_25 = arith.constant 0 : index
    %24 = vector.load %arg3[%c0_23, %c1_24, %c0_25] : memref<1x6x256xbf16, #tpu.memory_space<vmem>>, vector<1x2x256xbf16>
    %25 = vector.shape_cast %24 : vector<1x2x256xbf16> to vector<2x256xbf16>
    %c1280 = arith.constant 1280 : index
    %c0_26 = arith.constant 0 : index
    %26 = vector.load %arg5[%c1280, %c0_26] : memref<2304x512xbf16, #tpu.memory_space<vmem>>, vector<256x512xbf16>
    %cst_27 = arith.constant dense<0.000000e+00> : vector<2x512xf32>
    %27 = tpu.matmul %25, %26, %cst_27 {dimension_numbers = #tpu.dot_dimension_numbers<[1], [0], [0], [1], [0, 0, 1, 1], [], []>} : vector<2x256xbf16>, vector<256x512xbf16>, vector<2x512xf32> -> vector<2x512xf32>
    %28 = arith.addf %23, %27 : vector<2x512xf32>
    %c0_28 = arith.constant 0 : index
    %c2 = arith.constant 2 : index
    %c0_29 = arith.constant 0 : index
    %29 = vector.load %arg1[%c0_28, %c2, %c0_29] : memref<1x6x256xbf16, #tpu.memory_space<vmem>>, vector<1x2x256xbf16>
    %30 = vector.shape_cast %29 : vector<1x2x256xbf16> to vector<2x256xbf16>
    %c1536 = arith.constant 1536 : index
    %c0_30 = arith.constant 0 : index
    %31 = vector.load %arg5[%c1536, %c0_30] : memref<2304x512xbf16, #tpu.memory_space<vmem>>, vector<256x512xbf16>
    %cst_31 = arith.constant dense<0.000000e+00> : vector<2x512xf32>
    %32 = tpu.matmul %30, %31, %cst_31 {dimension_numbers = #tpu.dot_dimension_numbers<[1], [0], [0], [1], [0, 0, 1, 1], [], []>} : vector<2x256xbf16>, vector<256x512xbf16>, vector<2x512xf32> -> vector<2x512xf32>
    %33 = arith.addf %28, %32 : vector<2x512xf32>
    %c0_32 = arith.constant 0 : index
    %c2_33 = arith.constant 2 : index
    %c0_34 = arith.constant 0 : index
    %34 = vector.load %arg2[%c0_32, %c2_33, %c0_34] : memref<1x6x256xbf16, #tpu.memory_space<vmem>>, vector<1x2x256xbf16>
    %35 = vector.shape_cast %34 : vector<1x2x256xbf16> to vector<2x256xbf16>
    %c1792 = arith.constant 1792 : index
    %c0_35 = arith.constant 0 : index
    %36 = vector.load %arg5[%c1792, %c0_35] : memref<2304x512xbf16, #tpu.memory_space<vmem>>, vector<256x512xbf16>
    %cst_36 = arith.constant dense<0.000000e+00> : vector<2x512xf32>
    %37 = tpu.matmul %35, %36, %cst_36 {dimension_numbers = #tpu.dot_dimension_numbers<[1], [0], [0], [1], [0, 0, 1, 1], [], []>} : vector<2x256xbf16>, vector<256x512xbf16>, vector<2x512xf32> -> vector<2x512xf32>
    %38 = arith.addf %33, %37 : vector<2x512xf32>
    %c0_37 = arith.constant 0 : index
    %c3 = arith.constant 3 : index
    %c0_38 = arith.constant 0 : index
    %39 = vector.load %arg1[%c0_37, %c3, %c0_38] : memref<1x6x256xbf16, #tpu.memory_space<vmem>>, vector<1x2x256xbf16>
    %40 = vector.shape_cast %39 : vector<1x2x256xbf16> to vector<2x256xbf16>
    %c2048 = arith.constant 2048 : index
    %c0_39 = arith.constant 0 : index
    %41 = vector.load %arg5[%c2048, %c0_39] : memref<2304x512xbf16, #tpu.memory_space<vmem>>, vector<256x512xbf16>
    %cst_40 = arith.constant dense<0.000000e+00> : vector<2x512xf32>
    %42 = tpu.matmul %40, %41, %cst_40 {dimension_numbers = #tpu.dot_dimension_numbers<[1], [0], [0], [1], [0, 0, 1, 1], [], []>} : vector<2x256xbf16>, vector<256x512xbf16>, vector<2x512xf32> -> vector<2x512xf32>
    %43 = arith.addf %38, %42 : vector<2x512xf32>
    %c0_41 = arith.constant 0 : index
    %c0_42 = arith.constant 0 : index
    %44 = vector.load %arg6[%c0_41, %c0_42] : memref<8x512xf32, #tpu.memory_space<vmem>>, vector<1x512xf32>
    %45 = vector.broadcast %44 : vector<1x512xf32> to vector<2x512xf32>
    %46 = arith.addf %43, %45 : vector<2x512xf32>
    %cst_43 = arith.constant 0.000000e+00 : f32
    %47 = vector.broadcast %cst_43 : f32 to vector<2x512xf32>
    %48 = arith.maximumf %46, %47 : vector<2x512xf32>
    %c1_44 = arith.constant 1 : index
    %c0_45 = arith.constant 0 : index
    %49 = vector.load %arg6[%c1_44, %c0_45] : memref<8x512xf32, #tpu.memory_space<vmem>>, vector<1x512xf32>
    %50 = vector.broadcast %49 : vector<1x512xf32> to vector<2x512xf32>
    %51 = arith.mulf %48, %50 : vector<2x512xf32>
    %c2_46 = arith.constant 2 : index
    %c0_47 = arith.constant 0 : index
    %52 = vector.load %arg6[%c2_46, %c0_47] : memref<8x512xf32, #tpu.memory_space<vmem>>, vector<1x512xf32>
    %53 = vector.broadcast %52 : vector<1x512xf32> to vector<2x512xf32>
    %54 = arith.addf %51, %53 : vector<2x512xf32>
    %55 = arith.truncf %54 : vector<2x512xf32> to vector<2x512xbf16>
    %c0_48 = arith.constant 0 : index
    %c0_49 = arith.constant 0 : index
    %56 = vector.load %arg7[%c0_48, %c0_49] : memref<512x128xbf16, #tpu.memory_space<vmem>>, vector<512x128xbf16>
    %cst_50 = arith.constant dense<0.000000e+00> : vector<2x128xf32>
    %57 = tpu.matmul %55, %56, %cst_50 {dimension_numbers = #tpu.dot_dimension_numbers<[1], [0], [0], [1], [0, 0, 1, 1], [], []>} : vector<2x512xbf16>, vector<512x128xbf16>, vector<2x128xf32> -> vector<2x128xf32>
    %c0_51 = arith.constant 0 : index
    %c0_52 = arith.constant 0 : index
    %58 = vector.load %arg9[%c0_51, %c0_52] : memref<2x128xf32, #tpu.memory_space<vmem>>, vector<2x128xf32>
    tpu.vector_store %arg9[%c0_51, %c0_52], %57 {strides = array<i32>} : memref<2x128xf32, #tpu.memory_space<vmem>>, vector<2x128xf32>,
    %c0_53 = arith.constant 0 : index
    %c0_54 = arith.constant 0 : index
    %59 = vector.load %arg9[%c0_53, %c0_54] : memref<2x128xf32, #tpu.memory_space<vmem>>, vector<1x128xf32>
    %c0_55 = arith.constant 0 : index
    %c0_56 = arith.constant 0 : index
    %c0_57 = arith.constant 0 : index
    %60 = vector.load %arg8[%c0_55, %c0_56, %c0_57] : memref<1x1x128xf32, #tpu.memory_space<vmem>>, vector<1x1x128xf32>
    %61 = vector.shape_cast %60 : vector<1x1x128xf32> to vector<1x128xf32>
    %62 = vector.shape_cast %59 : vector<1x128xf32> to vector<1x1x128xf32>
    tpu.vector_store %arg8[%c0_55, %c0_56, %c0_57], %62 {strides = array<i32>} : memref<1x1x128xf32, #tpu.memory_space<vmem>>, vector<1x1x128xf32>,
    return
  }
  func.func @transform_0(%arg0: i32) -> (i32, i32, i32) {
    %c0_i32 = arith.constant 0 : i32
    %c0_i32_0 = arith.constant 0 : i32
    %c0_i32_1 = arith.constant 0 : i32
    return %arg0, %c0_i32, %c0_i32_0 : i32, i32, i32
  }
  func.func @transform_1(%arg0: i32) -> (i32, i32, i32) {
    %c0_i32 = arith.constant 0 : i32
    %c0_i32_0 = arith.constant 0 : i32
    %c0_i32_1 = arith.constant 0 : i32
    return %arg0, %c0_i32, %c0_i32_0 : i32, i32, i32
  }
  func.func @transform_2(%arg0: i32) -> (i32, i32, i32) {
    %c0_i32 = arith.constant 0 : i32
    %c0_i32_0 = arith.constant 0 : i32
    %c0_i32_1 = arith.constant 0 : i32
    return %arg0, %c0_i32, %c0_i32_0 : i32, i32, i32
  }
  func.func @transform_3(%arg0: i32) -> (i32, i32, i32) {
    %c0_i32 = arith.constant 0 : i32
    %c0_i32_0 = arith.constant 0 : i32
    %c0_i32_1 = arith.constant 0 : i32
    return %arg0, %c0_i32, %c0_i32_0 : i32, i32, i32
  }
  func.func @transform_4(%arg0: i32) -> (i32, i32) {
    %c0_i32 = arith.constant 0 : i32
    %c0_i32_0 = arith.constant 0 : i32
    %c0_i32_1 = arith.constant 0 : i32
    return %c0_i32, %c0_i32_0 : i32, i32
  }
  func.func @transform_5(%arg0: i32) -> (i32, i32) {
    %c0_i32 = arith.constant 0 : i32
    %c0_i32_0 = arith.constant 0 : i32
    %c0_i32_1 = arith.constant 0 : i32
    return %c0_i32, %c0_i32_0 : i32, i32
  }
  func.func @transform_6(%arg0: i32) -> (i32, i32) {
    %c0_i32 = arith.constant 0 : i32
    %c0_i32_0 = arith.constant 0 : i32
    %c0_i32_1 = arith.constant 0 : i32
    return %c0_i32, %c0_i32_0 : i32, i32
  }
  func.func @transform_7(%arg0: i32) -> (i32, i32, i32) {
    %c0_i32 = arith.constant 0 : i32
    %c0_i32_0 = arith.constant 0 : i32
    %c0_i32_1 = arith.constant 0 : i32
    return %arg0, %c0_i32, %c0_i32_0 : i32, i32, i32
  }
}

</mosaic_0001>

<bundles_post_ra>
// kernel: _lambda_.6
= control target key start
LH: loop header
LB: loop body
LE: loop exit
PB: predicated region body
PF: predicated region fallthrough
CT: control target
= control target key end

     0   :  { %8 = vsyncpa [#allocation3], 0  ;;  %s814_s0 = inlined_call_operand.vmem [shape: bf16[2,64,72], index: 0, kind: input, shape index: {}]   ;;  %s815_s1 = inlined_call_operand.hbm [shape: bf16[72,64], index: 1, kind: input, shape index: {}]   ;;  %s816_s2 = inlined_call_operand.hbm [shape: f32[8,64], index: 2, kind: input, shape index: {}]   ;;  %s817_s3 = inlined_call_operand.vmem [shape: bf16[2,64,64], index: 3, kind: output, shape index: {}]  }
   0x1   :  { %9 = vsyncpa [#allocation5], 0  ;;  %s723_s12 = smov 0  }
   0x2 LB: > { %s729_s13 = sadd.s32 4294967295, %s697_s12   ;;  %p505_p0 = scmp.ge.s32.totalorder %s697_s12, 1  ;;  %s697_s12 = sphi %s723_s12, %s15_s12  }
   0x3   : > { %p114_p1 = scmp.lt.s32.totalorder %s697_s12, 3  ;;  %s699_s14 = smov [#allocation2]  }
   0x4   : > { %s126_s15 = sshll.u32 %s699_s14, 4  ;;  %p606_p3 = scmp.eq.s32.totalorder %s729_s13, 0  ;;  %s127_s15 = int_to_ptr.vmem [resolvable:$true] %s126_s15 }
   0x5   : > { %p733_p2 = pnand %p505_p0, %p114_p1  ;;  %s700_s17 = smov [#allocation4]  }
   0x6   : > { %s140_s18 = sshll.u32 %s700_s17, 4  ;;  %s642_s20 = scalar_lea.vmem %s127_s15, 576  ;;  %s141_s18 = int_to_ptr.vmem [resolvable:$true] %s140_s18 }
   0x7   : > { %p599_p4 = pneg %p733_p2  ;;  %p643_p7 = scmp.ne.s32.totalorder %s127_s15, %s642_s20 }
   0x8   : > { %p650_p10 = scmp.lt.s32.totalorder %s127_s15, %s127_s15  ;;  %p651_p11 = scmp.lt.s32.totalorder %s642_s20, %s642_s20 }
   0x9   : > { %p742_p5 = pnand %p606_p3, %p599_p4 }
   0xa   : > { %p652_p12 = por %p651_p11, %p650_p10 }
   0xb   : > { %p633_p6 = pneg %p742_p5 }
   0xd   : > { %p645_p8 = pnand %p643_p7, %p633_p6 }
   0xf   : > { %p646_p9 = pneg %p645_p8 }
  0x11   : > { %p653_p13 = pnand %p652_p12, %p646_p9 }
  0x13   : > { %656 = shalt.err (!%p653_p13)
}
  0x14   : > { %s701_s21 = smov 64   ;;  %s702_s22 = smov 4  }
  0x15   : > { %602 = dma.hbm_to_vmem [thread:$0]  (!%p742_p5), %s815_s1, 576, %s127_s15, [#allocation3], %s701_s21, %s701_s21, %s702_s22  }
  0x16   : > { %s668_s25 = scalar_lea.vmem %s141_s18, 128  ;;  %p676_p7 = scmp.lt.s32.totalorder %s141_s18, %s141_s18 }
  0x17   : > { %p669_p0 = scmp.ne.s32.totalorder %s141_s18, %s668_s25  ;;  %p677_p8 = scmp.lt.s32.totalorder %s668_s25, %s668_s25 }
  0x19   : > { %p671_p1 = pnand %p669_p0, %p633_p6  ;;  %p678_p10 = por %p677_p8, %p676_p7 }
  0x1b   : > { %p672_p4 = pneg %p671_p1 }
  0x1d   : > { %p679_p9 = pnand %p678_p10, %p672_p4 }
  0x1f   : > { %682 = shalt.err (!%p679_p9)
}
  0x20   : > { %605 = dma.hbm_to_vmem [thread:$0]  (!%p742_p5), %s816_s2, 128, %s141_s18, [#allocation5]  }
  0x21   : > { %161 = sbr.rel (%p733_p2) target bundleno = 273 (0x111), region = 32 }
  0x26   : > { %688 = dma.done.wait (%p606_p3), [#allocation3], 576  }
  0x27   : > { %690 = vsyncadd (%p606_p3), [#allocation3], 4294966720 }
  0x28   : > { %692 = dma.done.wait (%p606_p3), [#allocation5], 128  }
  0x29   : > { %694 = vsyncadd (%p606_p3), [#allocation5], 4294967168  ;;  %p189_p6 = scmp.lt.s32.totalorder %s729_s13, 1  ;;  %vm282_vm0 = vcmask 1043456   ;;  %v622_v0 = vld [vmem:[#allocation2 + $0x20] ss:$0 sps:$4 sm:$0xff]  }
  0x2a   : > { %v623_v1 = vld [vmem:[#allocation2 + $0x18] sm:$0xff]   ;;  %589 = vmatprep.subr.msk.bf16.mxu0 %vm282_vm0, %v622_v0  ;;  %590 = vmatprep.subr.msk.bf16.mxu1 %vm282_vm0, %v622_v0  ;;  %v284_v2 = vsel %vm282_vm0, %v622_v0, 0  ;;  %v624_v3 = vld [vmem:[#allocation2 + $0x10] sm:$0xff]   ;;  %vm269_vm1 = vcmask 588800   ;;  %v625_v6 = vld [vmem:[#allocation2 + $0x8] sm:$0xff]   ;;  %vm417_vm2 = vcmask 519168  }
  0x2b   : > { %s821_s13 = smov (!%p189_p6, %s729_s13), 1  ;;  %562 = vmatpush3.bf16.msra.mxu0 %v284_v2  ;;  %584 = vmatpush3.bf16.msra.mxu1 %v284_v2  ;;  %v626_v7 = vld [vmem:[#allocation2] sm:$0xff]  }
  0x2c   : > { %s542_s28 = sshll.u32 %s821_s13, 5  ;;  %563 = vmatprep.subr.bf16.mxu0 %v623_v1  ;;  %580 = vmatprep.subr.bf16.mxu1 %v623_v1  ;;  %v516_v10 = vld [vmem:[#allocation4] ss:$0 sm:$0xff]  ;;  %v530_v15 = vld [vmem:[#allocation4 + $0x1] ss:$0 sm:$0xff] }
  0x2d   : > { %s193_s4 = scalar_lea.vmem %s814_s0, %s542_s28  ;;  %v531_v22 = vld [vmem:[#allocation4 + $0x2] ss:$0 sm:$0xff]  ;;  %s793_s7 = scalar_lea.vmem %s817_s3, %s542_s28 }
  0x2e   : > { %v627_v4 = vld [vmem:[%s193_s4] sm:$0xff]   ;;  %v628_v5 = vld [vmem:[%s193_s4 + $0x10] sm:$0xff]   ;;  %v629_v8 = vld [vmem:[%s193_s4 + $0x8] sm:$0xff]  }
  0x2f   : > { %564 = vmatpush3.bf16.msra.mxu0 %v623_v1  ;;  %585 = vmatpush3.bf16.msra.mxu1 %v623_v1  ;;  %v630_v9 = vld [vmem:[%s193_s4 + $0x18] sm:$0xff]  }
  0x30   : > { %565 = vmatprep.subr.bf16.mxu0 %v624_v3  ;;  %581 = vmatprep.subr.bf16.mxu1 %v624_v3 }
  0x31   : > { %571 = vmatprep.mubr.msk.bf16.mxu0 %vm269_vm1, %v627_v4  ;;  %575 = vmatprep.mubr.msk.bf16.mxu1 %vm269_vm1, %v628_v5 }
  0x33   : > { %566 = vmatpush3.bf16.msra.mxu0 %v624_v3  ;;  %586 = vmatpush3.bf16.msra.mxu1 %v624_v3 }
  0x34   : > { %567 = vmatprep.subr.bf16.mxu0 %v625_v6  ;;  %582 = vmatprep.subr.bf16.mxu1 %v625_v6 }
  0x37   : > { %568 = vmatpush3.bf16.msra.mxu0 %v625_v6  ;;  %587 = vmatpush3.bf16.msra.mxu1 %v625_v6 }
  0x38   : > { %569 = vmatprep.subr.bf16.mxu0 %v626_v7  ;;  %583 = vmatprep.subr.bf16.mxu1 %v626_v7 }
  0x3b   : > { %570 = vmatpush3.bf16.msra.mxu0 %v626_v7  ;;  %588 = vmatpush3.bf16.msra.mxu1 %v626_v7 }
  0x3e   : > { %572 = vmatmul.mubr.msk.bf16.vlgmr.msra.gmra.mxu0 %vm269_vm1, %v629_v8  ;;  %576 = vmatmul.mubr.msk.bf16.vlgmr.msra.gmra.mxu1 %vm269_vm1, %v630_v9 }
  0xfe   : > { %v573_v11 = vpop.f32.mrf.mxu0  ;;  %v577_v12 = vpop.f32.mrf.mxu1 }
  0xff   : > { %v329_v13 = vadd.f32 %v573_v11, %v516_v10  ;;  %v345_v14 = vadd.f32 %v577_v12, %v516_v10 }
 0x100   : > { %v320_v16 = vpop.f32.mrf.mxu0  ;;  %v336_v17 = vpop.f32.mrf.mxu1 }
 0x101   : > { %v353_v18 = vmax.f32 %v329_v13, 0.0  ;;  %v357_v19 = vmax.f32 %v345_v14, 0.0  ;;  %v321_v20 = vadd.f32 %v516_v10, %v320_v16  ;;  %v337_v21 = vadd.f32 %v516_v10, %v336_v17 }
 0x102   : > { %v574_v23 = vpop.f32.mrf.mxu0  ;;  %v578_v24 = vpop.f32.mrf.mxu1 }
 0x103   : > { %v366_v25 = vmul.f32 %v530_v15, %v353_v18  ;;  %v370_v26 = vmul.f32 %v530_v15, %v357_v19  ;;  %v351_v27 = vmax.f32 %v321_v20, 0.0  ;;  %v355_v28 = vmax.f32 %v337_v21, 0.0 }
 0x104   : > { %v332_v29 = vadd.f32 %v574_v23, %v516_v10  ;;  %v348_v30 = vadd.f32 %v578_v24, %v516_v10  ;;  %v323_v31 = vpop.f32.mrf.mxu0  ;;  %v339_v32 = vpop.f32.mrf.mxu1 }
 0x105   : > { %v379_v33 = vadd.f32 %v531_v22, %v366_v25  ;;  %v383_v34 = vadd.f32 %v531_v22, %v370_v26  ;;  %v364_v35 = vmul.f32 %v530_v15, %v351_v27  ;;  %v368_v36 = vmul.f32 %v530_v15, %v355_v28 }
 0x106   : > { %v354_v37 = vmax.f32 %v332_v29, 0.0  ;;  %v358_v38 = vmax.f32 %v348_v30, 0.0  ;;  %v324_v39 = vadd.f32 %v516_v10, %v323_v31  ;;  %v340_v40 = vadd.f32 %v516_v10, %v339_v32 }
 0x107   : > { %v546_v41 = vpack.c.bf16 %v379_v33, %v379_v33  ;;  %v550_v42 = vpack.c.bf16 %v383_v34, %v383_v34  ;;  %v377_v43 = vadd.f32 %v531_v22, %v364_v35  ;;  %v381_v44 = vadd.f32 %v531_v22, %v368_v36 }
 0x108   : > { %v367_v45 = vmul.f32 %v530_v15, %v354_v37  ;;  %v371_v46 = vmul.f32 %v530_v15, %v358_v38  ;;  %v352_v47 = vmax.f32 %v324_v39, 0.0  ;;  %v356_v48 = vmax.f32 %v340_v40, 0.0 }
 0x109   : > { %420 = vst.msk [vmem:[%s793_s7 + $0x8] sm:$0xf] %vm417_vm2, %v546_v41  ;;  %424 = vst.msk [vmem:[%s793_s7 + $0x18] sm:$0xf] %vm417_vm2, %v550_v42  ;;  %v544_v49 = vpack.c.bf16 %v377_v43, %v377_v43  ;;  %v548_v50 = vpack.c.bf16 %v381_v44, %v381_v44 }
 0x10a   : > { %v380_v51 = vadd.f32 %v531_v22, %v367_v45  ;;  %v384_v52 = vadd.f32 %v531_v22, %v371_v46  ;;  %v365_v53 = vmul.f32 %v530_v15, %v352_v47  ;;  %v369_v54 = vmul.f32 %v530_v15, %v356_v48 }
 0x10b   : > { %418 = vst.msk [vmem:[%s793_s7] sm:$0xf] %vm417_vm2, %v544_v49  ;;  %422 = vst.msk [vmem:[%s793_s7 + $0x10] sm:$0xf] %vm417_vm2, %v548_v50 }
 0x10c   : > { %v547_v55 = vpack.c.bf16 %v380_v51, %v380_v51  ;;  %v551_v56 = vpack.c.bf16 %v384_v52, %v384_v52  ;;  %v378_v57 = vadd.f32 %v531_v22, %v365_v53  ;;  %v382_v58 = vadd.f32 %v531_v22, %v369_v54 }
 0x10e   : > { %421 = vst.msk [vmem:[%s793_s7 + $0xc] sm:$0xf] %vm417_vm2, %v547_v55  ;;  %425 = vst.msk [vmem:[%s793_s7 + $0x1c] sm:$0xf] %vm417_vm2, %v551_v56  ;;  %v545_v59 = vpack.c.bf16 %v378_v57, %v378_v57  ;;  %v549_v60 = vpack.c.bf16 %v382_v58, %v382_v58 }
 0x110   : > { %419 = vst.msk [vmem:[%s793_s7 + $0x4] sm:$0xf] %vm417_vm2, %v545_v59  ;;  %423 = vst.msk [vmem:[%s793_s7 + $0x14] sm:$0xf] %vm417_vm2, %v549_v60 }
 0x111 PF: > { %s15_s12 = sadd.s32 1, %s697_s12  }
 0x112   : > { %p12_p2 = scmp.ge.s32.totalorder %s15_s12, 4  }
 0x114   :  { %14 = sbr.rel (!%p12_p2) target bundleno = 2 (0x2), region = 71 }
 0x119   :  { %447 = vsyncpa [#allocation3], 1 }
 0x11a   :  { %449 = vsyncpa [#allocation3 + $0x1], 1 }
 0x11b   :  { %450 = vsyncpa [#allocation5], 1 }

// kernel: _lambda_.7
= control target key start
LH: loop header
LB: loop body
LE: loop exit
PB: predicated region body
PF: predicated region fallthrough
CT: control target
= control target key end

     0   :  { %11 = vsyncpa [#allocation4], 0  ;;  %s2102_s0 = inlined_call_operand.vmem [shape: bf16[2,30,64], index: 0, kind: input, shape index: {}]   ;;  %s2103_s1 = inlined_call_operand.vmem [shape: bf16[2,30,64], index: 1, kind: input, shape index: {}]   ;;  %s2104_s2 = inlined_call_operand.vmem [shape: bf16[2,30,64], index: 2, kind: input, shape index: {}]   ;;  %s2105_s3 = inlined_call_operand.vmem [shape: bf16[2,30,64], index: 3, kind: input, shape index: {}]   ;;  %s2106_s4 = inlined_call_operand.hbm [shape: bf16[576,128], index: 4, kind: input, shape index: {}]   ;;  %s2107_s5 = inlined_call_operand.hbm [shape: f32[8,128], index: 5, kind: input, shape index: {}]   ;;  %s2108_s6 = inlined_call_operand.vmem [shape: bf16[2,16,128], index: 6, kind: output, shape index: {}]  }
   0x1   :  { %12 = vsyncpa [#allocation6], 0  ;;  %s1957_s21 = smov 0  }
   0x2 LB: > { %s1963_s22 = sadd.s32 4294967295, %s1916_s21   ;;  %p1497_p0 = scmp.ge.s32.totalorder %s1916_s21, 1  ;;  %s1916_s21 = sphi %s1957_s21, %s18_s21  }
   0x3   : > { %p195_p1 = scmp.lt.s32.totalorder %s1916_s21, 3  ;;  %s1918_s23 = smov [#allocation3]  }
   0x4   : > { %s207_s24 = sshll.u32 %s1918_s23, 4  ;;  %p1783_p3 = scmp.eq.s32.totalorder %s1963_s22, 0  ;;  %s208_s24 = int_to_ptr.vmem [resolvable:$true] %s207_s24 }
   0x5   : > { %p1967_p2 = pnand %p1497_p0, %p195_p1  ;;  %s1919_s26 = smov [#allocation5]  }
   0x6   : > { %s221_s27 = sshll.u32 %s1919_s26, 4  ;;  %s1861_s29 = scalar_lea.vmem %s208_s24, 4608  ;;  %s222_s27 = int_to_ptr.vmem [resolvable:$true] %s221_s27 }
   0x7   : > { %p1776_p4 = pneg %p1967_p2  ;;  %p1862_p7 = scmp.ne.s32.totalorder %s208_s24, %s1861_s29 }
   0x8   : > { %p1869_p10 = scmp.lt.s32.totalorder %s208_s24, %s208_s24  ;;  %p1870_p11 = scmp.lt.s32.totalorder %s1861_s29, %s1861_s29 }
   0x9   : > { %p1976_p5 = pnand %p1783_p3, %p1776_p4 }
   0xa   : > { %p1871_p12 = por %p1870_p11, %p1869_p10 }
   0xb   : > { %p1852_p6 = pneg %p1976_p5 }
   0xd   : > { %p1864_p8 = pnand %p1862_p7, %p1852_p6 }
   0xf   : > { %p1865_p9 = pneg %p1864_p8 }
  0x11   : > { %p1872_p13 = pnand %p1871_p12, %p1865_p9 }
  0x13   : > { %1875 = shalt.err (!%p1872_p13)
}
  0x14   : > { %s1920_s30 = smov 64   ;;  %s1921_s7 = smov 4  }
  0x15   : > { %1779 = dma.hbm_to_vmem [thread:$0]  (!%p1976_p5), %s2106_s4, 4608, %s208_s24, [#allocation4], %s1920_s30, %s1920_s30, %s1921_s7  }
  0x16   : > { %s1887_s10 = scalar_lea.vmem %s222_s27, 128  ;;  %p1895_p7 = scmp.lt.s32.totalorder %s222_s27, %s222_s27 }
  0x17   : > { %p1888_p0 = scmp.ne.s32.totalorder %s222_s27, %s1887_s10  ;;  %p1896_p8 = scmp.lt.s32.totalorder %s1887_s10, %s1887_s10 }
  0x19   : > { %p1890_p1 = pnand %p1888_p0, %p1852_p6  ;;  %p1897_p10 = por %p1896_p8, %p1895_p7 }
  0x1b   : > { %p1891_p4 = pneg %p1890_p1 }
  0x1d   : > { %p1898_p9 = pnand %p1897_p10, %p1891_p4 }
  0x1f   : > { %1901 = shalt.err (!%p1898_p9)
}
  0x20   : > { %1782 = dma.hbm_to_vmem [thread:$0]  (!%p1976_p5), %s2107_s5, 128, %s222_s27, [#allocation6]  }
  0x21   : > { %266 = sbr.rel (%p1967_p2) target bundleno = 351 (0x15f), region = 44 }
  0x26   : > { %1907 = dma.done.wait (%p1783_p3), [#allocation4], 4608  }
  0x27   : > { %1909 = vsyncadd (%p1783_p3), [#allocation4], 4294962688 }
  0x28   : > { %1911 = dma.done.wait (%p1783_p3), [#allocation6], 128  }
  0x29   : > { %1913 = vsyncadd (%p1783_p3), [#allocation6], 4294967168  ;;  %p315_p6 = scmp.lt.s32.totalorder %s1963_s22, 1  ;;  %v1799_v0 = vld [vmem:[#allocation3 + $0x38] sm:$0xff]   ;;  %v1801_v2 = vld [vmem:[#allocation3 + $0x30] sm:$0xff]   ;;  %vm395_vm0 = vcmask 523264  }
  0x2a   : > { %v1800_v1 = vld [vmem:[#allocation3 + $0x18] sm:$0xff]   ;;  %1660 = vmatprep.subr.bf16.mxu0 %v1799_v0  ;;  %v1802_v3 = vld [vmem:[#allocation3 + $0x10] sm:$0xff]   ;;  %v1803_v4 = vld [vmem:[#allocation3 + $0x28] sm:$0xff]   ;;  %vm548_vm1 = vsmask.f32 7424  ;;  %vm1204_vm3 = vcmask 1044480  }
  0x2b   : > { %s2112_s22 = smov (!%p315_p6, %s1963_s22), 1  ;;  %1672 = vmatprep.subr.bf16.mxu1 %v1800_v1  ;;  %1661 = vmatpush3.bf16.msra.mxu0 %v1799_v0  ;;  %v1804_v5 = vld [vmem:[#allocation3 + $0x8] sm:$0xff]   ;;  %v1805_v6 = vld [vmem:[#allocation3 + $0x20] sm:$0xff]   ;;  %v1811_v11 = vld [vmem:[#allocation3 + $0x58] sm:$0xff]   ;;  %vm973_vm2 = vsmask.f32 5376 }
  0x2c   : > { %s2013_s13 = sshll.u32 %s2112_s22, 4  ;;  %1673 = vmatpush3.bf16.msra.mxu1 %v1800_v1  ;;  %1662 = vmatprep.subr.bf16.mxu0 %v1801_v2  ;;  %v1806_v7 = vld [vmem:[#allocation3] sm:$0xff]   ;;  %v1812_v14 = vld [vmem:[#allocation3 + $0x78] sm:$0xff]   ;;  %v1813_v15 = vld [vmem:[#allocation3 + $0x50] sm:$0xff]   ;;  %s1597_s28 = sshll.u32 %s2112_s22, 3 }
  0x2d   : > { %1674 = vmatprep.subr.bf16.mxu1 %v1802_v3  ;;  %s2019_s16 = scalar_lea.vmem %s2103_s1, %s2013_s13  ;;  %s2025_s19 = scalar_lea.vmem %s2102_s0, %s2013_s13  ;;  %v1814_v16 = vld [vmem:[#allocation3 + $0x70] sm:$0xff]   ;;  %v1815_v19 = vld [vmem:[#allocation3 + $0x48] sm:$0xff]   ;;  %v1817_v25 = vld [vmem:[#allocation3 + $0x40] sm:$0xff]   ;;  %vm1336_vm4 = vsmask.f32 3328 }
  0x2e   : > { %v1807_v8 = vld [vmem:[%s2019_s16] sm:$0xff]   ;;  %v1809_v10 = vld [vmem:[%s2019_s16 + $0x8] ss:$0 sps:$4 sm:$0x33]   ;;  %s2039_s24 = scalar_lea.vmem %s2104_s2, %s2013_s13  ;;  %v1816_v20 = vld [vmem:[#allocation3 + $0x68] sm:$0xff]   ;;  %s2051_s27 = scalar_lea.vmem %s2105_s3, %s2013_s13 }
  0x2f   : > { %1663 = vmatpush3.bf16.msra.mxu0 %v1801_v2  ;;  %v1808_v9 = vld [vmem:[%s2025_s19] sm:$0xff]   ;;  %1668 = vmatprep.mubr.msk.bf16.mxu0 %vm395_vm0, %v1807_v8  ;;  %v1810_v13 = vld [vmem:[%s2025_s19 + $0x8] ss:$0 sps:$4 sm:$0x33]   ;;  %v1818_v26 = vld [vmem:[#allocation3 + $0x60] sm:$0xff]   ;;  %s2090_s7 = scalar_lea.vmem %s2108_s6, %s1597_s28 }
  0x30   : > { %1675 = vmatpush3.bf16.msra.mxu1 %v1802_v3  ;;  %1664 = vmatprep.subr.bf16.mxu0 %v1803_v4  ;;  %v551_v12 = vshll.u32 %v1808_v9, 16  ;;  %v549_v17 = vshrl.u32 %v1808_v9, 16  ;;  %v1819_v21 = vld [vmem:[%s2025_s19 + $0x8] ss:$0 sps:$4 sm:$0x77]   ;;  %v1821_v24 = vld [vmem:[%s2039_s24] sm:$0xff]  }
  0x31   : > { %1676 = vmatprep.subr.bf16.mxu1 %v1804_v5  ;;  %1680 = vmatprep.mubr.msk.bf16.mxu1 %vm395_vm0, %v1808_v9  ;;  %v556_v23 = vshll.u32 %v1819_v21, 16  ;;  %v560_v29 = vshrl.u32 %v1819_v21, 16  ;;  %v858_v30 = vshll.u32 %v1821_v24, 16  ;;  %v1820_v31 = vld [vmem:[#allocation3 + $0x98] sm:$0xff]   ;;  %v1824_v35 = vld [vmem:[#allocation3 + $0x90] sm:$0xff]   ;;  %v856_v37 = vshrl.u32 %v1821_v24, 16 }
  0x32   : > { %v553_v18 = vrot.slane %v551_v12, 1  ;;  %v1822_v32 = vld [vmem:[%s2039_s24 + $0x8] ss:$0 sps:$4 sm:$0x33]   ;;  %v1825_v36 = vld [vmem:[#allocation3 + $0xb0] sm:$0xff]   ;;  %v1826_v41 = vld [vmem:[#allocation3 + $0x88] sm:$0xff]  }
  0x33   : > { %1665 = vmatpush3.bf16.msra.mxu0 %v1803_v4  ;;  %v558_v27 = vrot.slane %v556_v23, 1  ;;  %v1823_v33 = vld [vmem:[#allocation3 + $0xb8] sm:$0xff]   ;;  %v860_v38 = vrot.slane %v858_v30, 1  ;;  %v1827_v44 = vld [vmem:[#allocation3 + $0xa8] sm:$0xff]   ;;  %v1828_v46 = vld [vmem:[#allocation3 + $0x80] sm:$0xff]  }
  0x34   : > { %1677 = vmatpush3.bf16.msra.mxu1 %v1804_v5  ;;  %1666 = vmatprep.subr.bf16.mxu0 %v1805_v6  ;;  %v554_v22 = vor.u32 %v553_v18, %v549_v17  ;;  %v1830_v39 = vld [vmem:[%s2051_s27] sm:$0xff]   ;;  %v1833_v40 = vld [vmem:[%s2039_s24 + $0x8] ss:$0 sps:$4 sm:$0x77]   ;;  %v1829_v48 = vld [vmem:[#allocation3 + $0xa0] sm:$0xff]  }
  0x35   : > { %1678 = vmatprep.subr.bf16.mxu1 %v1806_v7  ;;  %v562_v34 = vor.u32 %v560_v29, %v558_v27  ;;  %v861_v42 = vor.u32 %v860_v38, %v856_v37  ;;  %v863_v43 = vshll.u32 %v1833_v40, 16  ;;  %v951_v49 = vld [vmem:[%s2025_s19] sm:$0xc]  ;;  %v2061_v50 = vld [vmem:[%s2025_s19 + $0x4] sm:$0xf]  ;;  %v867_v54 = vshrl.u32 %v1833_v40, 16 }
  0x36   : > { %v559_v28 = vsel %vm548_vm1, %v554_v22, %v558_v27  ;;  %v1560_v51 = vcombine.low %v951_v49, %v2061_v50  ;;  %v2066_v52 = vld [vmem:[%s2025_s19 + $0x8] sm:$0x1f]   ;;  %v1844_v1 = vld [vmem:[%s2019_s16] sm:$0xfc]   ;;  %v1837_v18 = vld [vmem:[#allocation3 + $0xc8] sm:$0xff]  }
  0x37   : > { %1667 = vmatpush3.bf16.msra.mxu0 %v1805_v6  ;;  %v865_v45 = vrot.slane %v863_v43, 1  ;;  %v1832_v53 = vld [vmem:[#allocation3 + $0xd8] sm:$0xff]   ;;  %v983_v58 = vshrl.u32 %v2066_v52, 16  ;;  %v986_v59 = vshll.u32 %v2066_v52, 16  ;;  %v1835_v4 = vld [vmem:[#allocation3 + $0xd0] sm:$0xff]   ;;  %v1098_v8 = vshll.u32 %v1844_v1, 16 }
  0x38   : > { %1679 = vmatpush3.bf16.msra.mxu1 %v1806_v7  ;;  %1684 = vmatprep.subr.bf16.mxu0 %v1811_v11  ;;  %v1834_v55 = vld [vmem:[#allocation3 + $0xf8] sm:$0xff]   ;;  %v975_v56 = vshrl.u32 %v1560_v51, 16  ;;  %v978_v57 = vshll.u32 %v1560_v51, 16  ;;  %v1095_v7 = vshrl.u32 %v1844_v1, 16  ;;  %v1192_v22 = vld [vmem:[%s2025_s19] sm:$0x8] }
  0x39   : > { %1696 = vmatprep.subr.bf16.mxu1 %v1812_v14  ;;  %v866_v47 = vsel %vm548_vm1, %v861_v42, %v865_v45  ;;  %v1831_v60 = vld [vmem:[%s2051_s27 + $0x8] ss:$0 sps:$4 sm:$0x33]   ;;  %v985_v63 = vrot.slane %v983_v58, 2  ;;  %v988_v0 = vrot.slane %v986_v59, 3  ;;  %v869_v2 = vor.u32 %v867_v54, %v865_v45  ;;  %v1839_v23 = vld [vmem:[#allocation3 + $0xc0] sm:$0xff]  }
  0x3a   : > { %1669 = vmatmul.mubr.msk.bf16.vlgmr.msra.gmra.mxu0 %vm395_vm0, %v1809_v10  ;;  %v977_v61 = vrot.slane %v975_v56, 2  ;;  %v980_v62 = vrot.slane %v978_v57, 3  ;;  %v1845_v3 = vld [vmem:[%s2019_s16 + $0x8] sm:$0x1f]   ;;  %v1097_v12 = vrot.slane %v1095_v7, 2  ;;  %v1846_v29 = vld [vmem:[#allocation3 + $0x110] sm:$0xff]  }
  0x3b   : > { %1681 = vmatmul.mubr.msk.bf16.vlgmr.msra.gmra.mxu1 %vm395_vm0, %v1810_v13  ;;  %1685 = vmatpush3.bf16.msra.mxu0 %v1811_v11  ;;  %v989_v6 = vor.u32 %v988_v0, %v985_v63  ;;  %v1103_v9 = vshrl.u32 %v1845_v3, 16  ;;  %v1106_v10 = vshll.u32 %v1845_v3, 16  ;;  %v1836_v11 = vld [vmem:[#allocation3 + $0xf0] sm:$0xff]   ;;  %v1100_v13 = vrot.slane %v1098_v8, 3 }
  0x3c   : > { %1697 = vmatpush3.bf16.msra.mxu1 %v1812_v14  ;;  %1686 = vmatprep.subr.bf16.mxu0 %v1813_v15  ;;  %v981_v5 = vor.u32 %v980_v62, %v977_v61  ;;  %vm1363_vm5 = vsmask.f32 2304  ;;  %vm1364_vm6 = vsmask.f32 6416  ;;  %vm1337_vm7 = vsmask.f32 7440 }
  0x3d   : > { %1698 = vmatprep.subr.bf16.mxu1 %v1814_v16  ;;  %1704 = vmatprep.mubr.msk.bf16.mxu1 %vm395_vm0, %v1821_v24  ;;  %v1101_v17 = vor.u32 %v1100_v13, %v1097_v12  ;;  %v1840_v24 = vld [vmem:[#allocation3 + $0xe0] sm:$0xff]   ;;  %vm1365_vm8 = vmor %vm1363_vm5, %vm1364_vm6 }
  0x3e   : > { %1692 = vmatprep.mubr.msk.bf16.mxu0 %vm395_vm0, %v559_v28  ;;  %v990_v14 = vsel %vm973_vm2, %v981_v5, %v989_v6  ;;  %v1206_v28 = vrot.slane %v2066_v52, 3  ;;  %vm1338_vm9 = vmor %vm1336_vm4, %vm1337_vm7 }
  0x3f   : > { %1687 = vmatpush3.bf16.msra.mxu0 %v1813_v15  ;;  %v1105_v15 = vrot.slane %v1103_v9, 2 }
  0x40   : > { %1699 = vmatpush3.bf16.msra.mxu1 %v1814_v16  ;;  %1688 = vmatprep.subr.bf16.mxu0 %v1815_v19  ;;  %v1108_v16 = vrot.slane %v1106_v10, 3 }
  0x41   : > { %1700 = vmatprep.subr.bf16.mxu1 %v1816_v20 }
  0x43   : > { %1689 = vmatpush3.bf16.msra.mxu0 %v1815_v19  ;;  %v1109_v19 = vor.u32 %v1108_v16, %v1105_v15 }
  0x44   : > { %1701 = vmatpush3.bf16.msra.mxu1 %v1816_v20  ;;  %1690 = vmatprep.subr.bf16.mxu0 %v1817_v25  ;;  %v1838_v20 = vld [vmem:[#allocation3 + $0xe8] sm:$0xff]  }
  0x45   : > { %1702 = vmatprep.subr.bf16.mxu1 %v1818_v26  ;;  %v1110_v21 = vsel %vm973_vm2, %v1101_v17, %v1109_v19 }
  0x47   : > { %1691 = vmatpush3.bf16.msra.mxu0 %v1817_v25  ;;  %v1576_v25 = vcombine.low %v1192_v22, %v2061_v50 }
  0x48   : > { %1703 = vmatpush3.bf16.msra.mxu1 %v1818_v26  ;;  %1708 = vmatprep.subr.bf16.mxu0 %v1820_v31  ;;  %v1843_v26 = vld [vmem:[#allocation3 + $0x118] sm:$0xff]  }
  0x49   : > { %1720 = vmatprep.subr.bf16.mxu1 %v1823_v33  ;;  %v1205_v27 = vrot.slane %v1576_v25, 3 }
  0x4a   : > { %1693 = vmatmul.mubr.msk.bf16.vlgmr.msra.gmra.mxu0 %vm395_vm0, %v562_v34 }
  0x4b   : > { %1709 = vmatpush3.bf16.msra.mxu0 %v1820_v31  ;;  %1705 = vmatmul.mubr.msk.bf16.vlgmr.msra.gmra.mxu1 %vm395_vm0, %v1822_v32  ;;  %v1207_v30 = vsel %vm1204_vm3, %v1205_v27, %v1206_v28  ;;  %v1847_v31 = vld [vmem:[#allocation3 + $0x108] sm:$0xff]   ;;  %v1848_v32 = vld [vmem:[#allocation3 + $0x100] sm:$0xff]  }
  0x4c   : > { %1721 = vmatpush3.bf16.msra.mxu1 %v1823_v33  ;;  %1710 = vmatprep.subr.bf16.mxu0 %v1824_v35  ;;  %v1584_v27 = vld [vmem:[#allocation5 + $0x1] ss:$0 sm:$0xff] }
  0x4d   : > { %1722 = vmatprep.subr.bf16.mxu1 %v1825_v36  ;;  %1716 = vmatprep.mubr.msk.bf16.mxu0 %vm395_vm0, %v1830_v39 }
  0x4e   : > { %1728 = vmatprep.mubr.msk.bf16.mxu1 %vm395_vm0, %v866_v47 }
  0x4f   : > { %1711 = vmatpush3.bf16.msra.mxu0 %v1824_v35 }
  0x50   : > { %1723 = vmatpush3.bf16.msra.mxu1 %v1825_v36  ;;  %1712 = vmatprep.subr.bf16.mxu0 %v1826_v41 }
  0x51   : > { %1724 = vmatprep.subr.bf16.mxu1 %v1827_v44 }
  0x53   : > { %1713 = vmatpush3.bf16.msra.mxu0 %v1826_v41 }
  0x54   : > { %1725 = vmatpush3.bf16.msra.mxu1 %v1827_v44  ;;  %1714 = vmatprep.subr.bf16.mxu0 %v1828_v46 }
  0x55   : > { %1726 = vmatprep.subr.bf16.mxu1 %v1829_v48 }
  0x57   : > { %1715 = vmatpush3.bf16.msra.mxu0 %v1828_v46 }
  0x58   : > { %1727 = vmatpush3.bf16.msra.mxu1 %v1829_v48  ;;  %1732 = vmatprep.subr.bf16.mxu0 %v1832_v53 }
  0x59   : > { %1744 = vmatprep.subr.bf16.mxu1 %v1834_v55 }
  0x5a   : > { %1717 = vmatmul.mubr.msk.bf16.vlgmr.msra.gmra.mxu0 %vm395_vm0, %v1831_v60 }
  0x5b   : > { %1733 = vmatpush3.bf16.msra.mxu0 %v1832_v53  ;;  %1729 = vmatmul.mubr.msk.bf16.vlgmr.msra.gmra.mxu1 %vm395_vm0, %v869_v2 }
  0x5c   : > { %1745 = vmatpush3.bf16.msra.mxu1 %v1834_v55  ;;  %1734 = vmatprep.subr.bf16.mxu0 %v1835_v4 }
  0x5d   : > { %1746 = vmatprep.subr.bf16.mxu1 %v1836_v11  ;;  %1740 = vmatprep.mubr.msk.bf16.mxu0 %vm395_vm0, %v990_v14 }
  0x5e   : > { %1752 = vmatprep.mubr.msk.bf16.mxu1 %vm395_vm0, %v1110_v21 }
  0x5f   : > { %1735 = vmatpush3.bf16.msra.mxu0 %v1835_v4 }
  0x60   : > { %1747 = vmatpush3.bf16.msra.mxu1 %v1836_v11  ;;  %1736 = vmatprep.subr.bf16.mxu0 %v1837_v18 }
  0x61   : > { %1748 = vmatprep.subr.bf16.mxu1 %v1838_v20 }
  0x63   : > { %1737 = vmatpush3.bf16.msra.mxu0 %v1837_v18 }
  0x64   : > { %1749 = vmatpush3.bf16.msra.mxu1 %v1838_v20  ;;  %1738 = vmatprep.subr.bf16.mxu0 %v1839_v23 }
  0x65   : > { %1750 = vmatprep.subr.bf16.mxu1 %v1840_v24 }
  0x67   : > { %1739 = vmatpush3.bf16.msra.mxu0 %v1839_v23 }
  0x68   : > { %1751 = vmatpush3.bf16.msra.mxu1 %v1840_v24  ;;  %1756 = vmatprep.subr.bf16.mxu0 %v1843_v26 }
  0x6a   : > { %1741 = vmatmul.mubr.msk.bf16.vlgmr.msra.gmra.mxu0 %vm395_vm0, %v989_v6 }
  0x6b   : > { %1757 = vmatpush3.bf16.msra.mxu0 %v1843_v26  ;;  %1753 = vmatmul.mubr.msk.bf16.vlgmr.msra.gmra.mxu1 %vm395_vm0, %v1109_v19  ;;  %v1583_v19 = vld [vmem:[#allocation5] ss:$0 sm:$0xff] }
  0x6c   : > { %1758 = vmatprep.subr.bf16.mxu0 %v1846_v29  ;;  %1764 = vmatprep.mubr.msk.bf16.mxu0 %vm395_vm0, %v1207_v30 }
  0x6f   : > { %1759 = vmatpush3.bf16.msra.mxu0 %v1846_v29 }
  0x70   : > { %1760 = vmatprep.subr.bf16.mxu0 %v1847_v31 }
  0x73   : > { %1761 = vmatpush3.bf16.msra.mxu0 %v1847_v31 }
  0x74   : > { %1762 = vmatprep.subr.bf16.mxu0 %v1848_v32 }
  0x77   : > { %1763 = vmatpush3.bf16.msra.mxu0 %v1848_v32  ;;  %v1585_v32 = vld [vmem:[#allocation5 + $0x2] ss:$0 sm:$0xff] }
  0x7a   : > { %1765 = vmatmul.mubr.msk.bf16.vlgmr.msra.gmra.mxu0 %vm395_vm0, %v1206_v28 }
  0xfa   : > { %v1670_v33 = vpop.f32.mrf.mxu0 }
  0xfb   : > { %v1682_v34 = vpop.f32.mrf.mxu1 }
  0xfc   : > { %v436_v35 = vpop.f32.mrf.mxu0  ;;  %v531_v55 = vadd.f32 %v1682_v34, %v1670_v33 }
  0xfd   : > { %v522_v36 = vpop.f32.mrf.mxu1 }
  0xfe   : > { %v1671_v37 = vpop.f32.mrf.mxu0  ;;  %v523_v57 = vadd.f32 %v522_v36, %v436_v35 }
  0xff   : > { %v1683_v38 = vpop.f32.mrf.mxu1 }
 0x100   : > { %v439_v39 = vpop.f32.mrf.mxu0 }
 0x101   : > { %v525_v40 = vpop.f32.mrf.mxu1 }
 0x102   : > { %v526_v0 = vadd.f32 %v525_v40, %v439_v39 }
 0x10a   : > { %v1694_v41 = vpop.f32.mrf.mxu0 }
 0x10b   : > { %v1706_v42 = vpop.f32.mrf.mxu1  ;;  %v643_v58 = vadd.f32 %v1694_v41, %v531_v55 }
 0x10c   : > { %v627_v43 = vpop.f32.mrf.mxu0 }
 0x10d   : > { %v727_v44 = vpop.f32.mrf.mxu1  ;;  %v641_v61 = vadd.f32 %v627_v43, %v523_v57  ;;  %v743_v1 = vadd.f32 %v1706_v42, %v643_v58 }
 0x10e   : > { %v1695_v45 = vpop.f32.mrf.mxu0 }
 0x10f   : > { %v1707_v46 = vpop.f32.mrf.mxu1  ;;  %v741_v4 = vadd.f32 %v727_v44, %v641_v61 }
 0x110   : > { %v630_v47 = vpop.f32.mrf.mxu0 }
 0x111   : > { %v730_v48 = vpop.f32.mrf.mxu1  ;;  %v642_v5 = vadd.f32 %v630_v47, %v526_v0 }
 0x113   : > { %v742_v9 = vadd.f32 %v730_v48, %v642_v5 }
 0x11a   : > { %v1718_v49 = vpop.f32.mrf.mxu0 }
 0x11b   : > { %v1730_v50 = vpop.f32.mrf.mxu1  ;;  %v843_v6 = vadd.f32 %v1718_v49, %v743_v1 }
 0x11c   : > { %v827_v51 = vpop.f32.mrf.mxu0 }
 0x11d   : > { %v934_v52 = vpop.f32.mrf.mxu1  ;;  %v841_v8 = vadd.f32 %v827_v51, %v741_v4  ;;  %v950_v10 = vadd.f32 %v1730_v50, %v843_v6 }
 0x11e   : > { %v1719_v53 = vpop.f32.mrf.mxu0 }
 0x11f   : > { %v1731_v54 = vpop.f32.mrf.mxu1  ;;  %v948_v11 = vadd.f32 %v934_v52, %v841_v8 }
 0x120   : > { %v830_v56 = vpop.f32.mrf.mxu0 }
 0x121   : > { %v937_v59 = vpop.f32.mrf.mxu1  ;;  %v842_v12 = vadd.f32 %v830_v56, %v742_v9 }
 0x123   : > { %v949_v16 = vadd.f32 %v937_v59, %v842_v12 }
 0x12a   : > { %v1742_v60 = vpop.f32.mrf.mxu0 }
 0x12b   : > { %v1754_v62 = vpop.f32.mrf.mxu1  ;;  %v1071_v13 = vadd.f32 %v1742_v60, %v950_v10 }
 0x12c   : > { %v1055_v63 = vpop.f32.mrf.mxu0 }
 0x12d   : > { %v1175_v2 = vpop.f32.mrf.mxu1  ;;  %v1069_v14 = vadd.f32 %v1055_v63, %v948_v11  ;;  %v1191_v17 = vadd.f32 %v1754_v62, %v1071_v13 }
 0x12e   : > { %v1743_v3 = vpop.f32.mrf.mxu0 }
 0x12f   : > { %v1755_v7 = vpop.f32.mrf.mxu1  ;;  %v1189_v20 = vadd.f32 %v1175_v2, %v1069_v14 }
 0x130   : > { %v1058_v15 = vpop.f32.mrf.mxu0 }
 0x131   : > { %v1070_v21 = vadd.f32 %v1058_v15, %v949_v16  ;;  %v1178_v23 = vpop.f32.mrf.mxu1 }
 0x133   : > { %v1190_v29 = vadd.f32 %v1178_v23, %v1070_v21 }
 0x13a   : > { %v1766_v18 = vpop.f32.mrf.mxu0 }
 0x13b   : > { %v1288_v22 = vadd.f32 %v1766_v18, %v1191_v17 }
 0x13c   : > { %v1272_v24 = vpop.f32.mrf.mxu0 }
 0x13d   : > { %v1296_v25 = vadd.f32 %v1583_v19, %v1288_v22  ;;  %v1286_v26 = vadd.f32 %v1272_v24, %v1189_v20 }
 0x13e   : > { %v1767_v28 = vpop.f32.mrf.mxu0 }
 0x13f   : > { %v1299_v30 = vmax.f32 %v1296_v25, 0.0  ;;  %v1294_v31 = vadd.f32 %v1583_v19, %v1286_v26 }
 0x140   : > { %v1275_v33 = vpop.f32.mrf.mxu0 }
 0x141   : > { %v1307_v34 = vmul.f32 %v1584_v27, %v1299_v30  ;;  %v1297_v35 = vmax.f32 %v1294_v31, 0.0  ;;  %v1287_v36 = vadd.f32 %v1275_v33, %v1190_v29 }
 0x143   : > { %v1315_v37 = vadd.f32 %v1585_v32, %v1307_v34  ;;  %v1295_v38 = vadd.f32 %v1583_v19, %v1287_v36  ;;  %v1305_v40 = vmul.f32 %v1584_v27, %v1297_v35 }
 0x145   : > { %v1600_v39 = vpack.c.bf16 %v1315_v37, %v1315_v37  ;;  %v1298_v41 = vmax.f32 %v1295_v38, 0.0  ;;  %v1313_v43 = vadd.f32 %v1585_v32, %v1305_v40 }
 0x147   : > { %1331 = vst [vmem:[#allocation2 + $0x8] sm:$0x3] %v1600_v39  ;;  %v1306_v42 = vmul.f32 %v1584_v27, %v1298_v41 }
 0x149   : > { %v1314_v44 = vadd.f32 %v1585_v32, %v1306_v42 }
 0x14b   : > { %v1604_v45 = vpack.c.bf16 %v1314_v44, %v1313_v43 }
 0x14d   : > { %1605 = vst [vmem:[#allocation2] sm:$0xff] %v1604_v45  }
 0x14e   : > { %v1362_v46 = vld [vmem:[#allocation2 + $0x8] sm:$0x3] }
 0x14f   : > { %v1372_v47 = vshrl.u32 %v1362_v46, 16  ;;  %v1375_v48 = vshll.u32 %v1362_v46, 16 }
 0x151   : > { %v1374_v52 = vrot.slane %v1372_v47, 5  ;;  %v1377_v53 = vrot.slane %v1375_v48, 6 }
 0x153   : > { %v1378_v63 = vor.u32 %v1377_v53, %v1374_v52 }
 0x154   : > { %v1332_v49 = vld [vmem:[#allocation2] sm:$0x3]  ;;  %v1334_v50 = vld [vmem:[#allocation2] sm:$0xc]  ;;  %v1335_v51 = vld [vmem:[#allocation2 + $0x4] sm:$0x1] }
 0x155   : > { %1333 = vst [vmem:[%s2090_s7] sm:$0x3] %v1332_v49  ;;  %v1340_v54 = vshrl.u32 %v1334_v50, 16  ;;  %v1343_v55 = vshll.u32 %v1334_v50, 16  ;;  %v1355_v56 = vld [vmem:[#allocation2 + $0x4] sm:$0x6]  ;;  %v1349_v61 = vshll.u32 %v1335_v51, 16 }
 0x156   : > { %v1589_v57 = vrot.slane %v1355_v56, 9  ;;  %v1361_v58 = vld [vmem:[#allocation2 + $0x4] sm:$0x8] }
 0x157   : > { %v1342_v59 = vrot.slane %v1340_v54, 4  ;;  %v1345_v60 = vrot.slane %v1343_v55, 5  ;;  %v1367_v62 = vshrl.u32 %v1361_v58, 16  ;;  %v1351_v3 = vrot.slane %v1349_v61, 5 }
 0x158   : > { %1360 = vst [vmem:[%s2090_s7 + $0x4] sm:$0x3] %v1589_v57 }
 0x159   : > { %v1346_v0 = vor.u32 %v1345_v60, %v1342_v59  ;;  %v1590_v1 = vrot.slane %v1367_v62, 9 }
 0x15b   : > { %v1347_v2 = vrot.slane %v1346_v0, 4  ;;  %v1379_v4 = vsel %vm1365_vm8, %v1590_v1, %v1378_v63 }
 0x15c   : > { %1381 = vst [vmem:[%s2090_s7 + $0x4] sm:$0xc] %v1379_v4 }
 0x15d   : > { %v1352_v5 = vsel %vm1338_vm9, %v1347_v2, %v1351_v3 }
 0x15e   : > { %1354 = vst [vmem:[%s2090_s7] sm:$0xc] %v1352_v5 }
 0x15f PF: > { %s18_s21 = sadd.s32 1, %s1916_s21  }
 0x160   : > { %p15_p2 = scmp.ge.s32.totalorder %s18_s21, 4  }
 0x162   :  { %17 = sbr.rel (!%p15_p2) target bundleno = 2 (0x2), region = 92 }
 0x167   :  { %1403 = vsyncpa [#allocation4], 1 }
 0x168   :  { %1405 = vsyncpa [#allocation4 + $0x1], 1 }
 0x169   :  { %1406 = vsyncpa [#allocation6], 1 }

// kernel: _lambda_.8
= control target key start
LH: loop header
LB: loop body
LE: loop exit
PB: predicated region body
PF: predicated region fallthrough
CT: control target
= control target key end

     0   :  { %s1969_s12 = smov 0   ;;  %s2283_s0 = inlined_call_operand.vmem [shape: bf16[2,42,128], index: 0, kind: input, shape index: {}]   ;;  %s2284_s1 = inlined_call_operand.vmem [shape: bf16[1152,128], index: 1, kind: input, shape index: {}]   ;;  %s2285_s2 = inlined_call_operand.vmem [shape: f32[8,128], index: 2, kind: input, shape index: {}]   ;;  %s2286_s3 = inlined_call_operand.vmem [shape: bf16[2,16,128], index: 3, kind: output, shape index: {}]  }
   0x1 LB: > { %s1465_s13 = sadd.s32 4294967295, %s1947_s12   ;;  %p1469_p0 = scmp.ge.s32.totalorder %s1947_s12, 1  ;;  %s1947_s12 = sphi %s1969_s12, %s13_s12  }
   0x2   : > { %p137_p1 = scmp.lt.s32.totalorder %s1947_s12, 3 }
   0x4   : > { %p138_p2 = pnand %p1469_p0, %p137_p1 }
   0x5   : > { %p161_p3 = scmp.lt.s32.totalorder (!%p138_p2), %s1465_s13, 1 }
   0x6   : > { %141 = sbr.rel (%p138_p2) target bundleno = 395 (0x18b), region = 32 }
   0xb   : > { %v1856_v0 = vld [vmem:[%s2284_s1 + $0x78] sm:$0xff]   ;;  %v1858_v2 = vld [vmem:[%s2284_s1 + $0x70] sm:$0xff]   ;;  %v1860_v4 = vld [vmem:[%s2284_s1 + $0x68] sm:$0xff]   ;;  %s2288_s13 = smov (!%p161_p3, %s1465_s13), 1  ;;  %vm218_vm0 = vsmask.f32 7424 }
   0xc   : > { %v1857_v1 = vld [vmem:[%s2284_s1 + $0x38] sm:$0xff]   ;;  %1667 = vmatprep.subr.bf16.mxu0 %v1856_v0  ;;  %v1859_v3 = vld [vmem:[%s2284_s1 + $0x30] sm:$0xff]   ;;  %v1861_v5 = vld [vmem:[%s2284_s1 + $0x28] sm:$0xff]   ;;  %s1847_s30 = smul.u32 24, %s2288_s13  ;;  %vm451_vm1 = vcmask 1046528   ;;  %vm580_vm2 = vcmask 1044480  }
   0xd   : > { %1687 = vmatprep.subr.bf16.mxu1 %v1857_v1  ;;  %1668 = vmatpush3.bf16.msra.mxu0 %v1856_v0  ;;  %v1862_v6 = vld [vmem:[%s2284_s1 + $0x60] sm:$0xff]   ;;  %v1864_v8 = vld [vmem:[%s2284_s1 + $0x58] sm:$0xff]   ;;  %v1866_v10 = vld [vmem:[%s2284_s1 + $0x50] sm:$0xff]   ;;  %vm705_vm3 = vsmask.f32 4352  ;;  %vm973_vm4 = vcmask 1045504  }
   0xe   : > { %1688 = vmatpush3.bf16.msra.mxu1 %v1857_v1  ;;  %1669 = vmatprep.subr.bf16.mxu0 %v1858_v2  ;;  %v1863_v7 = vld [vmem:[%s2284_s1 + $0x20] sm:$0xff]   ;;  %v1865_v9 = vld [vmem:[%s2284_s1 + $0x18] sm:$0xff]   ;;  %s2013_s10 = scalar_lea.vmem %s2283_s0, %s1847_s30  ;;  %v1867_v14 = vld [vmem:[%s2284_s1 + $0x10] sm:$0xff]   ;;  %vm1098_vm5 = vsmask.f32 5376  ;;  %s1568_s20 = sshll.u32 %s2288_s13, 3 }
   0xf   : > { %1689 = vmatprep.subr.bf16.mxu1 %v1859_v3  ;;  %v172_v11 = vld [vmem:[%s2013_s10] sm:$0xf]  ;;  %v2020_v12 = vld [vmem:[%s2013_s10 + $0x4] sm:$0xf]  ;;  %v2023_v13 = vld [vmem:[%s2013_s10 + $0x8] sm:$0xf]  ;;  %s170_s23 = scalar_lea.vmem %s2286_s3, %s1568_s20 }
  0x10   : > { %v191_v15 = vld [vmem:[%s2013_s10 + $0xc] sm:$0x1]  ;;  %v1473_v16 = vcombine.low %v172_v11, %v2020_v12  ;;  %v1870_v26 = vld [vmem:[%s2284_s1 + $0x40] sm:$0xff]   ;;  %v1875_v30 = vld [vmem:[%s2284_s1 + $0xb8] sm:$0xff]   ;;  %v1483_v33 = vcombine.low %v2023_v13, %v2023_v13  ;;  %vm1390_vm6 = vcmask 1042432   ;;  %vm1391_vm7 = vcmask 1046532  }
  0x11   : > { %1670 = vmatpush3.bf16.msra.mxu0 %v1858_v2  ;;  %v2031_v17 = vcombine.low %v2023_v13, %v191_v15  ;;  %v1868_v20 = vld [vmem:[%s2284_s1 + $0x48] sm:$0xff]   ;;  %v1871_v27 = vld [vmem:[%s2284_s1] sm:$0xff]   ;;  %v1876_v31 = vld [vmem:[%s2284_s1 + $0xf8] sm:$0xff]   ;;  %v1520_v15 = vcombine.low %v2020_v12, %v2023_v13 }
  0x12   : > { %1690 = vmatpush3.bf16.msra.mxu1 %v1859_v3  ;;  %1671 = vmatprep.subr.bf16.mxu0 %v1860_v4  ;;  %v220_v18 = vshrl.u32 %v1473_v16, 16  ;;  %v222_v19 = vshll.u32 %v1473_v16, 16  ;;  %v1869_v22 = vld [vmem:[%s2284_s1 + $0x8] sm:$0xff]   ;;  %v1877_v34 = vld [vmem:[%s2284_s1 + $0xb0] sm:$0xff]   ;;  %v431_v36 = vld [vmem:[%s2013_s10] sm:$0xe] }
  0x13   : > { %1691 = vmatprep.subr.bf16.mxu1 %v1861_v5  ;;  %1703 = vmatprep.mubr.bf16.mxu1 %v1473_v16  ;;  %v227_v21 = vshll.u32 %v2031_v17, 16  ;;  %v231_v29 = vshrl.u32 %v2031_v17, 16  ;;  %v1878_v35 = vld [vmem:[%s2284_s1 + $0xf0] sm:$0xff]   ;;  %v1492_v37 = vcombine.low %v431_v36, %v2020_v12  ;;  %v453_v38 = vrot.slane %v2031_v17, 1  ;;  %v556_v39 = vld [vmem:[%s2013_s10] sm:$0x8]  ;;  %vm1392_vm8 = vmor %vm1390_vm6, %vm1391_vm7 }
  0x14   : > { %v224_v23 = vrot.slane %v222_v19, 1  ;;  %v557_v40 = vld [vmem:[%s2013_s10 + $0xc] sm:$0x7]  ;;  %v1501_v42 = vcombine.low %v556_v39, %v2020_v12  ;;  %v1881_v49 = vld [vmem:[%s2284_s1 + $0xa0] sm:$0xff]   ;;  %v1883_v52 = vld [vmem:[%s2284_s1 + $0x98] sm:$0xff]  }
  0x15   : > { %1672 = vmatpush3.bf16.msra.mxu0 %v1860_v4  ;;  %v229_v24 = vrot.slane %v227_v21, 1  ;;  %v1879_v41 = vld [vmem:[%s2284_s1 + $0xa8] sm:$0xff]   ;;  %v1502_v43 = vcombine.low %v2023_v13, %v557_v40  ;;  %v452_v45 = vrot.slane %v1492_v37, 1  ;;  %v1882_v51 = vld [vmem:[%s2284_s1 + $0xe0] sm:$0xff]   ;;  %v1884_v53 = vld [vmem:[%s2284_s1 + $0xd8] sm:$0xff]  }
  0x16   : > { %1692 = vmatpush3.bf16.msra.mxu1 %v1861_v5  ;;  %1673 = vmatprep.subr.bf16.mxu0 %v1862_v6  ;;  %v225_v25 = vor.u32 %v224_v23, %v220_v18  ;;  %v1880_v44 = vld [vmem:[%s2284_s1 + $0xe8] sm:$0xff]   ;;  %v581_v46 = vrot.slane %v1501_v42, 3  ;;  %v1885_v54 = vld [vmem:[%s2284_s1 + $0x90] sm:$0xff]   ;;  %v707_v58 = vshrl.u32 %v1501_v42, 16  ;;  %v710_v59 = vshll.u32 %v1501_v42, 16  ;;  %v1889_v0 = vld [vmem:[%s2284_s1 + $0x80] sm:$0xff]  }
  0x17   : > { %1693 = vmatprep.subr.bf16.mxu1 %v1863_v7  ;;  %v233_v32 = vor.u32 %v231_v29, %v229_v24  ;;  %v2075_v47 = vrot.slane %v1502_v43, 3  ;;  %v454_v48 = vsel %vm451_vm1, %v452_v45, %v453_v38  ;;  %v1886_v55 = vld [vmem:[%s2284_s1 + $0xd0] sm:$0xff]   ;;  %v1887_v56 = vld [vmem:[%s2284_s1 + $0x88] sm:$0xff]   ;;  %v1890_v1 = vld [vmem:[%s2284_s1 + $0xc0] sm:$0xff]  }
  0x18   : > { %v230_v28 = vsel %vm218_vm0, %v225_v25, %v229_v24  ;;  %v2104_v57 = vld [vmem:[%s2013_s10 + $0xc] sm:$0xf]  ;;  %v709_v2 = vrot.slane %v707_v58, 3  ;;  %v712_v3 = vrot.slane %v710_v59, 4  ;;  %v1897_v11 = vld [vmem:[%s2284_s1 + $0x170] sm:$0xff]   ;;  %v1900_v12 = vld [vmem:[%s2284_s1 + $0x120] sm:$0xff]  }
  0x19   : > { %1674 = vmatpush3.bf16.msra.mxu0 %v1862_v6  ;;  %1683 = vmatprep.mubr.bf16.mxu0 %v230_v28  ;;  %v583_v50 = vsel %vm580_vm2, %v581_v46, %v2075_v47  ;;  %v1511_v60 = vcombine.low %v2023_v13, %v2104_v57  ;;  %v1888_v61 = vld [vmem:[%s2284_s1 + $0xc8] sm:$0xff]   ;;  %v1892_v6 = vld [vmem:[%s2284_s1 + $0x138] sm:$0xff]   ;;  %v1901_v13 = vld [vmem:[%s2284_s1 + $0x160] sm:$0xff]  }
  0x1a   : > { %1694 = vmatpush3.bf16.msra.mxu1 %v1863_v7  ;;  %1675 = vmatprep.subr.bf16.mxu0 %v1864_v8  ;;  %v1895_v7 = vld [vmem:[%s2284_s1 + $0x178] sm:$0xff]   ;;  %v1898_v16 = vld [vmem:[%s2284_s1 + $0x128] sm:$0xff]   ;;  %v1078_v19 = vld [vmem:[%s2013_s10 + $0x10] sm:$0x7] }
  0x1b   : > { %1695 = vmatprep.subr.bf16.mxu1 %v1865_v9  ;;  %v715_v62 = vshrl.u32 %v1511_v60, 16  ;;  %v718_v63 = vshll.u32 %v1511_v60, 16  ;;  %v1899_v17 = vld [vmem:[%s2284_s1 + $0x168] sm:$0xff]   ;;  %v1903_v21 = vld [vmem:[%s2284_s1 + $0x158] sm:$0xff]   ;;  %v1217_v24 = vld [vmem:[%s2013_s10 + $0x4] sm:$0x8] }
  0x1c   : > { %v945_v18 = vld [vmem:[%s2013_s10 + $0xc] sm:$0xf]  ;;  %v944_v23 = vld [vmem:[%s2013_s10 + $0x8] sm:$0xf]  ;;  %v943_v28 = vld [vmem:[%s2013_s10 + $0x4] sm:$0xc] }
  0x1d   : > { %1676 = vmatpush3.bf16.msra.mxu0 %v1864_v8  ;;  %v717_v4 = vrot.slane %v715_v62, 3  ;;  %v720_v5 = vrot.slane %v718_v63, 4  ;;  %v713_v8 = vor.u32 %v712_v3, %v709_v2  ;;  %v1549_v25 = vcombine.low %v1217_v24, %v944_v23  ;;  %v1905_v29 = vld [vmem:[%s2284_s1 + $0x150] sm:$0xff]   ;;  %v1908_v40 = vld [vmem:[%s2284_s1 + $0x100] sm:$0xff]   ;;  %v1917_v58 = vld [vmem:[%s2284_s1 + $0x1a8] sm:$0xff]  }
  0x1e   : > { %1696 = vmatpush3.bf16.msra.mxu1 %v1865_v9  ;;  %1677 = vmatprep.subr.bf16.mxu0 %v1866_v10  ;;  %v1918_v59 = vld [vmem:[%s2284_s1 + $0x1e8] sm:$0xff]   ;;  %v1919_v60 = vld [vmem:[%s2284_s1 + $0x1a0] sm:$0xff]   ;;  %v1921_v62 = vld [vmem:[%s2284_s1 + $0x198] sm:$0xff]  }
  0x1f   : > { %1697 = vmatprep.subr.bf16.mxu1 %v1867_v14  ;;  %v2123_v9 = vor.u32 %v720_v5, %v717_v4  ;;  %v1922_v63 = vld [vmem:[%s2284_s1 + $0x1d8] sm:$0xff]   ;;  %v1925_v2 = vld [vmem:[%s2284_s1 + $0x188] sm:$0xff]   ;;  %v1927_v4 = vld [vmem:[%s2284_s1 + $0x180] sm:$0xff]  }
  0x20   : > { %v1926_v3 = vld [vmem:[%s2284_s1 + $0x1c8] sm:$0xff]   ;;  %v1928_v5 = vld [vmem:[%s2284_s1 + $0x1c0] sm:$0xff]  }
  0x21   : > { %1678 = vmatpush3.bf16.msra.mxu0 %v1866_v10  ;;  %v1896_v10 = vld [vmem:[%s2284_s1 + $0x130] sm:$0xff]  }
  0x22   : > { %1698 = vmatpush3.bf16.msra.mxu1 %v1867_v14  ;;  %1679 = vmatprep.subr.bf16.mxu0 %v1868_v20  ;;  %v722_v14 = vsel %vm705_vm3, %v713_v8, %v2123_v9  ;;  %v1934_v8 = vld [vmem:[%s2284_s1 + $0x228] sm:$0xff]  }
  0x23   : > { %1699 = vmatprep.subr.bf16.mxu1 %v1869_v22 }
  0x25   : > { %1680 = vmatpush3.bf16.msra.mxu0 %v1868_v20  ;;  %v1902_v20 = vld [vmem:[%s2284_s1 + $0x118] sm:$0xff]  }
  0x26   : > { %1700 = vmatpush3.bf16.msra.mxu1 %v1869_v22  ;;  %1681 = vmatprep.subr.bf16.mxu0 %v1870_v26  ;;  %v2157_v22 = vcombine.low %v945_v18, %v1078_v19 }
  0x27   : > { %1701 = vmatprep.subr.bf16.mxu1 %v1871_v27 }
  0x28   : > { %v1111_v39 = vshll.u32 %v2157_v22, 16 }
  0x29   : > { %1682 = vmatpush3.bf16.msra.mxu0 %v1870_v26  ;;  %v1238_v26 = vrot.slane %v2157_v22, 3 }
  0x2a   : > { %1702 = vmatpush3.bf16.msra.mxu1 %v1871_v27  ;;  %1707 = vmatprep.subr.bf16.mxu0 %v1875_v30  ;;  %v1904_v27 = vld [vmem:[%s2284_s1 + $0x110] sm:$0xff]   ;;  %v1113_v46 = vrot.slane %v1111_v39, 3 }
  0x2b   : > { %1727 = vmatprep.subr.bf16.mxu1 %v1876_v31 }
  0x2c   : > { %1684 = vmatmul.mubr.bf16.vlgmr.msra.gmra.mxu0 %v233_v32 }
  0x2d   : > { %1704 = vmatmul.mubr.bf16.vlgmr.msra.gmra.mxu1 %v1483_v33  ;;  %1708 = vmatpush3.bf16.msra.mxu0 %v1875_v30  ;;  %v1237_v30 = vrot.slane %v1549_v25, 3  ;;  %v1906_v33 = vld [vmem:[%s2284_s1 + $0x108] sm:$0xff]  }
  0x2e   : > { %1728 = vmatpush3.bf16.msra.mxu1 %v1876_v31  ;;  %1709 = vmatprep.subr.bf16.mxu0 %v1877_v34  ;;  %v1530_v31 = vcombine.low %v943_v28, %v944_v23 }
  0x2f   : > { %1729 = vmatprep.subr.bf16.mxu1 %v1878_v35  ;;  %1723 = vmatprep.mubr.bf16.mxu0 %v454_v48  ;;  %v2172_v32 = vsel %vm580_vm2, %v1237_v30, %v1238_v26  ;;  %v1914_v48 = vld [vmem:[%s2284_s1 + $0x1f8] sm:$0xff]  }
  0x30   : > { %1743 = vmatprep.mubr.bf16.mxu1 %v583_v50  ;;  %v1100_v36 = vshrl.u32 %v1530_v31, 16  ;;  %v1103_v37 = vshll.u32 %v1530_v31, 16 }
  0x31   : > { %1710 = vmatpush3.bf16.msra.mxu0 %v1877_v34  ;;  %v1907_v34 = vld [vmem:[%s2284_s1 + $0x148] sm:$0xff]  }
  0x32   : > { %1730 = vmatpush3.bf16.msra.mxu1 %v1878_v35  ;;  %1711 = vmatprep.subr.bf16.mxu0 %v1879_v41  ;;  %v946_v35 = vld [vmem:[%s2013_s10 + $0x10] sm:$0x3]  ;;  %v1102_v43 = vrot.slane %v1100_v36, 2 }
  0x33   : > { %1731 = vmatprep.subr.bf16.mxu1 %v1880_v44  ;;  %v1531_v42 = vcombine.low %v945_v18, %v946_v35 }
  0x35   : > { %1712 = vmatpush3.bf16.msra.mxu0 %v1879_v41  ;;  %v1909_v41 = vld [vmem:[%s2284_s1 + $0x140] sm:$0xff]   ;;  %v975_v50 = vrot.slane %v1531_v42, 2 }
  0x36   : > { %1732 = vmatpush3.bf16.msra.mxu1 %v1880_v44  ;;  %1713 = vmatprep.subr.bf16.mxu0 %v1881_v49  ;;  %v1105_v44 = vrot.slane %v1103_v37, 3 }
  0x37   : > { %1733 = vmatprep.subr.bf16.mxu1 %v1882_v51 }
  0x39   : > { %1714 = vmatpush3.bf16.msra.mxu0 %v1881_v49  ;;  %v974_v49 = vrot.slane %v1530_v31, 2 }
  0x3a   : > { %1734 = vmatpush3.bf16.msra.mxu1 %v1882_v51  ;;  %1715 = vmatprep.subr.bf16.mxu0 %v1883_v52  ;;  %v1521_v51 = vcombine.low %v2104_v57, %v2104_v57 }
  0x3b   : > { %1735 = vmatprep.subr.bf16.mxu1 %v1884_v53 }
  0x3d   : > { %1716 = vmatpush3.bf16.msra.mxu0 %v1883_v52  ;;  %v1106_v52 = vor.u32 %v1105_v44, %v1102_v43 }
  0x3e   : > { %1736 = vmatpush3.bf16.msra.mxu1 %v1884_v53  ;;  %1717 = vmatprep.subr.bf16.mxu0 %v1885_v54 }
  0x3f   : > { %1737 = vmatprep.subr.bf16.mxu1 %v1886_v55 }
  0x41   : > { %1718 = vmatpush3.bf16.msra.mxu0 %v1885_v54  ;;  %v1915_v54 = vld [vmem:[%s2284_s1 + $0x1b0] sm:$0xff]  }
  0x42   : > { %1738 = vmatpush3.bf16.msra.mxu1 %v1886_v55  ;;  %1719 = vmatprep.subr.bf16.mxu0 %v1887_v56  ;;  %v1916_v55 = vld [vmem:[%s2284_s1 + $0x1f0] sm:$0xff]  }
  0x43   : > { %1739 = vmatprep.subr.bf16.mxu1 %v1888_v61 }
  0x45   : > { %1720 = vmatpush3.bf16.msra.mxu0 %v1887_v56  ;;  %v976_v56 = vsel %vm973_vm4, %v974_v49, %v975_v50 }
  0x46   : > { %1740 = vmatpush3.bf16.msra.mxu1 %v1888_v61  ;;  %1721 = vmatprep.subr.bf16.mxu0 %v1889_v0  ;;  %v1920_v61 = vld [vmem:[%s2284_s1 + $0x1e0] sm:$0xff]  }
  0x47   : > { %1741 = vmatprep.subr.bf16.mxu1 %v1890_v1 }
  0x49   : > { %1722 = vmatpush3.bf16.msra.mxu0 %v1889_v0  ;;  %v1923_v0 = vld [vmem:[%s2284_s1 + $0x190] sm:$0xff]  }
  0x4a   : > { %1742 = vmatpush3.bf16.msra.mxu1 %v1890_v1  ;;  %1747 = vmatprep.subr.bf16.mxu0 %v1892_v6  ;;  %v1924_v1 = vld [vmem:[%s2284_s1 + $0x1d0] sm:$0xff]  }
  0x4b   : > { %1767 = vmatprep.subr.bf16.mxu1 %v1895_v7 }
  0x4c   : > { %1724 = vmatmul.mubr.bf16.vlgmr.msra.gmra.mxu0 %v453_v38  ;;  %v1108_v38 = vshrl.u32 %v2157_v22, 16 }
  0x4d   : > { %1748 = vmatpush3.bf16.msra.mxu0 %v1892_v6  ;;  %1744 = vmatmul.mubr.bf16.vlgmr.msra.gmra.mxu1 %v2075_v47  ;;  %v1911_v47 = vld [vmem:[%s2284_s1 + $0x1b8] sm:$0xff]  }
  0x4e   : > { %1768 = vmatpush3.bf16.msra.mxu1 %v1895_v7  ;;  %1749 = vmatprep.subr.bf16.mxu0 %v1896_v10  ;;  %v1110_v45 = vrot.slane %v1108_v38, 2  ;;  %v1932_v6 = vld [vmem:[%s2284_s1 + $0x238] sm:$0xff]   ;;  %v1933_v7 = vld [vmem:[%s2284_s1 + $0x230] sm:$0xff]  }
  0x4f   : > { %1769 = vmatprep.subr.bf16.mxu1 %v1897_v11  ;;  %1763 = vmatprep.mubr.bf16.mxu0 %v722_v14  ;;  %v1938_v14 = vld [vmem:[%s2284_s1 + $0x208] sm:$0xff]  }
  0x50   : > { %1783 = vmatprep.mubr.bf16.mxu1 %v1520_v15  ;;  %v1114_v53 = vor.u32 %v1113_v46, %v1110_v45  ;;  %v1939_v15 = vld [vmem:[%s2284_s1 + $0x200] sm:$0xff]  }
  0x51   : > { %1750 = vmatpush3.bf16.msra.mxu0 %v1896_v10  ;;  %v1936_v10 = vld [vmem:[%s2284_s1 + $0x218] sm:$0xff]  }
  0x52   : > { %1770 = vmatpush3.bf16.msra.mxu1 %v1897_v11  ;;  %1751 = vmatprep.subr.bf16.mxu0 %v1898_v16  ;;  %v1115_v57 = vsel %vm1098_vm5, %v1106_v52, %v1114_v53  ;;  %v1937_v11 = vld [vmem:[%s2284_s1 + $0x210] sm:$0xff]  }
  0x53   : > { %1771 = vmatprep.subr.bf16.mxu1 %v1899_v17 }
  0x55   : > { %1752 = vmatpush3.bf16.msra.mxu0 %v1898_v16 }
  0x56   : > { %1772 = vmatpush3.bf16.msra.mxu1 %v1899_v17  ;;  %1753 = vmatprep.subr.bf16.mxu0 %v1900_v12 }
  0x57   : > { %1773 = vmatprep.subr.bf16.mxu1 %v1901_v13 }
  0x59   : > { %1754 = vmatpush3.bf16.msra.mxu0 %v1900_v12 }
  0x5a   : > { %1774 = vmatpush3.bf16.msra.mxu1 %v1901_v13  ;;  %1755 = vmatprep.subr.bf16.mxu0 %v1902_v20 }
  0x5b   : > { %1775 = vmatprep.subr.bf16.mxu1 %v1903_v21 }
  0x5d   : > { %1756 = vmatpush3.bf16.msra.mxu0 %v1902_v20 }
  0x5e   : > { %1776 = vmatpush3.bf16.msra.mxu1 %v1903_v21  ;;  %1757 = vmatprep.subr.bf16.mxu0 %v1904_v27 }
  0x5f   : > { %1777 = vmatprep.subr.bf16.mxu1 %v1905_v29 }
  0x61   : > { %1758 = vmatpush3.bf16.msra.mxu0 %v1904_v27 }
  0x62   : > { %1778 = vmatpush3.bf16.msra.mxu1 %v1905_v29  ;;  %1759 = vmatprep.subr.bf16.mxu0 %v1906_v33 }
  0x63   : > { %1779 = vmatprep.subr.bf16.mxu1 %v1907_v34 }
  0x65   : > { %1760 = vmatpush3.bf16.msra.mxu0 %v1906_v33 }
  0x66   : > { %1780 = vmatpush3.bf16.msra.mxu1 %v1907_v34  ;;  %1761 = vmatprep.subr.bf16.mxu0 %v1908_v40 }
  0x67   : > { %1781 = vmatprep.subr.bf16.mxu1 %v1909_v41 }
  0x69   : > { %1762 = vmatpush3.bf16.msra.mxu0 %v1908_v40 }
  0x6a   : > { %1782 = vmatpush3.bf16.msra.mxu1 %v1909_v41  ;;  %1787 = vmatprep.subr.bf16.mxu0 %v1911_v47 }
  0x6b   : > { %1807 = vmatprep.subr.bf16.mxu1 %v1914_v48 }
  0x6c   : > { %1764 = vmatmul.mubr.bf16.vlgmr.msra.gmra.mxu0 %v2123_v9  ;;  %v1935_v9 = vld [vmem:[%s2284_s1 + $0x220] sm:$0xff]  }
  0x6d   : > { %1788 = vmatpush3.bf16.msra.mxu0 %v1911_v47  ;;  %1784 = vmatmul.mubr.bf16.vlgmr.msra.gmra.mxu1 %v1521_v51 }
  0x6e   : > { %1808 = vmatpush3.bf16.msra.mxu1 %v1914_v48  ;;  %1789 = vmatprep.subr.bf16.mxu0 %v1915_v54 }
  0x6f   : > { %1809 = vmatprep.subr.bf16.mxu1 %v1916_v55  ;;  %1803 = vmatprep.mubr.bf16.mxu0 %v976_v56 }
  0x70   : > { %1823 = vmatprep.mubr.bf16.mxu1 %v1115_v57 }
  0x71   : > { %1790 = vmatpush3.bf16.msra.mxu0 %v1915_v54 }
  0x72   : > { %1810 = vmatpush3.bf16.msra.mxu1 %v1916_v55  ;;  %1791 = vmatprep.subr.bf16.mxu0 %v1917_v58 }
  0x73   : > { %1811 = vmatprep.subr.bf16.mxu1 %v1918_v59 }
  0x75   : > { %1792 = vmatpush3.bf16.msra.mxu0 %v1917_v58 }
  0x76   : > { %1812 = vmatpush3.bf16.msra.mxu1 %v1918_v59  ;;  %1793 = vmatprep.subr.bf16.mxu0 %v1919_v60 }
  0x77   : > { %1813 = vmatprep.subr.bf16.mxu1 %v1920_v61 }
  0x79   : > { %1794 = vmatpush3.bf16.msra.mxu0 %v1919_v60 }
  0x7a   : > { %1814 = vmatpush3.bf16.msra.mxu1 %v1920_v61  ;;  %1795 = vmatprep.subr.bf16.mxu0 %v1921_v62 }
  0x7b   : > { %1815 = vmatprep.subr.bf16.mxu1 %v1922_v63 }
  0x7d   : > { %1796 = vmatpush3.bf16.msra.mxu0 %v1921_v62 }
  0x7e   : > { %1816 = vmatpush3.bf16.msra.mxu1 %v1922_v63  ;;  %1797 = vmatprep.subr.bf16.mxu0 %v1923_v0 }
  0x7f   : > { %1817 = vmatprep.subr.bf16.mxu1 %v1924_v1 }
  0x81   : > { %1798 = vmatpush3.bf16.msra.mxu0 %v1923_v0  ;;  %v1558_v0 = vld [vmem:[%s2285_s2] ss:$0 sm:$0xff] }
  0x82   : > { %1818 = vmatpush3.bf16.msra.mxu1 %v1924_v1  ;;  %1799 = vmatprep.subr.bf16.mxu0 %v1925_v2 }
  0x83   : > { %1819 = vmatprep.subr.bf16.mxu1 %v1926_v3 }
  0x85   : > { %1800 = vmatpush3.bf16.msra.mxu0 %v1925_v2 }
  0x86   : > { %1820 = vmatpush3.bf16.msra.mxu1 %v1926_v3  ;;  %1801 = vmatprep.subr.bf16.mxu0 %v1927_v4 }
  0x87   : > { %1821 = vmatprep.subr.bf16.mxu1 %v1928_v5 }
  0x89   : > { %1802 = vmatpush3.bf16.msra.mxu0 %v1927_v4 }
  0x8a   : > { %1822 = vmatpush3.bf16.msra.mxu1 %v1928_v5  ;;  %1827 = vmatprep.subr.bf16.mxu0 %v1932_v6 }
  0x8c   : > { %1804 = vmatmul.mubr.bf16.vlgmr.msra.gmra.mxu0 %v975_v50 }
  0x8d   : > { %1828 = vmatpush3.bf16.msra.mxu0 %v1932_v6  ;;  %1824 = vmatmul.mubr.bf16.vlgmr.msra.gmra.mxu1 %v1114_v53 }
  0x8e   : > { %1829 = vmatprep.subr.bf16.mxu0 %v1933_v7  ;;  %1843 = vmatprep.mubr.bf16.mxu0 %v2172_v32 }
  0x91   : > { %1830 = vmatpush3.bf16.msra.mxu0 %v1933_v7 }
  0x92   : > { %1831 = vmatprep.subr.bf16.mxu0 %v1934_v8 }
  0x95   : > { %1832 = vmatpush3.bf16.msra.mxu0 %v1934_v8  ;;  %v1559_v8 = vld [vmem:[%s2285_s2 + $0x1] ss:$0 sm:$0xff] }
  0x96   : > { %1833 = vmatprep.subr.bf16.mxu0 %v1935_v9 }
  0x99   : > { %1834 = vmatpush3.bf16.msra.mxu0 %v1935_v9 }
  0x9a   : > { %1835 = vmatprep.subr.bf16.mxu0 %v1936_v10 }
  0x9d   : > { %1836 = vmatpush3.bf16.msra.mxu0 %v1936_v10 }
  0x9e   : > { %1837 = vmatprep.subr.bf16.mxu0 %v1937_v11 }
  0xa1   : > { %1838 = vmatpush3.bf16.msra.mxu0 %v1937_v11 }
  0xa2   : > { %1839 = vmatprep.subr.bf16.mxu0 %v1938_v14 }
  0xa5   : > { %1840 = vmatpush3.bf16.msra.mxu0 %v1938_v14 }
  0xa6   : > { %1841 = vmatprep.subr.bf16.mxu0 %v1939_v15 }
  0xa9   : > { %1842 = vmatpush3.bf16.msra.mxu0 %v1939_v15  ;;  %v1560_v15 = vld [vmem:[%s2285_s2 + $0x2] ss:$0 sm:$0xff] }
  0xac   : > { %1844 = vmatmul.mubr.bf16.vlgmr.msra.gmra.mxu0 %v1238_v26 }
  0xec   : > { %v1685_v16 = vpop.f32.mrf.mxu0 }
  0xed   : > { %v1705_v17 = vpop.f32.mrf.mxu1 }
  0xee   : > { %v426_v12 = vadd.f32 %v1705_v17, %v1685_v16  ;;  %v318_v13 = vpop.f32.mrf.mxu0 }
  0xef   : > { %v417_v18 = vpop.f32.mrf.mxu1 }
  0xf0   : > { %v418_v19 = vadd.f32 %v417_v18, %v318_v13  ;;  %v1686_v20 = vpop.f32.mrf.mxu0 }
  0xf1   : > { %v1706_v21 = vpop.f32.mrf.mxu1 }
  0xf2   : > { %v321_v23 = vpop.f32.mrf.mxu0 }
  0xf3   : > { %v420_v24 = vpop.f32.mrf.mxu1 }
  0xf4   : > { %v421_v25 = vadd.f32 %v420_v24, %v321_v23 }
 0x10c   : > { %v1725_v27 = vpop.f32.mrf.mxu0 }
 0x10d   : > { %v555_v28 = vadd.f32 %v1725_v27, %v426_v12  ;;  %v1745_v29 = vpop.f32.mrf.mxu1 }
 0x10e   : > { %v539_v30 = vpop.f32.mrf.mxu0 }
 0x10f   : > { %v553_v31 = vadd.f32 %v539_v30, %v418_v19  ;;  %v684_v32 = vadd.f32 %v1745_v29, %v555_v28  ;;  %v668_v33 = vpop.f32.mrf.mxu1 }
 0x110   : > { %v1726_v22 = vpop.f32.mrf.mxu0 }
 0x111   : > { %v682_v26 = vadd.f32 %v668_v33, %v553_v31  ;;  %v1746_v34 = vpop.f32.mrf.mxu1 }
 0x112   : > { %v542_v35 = vpop.f32.mrf.mxu0 }
 0x113   : > { %v671_v36 = vpop.f32.mrf.mxu1  ;;  %v554_v51 = vadd.f32 %v542_v35, %v421_v25 }
 0x115   : > { %v683_v54 = vadd.f32 %v671_v36, %v554_v51 }
 0x12c   : > { %v1765_v37 = vpop.f32.mrf.mxu0 }
 0x12d   : > { %v1785_v38 = vpop.f32.mrf.mxu1  ;;  %v823_v52 = vadd.f32 %v1765_v37, %v684_v32 }
 0x12e   : > { %v807_v39 = vpop.f32.mrf.mxu0 }
 0x12f   : > { %v926_v40 = vpop.f32.mrf.mxu1  ;;  %v821_v53 = vadd.f32 %v807_v39, %v682_v26  ;;  %v942_v55 = vadd.f32 %v1785_v38, %v823_v52 }
 0x130   : > { %v1766_v41 = vpop.f32.mrf.mxu0 }
 0x131   : > { %v1786_v42 = vpop.f32.mrf.mxu1  ;;  %v940_v56 = vadd.f32 %v926_v40, %v821_v53 }
 0x132   : > { %v810_v43 = vpop.f32.mrf.mxu0 }
 0x133   : > { %v929_v44 = vpop.f32.mrf.mxu1  ;;  %v822_v57 = vadd.f32 %v810_v43, %v683_v54 }
 0x135   : > { %v941_v61 = vadd.f32 %v929_v44, %v822_v57 }
 0x14c   : > { %v1805_v45 = vpop.f32.mrf.mxu0 }
 0x14d   : > { %v1825_v46 = vpop.f32.mrf.mxu1  ;;  %v1077_v58 = vadd.f32 %v1805_v45, %v942_v55 }
 0x14e   : > { %v1061_v47 = vpop.f32.mrf.mxu0 }
 0x14f   : > { %v1200_v48 = vpop.f32.mrf.mxu1  ;;  %v1075_v59 = vadd.f32 %v1061_v47, %v940_v56  ;;  %v1216_v62 = vadd.f32 %v1825_v46, %v1077_v58 }
 0x150   : > { %v1806_v49 = vpop.f32.mrf.mxu0 }
 0x151   : > { %v1826_v50 = vpop.f32.mrf.mxu1  ;;  %v1214_v1 = vadd.f32 %v1200_v48, %v1075_v59 }
 0x152   : > { %v1064_v60 = vpop.f32.mrf.mxu0 }
 0x153   : > { %v1076_v2 = vadd.f32 %v1064_v60, %v941_v61  ;;  %v1203_v4 = vpop.f32.mrf.mxu1 }
 0x155   : > { %v1215_v10 = vadd.f32 %v1203_v4, %v1076_v2 }
 0x16c   : > { %v1845_v63 = vpop.f32.mrf.mxu0 }
 0x16d   : > { %v1340_v3 = vadd.f32 %v1845_v63, %v1216_v62 }
 0x16e   : > { %v1324_v5 = vpop.f32.mrf.mxu0 }
 0x16f   : > { %v1348_v6 = vadd.f32 %v1558_v0, %v1340_v3  ;;  %v1338_v7 = vadd.f32 %v1324_v5, %v1214_v1 }
 0x170   : > { %v1846_v9 = vpop.f32.mrf.mxu0 }
 0x171   : > { %v1351_v11 = vmax.f32 %v1348_v6, 0.0  ;;  %v1346_v14 = vadd.f32 %v1558_v0, %v1338_v7 }
 0x172   : > { %v1327_v16 = vpop.f32.mrf.mxu0 }
 0x173   : > { %v1359_v17 = vmul.f32 %v1559_v8, %v1351_v11  ;;  %v1349_v12 = vmax.f32 %v1346_v14, 0.0  ;;  %v1339_v13 = vadd.f32 %v1327_v16, %v1215_v10 }
 0x175   : > { %v1367_v18 = vadd.f32 %v1560_v15, %v1359_v17  ;;  %v1347_v19 = vadd.f32 %v1558_v0, %v1339_v13  ;;  %v1357_v21 = vmul.f32 %v1559_v8, %v1349_v12 }
 0x177   : > { %v1571_v20 = vpack.c.bf16 %v1367_v18, %v1367_v18  ;;  %v1350_v23 = vmax.f32 %v1347_v19, 0.0  ;;  %v1365_v25 = vadd.f32 %v1560_v15, %v1357_v21 }
 0x179   : > { %1383 = vst [vmem:[#allocation2 + $0x8] sm:$0xf] %v1571_v20  ;;  %v1358_v24 = vmul.f32 %v1559_v8, %v1350_v23 }
 0x17b   : > { %v1366_v27 = vadd.f32 %v1560_v15, %v1358_v24 }
 0x17d   : > { %v1575_v28 = vpack.c.bf16 %v1366_v27, %v1365_v25 }
 0x17f   : > { %1576 = vst [vmem:[#allocation2] sm:$0xff] %v1575_v28  }
 0x180   : > { %v1405_v29 = vld [vmem:[#allocation2 + $0x8] sm:$0x6] }
 0x181   : > { %v1407_v30 = vrot.slane %v1405_v29, 7 }
 0x183   : > { %1409 = vst [vmem:[%s170_s23 + $0x4] sm:$0xc] %v1407_v30 }
 0x186   : > { %v1384_v31 = vld [vmem:[#allocation2] sm:$0x3]  ;;  %v1386_v32 = vld [vmem:[#allocation2] sm:$0x8]  ;;  %v1387_v33 = vld [vmem:[#allocation2 + $0x4] sm:$0x1] }
 0x187   : > { %1385 = vst [vmem:[%s170_s23] sm:$0x3] %v1384_v31  ;;  %v1564_v22 = vrot.slane %v1386_v32, 9  ;;  %v1395_v26 = vrot.slane %v1387_v33, 5  ;;  %v1399_v34 = vld [vmem:[#allocation2 + $0x4] sm:$0xc] }
 0x188   : > { %v1565_v35 = vrot.slane %v1399_v34, 10 }
 0x189   : > { %v1396_v36 = vsel %vm1392_vm8, %v1564_v22, %v1395_v26 }
 0x18a   : > { %1398 = vst [vmem:[%s170_s23] sm:$0xc] %v1396_v36  ;;  %1404 = vst [vmem:[%s170_s23 + $0x4] sm:$0x3] %v1565_v35 }
 0x18b PF: > { %s13_s12 = sadd.s32 1, %s1947_s12  }
 0x18c   : > { %p10_p4 = scmp.ge.s32.totalorder %s13_s12, 4  }
 0x18e   :  { %12 = sbr.rel (!%p10_p4) target bundleno = 1 (0x1), region = 62 }

// kernel: _lambda_.9
= control target key start
LH: loop header
LB: loop body
LE: loop exit
PB: predicated region body
PF: predicated region fallthrough
CT: control target
= control target key end

     0   :  { %s2264_s21 = smov 0   ;;  %s2773_s0 = inlined_call_operand.vmem [shape: bf16[2,12,128], index: 0, kind: input, shape index: {}]   ;;  %s2774_s1 = inlined_call_operand.vmem [shape: bf16[2,12,128], index: 1, kind: input, shape index: {}]   ;;  %s2775_s2 = inlined_call_operand.vmem [shape: bf16[2,12,128], index: 2, kind: input, shape index: {}]   ;;  %s2776_s3 = inlined_call_operand.vmem [shape: bf16[2,12,128], index: 3, kind: input, shape index: {}]   ;;  %s2777_s4 = inlined_call_operand.vmem [shape: bf16[1152,256], index: 4, kind: input, shape index: {}]   ;;  %s2778_s5 = inlined_call_operand.vmem [shape: f32[8,256], index: 5, kind: input, shape index: {}]   ;;  %s2779_s6 = inlined_call_operand.vmem [shape: bf16[2,4,256], index: 6, kind: output, shape index: {}]  }
   0x1 LB: > { %s1812_s22 = sadd.s32 4294967295, %s2226_s21   ;;  %p1816_p0 = scmp.ge.s32.totalorder %s2226_s21, 1  ;;  %s2226_s21 = sphi %s2264_s21, %s16_s21  }
   0x2   : > { %p242_p1 = scmp.lt.s32.totalorder %s2226_s21, 3 }
   0x4   : > { %p243_p2 = pnand %p1816_p0, %p242_p1 }
   0x5   : > { %p287_p3 = scmp.lt.s32.totalorder (!%p243_p2), %s1812_s22, 1 }
   0x6   : > { %246 = sbr.rel (%p243_p2) target bundleno = 397 (0x18d), region = 44 }
   0xb   : > { %v1999_v0 = vld [vmem:[%s2777_s4 + $0xf4] ss:$8 sps:$4 sm:$0xff]   ;;  %v2228_v2 = vmov 0   ;;  %v2003_v3 = vld [vmem:[%s2777_s4 + $0xf0] ss:$8 sps:$4 sm:$0xff]   ;;  %s2781_s22 = smov (!%p287_p3, %s1812_s22), 1 }
   0xc   : > { %v2001_v1 = vld [vmem:[%s2777_s4 + $0x74] ss:$8 sps:$4 sm:$0xff]   ;;  %459 = vmatprep.mubr.bf16.mxu0 %v2228_v2  ;;  %580 = vmatprep.mubr.bf16.mxu1 %v2228_v2  ;;  %v2004_v4 = vld [vmem:[%s2777_s4 + $0x70] ss:$8 sps:$4 sm:$0xff]   ;;  %v2005_v5 = vld [vmem:[%s2777_s4 + $0xe4] ss:$8 sps:$4 sm:$0xff]  }
   0xd   : > { %427 = vmatprep.subr.bf16.mxu0 %v1999_v0  ;;  %548 = vmatprep.subr.bf16.mxu1 %v2001_v1  ;;  %v2007_v6 = vld [vmem:[%s2777_s4 + $0x64] ss:$8 sps:$4 sm:$0xff]   ;;  %v2009_v7 = vld [vmem:[%s2777_s4 + $0xe0] ss:$8 sps:$4 sm:$0xff]   ;;  %v2011_v9 = vld [vmem:[%s2777_s4 + $0xd4] ss:$8 sps:$4 sm:$0xff]  }
   0xe   : > { %428 = vmatpush1.bf16.msra.mxu0 %v2003_v3  ;;  %549 = vmatpush1.bf16.msra.mxu1 %v2004_v4  ;;  %v2010_v8 = vld [vmem:[%s2777_s4 + $0x60] ss:$8 sps:$4 sm:$0xff]   ;;  %v2013_v10 = vld [vmem:[%s2777_s4 + $0x54] ss:$8 sps:$4 sm:$0xff]   ;;  %v2015_v11 = vld [vmem:[%s2777_s4 + $0xd0] ss:$8 sps:$4 sm:$0xff]  }
   0xf   : > { %429 = vmatprep.subr.bf16.mxu0 %v2005_v5  ;;  %550 = vmatprep.subr.bf16.mxu1 %v2007_v6  ;;  %v2016_v12 = vld [vmem:[%s2777_s4 + $0x50] ss:$8 sps:$4 sm:$0xff]   ;;  %v2017_v13 = vld [vmem:[%s2777_s4 + $0xc4] ss:$8 sps:$4 sm:$0xff]   ;;  %v2021_v15 = vld [vmem:[%s2777_s4 + $0xc0] ss:$8 sps:$4 sm:$0xff]  }
  0x10   : > { %v2019_v14 = vld [vmem:[%s2777_s4 + $0x44] ss:$8 sps:$4 sm:$0xff]   ;;  %v2022_v16 = vld [vmem:[%s2777_s4 + $0x40] ss:$8 sps:$4 sm:$0xff]   ;;  %v2023_v17 = vld [vmem:[%s2777_s4 + $0xb4] ss:$8 sps:$4 sm:$0xff]  }
  0x11   : > { %v2025_v18 = vld [vmem:[%s2777_s4 + $0x34] ss:$8 sps:$4 sm:$0xff]   ;;  %v2027_v19 = vld [vmem:[%s2777_s4 + $0xb0] ss:$8 sps:$4 sm:$0xff]   ;;  %v2029_v21 = vld [vmem:[%s2777_s4 + $0xa4] ss:$8 sps:$4 sm:$0xff]  }
  0x12   : > { %430 = vmatpush1.bf16.msra.mxu0 %v2009_v7  ;;  %551 = vmatpush1.bf16.msra.mxu1 %v2010_v8  ;;  %v2028_v20 = vld [vmem:[%s2777_s4 + $0x30] ss:$8 sps:$4 sm:$0xff]   ;;  %v2031_v22 = vld [vmem:[%s2777_s4 + $0x24] ss:$8 sps:$4 sm:$0xff]   ;;  %s2347_s23 = sshll.u32 %s2781_s22, 3  ;;  %s1988_s9 = sshll.u32 %s2781_s22, 2 }
  0x13   : > { %431 = vmatprep.subr.bf16.mxu0 %v2011_v9  ;;  %552 = vmatprep.subr.bf16.mxu1 %v2013_v10  ;;  %v2033_v23 = vld [vmem:[%s2777_s4 + $0xa0] ss:$8 sps:$4 sm:$0xff]   ;;  %s2359_s30 = scalar_lea.vmem %s2774_s1, %s2347_s23  ;;  %v2035_v25 = vld [vmem:[%s2777_s4 + $0x94] ss:$8 sps:$4 sm:$0xff]   ;;  %v2039_v27 = vld [vmem:[%s2777_s4 + $0x90] ss:$8 sps:$4 sm:$0xff]   ;;  %s2386_s26 = scalar_lea.vmem %s2773_s0, %s2347_s23 }
  0x14   : > { %v2034_v24 = vld [vmem:[%s2777_s4 + $0x20] ss:$8 sps:$4 sm:$0xff]   ;;  %v2037_v26 = vld [vmem:[%s2777_s4 + $0x14] ss:$8 sps:$4 sm:$0xff]   ;;  %v2040_v28 = vld [vmem:[%s2777_s4 + $0x10] ss:$8 sps:$4 sm:$0xff]   ;;  %s2453_s29 = scalar_lea.vmem %s2775_s2, %s2347_s23  ;;  %s306_s10 = scalar_lea.vmem %s2776_s3, %s2347_s23 }
  0x15   : > { %v2041_v29 = vld [vmem:[%s2777_s4 + $0x84] ss:$8 sps:$4 sm:$0xff]   ;;  %v2045_v31 = vld [vmem:[%s2777_s4 + $0x80] ss:$8 sps:$4 sm:$0xff]   ;;  %v2050_v33 = vld [vmem:[%s2777_s4 + $0x174] ss:$8 sps:$4 sm:$0xff]   ;;  %s311_s12 = scalar_lea.vmem %s2779_s6, %s1988_s9 }
  0x16   : > { %432 = vmatpush1.bf16.msra.mxu0 %v2015_v11  ;;  %553 = vmatpush1.bf16.msra.mxu1 %v2016_v12  ;;  %v2043_v30 = vld [vmem:[%s2777_s4 + $0x4] ss:$8 sps:$4 sm:$0xff]   ;;  %v2046_v32 = vld [vmem:[%s2777_s4] ss:$8 sps:$4 sm:$0xff]   ;;  %v2053_v34 = vld [vmem:[%s2777_s4 + $0x1f4] ss:$8 sps:$4 sm:$0xff]  }
  0x17   : > { %433 = vmatprep.subr.bf16.mxu0 %v2017_v13  ;;  %554 = vmatprep.subr.bf16.mxu1 %v2019_v14  ;;  %v330_v35 = vld [vmem:[%s2359_s30] sm:$0x7]  ;;  %v2048_v37 = vld [vmem:[%s2777_s4 + $0x170] ss:$8 sps:$4 sm:$0xff]   ;;  %v2056_v39 = vld [vmem:[%s2777_s4 + $0x164] ss:$8 sps:$4 sm:$0xff]  }
  0x18   : > { %v313_v36 = vld [vmem:[%s2386_s26] sm:$0x7]  ;;  %v2051_v38 = vld [vmem:[%s2777_s4 + $0x1f0] ss:$8 sps:$4 sm:$0xff]   ;;  %v2059_v40 = vld [vmem:[%s2777_s4 + $0x1e4] ss:$8 sps:$4 sm:$0xff]  }
  0x19   : > { %v2054_v41 = vld [vmem:[%s2777_s4 + $0x160] ss:$8 sps:$4 sm:$0xff]   ;;  %v2062_v43 = vld [vmem:[%s2777_s4 + $0x154] ss:$8 sps:$4 sm:$0xff]   ;;  %v2060_v45 = vld [vmem:[%s2777_s4 + $0x150] ss:$8 sps:$4 sm:$0xff]  }
  0x1a   : > { %434 = vmatpush1.bf16.msra.mxu0 %v2021_v15  ;;  %555 = vmatpush1.bf16.msra.mxu1 %v2022_v16  ;;  %v2057_v42 = vld [vmem:[%s2777_s4 + $0x1e0] ss:$8 sps:$4 sm:$0xff]   ;;  %v2065_v44 = vld [vmem:[%s2777_s4 + $0x1d4] ss:$8 sps:$4 sm:$0xff]   ;;  %v2063_v46 = vld [vmem:[%s2777_s4 + $0x1d0] ss:$8 sps:$4 sm:$0xff]  }
  0x1b   : > { %435 = vmatprep.subr.bf16.mxu0 %v2023_v17  ;;  %556 = vmatprep.subr.bf16.mxu1 %v2025_v18  ;;  %v2068_v47 = vld [vmem:[%s2777_s4 + $0x144] ss:$8 sps:$4 sm:$0xff]   ;;  %v2066_v49 = vld [vmem:[%s2777_s4 + $0x140] ss:$8 sps:$4 sm:$0xff]   ;;  %v2074_v51 = vld [vmem:[%s2777_s4 + $0x134] ss:$8 sps:$4 sm:$0xff]  }
  0x1c   : > { %v2071_v48 = vld [vmem:[%s2777_s4 + $0x1c4] ss:$8 sps:$4 sm:$0xff]   ;;  %v2069_v50 = vld [vmem:[%s2777_s4 + $0x1c0] ss:$8 sps:$4 sm:$0xff]   ;;  %v2077_v52 = vld [vmem:[%s2777_s4 + $0x1b4] ss:$8 sps:$4 sm:$0xff]  }
  0x1d   : > { %v2072_v53 = vld [vmem:[%s2777_s4 + $0x130] ss:$8 sps:$4 sm:$0xff]   ;;  %v2080_v55 = vld [vmem:[%s2777_s4 + $0x124] ss:$8 sps:$4 sm:$0xff]   ;;  %v2078_v57 = vld [vmem:[%s2777_s4 + $0x120] ss:$8 sps:$4 sm:$0xff]  }
  0x1e   : > { %436 = vmatpush1.bf16.msra.mxu0 %v2027_v19  ;;  %557 = vmatpush1.bf16.msra.mxu1 %v2028_v20  ;;  %v2075_v54 = vld [vmem:[%s2777_s4 + $0x1b0] ss:$8 sps:$4 sm:$0xff]   ;;  %v2083_v56 = vld [vmem:[%s2777_s4 + $0x1a4] ss:$8 sps:$4 sm:$0xff]   ;;  %v2096_v58 = vld [vmem:[%s2386_s26] ss:$0 sps:$4 sm:$0xff]  }
  0x1f   : > { %437 = vmatprep.subr.bf16.mxu0 %v2029_v21  ;;  %558 = vmatprep.subr.bf16.mxu1 %v2031_v22  ;;  %v2081_v59 = vld [vmem:[%s2777_s4 + $0x1a0] ss:$8 sps:$4 sm:$0xff]   ;;  %v2086_v60 = vld [vmem:[%s2777_s4 + $0x114] ss:$8 sps:$4 sm:$0xff]   ;;  %v2084_v62 = vld [vmem:[%s2777_s4 + $0x110] ss:$8 sps:$4 sm:$0xff]  }
  0x20   : > { %v2089_v61 = vld [vmem:[%s2777_s4 + $0x194] ss:$8 sps:$4 sm:$0xff]   ;;  %v612_v63 = vshll.u32 %v2096_v58, 16  ;;  %v2087_v0 = vld [vmem:[%s2777_s4 + $0x190] ss:$8 sps:$4 sm:$0xff]   ;;  %v610_v5 = vshrl.u32 %v2096_v58, 16 }
  0x21   : > { %v2092_v1 = vld [vmem:[%s2777_s4 + $0x104] ss:$8 sps:$4 sm:$0xff]   ;;  %v2090_v4 = vld [vmem:[%s2777_s4 + $0x100] ss:$8 sps:$4 sm:$0xff]   ;;  %v2099_v8 = vld [vmem:[%s2777_s4 + $0x274] ss:$8 sps:$4 sm:$0xff]  }
  0x22   : > { %438 = vmatpush1.bf16.msra.mxu0 %v2033_v23  ;;  %559 = vmatpush1.bf16.msra.mxu1 %v2034_v24  ;;  %v2095_v3 = vld [vmem:[%s2777_s4 + $0x184] ss:$8 sps:$4 sm:$0xff]   ;;  %v614_v6 = vrot.slane %v612_v63, 1  ;;  %v2093_v7 = vld [vmem:[%s2777_s4 + $0x180] ss:$8 sps:$4 sm:$0xff]  }
  0x23   : > { %439 = vmatprep.subr.bf16.mxu0 %v2035_v25  ;;  %560 = vmatprep.subr.bf16.mxu1 %v2037_v26  ;;  %v2103_v9 = vld [vmem:[%s2777_s4 + $0x2f4] ss:$8 sps:$4 sm:$0xff]   ;;  %v2097_v11 = vld [vmem:[%s2777_s4 + $0x270] ss:$8 sps:$4 sm:$0xff]   ;;  %v740_v12 = vld [vmem:[%s2453_s29] sm:$0x7] }
  0x24   : > { %v615_v10 = vor.u32 %v614_v6, %v610_v5  ;;  %v2101_v13 = vld [vmem:[%s2777_s4 + $0x2f0] ss:$8 sps:$4 sm:$0xff]   ;;  %v2106_v14 = vld [vmem:[%s2777_s4 + $0x264] ss:$8 sps:$4 sm:$0xff]   ;;  %v2104_v16 = vld [vmem:[%s2777_s4 + $0x260] ss:$8 sps:$4 sm:$0xff]  }
  0x25   : > { %v2109_v15 = vld [vmem:[%s2777_s4 + $0x2e4] ss:$8 sps:$4 sm:$0xff]   ;;  %v2107_v17 = vld [vmem:[%s2777_s4 + $0x2e0] ss:$8 sps:$4 sm:$0xff]   ;;  %v2112_v18 = vld [vmem:[%s2777_s4 + $0x254] ss:$8 sps:$4 sm:$0xff]  }
  0x26   : > { %440 = vmatpush1.bf16.msra.mxu0 %v2039_v27  ;;  %561 = vmatpush1.bf16.msra.mxu1 %v2040_v28  ;;  %v2115_v19 = vld [vmem:[%s2777_s4 + $0x2d4] ss:$8 sps:$4 sm:$0xff]   ;;  %v2110_v20 = vld [vmem:[%s2777_s4 + $0x250] ss:$8 sps:$4 sm:$0xff]   ;;  %v2118_v22 = vld [vmem:[%s2777_s4 + $0x244] ss:$8 sps:$4 sm:$0xff]  }
  0x27   : > { %441 = vmatprep.subr.bf16.mxu0 %v2041_v29  ;;  %562 = vmatprep.subr.bf16.mxu1 %v2043_v30  ;;  %v2113_v21 = vld [vmem:[%s2777_s4 + $0x2d0] ss:$8 sps:$4 sm:$0xff]   ;;  %v2121_v23 = vld [vmem:[%s2777_s4 + $0x2c4] ss:$8 sps:$4 sm:$0xff]   ;;  %v2116_v24 = vld [vmem:[%s2777_s4 + $0x240] ss:$8 sps:$4 sm:$0xff]  }
  0x28   : > { %v2119_v25 = vld [vmem:[%s2777_s4 + $0x2c0] ss:$8 sps:$4 sm:$0xff]   ;;  %v2124_v26 = vld [vmem:[%s2777_s4 + $0x234] ss:$8 sps:$4 sm:$0xff]   ;;  %v2122_v28 = vld [vmem:[%s2777_s4 + $0x230] ss:$8 sps:$4 sm:$0xff]  }
  0x29   : > { %v2127_v27 = vld [vmem:[%s2777_s4 + $0x2b4] ss:$8 sps:$4 sm:$0xff]   ;;  %v2125_v29 = vld [vmem:[%s2777_s4 + $0x2b0] ss:$8 sps:$4 sm:$0xff]   ;;  %v2130_v30 = vld [vmem:[%s2777_s4 + $0x224] ss:$8 sps:$4 sm:$0xff]  }
  0x2a   : > { %442 = vmatpush1.bf16.msra.mxu0 %v2045_v31  ;;  %563 = vmatpush1.bf16.msra.mxu1 %v2046_v32  ;;  %v2133_v31 = vld [vmem:[%s2777_s4 + $0x2a4] ss:$8 sps:$4 sm:$0xff]   ;;  %v2100_v32 = vld [vmem:[%s2453_s29] ss:$0 sps:$4 sm:$0xff]   ;;  %v2158_v58 = vld [vmem:[%s2777_s4 + $0x350] ss:$8 sps:$4 sm:$0xff]  }
  0x2b   : > { %697 = vmatprep.subr.bf16.mxu0 %v2050_v33  ;;  %837 = vmatprep.subr.bf16.mxu1 %v2053_v34  ;;  %v2128_v33 = vld [vmem:[%s2777_s4 + $0x220] ss:$8 sps:$4 sm:$0xff]   ;;  %v2666_v6 = vld [vmem:[%s2386_s26 + $0x4] sm:$0x1]  ;;  %vm1702_vm0 = vsmask.f32 1280 }
  0x2c   : > { %v2131_v34 = vld [vmem:[%s2777_s4 + $0x2a0] ss:$8 sps:$4 sm:$0xff]   ;;  %vm1703_vm1 = vsmask.f32 3336  ;;  %vm1705_vm3 = vsmask.f32 5392 }
  0x2d   : > { %460 = vmatmul.mubr.bf16.vlgmr.msra.gmra.mxu0 %v330_v35  ;;  %581 = vmatmul.mubr.bf16.vlgmr.msra.gmra.mxu1 %v313_v36  ;;  %v2136_v35 = vld [vmem:[%s2777_s4 + $0x214] ss:$8 sps:$4 sm:$0xff]   ;;  %v2167_v63 = vld [vmem:[%s2777_s4 + $0x3c0] ss:$8 sps:$4 sm:$0xff]   ;;  %vm1704_vm2 = vmor %vm1702_vm0, %vm1703_vm1  ;;  %vm1707_vm5 = vsmask.f32 7448 }
  0x2e   : > { %698 = vmatpush1.bf16.msra.mxu0 %v2048_v37  ;;  %838 = vmatpush1.bf16.msra.mxu1 %v2051_v38  ;;  %v2139_v36 = vld [vmem:[%s2777_s4 + $0x294] ss:$8 sps:$4 sm:$0xff]   ;;  %v1043_v37 = vshll.u32 %v2100_v32, 16  ;;  %v2134_v38 = vld [vmem:[%s2777_s4 + $0x210] ss:$8 sps:$4 sm:$0xff]   ;;  %vm1706_vm4 = vmor %vm1704_vm2, %vm1705_vm3 }
  0x2f   : > { %699 = vmatprep.subr.bf16.mxu0 %v2056_v39  ;;  %839 = vmatprep.subr.bf16.mxu1 %v2059_v40  ;;  %v2137_v39 = vld [vmem:[%s2777_s4 + $0x290] ss:$8 sps:$4 sm:$0xff]   ;;  %v2142_v40 = vld [vmem:[%s2777_s4 + $0x204] ss:$8 sps:$4 sm:$0xff]   ;;  %v1171_v5 = vld [vmem:[%s2386_s26] sm:$0xe] }
  0x30   : > { %729 = vmatprep.mubr.bf16.mxu0 %v2228_v2  ;;  %869 = vmatprep.mubr.bf16.mxu1 %v2228_v2  ;;  %vm1708_vm6 = vmor %vm1706_vm4, %vm1707_vm5 }
  0x32   : > { %700 = vmatpush1.bf16.msra.mxu0 %v2054_v41  ;;  %840 = vmatpush1.bf16.msra.mxu1 %v2057_v42  ;;  %v2145_v41 = vld [vmem:[%s2777_s4 + $0x284] ss:$8 sps:$4 sm:$0xff]   ;;  %v1041_v42 = vshrl.u32 %v2100_v32, 16  ;;  %v2195_v32 = vld [vmem:[%s2777_s4 + $0x470] ss:$8 sps:$4 sm:$0xff]  }
  0x33   : > { %701 = vmatprep.subr.bf16.mxu0 %v2062_v43  ;;  %841 = vmatprep.subr.bf16.mxu1 %v2065_v44  ;;  %v1045_v43 = vrot.slane %v1043_v37, 1  ;;  %v2140_v44 = vld [vmem:[%s2777_s4 + $0x200] ss:$8 sps:$4 sm:$0xff]   ;;  %v2206_v37 = vld [vmem:[%s2777_s4 + $0x444] ss:$8 sps:$4 sm:$0xff]  }
  0x36   : > { %702 = vmatpush1.bf16.msra.mxu0 %v2060_v45  ;;  %842 = vmatpush1.bf16.msra.mxu1 %v2063_v46  ;;  %v2143_v45 = vld [vmem:[%s2777_s4 + $0x280] ss:$8 sps:$4 sm:$0xff]   ;;  %v2148_v46 = vld [vmem:[%s2777_s4 + $0x374] ss:$8 sps:$4 sm:$0xff]  }
  0x37   : > { %703 = vmatprep.subr.bf16.mxu0 %v2068_v47  ;;  %843 = vmatprep.subr.bf16.mxu1 %v2071_v48  ;;  %v2151_v47 = vld [vmem:[%s2777_s4 + $0x3f4] ss:$8 sps:$4 sm:$0xff]   ;;  %v880_v48 = vld [vmem:[%s306_s10] sm:$0x7] }
  0x3a   : > { %704 = vmatpush1.bf16.msra.mxu0 %v2066_v49  ;;  %844 = vmatpush1.bf16.msra.mxu1 %v2069_v50  ;;  %v2146_v49 = vld [vmem:[%s2777_s4 + $0x370] ss:$8 sps:$4 sm:$0xff]   ;;  %v1046_v50 = vor.u32 %v1045_v43, %v1041_v42  ;;  %v2215_v42 = vld [vmem:[%s2777_s4 + $0x414] ss:$8 sps:$4 sm:$0xff]  }
  0x3b   : > { %705 = vmatprep.subr.bf16.mxu0 %v2074_v51  ;;  %845 = vmatprep.subr.bf16.mxu1 %v2077_v52  ;;  %v2149_v51 = vld [vmem:[%s2777_s4 + $0x3f0] ss:$8 sps:$4 sm:$0xff]   ;;  %v2154_v52 = vld [vmem:[%s2777_s4 + $0x364] ss:$8 sps:$4 sm:$0xff]  }
  0x3c   : > { %v2213_v43 = vld [vmem:[%s2777_s4 + $0x410] ss:$8 sps:$4 sm:$0xff]  }
  0x3e   : > { %706 = vmatpush1.bf16.msra.mxu0 %v2072_v53  ;;  %846 = vmatpush1.bf16.msra.mxu1 %v2075_v54  ;;  %v2157_v53 = vld [vmem:[%s2777_s4 + $0x3e4] ss:$8 sps:$4 sm:$0xff]   ;;  %v2152_v54 = vld [vmem:[%s2777_s4 + $0x360] ss:$8 sps:$4 sm:$0xff]  }
  0x3f   : > { %707 = vmatprep.subr.bf16.mxu0 %v2080_v55  ;;  %847 = vmatprep.subr.bf16.mxu1 %v2083_v56  ;;  %v2155_v55 = vld [vmem:[%s2777_s4 + $0x3e0] ss:$8 sps:$4 sm:$0xff]   ;;  %v2160_v56 = vld [vmem:[%s2777_s4 + $0x354] ss:$8 sps:$4 sm:$0xff]  }
  0x42   : > { %708 = vmatpush1.bf16.msra.mxu0 %v2078_v57  ;;  %848 = vmatpush1.bf16.msra.mxu1 %v2081_v59  ;;  %v2163_v57 = vld [vmem:[%s2777_s4 + $0x3d4] ss:$8 sps:$4 sm:$0xff]   ;;  %v2161_v59 = vld [vmem:[%s2777_s4 + $0x3d0] ss:$8 sps:$4 sm:$0xff]  }
  0x43   : > { %709 = vmatprep.subr.bf16.mxu0 %v2086_v60  ;;  %849 = vmatprep.subr.bf16.mxu1 %v2089_v61  ;;  %v2166_v60 = vld [vmem:[%s2777_s4 + $0x344] ss:$8 sps:$4 sm:$0xff]  }
  0x44   : > { %v2169_v61 = vld [vmem:[%s2777_s4 + $0x3c4] ss:$8 sps:$4 sm:$0xff]  }
  0x46   : > { %710 = vmatpush1.bf16.msra.mxu0 %v2084_v62  ;;  %850 = vmatpush1.bf16.msra.mxu1 %v2087_v0  ;;  %v2164_v62 = vld [vmem:[%s2777_s4 + $0x340] ss:$8 sps:$4 sm:$0xff]   ;;  %v2172_v0 = vld [vmem:[%s2777_s4 + $0x334] ss:$8 sps:$4 sm:$0xff]  }
  0x47   : > { %711 = vmatprep.subr.bf16.mxu0 %v2092_v1  ;;  %851 = vmatprep.subr.bf16.mxu1 %v2095_v3  ;;  %v2175_v1 = vld [vmem:[%s2777_s4 + $0x3b4] ss:$8 sps:$4 sm:$0xff]   ;;  %v2170_v3 = vld [vmem:[%s2777_s4 + $0x330] ss:$8 sps:$4 sm:$0xff]  }
  0x4a   : > { %712 = vmatpush1.bf16.msra.mxu0 %v2090_v4  ;;  %852 = vmatpush1.bf16.msra.mxu1 %v2093_v7  ;;  %v2173_v4 = vld [vmem:[%s2777_s4 + $0x3b0] ss:$8 sps:$4 sm:$0xff]   ;;  %v2178_v7 = vld [vmem:[%s2777_s4 + $0x324] ss:$8 sps:$4 sm:$0xff]  }
  0x4b   : > { %977 = vmatprep.subr.bf16.mxu0 %v2099_v8  ;;  %1128 = vmatprep.subr.bf16.mxu1 %v2103_v9  ;;  %v2181_v8 = vld [vmem:[%s2777_s4 + $0x3a4] ss:$8 sps:$4 sm:$0xff]  }
  0x4c   : > { %v2047_v9 = vld [vmem:[%s2359_s30] sm:$0x1e]  }
  0x4d   : > { %730 = vmatmul.mubr.bf16.vlgmr.msra.gmra.mxu0 %v615_v10  ;;  %870 = vmatmul.mubr.bf16.vlgmr.msra.gmra.mxu1 %v740_v12  ;;  %v1925_v10 = vcombine.low %v1171_v5, %v2666_v6  ;;  %v2179_v12 = vld [vmem:[%s2777_s4 + $0x3a0] ss:$8 sps:$4 sm:$0xff]  }
  0x4e   : > { %978 = vmatpush1.bf16.msra.mxu0 %v2097_v11  ;;  %1129 = vmatpush1.bf16.msra.mxu1 %v2101_v13  ;;  %v2176_v11 = vld [vmem:[%s2777_s4 + $0x320] ss:$8 sps:$4 sm:$0xff]   ;;  %v2184_v13 = vld [vmem:[%s2777_s4 + $0x314] ss:$8 sps:$4 sm:$0xff]  }
  0x4f   : > { %979 = vmatprep.subr.bf16.mxu0 %v2106_v14  ;;  %1130 = vmatprep.subr.bf16.mxu1 %v2109_v15  ;;  %v2187_v14 = vld [vmem:[%s2777_s4 + $0x394] ss:$8 sps:$4 sm:$0xff]   ;;  %v1350_v15 = vshrl.u32 %v2047_v9, 16 }
  0x50   : > { %1009 = vmatprep.mubr.bf16.mxu0 %v2228_v2  ;;  %1160 = vmatprep.mubr.bf16.mxu1 %v2228_v2 }
  0x52   : > { %980 = vmatpush1.bf16.msra.mxu0 %v2104_v16  ;;  %1131 = vmatpush1.bf16.msra.mxu1 %v2107_v17  ;;  %v1353_v16 = vshll.u32 %v2047_v9, 16  ;;  %v1195_v17 = vshrl.u32 %v1925_v10, 16 }
  0x53   : > { %981 = vmatprep.subr.bf16.mxu0 %v2112_v18  ;;  %1132 = vmatprep.subr.bf16.mxu1 %v2115_v19  ;;  %v1198_v18 = vshll.u32 %v1925_v10, 16  ;;  %v2182_v19 = vld [vmem:[%s2777_s4 + $0x310] ss:$8 sps:$4 sm:$0xff]  }
  0x56   : > { %982 = vmatpush1.bf16.msra.mxu0 %v2110_v20  ;;  %1133 = vmatpush1.bf16.msra.mxu1 %v2113_v21  ;;  %v2185_v20 = vld [vmem:[%s2777_s4 + $0x390] ss:$8 sps:$4 sm:$0xff]   ;;  %v2190_v21 = vld [vmem:[%s2777_s4 + $0x304] ss:$8 sps:$4 sm:$0xff]  }
  0x57   : > { %983 = vmatprep.subr.bf16.mxu0 %v2118_v22  ;;  %1134 = vmatprep.subr.bf16.mxu1 %v2121_v23  ;;  %v2193_v22 = vld [vmem:[%s2777_s4 + $0x384] ss:$8 sps:$4 sm:$0xff]   ;;  %v1197_v23 = vrot.slane %v1195_v17, 1 }
  0x5a   : > { %984 = vmatpush1.bf16.msra.mxu0 %v2116_v24  ;;  %1135 = vmatpush1.bf16.msra.mxu1 %v2119_v25  ;;  %v1200_v24 = vrot.slane %v1198_v18, 2  ;;  %v1352_v25 = vrot.slane %v1350_v15, 1 }
  0x5b   : > { %985 = vmatprep.subr.bf16.mxu0 %v2124_v26  ;;  %1136 = vmatprep.subr.bf16.mxu1 %v2127_v27  ;;  %v1355_v26 = vrot.slane %v1353_v16, 2  ;;  %v2188_v27 = vld [vmem:[%s2777_s4 + $0x300] ss:$8 sps:$4 sm:$0xff]  }
  0x5e   : > { %986 = vmatpush1.bf16.msra.mxu0 %v2122_v28  ;;  %1137 = vmatpush1.bf16.msra.mxu1 %v2125_v29  ;;  %v2191_v28 = vld [vmem:[%s2777_s4 + $0x380] ss:$8 sps:$4 sm:$0xff]   ;;  %v2197_v29 = vld [vmem:[%s2777_s4 + $0x474] ss:$8 sps:$4 sm:$0xff]  }
  0x5f   : > { %987 = vmatprep.subr.bf16.mxu0 %v2130_v30  ;;  %1138 = vmatprep.subr.bf16.mxu1 %v2133_v31  ;;  %v1201_v30 = vor.u32 %v1200_v24, %v1197_v23  ;;  %v1356_v31 = vor.u32 %v1355_v26, %v1352_v25  ;;  %v1628_v24 = vlaneseq }
  0x62   : > { %988 = vmatpush1.bf16.msra.mxu0 %v2128_v33  ;;  %1139 = vmatpush1.bf16.msra.mxu1 %v2131_v34  ;;  %v2200_v33 = vld [vmem:[%s2777_s4 + $0x464] ss:$8 sps:$4 sm:$0xff]   ;;  %v2198_v34 = vld [vmem:[%s2777_s4 + $0x460] ss:$8 sps:$4 sm:$0xff]  }
  0x63   : > { %989 = vmatprep.subr.bf16.mxu0 %v2136_v35  ;;  %1140 = vmatprep.subr.bf16.mxu1 %v2139_v36  ;;  %v2203_v35 = vld [vmem:[%s2777_s4 + $0x454] ss:$8 sps:$4 sm:$0xff]   ;;  %v2201_v36 = vld [vmem:[%s2777_s4 + $0x450] ss:$8 sps:$4 sm:$0xff]  }
  0x66   : > { %990 = vmatpush1.bf16.msra.mxu0 %v2134_v38  ;;  %1141 = vmatpush1.bf16.msra.mxu1 %v2137_v39  ;;  %v2209_v38 = vld [vmem:[%s2777_s4 + $0x434] ss:$8 sps:$4 sm:$0xff]   ;;  %v2207_v39 = vld [vmem:[%s2777_s4 + $0x430] ss:$8 sps:$4 sm:$0xff]  }
  0x67   : > { %991 = vmatprep.subr.bf16.mxu0 %v2142_v40  ;;  %1142 = vmatprep.subr.bf16.mxu1 %v2145_v41  ;;  %v2212_v40 = vld [vmem:[%s2777_s4 + $0x424] ss:$8 sps:$4 sm:$0xff]   ;;  %v2210_v41 = vld [vmem:[%s2777_s4 + $0x420] ss:$8 sps:$4 sm:$0xff]  }
  0x6a   : > { %992 = vmatpush1.bf16.msra.mxu0 %v2140_v44  ;;  %1143 = vmatpush1.bf16.msra.mxu1 %v2143_v45  ;;  %v1481_v44 = vld [vmem:[%s2386_s26] sm:$0xc]  ;;  %v2218_v45 = vld [vmem:[%s2777_s4 + $0x404] ss:$8 sps:$4 sm:$0xff]  }
  0x6b   : > { %1283 = vmatprep.subr.bf16.mxu0 %v2148_v46  ;;  %1438 = vmatprep.subr.bf16.mxu1 %v2151_v47  ;;  %v1959_v46 = vcombine.low %v1481_v44, %v2666_v6  ;;  %v2216_v47 = vld [vmem:[%s2777_s4 + $0x400] ss:$8 sps:$4 sm:$0xff]  }
  0x6d   : > { %1010 = vmatmul.mubr.bf16.vlgmr.msra.gmra.mxu0 %v880_v48  ;;  %1161 = vmatmul.mubr.bf16.vlgmr.msra.gmra.mxu1 %v1046_v50  ;;  %v1501_v48 = vrot.slane %v1959_v46, 2 }
  0x6e   : > { %1284 = vmatpush1.bf16.msra.mxu0 %v2146_v49  ;;  %1439 = vmatpush1.bf16.msra.mxu1 %v2149_v51 }
  0x6f   : > { %1285 = vmatprep.subr.bf16.mxu0 %v2154_v52  ;;  %1440 = vmatprep.subr.bf16.mxu1 %v2157_v53 }
  0x70   : > { %1315 = vmatprep.mubr.bf16.mxu0 %v2228_v2  ;;  %1470 = vmatprep.mubr.bf16.mxu1 %v2228_v2 }
  0x72   : > { %1286 = vmatpush1.bf16.msra.mxu0 %v2152_v54  ;;  %1441 = vmatpush1.bf16.msra.mxu1 %v2155_v55 }
  0x73   : > { %1287 = vmatprep.subr.bf16.mxu0 %v2160_v56  ;;  %1442 = vmatprep.subr.bf16.mxu1 %v2163_v57 }
  0x76   : > { %1288 = vmatpush1.bf16.msra.mxu0 %v2158_v58  ;;  %1443 = vmatpush1.bf16.msra.mxu1 %v2161_v59 }
  0x77   : > { %1289 = vmatprep.subr.bf16.mxu0 %v2166_v60  ;;  %1444 = vmatprep.subr.bf16.mxu1 %v2169_v61 }
  0x7a   : > { %1290 = vmatpush1.bf16.msra.mxu0 %v2164_v62  ;;  %1445 = vmatpush1.bf16.msra.mxu1 %v2167_v63 }
  0x7b   : > { %1291 = vmatprep.subr.bf16.mxu0 %v2172_v0  ;;  %1446 = vmatprep.subr.bf16.mxu1 %v2175_v1 }
  0x7e   : > { %1292 = vmatpush1.bf16.msra.mxu0 %v2170_v3  ;;  %1447 = vmatpush1.bf16.msra.mxu1 %v2173_v4 }
  0x7f   : > { %1293 = vmatprep.subr.bf16.mxu0 %v2178_v7  ;;  %1448 = vmatprep.subr.bf16.mxu1 %v2181_v8 }
  0x82   : > { %1294 = vmatpush1.bf16.msra.mxu0 %v2176_v11  ;;  %1449 = vmatpush1.bf16.msra.mxu1 %v2179_v12 }
  0x83   : > { %1295 = vmatprep.subr.bf16.mxu0 %v2184_v13  ;;  %1450 = vmatprep.subr.bf16.mxu1 %v2187_v14 }
  0x86   : > { %1296 = vmatpush1.bf16.msra.mxu0 %v2182_v19  ;;  %1451 = vmatpush1.bf16.msra.mxu1 %v2185_v20 }
  0x87   : > { %1297 = vmatprep.subr.bf16.mxu0 %v2190_v21  ;;  %1452 = vmatprep.subr.bf16.mxu1 %v2193_v22 }
  0x8a   : > { %1298 = vmatpush1.bf16.msra.mxu0 %v2188_v27  ;;  %1453 = vmatpush1.bf16.msra.mxu1 %v2191_v28  ;;  %v1629_v27 = vshrl.u32 %v1628_v24, 7 }
  0x8b   : > { %1583 = vmatprep.subr.bf16.mxu0 %v2197_v29 }
  0x8d   : > { %1316 = vmatmul.mubr.bf16.vlgmr.msra.gmra.mxu0 %v1201_v30  ;;  %1471 = vmatmul.mubr.bf16.vlgmr.msra.gmra.mxu1 %v1356_v31  ;;  %v1630_v31 = vsub.s32 0, %v1629_v27 }
  0x8e   : > { %1584 = vmatpush1.bf16.msra.mxu0 %v2195_v32  ;;  %1615 = vmatprep.mubr.bf16.mxu0 %v2228_v2  ;;  %v2204_v2 = vld [vmem:[%s2777_s4 + $0x440] ss:$8 sps:$4 sm:$0xff]  }
  0x8f   : > { %1585 = vmatprep.subr.bf16.mxu0 %v2200_v33  ;;  %v1626_v32 = vld [vmem:[%s2778_s5] ss:$8 sm:$0x3] }
  0x92   : > { %1586 = vmatpush1.bf16.msra.mxu0 %v2198_v34  ;;  %v1634_v34 = vsub.s32 1, %v1629_v27 }
  0x93   : > { %1587 = vmatprep.subr.bf16.mxu0 %v2203_v35 }
  0x96   : > { %1588 = vmatpush1.bf16.msra.mxu0 %v2201_v36  ;;  %v1631_v36 = vrot.slane %v1626_v32, %v1630_v31 }
  0x97   : > { %1589 = vmatprep.subr.bf16.mxu0 %v2206_v37 }
  0x9a   : > { %1590 = vmatpush1.bf16.msra.mxu0 %v2204_v2  ;;  %v1976_v2 = vld [vmem:[%s2778_s5 + $0x1] ss:$8 sm:$0x3] }
  0x9b   : > { %1591 = vmatprep.subr.bf16.mxu0 %v2209_v38 }
  0x9e   : > { %1592 = vmatpush1.bf16.msra.mxu0 %v2207_v39 }
  0x9f   : > { %1593 = vmatprep.subr.bf16.mxu0 %v2212_v40  ;;  %v1635_v40 = vrot.slane %v1626_v32, %v1634_v34 }
  0xa2   : > { %1594 = vmatpush1.bf16.msra.mxu0 %v2210_v41 }
  0xa3   : > { %1595 = vmatprep.subr.bf16.mxu0 %v2215_v42 }
  0xa6   : > { %1596 = vmatpush1.bf16.msra.mxu0 %v2213_v43  ;;  %v1648_v43 = vrot.slane %v1976_v2, %v1630_v31 }
  0xa7   : > { %1597 = vmatprep.subr.bf16.mxu0 %v2218_v45  ;;  %v1977_v45 = vld [vmem:[%s2778_s5 + $0x2] ss:$8 sm:$0x3] }
  0xaa   : > { %1598 = vmatpush1.bf16.msra.mxu0 %v2216_v47 }
  0xad   : > { %1616 = vmatmul.mubr.bf16.vlgmr.msra.gmra.mxu0 %v1501_v48 }
  0xed   : > { %v461_v49 = vpop.f32.mrf.mxu0  ;;  %v582_v50 = vpop.f32.mrf.mxu1 }
  0xee   : > { %v583_v51 = vadd.f32 %v582_v50, %v461_v49  ;;  %v1652_v49 = vrot.slane %v1976_v2, %v1634_v34 }
  0xef   : > { %v463_v52 = vpop.f32.mrf.mxu0  ;;  %v584_v53 = vpop.f32.mrf.mxu1 }
  0xf0   : > { %v585_v54 = vadd.f32 %v584_v53, %v463_v52  ;;  %v1663_v52 = vrot.slane %v1977_v45, %v1630_v31 }
  0xf1   : > { %v465_v55 = vpop.f32.mrf.mxu0  ;;  %v586_v56 = vpop.f32.mrf.mxu1 }
  0xf3   : > { %v466_v57 = vpop.f32.mrf.mxu0  ;;  %v587_v58 = vpop.f32.mrf.mxu1 }
 0x10d   : > { %v731_v59 = vpop.f32.mrf.mxu0  ;;  %v871_v60 = vpop.f32.mrf.mxu1 }
 0x10e   : > { %v738_v61 = vadd.f32 %v731_v59, %v583_v51 }
 0x10f   : > { %v733_v62 = vpop.f32.mrf.mxu0  ;;  %v873_v63 = vpop.f32.mrf.mxu1 }
 0x110   : > { %v739_v0 = vadd.f32 %v733_v62, %v585_v54  ;;  %v878_v1 = vadd.f32 %v871_v60, %v738_v61  ;;  %v1667_v54 = vrot.slane %v1977_v45, %v1634_v34 }
 0x111   : > { %v735_v3 = vpop.f32.mrf.mxu0  ;;  %v875_v4 = vpop.f32.mrf.mxu1 }
 0x112   : > { %v879_v5 = vadd.f32 %v873_v63, %v739_v0 }
 0x113   : > { %v736_v6 = vpop.f32.mrf.mxu0  ;;  %v876_v7 = vpop.f32.mrf.mxu1 }
 0x12d   : > { %v1011_v8 = vpop.f32.mrf.mxu0  ;;  %v1162_v9 = vpop.f32.mrf.mxu1 }
 0x12e   : > { %v1018_v25 = vadd.f32 %v1011_v8, %v878_v1 }
 0x12f   : > { %v1013_v10 = vpop.f32.mrf.mxu0  ;;  %v1164_v11 = vpop.f32.mrf.mxu1 }
 0x130   : > { %v1019_v26 = vadd.f32 %v1013_v10, %v879_v5  ;;  %v1169_v28 = vadd.f32 %v1162_v9, %v1018_v25 }
 0x131   : > { %v1015_v12 = vpop.f32.mrf.mxu0  ;;  %v1166_v13 = vpop.f32.mrf.mxu1 }
 0x132   : > { %v1170_v29 = vadd.f32 %v1164_v11, %v1019_v26 }
 0x133   : > { %v1016_v14 = vpop.f32.mrf.mxu0  ;;  %v1167_v15 = vpop.f32.mrf.mxu1 }
 0x14d   : > { %v1317_v16 = vpop.f32.mrf.mxu0  ;;  %v1472_v17 = vpop.f32.mrf.mxu1 }
 0x14e   : > { %v1324_v30 = vadd.f32 %v1317_v16, %v1169_v28 }
 0x14f   : > { %v1319_v18 = vpop.f32.mrf.mxu0  ;;  %v1474_v19 = vpop.f32.mrf.mxu1 }
 0x150   : > { %v1325_v33 = vadd.f32 %v1319_v18, %v1170_v29  ;;  %v1479_v35 = vadd.f32 %v1472_v17, %v1324_v30 }
 0x151   : > { %v1321_v20 = vpop.f32.mrf.mxu0  ;;  %v1476_v21 = vpop.f32.mrf.mxu1 }
 0x152   : > { %v1480_v38 = vadd.f32 %v1474_v19, %v1325_v33 }
 0x153   : > { %v1322_v22 = vpop.f32.mrf.mxu0  ;;  %v1477_v23 = vpop.f32.mrf.mxu1 }
 0x16d   : > { %v1617_v37 = vpop.f32.mrf.mxu0 }
 0x16e   : > { %v1624_v39 = vadd.f32 %v1617_v37, %v1479_v35 }
 0x16f   : > { %v1619_v41 = vpop.f32.mrf.mxu0 }
 0x170   : > { %v1638_v42 = vadd.f32 %v1631_v36, %v1624_v39  ;;  %v1625_v44 = vadd.f32 %v1619_v41, %v1480_v38 }
 0x171   : > { %v1621_v46 = vpop.f32.mrf.mxu0 }
 0x172   : > { %v1640_v47 = vmax.f32 %v1638_v42, 0.0  ;;  %v1639_v48 = vadd.f32 %v1635_v40, %v1625_v44 }
 0x173   : > { %v1622_v50 = vpop.f32.mrf.mxu0 }
 0x174   : > { %v1655_v51 = vmul.f32 %v1648_v43, %v1640_v47  ;;  %v1641_v53 = vmax.f32 %v1639_v48, 0.0 }
 0x176   : > { %v1656_v55 = vmul.f32 %v1652_v49, %v1641_v53  ;;  %v1670_v56 = vadd.f32 %v1663_v52, %v1655_v51 }
 0x178   : > { %v1671_v57 = vadd.f32 %v1667_v54, %v1656_v55 }
 0x17a   : > { %v1989_v58 = vpack.c.bf16 %v1671_v57, %v1670_v56 }
 0x17c   : > { %1680 = vst [vmem:[#allocation2] sm:$0x77] %v1989_v58 }
 0x183   : > { %v1979_v59 = vld.sshfl [vmem:[#allocation2] sm:$0x5 pattern:$0x76325410] }
 0x184   : > { %1691 = vst [vmem:[%s311_s12] sm:$0x5] %v1979_v59  ;;  %v1980_v60 = vld.sshfl [vmem:[#allocation2] sm:$0x5a pattern:$0x76325410] }
 0x185   : > { %v1701_v61 = vcombine.high %v1980_v60, %v1980_v60  ;;  %v1710_v63 = vshrl.u32 %v1980_v60, 16 }
 0x187   : > { %v1715_v62 = vshll.u32 %v1701_v61, 16 }
 0x189   : > { %v1717_v0 = vrot.slane %v1715_v62, 7 }
 0x18b   : > { %v1718_v1 = vsel %vm1708_vm6, %v1710_v63, %v1717_v0 }
 0x18c   : > { %1720 = vst [vmem:[%s311_s12] sm:$0xa] %v1718_v1 }
 0x18d PF: > { %s16_s21 = sadd.s32 1, %s2226_s21  }
 0x18e   : > { %p13_p4 = scmp.ge.s32.totalorder %s16_s21, 4  }
 0x190   :  { %15 = sbr.rel (!%p13_p4) target bundleno = 1 (0x1), region = 85 }

// kernel: _lambda_.10
= control target key start
LH: loop header
LB: loop body
LE: loop exit
PB: predicated region body
PF: predicated region fallthrough
CT: control target
= control target key end

     0   :  { %s3358_s12 = smov 0   ;;  %s4330_s0 = inlined_call_operand.vmem [shape: bf16[2,20,256], index: 0, kind: input, shape index: {}]   ;;  %s4331_s1 = inlined_call_operand.vmem [shape: bf16[2304,256], index: 1, kind: input, shape index: {}]   ;;  %s4332_s2 = inlined_call_operand.vmem [shape: f32[8,256], index: 2, kind: input, shape index: {}]   ;;  %s4333_s3 = inlined_call_operand.vmem [shape: bf16[2,4,256], index: 3, kind: output, shape index: {}]  }
   0x1 LB: > { %s2548_s13 = sadd.s32 4294967295, %s3336_s12   ;;  %p2552_p0 = scmp.ge.s32.totalorder %s3336_s12, 1  ;;  %s3336_s12 = sphi %s3358_s12, %s13_s12  }
   0x2   : > { %p137_p1 = scmp.lt.s32.totalorder %s3336_s12, 3 }
   0x4   : > { %p138_p2 = pnand %p2552_p0, %p137_p1 }
   0x5   : > { %p161_p3 = scmp.lt.s32.totalorder (!%p138_p2), %s2548_s13, 1 }
   0x6   : > { %141 = sbr.rel (%p138_p2) target bundleno = 553 (0x229), region = 32 }
   0xb   : > { %v2880_v0 = vld [vmem:[%s4331_s1 + $0x174] ss:$8 sps:$4 sm:$0xff]   ;;  %v2884_v2 = vld [vmem:[%s4331_s1 + $0x170] ss:$8 sps:$4 sm:$0xff]   ;;  %v2886_v4 = vld [vmem:[%s4331_s1 + $0x164] ss:$8 sps:$4 sm:$0xff]  }
   0xc   : > { %v2882_v1 = vld [vmem:[%s4331_s1 + $0x74] ss:$8 sps:$4 sm:$0xff]   ;;  %421 = vmatprep.subr.bf16.mxu0 %v2880_v0  ;;  %v2885_v3 = vld [vmem:[%s4331_s1 + $0x70] ss:$8 sps:$4 sm:$0xff]   ;;  %v2888_v5 = vld [vmem:[%s4331_s1 + $0x64] ss:$8 sps:$4 sm:$0xff]  }
   0xd   : > { %626 = vmatprep.subr.bf16.mxu1 %v2882_v1  ;;  %422 = vmatpush1.bf16.msra.mxu0 %v2884_v2  ;;  %v2890_v6 = vld [vmem:[%s4331_s1 + $0x160] ss:$8 sps:$4 sm:$0xff]   ;;  %v2892_v8 = vld [vmem:[%s4331_s1 + $0x154] ss:$8 sps:$4 sm:$0xff]   ;;  %v2896_v10 = vld [vmem:[%s4331_s1 + $0x150] ss:$8 sps:$4 sm:$0xff]  }
   0xe   : > { %627 = vmatpush1.bf16.msra.mxu1 %v2885_v3  ;;  %423 = vmatprep.subr.bf16.mxu0 %v2886_v4  ;;  %v2891_v7 = vld [vmem:[%s4331_s1 + $0x60] ss:$8 sps:$4 sm:$0xff]   ;;  %v2894_v9 = vld [vmem:[%s4331_s1 + $0x54] ss:$8 sps:$4 sm:$0xff]   ;;  %v2897_v11 = vld [vmem:[%s4331_s1 + $0x50] ss:$8 sps:$4 sm:$0xff]  }
   0xf   : > { %628 = vmatprep.subr.bf16.mxu1 %v2888_v5  ;;  %v2898_v12 = vld [vmem:[%s4331_s1 + $0x144] ss:$8 sps:$4 sm:$0xff]   ;;  %v2902_v14 = vld [vmem:[%s4331_s1 + $0x140] ss:$8 sps:$4 sm:$0xff]   ;;  %v2904_v16 = vld [vmem:[%s4331_s1 + $0x134] ss:$8 sps:$4 sm:$0xff]  }
  0x10   : > { %v2900_v13 = vld [vmem:[%s4331_s1 + $0x44] ss:$8 sps:$4 sm:$0xff]   ;;  %v2903_v15 = vld [vmem:[%s4331_s1 + $0x40] ss:$8 sps:$4 sm:$0xff]   ;;  %v2906_v17 = vld [vmem:[%s4331_s1 + $0x34] ss:$8 sps:$4 sm:$0xff]  }
  0x11   : > { %424 = vmatpush1.bf16.msra.mxu0 %v2890_v6  ;;  %v2908_v18 = vld [vmem:[%s4331_s1 + $0x130] ss:$8 sps:$4 sm:$0xff]   ;;  %v2910_v20 = vld [vmem:[%s4331_s1 + $0x124] ss:$8 sps:$4 sm:$0xff]   ;;  %v2914_v22 = vld [vmem:[%s4331_s1 + $0x120] ss:$8 sps:$4 sm:$0xff]  }
  0x12   : > { %629 = vmatpush1.bf16.msra.mxu1 %v2891_v7  ;;  %425 = vmatprep.subr.bf16.mxu0 %v2892_v8  ;;  %v2909_v19 = vld [vmem:[%s4331_s1 + $0x30] ss:$8 sps:$4 sm:$0xff]   ;;  %v2912_v21 = vld [vmem:[%s4331_s1 + $0x24] ss:$8 sps:$4 sm:$0xff]   ;;  %v2915_v23 = vld [vmem:[%s4331_s1 + $0x20] ss:$8 sps:$4 sm:$0xff]  }
  0x13   : > { %630 = vmatprep.subr.bf16.mxu1 %v2894_v9  ;;  %v2916_v24 = vld [vmem:[%s4331_s1 + $0x114] ss:$8 sps:$4 sm:$0xff]   ;;  %v2920_v26 = vld [vmem:[%s4331_s1 + $0x110] ss:$8 sps:$4 sm:$0xff]   ;;  %v2922_v28 = vld [vmem:[%s4331_s1 + $0x104] ss:$8 sps:$4 sm:$0xff]  }
  0x14   : > { %v2918_v25 = vld [vmem:[%s4331_s1 + $0x14] ss:$8 sps:$4 sm:$0xff]   ;;  %v2921_v27 = vld [vmem:[%s4331_s1 + $0x10] ss:$8 sps:$4 sm:$0xff]   ;;  %v2924_v29 = vld [vmem:[%s4331_s1 + $0x4] ss:$8 sps:$4 sm:$0xff]  }
  0x15   : > { %426 = vmatpush1.bf16.msra.mxu0 %v2896_v10  ;;  %v2926_v30 = vld [vmem:[%s4331_s1 + $0x100] ss:$8 sps:$4 sm:$0xff]   ;;  %v2928_v32 = vld [vmem:[%s4331_s1 + $0x1f4] ss:$8 sps:$4 sm:$0xff]   ;;  %v2932_v34 = vld [vmem:[%s4331_s1 + $0x1f0] ss:$8 sps:$4 sm:$0xff]  }
  0x16   : > { %631 = vmatpush1.bf16.msra.mxu1 %v2897_v11  ;;  %427 = vmatprep.subr.bf16.mxu0 %v2898_v12  ;;  %v2927_v31 = vld [vmem:[%s4331_s1] ss:$8 sps:$4 sm:$0xff]   ;;  %v2930_v33 = vld [vmem:[%s4331_s1 + $0xf4] ss:$8 sps:$4 sm:$0xff]   ;;  %v2933_v35 = vld [vmem:[%s4331_s1 + $0xf0] ss:$8 sps:$4 sm:$0xff]  }
  0x17   : > { %632 = vmatprep.subr.bf16.mxu1 %v2900_v13  ;;  %s4335_s13 = smov (!%p161_p3, %s2548_s13), 1  ;;  %v2934_v36 = vld [vmem:[%s4331_s1 + $0x1e4] ss:$8 sps:$4 sm:$0xff]   ;;  %v2938_v38 = vld [vmem:[%s4331_s1 + $0x1e0] ss:$8 sps:$4 sm:$0xff]  }
  0x18   : > { %v2936_v37 = vld [vmem:[%s4331_s1 + $0xe4] ss:$8 sps:$4 sm:$0xff]   ;;  %s2871_s17 = smul.u32 24, %s4335_s13  ;;  %v2939_v39 = vld [vmem:[%s4331_s1 + $0xe0] ss:$8 sps:$4 sm:$0xff]  }
  0x19   : > { %428 = vmatpush1.bf16.msra.mxu0 %v2902_v14  ;;  %v2940_v40 = vld [vmem:[%s4331_s1 + $0x1d4] ss:$8 sps:$4 sm:$0xff]   ;;  %v2944_v42 = vld [vmem:[%s4331_s1 + $0x1d0] ss:$8 sps:$4 sm:$0xff]   ;;  %v2946_v44 = vld [vmem:[%s4331_s1 + $0x1c4] ss:$8 sps:$4 sm:$0xff]  }
  0x1a   : > { %633 = vmatpush1.bf16.msra.mxu1 %v2903_v15  ;;  %429 = vmatprep.subr.bf16.mxu0 %v2904_v16  ;;  %v2942_v41 = vld [vmem:[%s4331_s1 + $0xd4] ss:$8 sps:$4 sm:$0xff]   ;;  %v2945_v43 = vld [vmem:[%s4331_s1 + $0xd0] ss:$8 sps:$4 sm:$0xff]   ;;  %s3508_s30 = scalar_lea.vmem %s4330_s0, %s2871_s17  ;;  %v2948_v45 = vld [vmem:[%s4331_s1 + $0xc4] ss:$8 sps:$4 sm:$0xff]  }
  0x1b   : > { %634 = vmatprep.subr.bf16.mxu1 %v2906_v17  ;;  %v3517_v46 = vld [vmem:[%s3508_s30] sm:$0xff]  ;;  %v3520_v47 = vld [vmem:[%s3508_s30 + $0x8] sm:$0x11]  ;;  %v2952_v52 = vld [vmem:[%s4331_s1 + $0x1b4] ss:$8 sps:$4 sm:$0xff]   ;;  %s2869_s17 = sshll.u32 %s4335_s13, 2 }
  0x1c   : > { %v2591_v48 = vcombine.high %v3517_v46, %v3517_v46  ;;  %v2950_v49 = vld [vmem:[%s4331_s1 + $0x1c0] ss:$8 sps:$4 sm:$0xff]   ;;  %v2557_v51 = vcombine.high %v3517_v46, %v3520_v47  ;;  %v2954_v53 = vld [vmem:[%s4331_s1 + $0xb4] ss:$8 sps:$4 sm:$0xff]   ;;  %v2956_v56 = vld [vmem:[%s4331_s1 + $0x1b0] ss:$8 sps:$4 sm:$0xff]   ;;  %v2556_v63 = vcombine.low %v3517_v46, %v3520_v47  ;;  %v2590_v15 = vcombine.low %v3517_v46, %v3517_v46  ;;  %s170_s20 = scalar_lea.vmem %s4333_s3, %s2869_s17 }
  0x1d   : > { %430 = vmatpush1.bf16.msra.mxu0 %v2908_v18  ;;  %v2951_v50 = vld [vmem:[%s4331_s1 + $0xc0] ss:$8 sps:$4 sm:$0xff]   ;;  %v2957_v57 = vld [vmem:[%s4331_s1 + $0xb0] ss:$8 sps:$4 sm:$0xff]   ;;  %v2958_v59 = vld [vmem:[%s4331_s1 + $0x1a4] ss:$8 sps:$4 sm:$0xff]  }
  0x1e   : > { %635 = vmatpush1.bf16.msra.mxu1 %v2909_v19  ;;  %431 = vmatprep.subr.bf16.mxu0 %v2910_v20  ;;  %v253_v54 = vshrl.u32 %v2557_v51, 16  ;;  %v255_v55 = vshll.u32 %v2557_v51, 16  ;;  %v2960_v60 = vld [vmem:[%s4331_s1 + $0xa4] ss:$8 sps:$4 sm:$0xff]   ;;  %v2962_v62 = vld [vmem:[%s4331_s1 + $0x1a0] ss:$8 sps:$4 sm:$0xff]  }
  0x1f   : > { %636 = vmatprep.subr.bf16.mxu1 %v2912_v21  ;;  %658 = vmatprep.mubr.bf16.mxu1 %v2591_v48  ;;  %v2963_v0 = vld [vmem:[%s4331_s1 + $0xa0] ss:$8 sps:$4 sm:$0xff]   ;;  %v2964_v1 = vld [vmem:[%s4331_s1 + $0x194] ss:$8 sps:$4 sm:$0xff]   ;;  %v2968_v3 = vld [vmem:[%s4331_s1 + $0x190] ss:$8 sps:$4 sm:$0xff]  }
  0x20   : > { %v257_v58 = vrot.slane %v255_v55, 1  ;;  %v2966_v2 = vld [vmem:[%s4331_s1 + $0x94] ss:$8 sps:$4 sm:$0xff]   ;;  %v248_v4 = vshll.u32 %v2556_v63, 16  ;;  %v2969_v5 = vld [vmem:[%s4331_s1 + $0x90] ss:$8 sps:$4 sm:$0xff]  }
  0x21   : > { %432 = vmatpush1.bf16.msra.mxu0 %v2914_v22  ;;  %v2970_v6 = vld [vmem:[%s4331_s1 + $0x184] ss:$8 sps:$4 sm:$0xff]   ;;  %v2974_v8 = vld [vmem:[%s4331_s1 + $0x180] ss:$8 sps:$4 sm:$0xff]   ;;  %v246_v9 = vshrl.u32 %v2556_v63, 16 }
  0x22   : > { %637 = vmatpush1.bf16.msra.mxu1 %v2915_v23  ;;  %433 = vmatprep.subr.bf16.mxu0 %v2916_v24  ;;  %v258_v61 = vor.u32 %v257_v58, %v253_v54  ;;  %v2972_v7 = vld [vmem:[%s4331_s1 + $0x84] ss:$8 sps:$4 sm:$0xff]   ;;  %v250_v10 = vrot.slane %v248_v4, 1  ;;  %v2975_v11 = vld [vmem:[%s4331_s1 + $0x80] ss:$8 sps:$4 sm:$0xff]  }
  0x23   : > { %638 = vmatprep.subr.bf16.mxu1 %v2918_v25  ;;  %v2982_v12 = vld [vmem:[%s4331_s1 + $0x274] ss:$8 sps:$4 sm:$0xff]   ;;  %v2980_v16 = vld [vmem:[%s4331_s1 + $0x270] ss:$8 sps:$4 sm:$0xff]   ;;  %v2988_v18 = vld [vmem:[%s4331_s1 + $0x264] ss:$8 sps:$4 sm:$0xff]  }
  0x24   : > { %453 = vmatprep.mubr.bf16.mxu0 %v258_v61  ;;  %v2985_v13 = vld [vmem:[%s4331_s1 + $0x374] ss:$8 sps:$4 sm:$0xff]   ;;  %v251_v14 = vor.u32 %v250_v10, %v246_v9  ;;  %v2983_v17 = vld [vmem:[%s4331_s1 + $0x370] ss:$8 sps:$4 sm:$0xff]   ;;  %v2991_v19 = vld [vmem:[%s4331_s1 + $0x364] ss:$8 sps:$4 sm:$0xff]  }
  0x25   : > { %434 = vmatpush1.bf16.msra.mxu0 %v2920_v26  ;;  %v2986_v20 = vld [vmem:[%s4331_s1 + $0x260] ss:$8 sps:$4 sm:$0xff]   ;;  %v2994_v22 = vld [vmem:[%s4331_s1 + $0x254] ss:$8 sps:$4 sm:$0xff]   ;;  %v2992_v24 = vld [vmem:[%s4331_s1 + $0x250] ss:$8 sps:$4 sm:$0xff]  }
  0x26   : > { %639 = vmatpush1.bf16.msra.mxu1 %v2921_v27  ;;  %435 = vmatprep.subr.bf16.mxu0 %v2922_v28  ;;  %v2989_v21 = vld [vmem:[%s4331_s1 + $0x360] ss:$8 sps:$4 sm:$0xff]   ;;  %v2997_v23 = vld [vmem:[%s4331_s1 + $0x354] ss:$8 sps:$4 sm:$0xff]   ;;  %v2995_v25 = vld [vmem:[%s4331_s1 + $0x350] ss:$8 sps:$4 sm:$0xff]  }
  0x27   : > { %640 = vmatprep.subr.bf16.mxu1 %v2924_v29  ;;  %v3000_v26 = vld [vmem:[%s4331_s1 + $0x244] ss:$8 sps:$4 sm:$0xff]   ;;  %v2998_v28 = vld [vmem:[%s4331_s1 + $0x240] ss:$8 sps:$4 sm:$0xff]   ;;  %v3030_v54 = vld [vmem:[%s4331_s1 + $0x2f4] ss:$8 sps:$4 sm:$0xff]  }
  0x28   : > { %v3003_v27 = vld [vmem:[%s4331_s1 + $0x344] ss:$8 sps:$4 sm:$0xff]   ;;  %v3001_v29 = vld [vmem:[%s4331_s1 + $0x340] ss:$8 sps:$4 sm:$0xff]   ;;  %v3033_v55 = vld [vmem:[%s4331_s1 + $0x3f4] ss:$8 sps:$4 sm:$0xff]  }
  0x29   : > { %436 = vmatpush1.bf16.msra.mxu0 %v2926_v30  ;;  %v3006_v30 = vld [vmem:[%s4331_s1 + $0x234] ss:$8 sps:$4 sm:$0xff]   ;;  %v3680_v46 = vld [vmem:[%s3508_s30 + $0x8] sm:$0x33]  ;;  %v3055_v9 = vld [vmem:[%s4331_s1 + $0x3b0] ss:$8 sps:$4 sm:$0xff]  }
  0x2a   : > { %641 = vmatpush1.bf16.msra.mxu1 %v2927_v31  ;;  %437 = vmatprep.subr.bf16.mxu0 %v2928_v32  ;;  %v3009_v31 = vld [vmem:[%s4331_s1 + $0x334] ss:$8 sps:$4 sm:$0xff]   ;;  %v3004_v32 = vld [vmem:[%s4331_s1 + $0x230] ss:$8 sps:$4 sm:$0xff]   ;;  %v3027_v48 = vld [vmem:[%s4331_s1 + $0x304] ss:$8 sps:$4 sm:$0xff]  }
  0x2b   : > { %642 = vmatprep.subr.bf16.mxu1 %v2930_v33  ;;  %v3007_v33 = vld [vmem:[%s4331_s1 + $0x330] ss:$8 sps:$4 sm:$0xff]   ;;  %v3036_v58 = vld [vmem:[%s4331_s1 + $0x2e4] ss:$8 sps:$4 sm:$0xff]   ;;  %v3037_v61 = vld [vmem:[%s4331_s1 + $0x3e0] ss:$8 sps:$4 sm:$0xff]  }
  0x2c   : > { %v3045_v63 = vld [vmem:[%s4331_s1 + $0x3d4] ss:$8 sps:$4 sm:$0xff]   ;;  %v3046_v4 = vld [vmem:[%s4331_s1 + $0x2c0] ss:$8 sps:$4 sm:$0xff]   ;;  %v3060_v10 = vld [vmem:[%s4331_s1 + $0x2a4] ss:$8 sps:$4 sm:$0xff]  }
  0x2d   : > { %438 = vmatpush2.bf16.msra.mxu0 %v2932_v34  ;;  %v3012_v34 = vld [vmem:[%s4331_s1 + $0x224] ss:$8 sps:$4 sm:$0xff]  }
  0x2e   : > { %643 = vmatpush2.bf16.msra.mxu1 %v2933_v35  ;;  %439 = vmatprep.subr.bf16.mxu0 %v2934_v36  ;;  %v3015_v35 = vld [vmem:[%s4331_s1 + $0x324] ss:$8 sps:$4 sm:$0xff]   ;;  %v3010_v36 = vld [vmem:[%s4331_s1 + $0x220] ss:$8 sps:$4 sm:$0xff]  }
  0x2f   : > { %644 = vmatprep.subr.bf16.mxu1 %v2936_v37  ;;  %v3013_v37 = vld [vmem:[%s4331_s1 + $0x320] ss:$8 sps:$4 sm:$0xff]  }
  0x31   : > { %440 = vmatpush2.bf16.msra.mxu0 %v2938_v38  ;;  %v3018_v38 = vld [vmem:[%s4331_s1 + $0x214] ss:$8 sps:$4 sm:$0xff]  }
  0x32   : > { %645 = vmatpush2.bf16.msra.mxu1 %v2939_v39  ;;  %441 = vmatprep.subr.bf16.mxu0 %v2940_v40  ;;  %v3021_v39 = vld [vmem:[%s4331_s1 + $0x314] ss:$8 sps:$4 sm:$0xff]   ;;  %v3016_v40 = vld [vmem:[%s4331_s1 + $0x210] ss:$8 sps:$4 sm:$0xff]  }
  0x33   : > { %646 = vmatprep.subr.bf16.mxu1 %v2942_v41  ;;  %v3666_v41 = vld [vmem:[%s3508_s30] sm:$0xee] }
  0x35   : > { %442 = vmatpush2.bf16.msra.mxu0 %v2944_v42  ;;  %v3019_v42 = vld [vmem:[%s4331_s1 + $0x310] ss:$8 sps:$4 sm:$0xff]  }
  0x36   : > { %647 = vmatpush2.bf16.msra.mxu1 %v2945_v43  ;;  %443 = vmatprep.subr.bf16.mxu0 %v2946_v44  ;;  %v3024_v43 = vld [vmem:[%s4331_s1 + $0x204] ss:$8 sps:$4 sm:$0xff]   ;;  %v2625_v44 = vcombine.high %v3666_v41, %v3520_v47 }
  0x37   : > { %648 = vmatprep.subr.bf16.mxu1 %v2948_v45  ;;  %v3677_v45 = vld [vmem:[%s3508_s30] sm:$0xcc] }
  0x39   : > { %444 = vmatpush2.bf16.msra.mxu0 %v2950_v49  ;;  %v706_v49 = vrot.slane %v2625_v44, 1 }
  0x3a   : > { %649 = vmatpush2.bf16.msra.mxu1 %v2951_v50  ;;  %445 = vmatprep.subr.bf16.mxu0 %v2952_v52  ;;  %v2659_v50 = vcombine.high %v3677_v45, %v3680_v46  ;;  %v3022_v52 = vld [vmem:[%s4331_s1 + $0x200] ss:$8 sps:$4 sm:$0xff]  }
  0x3b   : > { %650 = vmatprep.subr.bf16.mxu1 %v2954_v53  ;;  %v3025_v53 = vld [vmem:[%s4331_s1 + $0x300] ss:$8 sps:$4 sm:$0xff]  }
  0x3c   : > { %v955_v51 = vrot.slane %v2659_v50, 2 }
  0x3d   : > { %446 = vmatpush2.bf16.msra.mxu0 %v2956_v56  ;;  %v3028_v56 = vld [vmem:[%s4331_s1 + $0x2f0] ss:$8 sps:$4 sm:$0xff]  }
  0x3e   : > { %651 = vmatpush2.bf16.msra.mxu1 %v2957_v57  ;;  %447 = vmatprep.subr.bf16.mxu0 %v2958_v59  ;;  %v3031_v57 = vld [vmem:[%s4331_s1 + $0x3f0] ss:$8 sps:$4 sm:$0xff]   ;;  %v3039_v59 = vld [vmem:[%s4331_s1 + $0x3e4] ss:$8 sps:$4 sm:$0xff]  }
  0x3f   : > { %652 = vmatprep.subr.bf16.mxu1 %v2960_v60  ;;  %v3034_v60 = vld [vmem:[%s4331_s1 + $0x2e0] ss:$8 sps:$4 sm:$0xff]  }
  0x41   : > { %448 = vmatpush2.bf16.msra.mxu0 %v2962_v62  ;;  %v3042_v62 = vld [vmem:[%s4331_s1 + $0x2d4] ss:$8 sps:$4 sm:$0xff]  }
  0x42   : > { %653 = vmatpush2.bf16.msra.mxu1 %v2963_v0  ;;  %449 = vmatprep.subr.bf16.mxu0 %v2964_v1  ;;  %v3040_v0 = vld [vmem:[%s4331_s1 + $0x2d0] ss:$8 sps:$4 sm:$0xff]  }
  0x43   : > { %654 = vmatprep.subr.bf16.mxu1 %v2966_v2  ;;  %v3043_v1 = vld [vmem:[%s4331_s1 + $0x3d0] ss:$8 sps:$4 sm:$0xff]   ;;  %v3048_v2 = vld [vmem:[%s4331_s1 + $0x2c4] ss:$8 sps:$4 sm:$0xff]  }
  0x45   : > { %450 = vmatpush2.bf16.msra.mxu0 %v2968_v3  ;;  %v3051_v3 = vld [vmem:[%s4331_s1 + $0x3c4] ss:$8 sps:$4 sm:$0xff]  }
  0x46   : > { %655 = vmatpush2.bf16.msra.mxu1 %v2969_v5  ;;  %451 = vmatprep.subr.bf16.mxu0 %v2970_v6  ;;  %v3049_v5 = vld [vmem:[%s4331_s1 + $0x3c0] ss:$8 sps:$4 sm:$0xff]   ;;  %v3054_v6 = vld [vmem:[%s4331_s1 + $0x2b4] ss:$8 sps:$4 sm:$0xff]  }
  0x47   : > { %656 = vmatprep.subr.bf16.mxu1 %v2972_v7  ;;  %v3057_v7 = vld [vmem:[%s4331_s1 + $0x3b4] ss:$8 sps:$4 sm:$0xff]  }
  0x49   : > { %452 = vmatpush2.bf16.msra.mxu0 %v2974_v8  ;;  %v3052_v8 = vld [vmem:[%s4331_s1 + $0x2b0] ss:$8 sps:$4 sm:$0xff]  }
  0x4a   : > { %657 = vmatpush2.bf16.msra.mxu1 %v2975_v11  ;;  %869 = vmatprep.subr.bf16.mxu0 %v2982_v12  ;;  %v3063_v11 = vld [vmem:[%s4331_s1 + $0x3a4] ss:$8 sps:$4 sm:$0xff]   ;;  %v3058_v12 = vld [vmem:[%s4331_s1 + $0x2a0] ss:$8 sps:$4 sm:$0xff]  }
  0x4b   : > { %1118 = vmatprep.subr.bf16.mxu1 %v2985_v13  ;;  %v3061_v13 = vld [vmem:[%s4331_s1 + $0x3a0] ss:$8 sps:$4 sm:$0xff]  }
  0x4c   : > { %454 = vmatmul.mubr.bf16.vlgmr.msra.gmra.mxu0 %v251_v14  ;;  %v3066_v14 = vld [vmem:[%s4331_s1 + $0x294] ss:$8 sps:$4 sm:$0xff]  }
  0x4d   : > { %659 = vmatmul.mubr.bf16.vlgmr.msra.gmra.mxu1 %v2590_v15  ;;  %870 = vmatpush1.bf16.msra.mxu0 %v2980_v16  ;;  %v3069_v15 = vld [vmem:[%s4331_s1 + $0x394] ss:$8 sps:$4 sm:$0xff]   ;;  %v3064_v16 = vld [vmem:[%s4331_s1 + $0x290] ss:$8 sps:$4 sm:$0xff]  }
  0x4e   : > { %1119 = vmatpush1.bf16.msra.mxu1 %v2983_v17  ;;  %871 = vmatprep.subr.bf16.mxu0 %v2988_v18  ;;  %v3067_v17 = vld [vmem:[%s4331_s1 + $0x390] ss:$8 sps:$4 sm:$0xff]   ;;  %v3072_v18 = vld [vmem:[%s4331_s1 + $0x284] ss:$8 sps:$4 sm:$0xff]  }
  0x4f   : > { %1120 = vmatprep.subr.bf16.mxu1 %v2991_v19  ;;  %901 = vmatprep.mubr.bf16.mxu0 %v706_v49  ;;  %v3075_v19 = vld [vmem:[%s4331_s1 + $0x384] ss:$8 sps:$4 sm:$0xff]  }
  0x50   : > { %1150 = vmatprep.mubr.bf16.mxu1 %v955_v51  ;;  %v3103_v49 = vld [vmem:[%s4331_s1 + $0x544] ss:$8 sps:$4 sm:$0xff]   ;;  %v3098_v51 = vld [vmem:[%s4331_s1 + $0x440] ss:$8 sps:$4 sm:$0xff]  }
  0x51   : > { %872 = vmatpush1.bf16.msra.mxu0 %v2986_v20  ;;  %v2624_v20 = vcombine.low %v3666_v41, %v3520_v47  ;;  %v3080_v47 = vld [vmem:[%s4331_s1 + $0x474] ss:$8 sps:$4 sm:$0xff]  }
  0x52   : > { %1121 = vmatpush1.bf16.msra.mxu1 %v2989_v21  ;;  %873 = vmatprep.subr.bf16.mxu0 %v2994_v22  ;;  %v2658_v21 = vcombine.low %v3677_v45, %v3680_v46  ;;  %v3070_v22 = vld [vmem:[%s4331_s1 + $0x280] ss:$8 sps:$4 sm:$0xff]  }
  0x53   : > { %1122 = vmatprep.subr.bf16.mxu1 %v2997_v23  ;;  %v3073_v23 = vld [vmem:[%s4331_s1 + $0x380] ss:$8 sps:$4 sm:$0xff]  }
  0x55   : > { %874 = vmatpush1.bf16.msra.mxu0 %v2992_v24  ;;  %v3085_v24 = vld [vmem:[%s4331_s1 + $0x574] ss:$8 sps:$4 sm:$0xff]  }
  0x56   : > { %1123 = vmatpush1.bf16.msra.mxu1 %v2995_v25  ;;  %875 = vmatprep.subr.bf16.mxu0 %v3000_v26  ;;  %v705_v25 = vrot.slane %v2624_v20, 1  ;;  %v954_v26 = vrot.slane %v2658_v21, 2  ;;  %v3149_v20 = vld [vmem:[%s4331_s1 + $0x5c0] ss:$8 sps:$4 sm:$0xff]   ;;  %v3154_v21 = vld [vmem:[%s4331_s1 + $0x4b4] ss:$8 sps:$4 sm:$0xff]  }
  0x57   : > { %1124 = vmatprep.subr.bf16.mxu1 %v3003_v27  ;;  %v3078_v27 = vld [vmem:[%s4331_s1 + $0x470] ss:$8 sps:$4 sm:$0xff]  }
  0x59   : > { %876 = vmatpush1.bf16.msra.mxu0 %v2998_v28  ;;  %v3083_v28 = vld [vmem:[%s4331_s1 + $0x570] ss:$8 sps:$4 sm:$0xff]  }
  0x5a   : > { %1125 = vmatpush1.bf16.msra.mxu1 %v3001_v29  ;;  %877 = vmatprep.subr.bf16.mxu0 %v3006_v30  ;;  %v3088_v29 = vld [vmem:[%s4331_s1 + $0x464] ss:$8 sps:$4 sm:$0xff]  }
  0x5b   : > { %1126 = vmatprep.subr.bf16.mxu1 %v3009_v31  ;;  %v3091_v30 = vld [vmem:[%s4331_s1 + $0x564] ss:$8 sps:$4 sm:$0xff]  }
  0x5c   : > { %v3812_v31 = vld [vmem:[%s3508_s30 + $0x8] sm:$0x77] }
  0x5d   : > { %878 = vmatpush1.bf16.msra.mxu0 %v3004_v32  ;;  %v3086_v32 = vld [vmem:[%s4331_s1 + $0x460] ss:$8 sps:$4 sm:$0xff]  }
  0x5e   : > { %1127 = vmatpush1.bf16.msra.mxu1 %v3007_v33  ;;  %879 = vmatprep.subr.bf16.mxu0 %v3012_v34  ;;  %v2693_v33 = vcombine.high %v3677_v45, %v3812_v31  ;;  %v3820_v34 = vld [vmem:[%s3508_s30] sm:$0x88] }
  0x5f   : > { %1128 = vmatprep.subr.bf16.mxu1 %v3015_v35  ;;  %v3089_v35 = vld [vmem:[%s4331_s1 + $0x560] ss:$8 sps:$4 sm:$0xff]  }
  0x61   : > { %880 = vmatpush1.bf16.msra.mxu0 %v3010_v36  ;;  %v2727_v36 = vcombine.high %v3820_v34, %v3812_v31 }
  0x62   : > { %1129 = vmatpush1.bf16.msra.mxu1 %v3013_v37  ;;  %881 = vmatprep.subr.bf16.mxu0 %v3018_v38  ;;  %v3094_v37 = vld [vmem:[%s4331_s1 + $0x454] ss:$8 sps:$4 sm:$0xff]  }
  0x63   : > { %1130 = vmatprep.subr.bf16.mxu1 %v3021_v39  ;;  %v3097_v38 = vld [vmem:[%s4331_s1 + $0x554] ss:$8 sps:$4 sm:$0xff]   ;;  %v1208_v39 = vshrl.u32 %v2693_v33, 16  ;;  %v1459_v41 = vrot.slane %v2727_v36, 3  ;;  %v3167_v36 = vld [vmem:[%s4331_s1 + $0x590] ss:$8 sps:$4 sm:$0xff]  }
  0x65   : > { %882 = vmatpush1.bf16.msra.mxu0 %v3016_v40  ;;  %v1211_v40 = vshll.u32 %v2693_v33, 16  ;;  %v1210_v44 = vrot.slane %v1208_v39, 2  ;;  %v3169_v33 = vld [vmem:[%s4331_s1 + $0x594] ss:$8 sps:$4 sm:$0xff]   ;;  %v3172_v39 = vld [vmem:[%s4331_s1 + $0x484] ss:$8 sps:$4 sm:$0xff]  }
  0x66   : > { %1131 = vmatpush1.bf16.msra.mxu1 %v3019_v42  ;;  %883 = vmatprep.subr.bf16.mxu0 %v3024_v43  ;;  %v3092_v42 = vld [vmem:[%s4331_s1 + $0x450] ss:$8 sps:$4 sm:$0xff]  }
  0x67   : > { %1132 = vmatprep.subr.bf16.mxu1 %v3027_v48  ;;  %v3095_v43 = vld [vmem:[%s4331_s1 + $0x550] ss:$8 sps:$4 sm:$0xff]   ;;  %v1213_v46 = vrot.slane %v1211_v40, 3  ;;  %v3100_v48 = vld [vmem:[%s4331_s1 + $0x444] ss:$8 sps:$4 sm:$0xff]  }
  0x68   : > { %v3175_v40 = vld [vmem:[%s4331_s1 + $0x584] ss:$8 sps:$4 sm:$0xff]  }
  0x69   : > { %884 = vmatpush1.bf16.msra.mxu0 %v3022_v52  ;;  %v1214_v50 = vor.u32 %v1213_v46, %v1210_v44  ;;  %v3101_v52 = vld [vmem:[%s4331_s1 + $0x540] ss:$8 sps:$4 sm:$0xff]  }
  0x6a   : > { %1133 = vmatpush1.bf16.msra.mxu1 %v3025_v53  ;;  %885 = vmatprep.subr.bf16.mxu0 %v3030_v54  ;;  %v3106_v53 = vld [vmem:[%s4331_s1 + $0x434] ss:$8 sps:$4 sm:$0xff]  }
  0x6b   : > { %1134 = vmatprep.subr.bf16.mxu1 %v3033_v55  ;;  %v3109_v54 = vld [vmem:[%s4331_s1 + $0x534] ss:$8 sps:$4 sm:$0xff]   ;;  %v3104_v55 = vld [vmem:[%s4331_s1 + $0x430] ss:$8 sps:$4 sm:$0xff]  }
  0x6d   : > { %886 = vmatpush2.bf16.msra.mxu0 %v3028_v56  ;;  %v3107_v56 = vld [vmem:[%s4331_s1 + $0x530] ss:$8 sps:$4 sm:$0xff]  }
  0x6e   : > { %1135 = vmatpush2.bf16.msra.mxu1 %v3031_v57  ;;  %887 = vmatprep.subr.bf16.mxu0 %v3036_v58  ;;  %v3112_v57 = vld [vmem:[%s4331_s1 + $0x424] ss:$8 sps:$4 sm:$0xff]  }
  0x6f   : > { %1136 = vmatprep.subr.bf16.mxu1 %v3039_v59  ;;  %v3115_v58 = vld [vmem:[%s4331_s1 + $0x524] ss:$8 sps:$4 sm:$0xff]   ;;  %v3110_v59 = vld [vmem:[%s4331_s1 + $0x420] ss:$8 sps:$4 sm:$0xff]  }
  0x71   : > { %888 = vmatpush2.bf16.msra.mxu0 %v3034_v60  ;;  %v3113_v60 = vld [vmem:[%s4331_s1 + $0x520] ss:$8 sps:$4 sm:$0xff]  }
  0x72   : > { %1137 = vmatpush2.bf16.msra.mxu1 %v3037_v61  ;;  %889 = vmatprep.subr.bf16.mxu0 %v3042_v62  ;;  %v3118_v61 = vld [vmem:[%s4331_s1 + $0x414] ss:$8 sps:$4 sm:$0xff]  }
  0x73   : > { %1138 = vmatprep.subr.bf16.mxu1 %v3045_v63  ;;  %v3121_v62 = vld [vmem:[%s4331_s1 + $0x514] ss:$8 sps:$4 sm:$0xff]   ;;  %v3116_v63 = vld [vmem:[%s4331_s1 + $0x410] ss:$8 sps:$4 sm:$0xff]  }
  0x75   : > { %890 = vmatpush2.bf16.msra.mxu0 %v3040_v0  ;;  %v3119_v0 = vld [vmem:[%s4331_s1 + $0x510] ss:$8 sps:$4 sm:$0xff]  }
  0x76   : > { %1139 = vmatpush2.bf16.msra.mxu1 %v3043_v1  ;;  %891 = vmatprep.subr.bf16.mxu0 %v3048_v2  ;;  %v3124_v1 = vld [vmem:[%s4331_s1 + $0x404] ss:$8 sps:$4 sm:$0xff]  }
  0x77   : > { %1140 = vmatprep.subr.bf16.mxu1 %v3051_v3  ;;  %v3127_v2 = vld [vmem:[%s4331_s1 + $0x504] ss:$8 sps:$4 sm:$0xff]   ;;  %v3122_v3 = vld [vmem:[%s4331_s1 + $0x400] ss:$8 sps:$4 sm:$0xff]  }
  0x79   : > { %892 = vmatpush2.bf16.msra.mxu0 %v3046_v4  ;;  %v3125_v4 = vld [vmem:[%s4331_s1 + $0x500] ss:$8 sps:$4 sm:$0xff]  }
  0x7a   : > { %1141 = vmatpush2.bf16.msra.mxu1 %v3049_v5  ;;  %893 = vmatprep.subr.bf16.mxu0 %v3054_v6  ;;  %v3130_v5 = vld [vmem:[%s4331_s1 + $0x4f4] ss:$8 sps:$4 sm:$0xff]  }
  0x7b   : > { %1142 = vmatprep.subr.bf16.mxu1 %v3057_v7  ;;  %v3133_v6 = vld [vmem:[%s4331_s1 + $0x5f4] ss:$8 sps:$4 sm:$0xff]   ;;  %v3128_v7 = vld [vmem:[%s4331_s1 + $0x4f0] ss:$8 sps:$4 sm:$0xff]  }
  0x7d   : > { %894 = vmatpush2.bf16.msra.mxu0 %v3052_v8  ;;  %v3131_v8 = vld [vmem:[%s4331_s1 + $0x5f0] ss:$8 sps:$4 sm:$0xff]  }
  0x7e   : > { %1143 = vmatpush2.bf16.msra.mxu1 %v3055_v9  ;;  %895 = vmatprep.subr.bf16.mxu0 %v3060_v10  ;;  %v3136_v9 = vld [vmem:[%s4331_s1 + $0x4e4] ss:$8 sps:$4 sm:$0xff]  }
  0x7f   : > { %1144 = vmatprep.subr.bf16.mxu1 %v3063_v11  ;;  %v3139_v10 = vld [vmem:[%s4331_s1 + $0x5e4] ss:$8 sps:$4 sm:$0xff]   ;;  %v3134_v11 = vld [vmem:[%s4331_s1 + $0x4e0] ss:$8 sps:$4 sm:$0xff]  }
  0x81   : > { %896 = vmatpush2.bf16.msra.mxu0 %v3058_v12  ;;  %v3137_v12 = vld [vmem:[%s4331_s1 + $0x5e0] ss:$8 sps:$4 sm:$0xff]  }
  0x82   : > { %1145 = vmatpush2.bf16.msra.mxu1 %v3061_v13  ;;  %897 = vmatprep.subr.bf16.mxu0 %v3066_v14  ;;  %v3142_v13 = vld [vmem:[%s4331_s1 + $0x4d4] ss:$8 sps:$4 sm:$0xff]  }
  0x83   : > { %1146 = vmatprep.subr.bf16.mxu1 %v3069_v15  ;;  %v3145_v14 = vld [vmem:[%s4331_s1 + $0x5d4] ss:$8 sps:$4 sm:$0xff]   ;;  %v3140_v15 = vld [vmem:[%s4331_s1 + $0x4d0] ss:$8 sps:$4 sm:$0xff]  }
  0x85   : > { %898 = vmatpush2.bf16.msra.mxu0 %v3064_v16  ;;  %v3143_v16 = vld [vmem:[%s4331_s1 + $0x5d0] ss:$8 sps:$4 sm:$0xff]  }
  0x86   : > { %1147 = vmatpush2.bf16.msra.mxu1 %v3067_v17  ;;  %899 = vmatprep.subr.bf16.mxu0 %v3072_v18  ;;  %v3148_v17 = vld [vmem:[%s4331_s1 + $0x4c4] ss:$8 sps:$4 sm:$0xff]  }
  0x87   : > { %1148 = vmatprep.subr.bf16.mxu1 %v3075_v19  ;;  %v3151_v18 = vld [vmem:[%s4331_s1 + $0x5c4] ss:$8 sps:$4 sm:$0xff]   ;;  %v3146_v19 = vld [vmem:[%s4331_s1 + $0x4c0] ss:$8 sps:$4 sm:$0xff]  }
  0x89   : > { %900 = vmatpush2.bf16.msra.mxu0 %v3070_v22  ;;  %v3157_v22 = vld [vmem:[%s4331_s1 + $0x5b4] ss:$8 sps:$4 sm:$0xff]  }
  0x8a   : > { %1149 = vmatpush2.bf16.msra.mxu1 %v3073_v23  ;;  %1377 = vmatprep.subr.bf16.mxu0 %v3080_v47  ;;  %v3152_v23 = vld [vmem:[%s4331_s1 + $0x4b0] ss:$8 sps:$4 sm:$0xff]  }
  0x8b   : > { %1622 = vmatprep.subr.bf16.mxu1 %v3085_v24  ;;  %v3155_v47 = vld [vmem:[%s4331_s1 + $0x5b0] ss:$8 sps:$4 sm:$0xff]   ;;  %v3160_v24 = vld [vmem:[%s4331_s1 + $0x4a4] ss:$8 sps:$4 sm:$0xff]  }
  0x8c   : > { %902 = vmatmul.mubr.bf16.vlgmr.msra.gmra.mxu0 %v705_v25  ;;  %v3163_v25 = vld [vmem:[%s4331_s1 + $0x5a4] ss:$8 sps:$4 sm:$0xff]  }
  0x8d   : > { %1151 = vmatmul.mubr.bf16.vlgmr.msra.gmra.mxu1 %v954_v26  ;;  %1378 = vmatpush1.bf16.msra.mxu0 %v3078_v27  ;;  %v3158_v26 = vld [vmem:[%s4331_s1 + $0x4a0] ss:$8 sps:$4 sm:$0xff]  }
  0x8e   : > { %1623 = vmatpush1.bf16.msra.mxu1 %v3083_v28  ;;  %1379 = vmatprep.subr.bf16.mxu0 %v3088_v29  ;;  %v3161_v27 = vld [vmem:[%s4331_s1 + $0x5a0] ss:$8 sps:$4 sm:$0xff]   ;;  %v2692_v28 = vcombine.low %v3677_v45, %v3812_v31  ;;  %v3164_v45 = vld [vmem:[%s4331_s1 + $0x490] ss:$8 sps:$4 sm:$0xff]  }
  0x8f   : > { %1624 = vmatprep.subr.bf16.mxu1 %v3091_v30  ;;  %1654 = vmatprep.mubr.bf16.mxu1 %v1459_v41  ;;  %v3974_v29 = vld [vmem:[%s3508_s30 + $0x8] sm:$0xff]  ;;  %v3977_v30 = vld [vmem:[%s3508_s30 + $0x10] sm:$0x11] }
  0x90   : > { %1409 = vmatprep.mubr.bf16.mxu0 %v1214_v50  ;;  %v3170_v41 = vld [vmem:[%s4331_s1 + $0x480] ss:$8 sps:$4 sm:$0xff]   ;;  %v3185_v50 = vld [vmem:[%s4331_s1 + $0x774] ss:$8 sps:$4 sm:$0xff]  }
  0x91   : > { %1380 = vmatpush1.bf16.msra.mxu0 %v3086_v32  ;;  %v3166_v32 = vld [vmem:[%s4331_s1 + $0x494] ss:$8 sps:$4 sm:$0xff]  }
  0x92   : > { %1625 = vmatpush1.bf16.msra.mxu1 %v3089_v35  ;;  %1381 = vmatprep.subr.bf16.mxu0 %v3094_v37  ;;  %v2795_v35 = vcombine.high %v3974_v29, %v3977_v30  ;;  %v1200_v37 = vshrl.u32 %v2692_v28, 16 }
  0x93   : > { %1626 = vmatprep.subr.bf16.mxu1 %v3097_v38  ;;  %v1203_v38 = vshll.u32 %v2692_v28, 16  ;;  %v3242_v28 = vld [vmem:[%s4331_s1 + $0x6d4] ss:$8 sps:$4 sm:$0xff]  }
  0x94   : > { %v1202_v44 = vrot.slane %v1200_v37, 2  ;;  %v3246_v37 = vld [vmem:[%s4331_s1 + $0x6c0] ss:$8 sps:$4 sm:$0xff]  }
  0x95   : > { %1382 = vmatpush1.bf16.msra.mxu0 %v3092_v42  ;;  %v1960_v42 = vshll.u32 %v2795_v35, 16  ;;  %v1205_v46 = vrot.slane %v1203_v38, 3  ;;  %v3249_v38 = vld [vmem:[%s4331_s1 + $0x7c0] ss:$8 sps:$4 sm:$0xff]  }
  0x96   : > { %1627 = vmatpush1.bf16.msra.mxu1 %v3095_v43  ;;  %1383 = vmatprep.subr.bf16.mxu0 %v3100_v48  ;;  %v3173_v43 = vld [vmem:[%s4331_s1 + $0x580] ss:$8 sps:$4 sm:$0xff]   ;;  %v2726_v48 = vcombine.low %v3820_v34, %v3812_v31  ;;  %v3183_v34 = vld [vmem:[%s4331_s1 + $0x770] ss:$8 sps:$4 sm:$0xff]  }
  0x97   : > { %1628 = vmatprep.subr.bf16.mxu1 %v3103_v49  ;;  %v3180_v49 = vld [vmem:[%s4331_s1 + $0x674] ss:$8 sps:$4 sm:$0xff]  }
  0x98   : > { %v1458_v31 = vrot.slane %v2726_v48, 3  ;;  %v3258_v48 = vld [vmem:[%s4331_s1 + $0x6a0] ss:$8 sps:$4 sm:$0xff]  }
  0x99   : > { %1384 = vmatpush1.bf16.msra.mxu0 %v3098_v51  ;;  %v1958_v51 = vshrl.u32 %v2795_v35, 16  ;;  %v3248_v35 = vld [vmem:[%s4331_s1 + $0x6c4] ss:$8 sps:$4 sm:$0xff]  }
  0x9a   : > { %1629 = vmatpush1.bf16.msra.mxu1 %v3101_v52  ;;  %1385 = vmatprep.subr.bf16.mxu0 %v3106_v53  ;;  %v1962_v52 = vrot.slane %v1960_v42, 1  ;;  %v1206_v53 = vor.u32 %v1205_v46, %v1202_v44  ;;  %v3255_v42 = vld [vmem:[%s4331_s1 + $0x7b0] ss:$8 sps:$4 sm:$0xff]   ;;  %v3263_v44 = vld [vmem:[%s4331_s1 + $0x7a4] ss:$8 sps:$4 sm:$0xff]   ;;  %v2794_v46 = vcombine.low %v3974_v29, %v3977_v30 }
  0x9b   : > { %1630 = vmatprep.subr.bf16.mxu1 %v3109_v54  ;;  %v3178_v54 = vld [vmem:[%s4331_s1 + $0x670] ss:$8 sps:$4 sm:$0xff]  }
  0x9d   : > { %1386 = vmatpush1.bf16.msra.mxu0 %v3104_v55  ;;  %v3188_v55 = vld [vmem:[%s4331_s1 + $0x664] ss:$8 sps:$4 sm:$0xff]  }
  0x9e   : > { %1631 = vmatpush1.bf16.msra.mxu1 %v3107_v56  ;;  %1387 = vmatprep.subr.bf16.mxu0 %v3112_v57  ;;  %v3191_v56 = vld [vmem:[%s4331_s1 + $0x764] ss:$8 sps:$4 sm:$0xff]   ;;  %v2761_v57 = vcombine.high %v3974_v29, %v3974_v29 }
  0x9f   : > { %1632 = vmatprep.subr.bf16.mxu1 %v3115_v58  ;;  %v1963_v58 = vor.u32 %v1962_v52, %v1958_v51  ;;  %v3269_v51 = vld [vmem:[%s4331_s1 + $0x794] ss:$8 sps:$4 sm:$0xff]   ;;  %v1953_v52 = vshll.u32 %v2794_v46, 16 }
  0xa1   : > { %1388 = vmatpush1.bf16.msra.mxu0 %v3110_v59  ;;  %v3186_v59 = vld [vmem:[%s4331_s1 + $0x660] ss:$8 sps:$4 sm:$0xff]  }
  0xa2   : > { %1633 = vmatpush1.bf16.msra.mxu1 %v3113_v60  ;;  %1389 = vmatprep.subr.bf16.mxu0 %v3118_v61  ;;  %v3189_v60 = vld [vmem:[%s4331_s1 + $0x760] ss:$8 sps:$4 sm:$0xff]   ;;  %v3194_v61 = vld [vmem:[%s4331_s1 + $0x654] ss:$8 sps:$4 sm:$0xff]  }
  0xa3   : > { %1634 = vmatprep.subr.bf16.mxu1 %v3121_v62  ;;  %v3197_v62 = vld [vmem:[%s4331_s1 + $0x754] ss:$8 sps:$4 sm:$0xff]  }
  0xa5   : > { %1390 = vmatpush1.bf16.msra.mxu0 %v3116_v63  ;;  %v3192_v63 = vld [vmem:[%s4331_s1 + $0x650] ss:$8 sps:$4 sm:$0xff]  }
  0xa6   : > { %1635 = vmatpush1.bf16.msra.mxu1 %v3119_v0  ;;  %1391 = vmatprep.subr.bf16.mxu0 %v3124_v1  ;;  %v3195_v0 = vld [vmem:[%s4331_s1 + $0x750] ss:$8 sps:$4 sm:$0xff]   ;;  %v3200_v1 = vld [vmem:[%s4331_s1 + $0x644] ss:$8 sps:$4 sm:$0xff]  }
  0xa7   : > { %1636 = vmatprep.subr.bf16.mxu1 %v3127_v2  ;;  %v3203_v2 = vld [vmem:[%s4331_s1 + $0x744] ss:$8 sps:$4 sm:$0xff]  }
  0xa9   : > { %1392 = vmatpush1.bf16.msra.mxu0 %v3122_v3  ;;  %v3198_v3 = vld [vmem:[%s4331_s1 + $0x640] ss:$8 sps:$4 sm:$0xff]  }
  0xaa   : > { %1637 = vmatpush1.bf16.msra.mxu1 %v3125_v4  ;;  %1393 = vmatprep.subr.bf16.mxu0 %v3130_v5  ;;  %v3201_v4 = vld [vmem:[%s4331_s1 + $0x740] ss:$8 sps:$4 sm:$0xff]   ;;  %v3206_v5 = vld [vmem:[%s4331_s1 + $0x634] ss:$8 sps:$4 sm:$0xff]  }
  0xab   : > { %1638 = vmatprep.subr.bf16.mxu1 %v3133_v6  ;;  %v3209_v6 = vld [vmem:[%s4331_s1 + $0x734] ss:$8 sps:$4 sm:$0xff]  }
  0xad   : > { %1394 = vmatpush2.bf16.msra.mxu0 %v3128_v7  ;;  %v3204_v7 = vld [vmem:[%s4331_s1 + $0x630] ss:$8 sps:$4 sm:$0xff]  }
  0xae   : > { %1639 = vmatpush2.bf16.msra.mxu1 %v3131_v8  ;;  %1395 = vmatprep.subr.bf16.mxu0 %v3136_v9  ;;  %v3207_v8 = vld [vmem:[%s4331_s1 + $0x730] ss:$8 sps:$4 sm:$0xff]   ;;  %v3212_v9 = vld [vmem:[%s4331_s1 + $0x624] ss:$8 sps:$4 sm:$0xff]  }
  0xaf   : > { %1640 = vmatprep.subr.bf16.mxu1 %v3139_v10  ;;  %v3215_v10 = vld [vmem:[%s4331_s1 + $0x724] ss:$8 sps:$4 sm:$0xff]  }
  0xb1   : > { %1396 = vmatpush2.bf16.msra.mxu0 %v3134_v11  ;;  %v3210_v11 = vld [vmem:[%s4331_s1 + $0x620] ss:$8 sps:$4 sm:$0xff]  }
  0xb2   : > { %1641 = vmatpush2.bf16.msra.mxu1 %v3137_v12  ;;  %1397 = vmatprep.subr.bf16.mxu0 %v3142_v13  ;;  %v3213_v12 = vld [vmem:[%s4331_s1 + $0x720] ss:$8 sps:$4 sm:$0xff]   ;;  %v3218_v13 = vld [vmem:[%s4331_s1 + $0x614] ss:$8 sps:$4 sm:$0xff]  }
  0xb3   : > { %1642 = vmatprep.subr.bf16.mxu1 %v3145_v14  ;;  %v3221_v14 = vld [vmem:[%s4331_s1 + $0x714] ss:$8 sps:$4 sm:$0xff]  }
  0xb5   : > { %1398 = vmatpush2.bf16.msra.mxu0 %v3140_v15  ;;  %v3216_v15 = vld [vmem:[%s4331_s1 + $0x610] ss:$8 sps:$4 sm:$0xff]  }
  0xb6   : > { %1643 = vmatpush2.bf16.msra.mxu1 %v3143_v16  ;;  %1399 = vmatprep.subr.bf16.mxu0 %v3148_v17  ;;  %v3219_v16 = vld [vmem:[%s4331_s1 + $0x710] ss:$8 sps:$4 sm:$0xff]   ;;  %v3224_v17 = vld [vmem:[%s4331_s1 + $0x604] ss:$8 sps:$4 sm:$0xff]  }
  0xb7   : > { %1644 = vmatprep.subr.bf16.mxu1 %v3151_v18  ;;  %v3227_v18 = vld [vmem:[%s4331_s1 + $0x704] ss:$8 sps:$4 sm:$0xff]  }
  0xb9   : > { %1400 = vmatpush2.bf16.msra.mxu0 %v3146_v19  ;;  %v3222_v19 = vld [vmem:[%s4331_s1 + $0x600] ss:$8 sps:$4 sm:$0xff]  }
  0xba   : > { %1645 = vmatpush2.bf16.msra.mxu1 %v3149_v20  ;;  %1401 = vmatprep.subr.bf16.mxu0 %v3154_v21  ;;  %v3225_v20 = vld [vmem:[%s4331_s1 + $0x700] ss:$8 sps:$4 sm:$0xff]   ;;  %v3230_v21 = vld [vmem:[%s4331_s1 + $0x6f4] ss:$8 sps:$4 sm:$0xff]  }
  0xbb   : > { %1646 = vmatprep.subr.bf16.mxu1 %v3157_v22  ;;  %v3233_v22 = vld [vmem:[%s4331_s1 + $0x7f4] ss:$8 sps:$4 sm:$0xff]  }
  0xbd   : > { %1402 = vmatpush2.bf16.msra.mxu0 %v3152_v23  ;;  %v3228_v23 = vld [vmem:[%s4331_s1 + $0x6f0] ss:$8 sps:$4 sm:$0xff]  }
  0xbe   : > { %1647 = vmatpush2.bf16.msra.mxu1 %v3155_v47  ;;  %1403 = vmatprep.subr.bf16.mxu0 %v3160_v24  ;;  %v3231_v47 = vld [vmem:[%s4331_s1 + $0x7f0] ss:$8 sps:$4 sm:$0xff]   ;;  %v3236_v24 = vld [vmem:[%s4331_s1 + $0x6e4] ss:$8 sps:$4 sm:$0xff]  }
  0xbf   : > { %1648 = vmatprep.subr.bf16.mxu1 %v3163_v25  ;;  %v3239_v25 = vld [vmem:[%s4331_s1 + $0x7e4] ss:$8 sps:$4 sm:$0xff]  }
  0xc1   : > { %1404 = vmatpush2.bf16.msra.mxu0 %v3158_v26  ;;  %v3234_v26 = vld [vmem:[%s4331_s1 + $0x6e0] ss:$8 sps:$4 sm:$0xff]  }
  0xc2   : > { %1649 = vmatpush2.bf16.msra.mxu1 %v3161_v27  ;;  %1405 = vmatprep.subr.bf16.mxu0 %v3166_v32  ;;  %v3237_v27 = vld [vmem:[%s4331_s1 + $0x7e0] ss:$8 sps:$4 sm:$0xff]   ;;  %v3245_v32 = vld [vmem:[%s4331_s1 + $0x7d4] ss:$8 sps:$4 sm:$0xff]  }
  0xc3   : > { %1650 = vmatprep.subr.bf16.mxu1 %v3169_v33  ;;  %v3240_v33 = vld [vmem:[%s4331_s1 + $0x6d0] ss:$8 sps:$4 sm:$0xff]  }
  0xc5   : > { %1406 = vmatpush2.bf16.msra.mxu0 %v3164_v45  ;;  %v3243_v45 = vld [vmem:[%s4331_s1 + $0x7d0] ss:$8 sps:$4 sm:$0xff]  }
  0xc6   : > { %1651 = vmatpush2.bf16.msra.mxu1 %v3167_v36  ;;  %1407 = vmatprep.subr.bf16.mxu0 %v3172_v39  ;;  %v3251_v36 = vld [vmem:[%s4331_s1 + $0x7c4] ss:$8 sps:$4 sm:$0xff]   ;;  %v3254_v39 = vld [vmem:[%s4331_s1 + $0x6b4] ss:$8 sps:$4 sm:$0xff]  }
  0xc7   : > { %1652 = vmatprep.subr.bf16.mxu1 %v3175_v40  ;;  %v3257_v40 = vld [vmem:[%s4331_s1 + $0x7b4] ss:$8 sps:$4 sm:$0xff]  }
  0xc9   : > { %1408 = vmatpush2.bf16.msra.mxu0 %v3170_v41  ;;  %v3252_v41 = vld [vmem:[%s4331_s1 + $0x6b0] ss:$8 sps:$4 sm:$0xff]  }
  0xca   : > { %1653 = vmatpush2.bf16.msra.mxu1 %v3173_v43  ;;  %1865 = vmatprep.subr.bf16.mxu0 %v3180_v49  ;;  %v3260_v43 = vld [vmem:[%s4331_s1 + $0x6a4] ss:$8 sps:$4 sm:$0xff]   ;;  %v3261_v49 = vld [vmem:[%s4331_s1 + $0x7a0] ss:$8 sps:$4 sm:$0xff]  }
  0xcb   : > { %2126 = vmatprep.subr.bf16.mxu1 %v3185_v50  ;;  %v3266_v50 = vld [vmem:[%s4331_s1 + $0x694] ss:$8 sps:$4 sm:$0xff]  }
  0xcc   : > { %1410 = vmatmul.mubr.bf16.vlgmr.msra.gmra.mxu0 %v1206_v53  ;;  %v3264_v53 = vld [vmem:[%s4331_s1 + $0x690] ss:$8 sps:$4 sm:$0xff]  }
  0xcd   : > { %1655 = vmatmul.mubr.bf16.vlgmr.msra.gmra.mxu1 %v1458_v31  ;;  %1866 = vmatpush1.bf16.msra.mxu0 %v3178_v54  ;;  %v3267_v54 = vld [vmem:[%s4331_s1 + $0x790] ss:$8 sps:$4 sm:$0xff]   ;;  %v3272_v31 = vld [vmem:[%s4331_s1 + $0x684] ss:$8 sps:$4 sm:$0xff]  }
  0xce   : > { %2127 = vmatpush1.bf16.msra.mxu1 %v3183_v34  ;;  %1867 = vmatprep.subr.bf16.mxu0 %v3188_v55  ;;  %v3275_v34 = vld [vmem:[%s4331_s1 + $0x784] ss:$8 sps:$4 sm:$0xff]  }
  0xcf   : > { %2128 = vmatprep.subr.bf16.mxu1 %v3191_v56  ;;  %1897 = vmatprep.mubr.bf16.mxu0 %v2761_v57  ;;  %v4198_v55 = vld [vmem:[%s3508_s30 + $0x8] sm:$0xee]  ;;  %v1951_v56 = vshrl.u32 %v2794_v46, 16  ;;  %v1955_v57 = vrot.slane %v1953_v52, 1 }
  0xd0   : > { %2158 = vmatprep.mubr.bf16.mxu1 %v1963_v58  ;;  %v3270_v58 = vld [vmem:[%s4331_s1 + $0x680] ss:$8 sps:$4 sm:$0xff]  }
  0xd1   : > { %1868 = vmatpush1.bf16.msra.mxu0 %v3186_v59  ;;  %v3273_v59 = vld [vmem:[%s4331_s1 + $0x780] ss:$8 sps:$4 sm:$0xff]  }
  0xd2   : > { %2129 = vmatpush1.bf16.msra.mxu1 %v3189_v60  ;;  %1869 = vmatprep.subr.bf16.mxu0 %v3194_v61  ;;  %v2829_v60 = vcombine.high %v4198_v55, %v3977_v30  ;;  %v3280_v61 = vld [vmem:[%s4331_s1 + $0x874] ss:$8 sps:$4 sm:$0xff]  }
  0xd3   : > { %2130 = vmatprep.subr.bf16.mxu1 %v3197_v62  ;;  %v2760_v62 = vcombine.low %v3974_v29, %v3974_v29  ;;  %v3283_v29 = vld [vmem:[%s4331_s1 + $0x860] ss:$8 sps:$4 sm:$0xff]  }
  0xd5   : > { %1870 = vmatpush1.bf16.msra.mxu0 %v3192_v63  ;;  %v1956_v63 = vor.u32 %v1955_v57, %v1951_v56 }
  0xd6   : > { %2131 = vmatpush1.bf16.msra.mxu1 %v3195_v0  ;;  %1871 = vmatprep.subr.bf16.mxu0 %v3200_v1  ;;  %v3278_v0 = vld [vmem:[%s4331_s1 + $0x870] ss:$8 sps:$4 sm:$0xff]   ;;  %v2208_v1 = vrot.slane %v2829_v60, 1 }
  0xd7   : > { %2132 = vmatprep.subr.bf16.mxu1 %v3203_v2  ;;  %v3285_v2 = vld [vmem:[%s4331_s1 + $0x864] ss:$8 sps:$4 sm:$0xff]  }
  0xd9   : > { %1872 = vmatpush1.bf16.msra.mxu0 %v3198_v3 }
  0xda   : > { %2133 = vmatpush1.bf16.msra.mxu1 %v3201_v4  ;;  %1873 = vmatprep.subr.bf16.mxu0 %v3206_v5 }
  0xdb   : > { %2134 = vmatprep.subr.bf16.mxu1 %v3209_v6 }
  0xdd   : > { %1874 = vmatpush1.bf16.msra.mxu0 %v3204_v7 }
  0xde   : > { %2135 = vmatpush1.bf16.msra.mxu1 %v3207_v8  ;;  %1875 = vmatprep.subr.bf16.mxu0 %v3212_v9  ;;  %v3288_v8 = vld [vmem:[%s4331_s1 + $0x854] ss:$8 sps:$4 sm:$0xff]  }
  0xdf   : > { %2136 = vmatprep.subr.bf16.mxu1 %v3215_v10 }
  0xe1   : > { %1876 = vmatpush1.bf16.msra.mxu0 %v3210_v11 }
  0xe2   : > { %2137 = vmatpush1.bf16.msra.mxu1 %v3213_v12  ;;  %1877 = vmatprep.subr.bf16.mxu0 %v3218_v13  ;;  %v3286_v12 = vld [vmem:[%s4331_s1 + $0x850] ss:$8 sps:$4 sm:$0xff]  }
  0xe3   : > { %2138 = vmatprep.subr.bf16.mxu1 %v3221_v14  ;;  %v3291_v14 = vld [vmem:[%s4331_s1 + $0x844] ss:$8 sps:$4 sm:$0xff]  }
  0xe5   : > { %1878 = vmatpush1.bf16.msra.mxu0 %v3216_v15 }
  0xe6   : > { %2139 = vmatpush1.bf16.msra.mxu1 %v3219_v16  ;;  %1879 = vmatprep.subr.bf16.mxu0 %v3224_v17  ;;  %v3289_v16 = vld [vmem:[%s4331_s1 + $0x840] ss:$8 sps:$4 sm:$0xff]   ;;  %v3294_v17 = vld [vmem:[%s4331_s1 + $0x834] ss:$8 sps:$4 sm:$0xff]  }
  0xe7   : > { %2140 = vmatprep.subr.bf16.mxu1 %v3227_v18  ;;  %v3292_v18 = vld [vmem:[%s4331_s1 + $0x830] ss:$8 sps:$4 sm:$0xff]  }
  0xe9   : > { %1880 = vmatpush1.bf16.msra.mxu0 %v3222_v19  ;;  %v3297_v19 = vld [vmem:[%s4331_s1 + $0x824] ss:$8 sps:$4 sm:$0xff]  }
  0xea   : > { %2141 = vmatpush1.bf16.msra.mxu1 %v3225_v20  ;;  %1881 = vmatprep.subr.bf16.mxu0 %v3230_v21  ;;  %v3295_v20 = vld [vmem:[%s4331_s1 + $0x820] ss:$8 sps:$4 sm:$0xff]   ;;  %v3300_v21 = vld [vmem:[%s4331_s1 + $0x814] ss:$8 sps:$4 sm:$0xff]  }
  0xeb   : > { %2142 = vmatprep.subr.bf16.mxu1 %v3233_v22  ;;  %v3298_v22 = vld [vmem:[%s4331_s1 + $0x810] ss:$8 sps:$4 sm:$0xff]  }
  0xed   : > { %1882 = vmatpush2.bf16.msra.mxu0 %v3228_v23  ;;  %v3303_v23 = vld [vmem:[%s4331_s1 + $0x804] ss:$8 sps:$4 sm:$0xff]  }
  0xee   : > { %2143 = vmatpush2.bf16.msra.mxu1 %v3231_v47  ;;  %1883 = vmatprep.subr.bf16.mxu0 %v3236_v24  ;;  %v3301_v47 = vld [vmem:[%s4331_s1 + $0x800] ss:$8 sps:$4 sm:$0xff]   ;;  %v3306_v24 = vld [vmem:[%s4331_s1 + $0x8f4] ss:$8 sps:$4 sm:$0xff]  }
  0xef   : > { %2144 = vmatprep.subr.bf16.mxu1 %v3239_v25  ;;  %v3304_v25 = vld [vmem:[%s4331_s1 + $0x8f0] ss:$8 sps:$4 sm:$0xff]  }
  0xf1   : > { %1884 = vmatpush2.bf16.msra.mxu0 %v3234_v26  ;;  %v3309_v26 = vld [vmem:[%s4331_s1 + $0x8e4] ss:$8 sps:$4 sm:$0xff]  }
  0xf2   : > { %2145 = vmatpush2.bf16.msra.mxu1 %v3237_v27  ;;  %1885 = vmatprep.subr.bf16.mxu0 %v3242_v28  ;;  %v3307_v27 = vld [vmem:[%s4331_s1 + $0x8e0] ss:$8 sps:$4 sm:$0xff]   ;;  %v3312_v28 = vld [vmem:[%s4331_s1 + $0x8d4] ss:$8 sps:$4 sm:$0xff]  }
  0xf3   : > { %2146 = vmatprep.subr.bf16.mxu1 %v3245_v32  ;;  %v3310_v32 = vld [vmem:[%s4331_s1 + $0x8d0] ss:$8 sps:$4 sm:$0xff]  }
  0xf5   : > { %1886 = vmatpush2.bf16.msra.mxu0 %v3240_v33  ;;  %v3315_v33 = vld [vmem:[%s4331_s1 + $0x8c4] ss:$8 sps:$4 sm:$0xff]  }
  0xf6   : > { %2147 = vmatpush2.bf16.msra.mxu1 %v3243_v45  ;;  %1887 = vmatprep.subr.bf16.mxu0 %v3248_v35  ;;  %v3313_v45 = vld [vmem:[%s4331_s1 + $0x8c0] ss:$8 sps:$4 sm:$0xff]   ;;  %v3318_v35 = vld [vmem:[%s4331_s1 + $0x8b4] ss:$8 sps:$4 sm:$0xff]  }
  0xf7   : > { %2148 = vmatprep.subr.bf16.mxu1 %v3251_v36  ;;  %v3316_v36 = vld [vmem:[%s4331_s1 + $0x8b0] ss:$8 sps:$4 sm:$0xff]  }
  0xf9   : > { %1888 = vmatpush2.bf16.msra.mxu0 %v3246_v37  ;;  %v3321_v37 = vld [vmem:[%s4331_s1 + $0x8a4] ss:$8 sps:$4 sm:$0xff]  }
  0xfa   : > { %2149 = vmatpush2.bf16.msra.mxu1 %v3249_v38  ;;  %1889 = vmatprep.subr.bf16.mxu0 %v3254_v39  ;;  %v3319_v38 = vld [vmem:[%s4331_s1 + $0x8a0] ss:$8 sps:$4 sm:$0xff]   ;;  %v3324_v39 = vld [vmem:[%s4331_s1 + $0x894] ss:$8 sps:$4 sm:$0xff]  }
  0xfb   : > { %2150 = vmatprep.subr.bf16.mxu1 %v3257_v40  ;;  %v3322_v40 = vld [vmem:[%s4331_s1 + $0x890] ss:$8 sps:$4 sm:$0xff]  }
  0xfd   : > { %1890 = vmatpush2.bf16.msra.mxu0 %v3252_v41  ;;  %v3327_v41 = vld [vmem:[%s4331_s1 + $0x884] ss:$8 sps:$4 sm:$0xff]  }
  0xfe   : > { %2151 = vmatpush2.bf16.msra.mxu1 %v3255_v42  ;;  %1891 = vmatprep.subr.bf16.mxu0 %v3260_v43  ;;  %v2828_v42 = vcombine.low %v4198_v55, %v3977_v30  ;;  %v3325_v43 = vld [vmem:[%s4331_s1 + $0x880] ss:$8 sps:$4 sm:$0xff]  }
  0xff   : > { %2152 = vmatprep.subr.bf16.mxu1 %v3263_v44 }
 0x100   : > { %v2207_v44 = vrot.slane %v2828_v42, 1 }
 0x101   : > { %1892 = vmatpush2.bf16.msra.mxu0 %v3258_v48 }
 0x102   : > { %2153 = vmatpush2.bf16.msra.mxu1 %v3261_v49  ;;  %1893 = vmatprep.subr.bf16.mxu0 %v3266_v50 }
 0x103   : > { %2154 = vmatprep.subr.bf16.mxu1 %v3269_v51 }
 0x105   : > { %1894 = vmatpush2.bf16.msra.mxu0 %v3264_v53 }
 0x106   : > { %2155 = vmatpush2.bf16.msra.mxu1 %v3267_v54  ;;  %1895 = vmatprep.subr.bf16.mxu0 %v3272_v31 }
 0x107   : > { %2156 = vmatprep.subr.bf16.mxu1 %v3275_v34 }
 0x109   : > { %1896 = vmatpush2.bf16.msra.mxu0 %v3270_v58 }
 0x10a   : > { %2157 = vmatpush2.bf16.msra.mxu1 %v3273_v59  ;;  %2371 = vmatprep.subr.bf16.mxu0 %v3280_v61 }
 0x10c   : > { %v455_v3 = vpop.f32.mrf.mxu0  ;;  %1898 = vmatmul.mubr.bf16.vlgmr.msra.gmra.mxu0 %v2760_v62 }
 0x10d   : > { %v660_v4 = vpop.f32.mrf.mxu1  ;;  %2159 = vmatmul.mubr.bf16.vlgmr.msra.gmra.mxu1 %v1956_v63  ;;  %2372 = vmatpush1.bf16.msra.mxu0 %v3278_v0 }
 0x10e   : > { %v4219_v5 = vadd.f32 %v660_v4, %v455_v3  ;;  %2403 = vmatprep.mubr.bf16.mxu0 %v2208_v1  ;;  %v457_v6 = vpop.f32.mrf.mxu0  ;;  %2373 = vmatprep.subr.bf16.mxu0 %v3285_v2 }
 0x10f   : > { %v662_v7 = vpop.f32.mrf.mxu1 }
 0x110   : > { %v4227_v9 = vadd.f32 %v662_v7, %v457_v6  ;;  %v459_v10 = vpop.f32.mrf.mxu0 }
 0x111   : > { %v664_v11 = vpop.f32.mrf.mxu1  ;;  %2374 = vmatpush1.bf16.msra.mxu0 %v3283_v29 }
 0x112   : > { %v460_v13 = vpop.f32.mrf.mxu0  ;;  %2375 = vmatprep.subr.bf16.mxu0 %v3288_v8 }
 0x113   : > { %v665_v15 = vpop.f32.mrf.mxu1  ;;  %v2416_v13 = vlaneseq }
 0x115   : > { %2376 = vmatpush1.bf16.msra.mxu0 %v3286_v12 }
 0x116   : > { %2377 = vmatprep.subr.bf16.mxu0 %v3291_v14  ;;  %v2417_v14 = vshrl.u32 %v2416_v13, 7 }
 0x118   : > { %v2418_v15 = vsub.s32 0, %v2417_v14 }
 0x119   : > { %2378 = vmatpush1.bf16.msra.mxu0 %v3289_v16  ;;  %v2414_v16 = vld [vmem:[%s4332_s2] ss:$8 sm:$0x3] }
 0x11a   : > { %2379 = vmatprep.subr.bf16.mxu0 %v3294_v17 }
 0x11d   : > { %2380 = vmatpush1.bf16.msra.mxu0 %v3292_v18  ;;  %v2422_v18 = vsub.s32 1, %v2417_v14 }
 0x11e   : > { %2381 = vmatprep.subr.bf16.mxu0 %v3297_v19  ;;  %v2419_v19 = vrot.slane %v2414_v16, %v2418_v15 }
 0x121   : > { %2382 = vmatpush1.bf16.msra.mxu0 %v3295_v20 }
 0x122   : > { %2383 = vmatprep.subr.bf16.mxu0 %v3300_v21  ;;  %v2862_v21 = vld [vmem:[%s4332_s2 + $0x1] ss:$8 sm:$0x3] }
 0x125   : > { %2384 = vmatpush1.bf16.msra.mxu0 %v3298_v22 }
 0x126   : > { %2385 = vmatprep.subr.bf16.mxu0 %v3303_v23 }
 0x129   : > { %2386 = vmatpush1.bf16.msra.mxu0 %v3301_v47  ;;  %v2423_v47 = vrot.slane %v2414_v16, %v2422_v18 }
 0x12a   : > { %2387 = vmatprep.subr.bf16.mxu0 %v3306_v24 }
 0x12d   : > { %2388 = vmatpush2.bf16.msra.mxu0 %v3304_v25 }
 0x12e   : > { %2389 = vmatprep.subr.bf16.mxu0 %v3309_v26  ;;  %v2436_v26 = vrot.slane %v2862_v21, %v2418_v15 }
 0x131   : > { %2390 = vmatpush2.bf16.msra.mxu0 %v3307_v27 }
 0x132   : > { %2391 = vmatprep.subr.bf16.mxu0 %v3312_v28  ;;  %v2863_v28 = vld [vmem:[%s4332_s2 + $0x2] ss:$8 sm:$0x3] }
 0x135   : > { %2392 = vmatpush2.bf16.msra.mxu0 %v3310_v32 }
 0x136   : > { %2393 = vmatprep.subr.bf16.mxu0 %v3315_v33 }
 0x139   : > { %2394 = vmatpush2.bf16.msra.mxu0 %v3313_v45 }
 0x13a   : > { %2395 = vmatprep.subr.bf16.mxu0 %v3318_v35  ;;  %v2440_v35 = vrot.slane %v2862_v21, %v2422_v18 }
 0x13d   : > { %2396 = vmatpush2.bf16.msra.mxu0 %v3316_v36 }
 0x13e   : > { %2397 = vmatprep.subr.bf16.mxu0 %v3321_v37 }
 0x141   : > { %2398 = vmatpush2.bf16.msra.mxu0 %v3319_v38  ;;  %v2451_v38 = vrot.slane %v2863_v28, %v2418_v15 }
 0x142   : > { %2399 = vmatprep.subr.bf16.mxu0 %v3324_v39 }
 0x145   : > { %2400 = vmatpush2.bf16.msra.mxu0 %v3322_v40  ;;  %v2455_v40 = vrot.slane %v2863_v28, %v2422_v18 }
 0x146   : > { %2401 = vmatprep.subr.bf16.mxu0 %v3327_v41 }
 0x149   : > { %2402 = vmatpush2.bf16.msra.mxu0 %v3325_v43 }
 0x14c   : > { %v903_v46 = vpop.f32.mrf.mxu0  ;;  %2404 = vmatmul.mubr.bf16.vlgmr.msra.gmra.mxu0 %v2207_v44 }
 0x14d   : > { %v1152_v48 = vpop.f32.mrf.mxu1  ;;  %v910_v49 = vadd.f32 %v903_v46, %v4219_v5 }
 0x14e   : > { %v905_v50 = vpop.f32.mrf.mxu0 }
 0x14f   : > { %v1154_v51 = vpop.f32.mrf.mxu1  ;;  %v911_v52 = vadd.f32 %v905_v50, %v4227_v9  ;;  %v1159_v53 = vadd.f32 %v1152_v48, %v910_v49 }
 0x150   : > { %v907_v54 = vpop.f32.mrf.mxu0 }
 0x151   : > { %v1156_v30 = vpop.f32.mrf.mxu1  ;;  %v1160_v31 = vadd.f32 %v1154_v51, %v911_v52 }
 0x152   : > { %v908_v34 = vpop.f32.mrf.mxu0 }
 0x153   : > { %v1157_v55 = vpop.f32.mrf.mxu1 }
 0x18c   : > { %v1411_v56 = vpop.f32.mrf.mxu0 }
 0x18d   : > { %v1656_v57 = vpop.f32.mrf.mxu1  ;;  %v1418_v58 = vadd.f32 %v1411_v56, %v1159_v53 }
 0x18e   : > { %v1413_v59 = vpop.f32.mrf.mxu0 }
 0x18f   : > { %v1658_v60 = vpop.f32.mrf.mxu1  ;;  %v1419_v61 = vadd.f32 %v1413_v59, %v1160_v31  ;;  %v1663_v62 = vadd.f32 %v1656_v57, %v1418_v58 }
 0x190   : > { %v1415_v63 = vpop.f32.mrf.mxu0 }
 0x191   : > { %v1660_v0 = vpop.f32.mrf.mxu1  ;;  %v1664_v1 = vadd.f32 %v1658_v60, %v1419_v61 }
 0x192   : > { %v1416_v2 = vpop.f32.mrf.mxu0 }
 0x193   : > { %v1661_v3 = vpop.f32.mrf.mxu1 }
 0x1cc   : > { %v1899_v4 = vpop.f32.mrf.mxu0 }
 0x1cd   : > { %v2160_v5 = vpop.f32.mrf.mxu1  ;;  %v1906_v29 = vadd.f32 %v1899_v4, %v1663_v62 }
 0x1ce   : > { %v1901_v6 = vpop.f32.mrf.mxu0 }
 0x1cf   : > { %v2162_v7 = vpop.f32.mrf.mxu1  ;;  %v2167_v8 = vadd.f32 %v2160_v5, %v1906_v29  ;;  %v1907_v17 = vadd.f32 %v1901_v6, %v1664_v1 }
 0x1d0   : > { %v1903_v9 = vpop.f32.mrf.mxu0 }
 0x1d1   : > { %v2164_v10 = vpop.f32.mrf.mxu1  ;;  %v2168_v22 = vadd.f32 %v2162_v7, %v1907_v17 }
 0x1d2   : > { %v1904_v11 = vpop.f32.mrf.mxu0 }
 0x1d3   : > { %v2165_v12 = vpop.f32.mrf.mxu1 }
 0x20c   : > { %v2405_v20 = vpop.f32.mrf.mxu0 }
 0x20d   : > { %v2412_v23 = vadd.f32 %v2405_v20, %v2167_v8 }
 0x20e   : > { %v2407_v24 = vpop.f32.mrf.mxu0 }
 0x20f   : > { %v2426_v25 = vadd.f32 %v2419_v19, %v2412_v23  ;;  %v2413_v27 = vadd.f32 %v2407_v24, %v2168_v22 }
 0x210   : > { %v2409_v32 = vpop.f32.mrf.mxu0 }
 0x211   : > { %v2428_v33 = vmax.f32 %v2426_v25, 0.0  ;;  %v2427_v45 = vadd.f32 %v2423_v47, %v2413_v27 }
 0x212   : > { %v2410_v36 = vpop.f32.mrf.mxu0 }
 0x213   : > { %v2443_v37 = vmul.f32 %v2436_v26, %v2428_v33  ;;  %v2429_v39 = vmax.f32 %v2427_v45, 0.0 }
 0x215   : > { %v2444_v41 = vmul.f32 %v2440_v35, %v2429_v39  ;;  %v2458_v42 = vadd.f32 %v2451_v38, %v2443_v37 }
 0x217   : > { %v2459_v43 = vadd.f32 %v2455_v40, %v2444_v41 }
 0x219   : > { %v2870_v44 = vpack.c.bf16 %v2459_v43, %v2458_v42 }
 0x21b   : > { %2468 = vst [vmem:[#allocation2] sm:$0xff] %v2870_v44 }
 0x222   : > { %v2865_v46 = vld.sshfl [vmem:[#allocation2] sm:$0x5 pattern:$0x76325410] }
 0x223   : > { %2479 = vst [vmem:[%s170_s20] sm:$0x5] %v2865_v46  ;;  %v2866_v48 = vld.sshfl [vmem:[#allocation2] sm:$0x50 pattern:$0x76325410] }
 0x224   : > { %v2489_v49 = vcombine.high %v2866_v48, %v2866_v48 }
 0x226   : > { %v2490_v50 = vrot.slane %v2489_v49, 7 }
 0x228   : > { %2492 = vst [vmem:[%s170_s20] sm:$0xa] %v2490_v50 }
 0x229 PF: > { %s13_s12 = sadd.s32 1, %s3336_s12  }
 0x22a   : > { %p10_p4 = scmp.ge.s32.totalorder %s13_s12, 4  }
 0x22c   :  { %12 = sbr.rel (!%p10_p4) target bundleno = 1 (0x1), region = 64 }

// kernel: _lambda_.11
= control target key start
LH: loop header
LB: loop body
LE: loop exit
PB: predicated region body
PF: predicated region fallthrough
CT: control target
= control target key end

     0   :  { %s9020_s0 = inlined_call_operand.vmem [shape: bf16[2,6,256], index: 0, kind: input, shape index: {}]   ;;  %s9021_s1 = inlined_call_operand.vmem [shape: bf16[2,6,256], index: 1, kind: input, shape index: {}]   ;;  %s9022_s2 = inlined_call_operand.vmem [shape: bf16[2,6,256], index: 2, kind: input, shape index: {}]   ;;  %s9023_s3 = inlined_call_operand.vmem [shape: bf16[2,6,256], index: 3, kind: input, shape index: {}]   ;;  %s9024_s4 = inlined_call_operand.vmem [shape: bf16[2304,512], index: 4, kind: input, shape index: {}]   ;;  %s9025_s5 = inlined_call_operand.vmem [shape: f32[8,512], index: 5, kind: input, shape index: {}]   ;;  %s9026_s6 = inlined_call_operand.vmem [shape: bf16[512,128], index: 6, kind: input, shape index: {}]   ;;  %s9027_s7 = inlined_call_operand.hbm [shape: f32[2,1,128], index: 7, kind: output, shape index: {}]  }
   0x1   :  { %9028 = sst [smem:[#allocation6_spill]] %s9020_s0 }
   0x2   :  { %12 = vsyncpa [#allocation4], 0 }
   0x3   :  { %14 = vsyncpa [#allocation4 + $0x1], 0  ;;  %s6957_s24 = smov 0   ;;  %s6959_s25 = smov 0  }
   0x4   :  { %s6961_s26 = smov 0   ;;  %s6963_s27 = smov 0  }
   0x5 LB: > { %s6978_s28 = sadd.s32 4294967295, %s6914_s27   ;;  %s5210_s29 = sadd.s32 4294967294, %s6914_s27   ;;  %s6914_s27 = sphi %s6963_s27, %s9035_s27   ;;  %s6910_s26 = sphi %s6961_s26, %s9034_s26   ;;  %s6906_s25 = sphi %s6959_s25, %s9033_s25   ;;  %s6902_s24 = sphi %s6957_s24, %s9032_s24  }
   0x6   : > { %s6982_s30 = sadd.s32 1, %s6914_s27   ;;  %s194_s8 = sadd.s32 1, %s6910_s26 }
   0x7   : > { %s191_s9 = ssub.s32 %s6914_s27, %s6982_s30  ;;  %p204_p0 = scmp.ne.s32.totalorder %s6910_s26, %s6906_s25 }
   0x8   : > { %p192_p1 = scmp.eq.s32.totalorder %s191_s9, 0  ;;  %p205_p2 = scmp.eq.s32.totalorder %s6978_s28, 1 }
   0x9   : > { %p210_p3 = scmp.ne.s32.totalorder %s6906_s25, %s6902_s24  ;;  %p211_p4 = scmp.eq.s32.totalorder %s5210_s29, 1 }
   0xa   : > { %s6993_s10 = scalar_select %p192_p1, %s6910_s26, %s194_s8  }
   0xb   : > { %p6995_p5 = por %p205_p2, %p204_p0  ;;  %p6999_p6 = por %p211_p4, %p210_p3 }
   0xc   : > { %p5213_p7 = scmp.ge.s32.totalorder %s6914_s27, 1  ;;  %p270_p8 = scmp.lt.s32.totalorder %s6914_s27, 3 }
   0xe   : > { %p271_p9 = pnand %p5213_p7, %p270_p8 }
   0xf   : > { %p316_p10 = scmp.lt.s32.totalorder (!%p271_p9), %s6978_s28, 1  ;;  %s9031_s0 = sld [smem:[#allocation6_spill]] (!%p271_p9) }
  0x10   : > { %274 = sbr.rel (%p271_p9) target bundleno = 1026 (0x402), region = 48  ;;  %s5850_s8 = sshll.u32 (!%p271_p9), %s6978_s28, 4 }
  0x11   : > { %s8985_s16 = scalar_lea.hbm (!%p271_p9), %s9027_s7, %s5850_s8  ;;  %s6916_s19 = smov (!%p271_p9), [#allocation3]  }
  0x12   : > { %s6858_s21 = sshll.u32 (!%p271_p9), %s6916_s19, 4  ;;  %s6859_s21 = int_to_ptr.vmem [resolvable:$false] %s6858_s21 }
  0x15   : > { %v5940_v0 = vld [vmem:[%s9024_s4 + $0x2e4] ss:$16 sps:$4 sm:$0xff]   ;;  %v5942_v1 = vld [vmem:[%s9024_s4 + $0x2ec] ss:$16 sps:$4 sm:$0xff]   ;;  %v5944_v2 = vld [vmem:[%s9024_s4 + $0x2e0] ss:$16 sps:$4 sm:$0xff]  }
  0x16   : > { %794 = vmatprep.subr.bf16.mxu0 %v5940_v0  ;;  %v5945_v3 = vld [vmem:[%s9024_s4 + $0x2e8] ss:$16 sps:$4 sm:$0xff]   ;;  %835 = vmatprep.subr.bf16.mxu1 %v5942_v1  ;;  %v5946_v4 = vld [vmem:[%s9024_s4 + $0x2c4] ss:$16 sps:$4 sm:$0xff]   ;;  %v5948_v5 = vld [vmem:[%s9024_s4 + $0x2cc] ss:$16 sps:$4 sm:$0xff]  }
  0x17   : > { %795 = vmatpush1.bf16.msra.mxu0 %v5944_v2  ;;  %836 = vmatpush1.bf16.msra.mxu1 %v5945_v3  ;;  %v5950_v6 = vld [vmem:[%s9024_s4 + $0x2c0] ss:$16 sps:$4 sm:$0xff]   ;;  %v5951_v7 = vld [vmem:[%s9024_s4 + $0x2c8] ss:$16 sps:$4 sm:$0xff]   ;;  %v5952_v8 = vld [vmem:[%s9024_s4 + $0x2a4] ss:$16 sps:$4 sm:$0xff]  }
  0x18   : > { %796 = vmatprep.subr.bf16.mxu0 %v5946_v4  ;;  %837 = vmatprep.subr.bf16.mxu1 %v5948_v5  ;;  %v5954_v9 = vld [vmem:[%s9024_s4 + $0x2ac] ss:$16 sps:$4 sm:$0xff]   ;;  %v5956_v10 = vld [vmem:[%s9024_s4 + $0x2a0] ss:$16 sps:$4 sm:$0xff]   ;;  %v5957_v11 = vld [vmem:[%s9024_s4 + $0x2a8] ss:$16 sps:$4 sm:$0xff]  }
  0x19   : > { %v5958_v12 = vld [vmem:[%s9024_s4 + $0x284] ss:$16 sps:$4 sm:$0xff]   ;;  %v5960_v13 = vld [vmem:[%s9024_s4 + $0x28c] ss:$16 sps:$4 sm:$0xff]   ;;  %v5962_v14 = vld [vmem:[%s9024_s4 + $0x280] ss:$16 sps:$4 sm:$0xff]  }
  0x1a   : > { %v5963_v15 = vld [vmem:[%s9024_s4 + $0x288] ss:$16 sps:$4 sm:$0xff]   ;;  %v5964_v16 = vld [vmem:[%s9024_s4 + $0x264] ss:$16 sps:$4 sm:$0xff]   ;;  %v5966_v17 = vld [vmem:[%s9024_s4 + $0x26c] ss:$16 sps:$4 sm:$0xff]  }
  0x1b   : > { %797 = vmatpush1.bf16.msra.mxu0 %v5950_v6  ;;  %838 = vmatpush1.bf16.msra.mxu1 %v5951_v7  ;;  %v5968_v18 = vld [vmem:[%s9024_s4 + $0x260] ss:$16 sps:$4 sm:$0xff]   ;;  %v5969_v19 = vld [vmem:[%s9024_s4 + $0x268] ss:$16 sps:$4 sm:$0xff]   ;;  %v5970_v20 = vld [vmem:[%s9024_s4 + $0x244] ss:$16 sps:$4 sm:$0xff]  }
  0x1c   : > { %798 = vmatprep.subr.bf16.mxu0 %v5952_v8  ;;  %839 = vmatprep.subr.bf16.mxu1 %v5954_v9  ;;  %v5972_v21 = vld [vmem:[%s9024_s4 + $0x24c] ss:$16 sps:$4 sm:$0xff]   ;;  %v5974_v22 = vld [vmem:[%s9024_s4 + $0x240] ss:$16 sps:$4 sm:$0xff]   ;;  %v5975_v23 = vld [vmem:[%s9024_s4 + $0x248] ss:$16 sps:$4 sm:$0xff]  }
  0x1d   : > { %v5976_v24 = vld [vmem:[%s9024_s4 + $0x224] ss:$16 sps:$4 sm:$0xff]   ;;  %v5978_v25 = vld [vmem:[%s9024_s4 + $0x22c] ss:$16 sps:$4 sm:$0xff]   ;;  %v5980_v26 = vld [vmem:[%s9024_s4 + $0x220] ss:$16 sps:$4 sm:$0xff]  }
  0x1e   : > { %v5981_v27 = vld [vmem:[%s9024_s4 + $0x228] ss:$16 sps:$4 sm:$0xff]   ;;  %v5982_v28 = vld [vmem:[%s9024_s4 + $0x204] ss:$16 sps:$4 sm:$0xff]   ;;  %v5984_v29 = vld [vmem:[%s9024_s4 + $0x20c] ss:$16 sps:$4 sm:$0xff]  }
  0x1f   : > { %799 = vmatpush1.bf16.msra.mxu0 %v5956_v10  ;;  %840 = vmatpush1.bf16.msra.mxu1 %v5957_v11  ;;  %v5986_v30 = vld [vmem:[%s9024_s4 + $0x200] ss:$16 sps:$4 sm:$0xff]   ;;  %v5987_v31 = vld [vmem:[%s9024_s4 + $0x208] ss:$16 sps:$4 sm:$0xff]   ;;  %v5988_v32 = vld [vmem:[%s9024_s4 + $0x3e4] ss:$16 sps:$4 sm:$0xff]  }
  0x20   : > { %800 = vmatprep.subr.bf16.mxu0 %v5958_v12  ;;  %841 = vmatprep.subr.bf16.mxu1 %v5960_v13  ;;  %v5990_v33 = vld [vmem:[%s9024_s4 + $0x3ec] ss:$16 sps:$4 sm:$0xff]   ;;  %v5992_v34 = vld [vmem:[%s9024_s4 + $0x3e0] ss:$16 sps:$4 sm:$0xff]   ;;  %v5993_v35 = vld [vmem:[%s9024_s4 + $0x3e8] ss:$16 sps:$4 sm:$0xff]  }
  0x21   : > { %v5994_v36 = vld [vmem:[%s9024_s4 + $0x3c4] ss:$16 sps:$4 sm:$0xff]   ;;  %s317_s17 = scalar_select %p316_p10, %s6978_s28, 1  ;;  %v5996_v37 = vld [vmem:[%s9024_s4 + $0x3cc] ss:$16 sps:$4 sm:$0xff]  }
  0x22   : > { %v5998_v38 = vld [vmem:[%s9024_s4 + $0x3c0] ss:$16 sps:$4 sm:$0xff]   ;;  %v5999_v39 = vld [vmem:[%s9024_s4 + $0x3c8] ss:$16 sps:$4 sm:$0xff]   ;;  %v6000_v40 = vld [vmem:[%s9024_s4 + $0x3a4] ss:$16 sps:$4 sm:$0xff]  }
  0x23   : > { %801 = vmatpush1.bf16.msra.mxu0 %v5962_v14  ;;  %842 = vmatpush1.bf16.msra.mxu1 %v5963_v15  ;;  %s7130_s9 = sshll.u32 %s317_s17, 3  ;;  %v6002_v41 = vld [vmem:[%s9024_s4 + $0x3ac] ss:$16 sps:$4 sm:$0xff]   ;;  %v6004_v42 = vld [vmem:[%s9024_s4 + $0x3a0] ss:$16 sps:$4 sm:$0xff]   ;;  %s6860_s28 = scalar_lea.vmem %s6859_s21, 32 }
  0x24   : > { %802 = vmatprep.subr.bf16.mxu0 %v5964_v16  ;;  %843 = vmatprep.subr.bf16.mxu1 %v5966_v17  ;;  %v6005_v43 = vld [vmem:[%s9024_s4 + $0x3a8] ss:$16 sps:$4 sm:$0xff]   ;;  %s7145_s17 = scalar_lea.vmem %s9021_s1, %s7130_s9  ;;  %v6006_v44 = vld [vmem:[%s9024_s4 + $0x384] ss:$16 sps:$4 sm:$0xff]   ;;  %v6008_v45 = vld [vmem:[%s9024_s4 + $0x38c] ss:$16 sps:$4 sm:$0xff]   ;;  %s7278_s29 = scalar_lea.vmem %s9031_s0, %s7130_s9 }
  0x25   : > { %v402_v46 = vld [vmem:[%s7145_s17] sm:$0x11]  ;;  %v6011_v49 = vld [vmem:[%s9024_s4 + $0x388] ss:$16 sps:$4 sm:$0xff]   ;;  %v6014_v51 = vld [vmem:[%s9024_s4 + $0x36c] ss:$16 sps:$4 sm:$0xff]   ;;  %s7619_s20 = scalar_lea.vmem %s9022_s2, %s7130_s9  ;;  %s335_s0 = scalar_lea.vmem %s9023_s3, %s7130_s9 }
  0x26   : > { %v5223_v47 = vcombine.high %v402_v46, %v402_v46  ;;  %v6010_v48 = vld [vmem:[%s9024_s4 + $0x380] ss:$16 sps:$4 sm:$0xff]   ;;  %v6012_v50 = vld [vmem:[%s9024_s4 + $0x364] ss:$16 sps:$4 sm:$0xff]   ;;  %v6017_v53 = vld [vmem:[%s9024_s4 + $0x368] ss:$16 sps:$4 sm:$0xff]   ;;  %v5222_v4 = vcombine.low %v402_v46, %v402_v46 }
  0x27   : > { %803 = vmatpush1.bf16.msra.mxu0 %v5968_v18  ;;  %844 = vmatpush1.bf16.msra.mxu1 %v5969_v19  ;;  %v6016_v52 = vld [vmem:[%s9024_s4 + $0x360] ss:$16 sps:$4 sm:$0xff]   ;;  %v6018_v54 = vld [vmem:[%s9024_s4 + $0x344] ss:$16 sps:$4 sm:$0xff]   ;;  %v6020_v55 = vld [vmem:[%s9024_s4 + $0x34c] ss:$16 sps:$4 sm:$0xff]  }
  0x28   : > { %804 = vmatprep.subr.bf16.mxu0 %v5970_v20  ;;  %845 = vmatprep.subr.bf16.mxu1 %v5972_v21  ;;  %v6022_v56 = vld [vmem:[%s9024_s4 + $0x340] ss:$16 sps:$4 sm:$0xff]   ;;  %v6023_v57 = vld [vmem:[%s9024_s4 + $0x348] ss:$16 sps:$4 sm:$0xff]   ;;  %v6024_v58 = vld [vmem:[%s9024_s4 + $0x324] ss:$16 sps:$4 sm:$0xff]  }
  0x29   : > { %826 = vmatprep.mubr.bf16.mxu0 %v5223_v47  ;;  %867 = vmatprep.mubr.bf16.mxu1 %v5223_v47  ;;  %v6026_v59 = vld [vmem:[%s9024_s4 + $0x32c] ss:$16 sps:$4 sm:$0xff]   ;;  %v6028_v60 = vld [vmem:[%s9024_s4 + $0x320] ss:$16 sps:$4 sm:$0xff]   ;;  %v6029_v61 = vld [vmem:[%s9024_s4 + $0x328] ss:$16 sps:$4 sm:$0xff]  }
  0x2a   : > { %v6030_v62 = vld [vmem:[%s9024_s4 + $0x304] ss:$16 sps:$4 sm:$0xff]   ;;  %v6032_v63 = vld [vmem:[%s9024_s4 + $0x30c] ss:$16 sps:$4 sm:$0xff]   ;;  %v6034_v0 = vld [vmem:[%s9024_s4 + $0x300] ss:$16 sps:$4 sm:$0xff]  }
  0x2b   : > { %805 = vmatpush1.bf16.msra.mxu0 %v5974_v22  ;;  %846 = vmatpush1.bf16.msra.mxu1 %v5975_v23  ;;  %v6035_v1 = vld [vmem:[%s9024_s4 + $0x308] ss:$16 sps:$4 sm:$0xff]   ;;  %v6041_v2 = vld [vmem:[%s9024_s4 + $0xe4] ss:$16 sps:$4 sm:$0xff]   ;;  %v6044_v3 = vld [vmem:[%s9024_s4 + $0xec] ss:$16 sps:$4 sm:$0xff]  }
  0x2c   : > { %806 = vmatprep.subr.bf16.mxu0 %v5976_v24  ;;  %847 = vmatprep.subr.bf16.mxu1 %v5978_v25  ;;  %v6039_v5 = vld [vmem:[%s9024_s4 + $0xe0] ss:$16 sps:$4 sm:$0xff]   ;;  %v6042_v6 = vld [vmem:[%s9024_s4 + $0xe8] ss:$16 sps:$4 sm:$0xff]   ;;  %v6047_v7 = vld [vmem:[%s9024_s4 + $0xc4] ss:$16 sps:$4 sm:$0xff]  }
  0x2d   : > { %v6050_v8 = vld [vmem:[%s9024_s4 + $0xcc] ss:$16 sps:$4 sm:$0xff]   ;;  %v6045_v9 = vld [vmem:[%s9024_s4 + $0xc0] ss:$16 sps:$4 sm:$0xff]   ;;  %v6048_v10 = vld [vmem:[%s9024_s4 + $0xc8] ss:$16 sps:$4 sm:$0xff]  }
  0x2e   : > { %v6053_v11 = vld [vmem:[%s9024_s4 + $0xa4] ss:$16 sps:$4 sm:$0xff]   ;;  %v6056_v12 = vld [vmem:[%s9024_s4 + $0xac] ss:$16 sps:$4 sm:$0xff]   ;;  %v6051_v13 = vld [vmem:[%s9024_s4 + $0xa0] ss:$16 sps:$4 sm:$0xff]  }
  0x2f   : > { %807 = vmatpush1.bf16.msra.mxu0 %v5980_v26  ;;  %848 = vmatpush1.bf16.msra.mxu1 %v5981_v27  ;;  %v6054_v14 = vld [vmem:[%s9024_s4 + $0xa8] ss:$16 sps:$4 sm:$0xff]   ;;  %v6059_v15 = vld [vmem:[%s9024_s4 + $0x84] ss:$16 sps:$4 sm:$0xff]   ;;  %v6062_v16 = vld [vmem:[%s9024_s4 + $0x8c] ss:$16 sps:$4 sm:$0xff]  }
  0x30   : > { %808 = vmatprep.subr.bf16.mxu0 %v5982_v28  ;;  %849 = vmatprep.subr.bf16.mxu1 %v5984_v29  ;;  %v6057_v17 = vld [vmem:[%s9024_s4 + $0x80] ss:$16 sps:$4 sm:$0xff]   ;;  %v6060_v18 = vld [vmem:[%s9024_s4 + $0x88] ss:$16 sps:$4 sm:$0xff]   ;;  %v6065_v19 = vld [vmem:[%s9024_s4 + $0x64] ss:$16 sps:$4 sm:$0xff]  }
  0x31   : > { %v6068_v20 = vld [vmem:[%s9024_s4 + $0x6c] ss:$16 sps:$4 sm:$0xff]   ;;  %v6063_v21 = vld [vmem:[%s9024_s4 + $0x60] ss:$16 sps:$4 sm:$0xff]   ;;  %v6066_v22 = vld [vmem:[%s9024_s4 + $0x68] ss:$16 sps:$4 sm:$0xff]  }
  0x32   : > { %v6071_v23 = vld [vmem:[%s9024_s4 + $0x44] ss:$16 sps:$4 sm:$0xff]   ;;  %v6074_v24 = vld [vmem:[%s9024_s4 + $0x4c] ss:$16 sps:$4 sm:$0xff]   ;;  %v6069_v25 = vld [vmem:[%s9024_s4 + $0x40] ss:$16 sps:$4 sm:$0xff]  }
  0x33   : > { %809 = vmatpush1.bf16.msra.mxu0 %v5986_v30  ;;  %850 = vmatpush1.bf16.msra.mxu1 %v5987_v31  ;;  %v6072_v26 = vld [vmem:[%s9024_s4 + $0x48] ss:$16 sps:$4 sm:$0xff]   ;;  %v6077_v27 = vld [vmem:[%s9024_s4 + $0x24] ss:$16 sps:$4 sm:$0xff]   ;;  %v6080_v28 = vld [vmem:[%s9024_s4 + $0x2c] ss:$16 sps:$4 sm:$0xff]  }
  0x34   : > { %810 = vmatprep.subr.bf16.mxu0 %v5988_v32  ;;  %851 = vmatprep.subr.bf16.mxu1 %v5990_v33  ;;  %v7293_v29 = vld [vmem:[%s7278_s29] sm:$0x11]  ;;  %v6078_v32 = vld [vmem:[%s9024_s4 + $0x28] ss:$16 sps:$4 sm:$0xff]   ;;  %v6104_v46 = vld [vmem:[%s9024_s4 + $0x1ac] ss:$16 sps:$4 sm:$0xff]  }
  0x35   : > { %v6075_v30 = vld [vmem:[%s9024_s4 + $0x20] ss:$16 sps:$4 sm:$0xff]   ;;  %v5289_v31 = vcombine.high %v7293_v29, %v7293_v29  ;;  %v6083_v33 = vld [vmem:[%s9024_s4 + $0x4] ss:$16 sps:$4 sm:$0xff]  }
  0x36   : > { %v6099_v47 = vld [vmem:[%s9024_s4 + $0x1a0] ss:$16 sps:$4 sm:$0xff]  }
  0x37   : > { %811 = vmatpush2.bf16.msra.mxu0 %v5992_v34  ;;  %852 = vmatpush2.bf16.msra.mxu1 %v5993_v35  ;;  %v6086_v34 = vld [vmem:[%s9024_s4 + $0xc] ss:$16 sps:$4 sm:$0xff]   ;;  %v6081_v35 = vld [vmem:[%s9024_s4] ss:$16 sps:$4 sm:$0xff]  }
  0x38   : > { %812 = vmatprep.subr.bf16.mxu0 %v5994_v36  ;;  %853 = vmatprep.subr.bf16.mxu1 %v5996_v37  ;;  %v6084_v36 = vld [vmem:[%s9024_s4 + $0x8] ss:$16 sps:$4 sm:$0xff]   ;;  %v6089_v37 = vld [vmem:[%s9024_s4 + $0x1e4] ss:$16 sps:$4 sm:$0xff]  }
  0x3b   : > { %813 = vmatpush2.bf16.msra.mxu0 %v5998_v38  ;;  %854 = vmatpush2.bf16.msra.mxu1 %v5999_v39  ;;  %v6092_v38 = vld [vmem:[%s9024_s4 + $0x1ec] ss:$16 sps:$4 sm:$0xff]   ;;  %v6087_v39 = vld [vmem:[%s9024_s4 + $0x1e0] ss:$16 sps:$4 sm:$0xff]  }
  0x3c   : > { %814 = vmatprep.subr.bf16.mxu0 %v6000_v40  ;;  %855 = vmatprep.subr.bf16.mxu1 %v6002_v41  ;;  %v6090_v40 = vld [vmem:[%s9024_s4 + $0x1e8] ss:$16 sps:$4 sm:$0xff]   ;;  %v6095_v41 = vld [vmem:[%s9024_s4 + $0x1c4] ss:$16 sps:$4 sm:$0xff]  }
  0x3f   : > { %815 = vmatpush2.bf16.msra.mxu0 %v6004_v42  ;;  %856 = vmatpush2.bf16.msra.mxu1 %v6005_v43  ;;  %v6098_v42 = vld [vmem:[%s9024_s4 + $0x1cc] ss:$16 sps:$4 sm:$0xff]   ;;  %v6093_v43 = vld [vmem:[%s9024_s4 + $0x1c0] ss:$16 sps:$4 sm:$0xff]  }
  0x40   : > { %816 = vmatprep.subr.bf16.mxu0 %v6006_v44  ;;  %857 = vmatprep.subr.bf16.mxu1 %v6008_v45  ;;  %v6096_v44 = vld [vmem:[%s9024_s4 + $0x1c8] ss:$16 sps:$4 sm:$0xff]   ;;  %v6101_v45 = vld [vmem:[%s9024_s4 + $0x1a4] ss:$16 sps:$4 sm:$0xff]  }
  0x43   : > { %817 = vmatpush2.bf16.msra.mxu0 %v6010_v48  ;;  %858 = vmatpush2.bf16.msra.mxu1 %v6011_v49  ;;  %v6102_v48 = vld [vmem:[%s9024_s4 + $0x1a8] ss:$16 sps:$4 sm:$0xff]   ;;  %v6107_v49 = vld [vmem:[%s9024_s4 + $0x184] ss:$16 sps:$4 sm:$0xff]  }
  0x44   : > { %818 = vmatprep.subr.bf16.mxu0 %v6012_v50  ;;  %859 = vmatprep.subr.bf16.mxu1 %v6014_v51  ;;  %v6110_v50 = vld [vmem:[%s9024_s4 + $0x18c] ss:$16 sps:$4 sm:$0xff]   ;;  %v6105_v51 = vld [vmem:[%s9024_s4 + $0x180] ss:$16 sps:$4 sm:$0xff]  }
  0x47   : > { %819 = vmatpush2.bf16.msra.mxu0 %v6016_v52  ;;  %860 = vmatpush2.bf16.msra.mxu1 %v6017_v53  ;;  %v6108_v52 = vld [vmem:[%s9024_s4 + $0x188] ss:$16 sps:$4 sm:$0xff]   ;;  %v6113_v53 = vld [vmem:[%s9024_s4 + $0x164] ss:$16 sps:$4 sm:$0xff]  }
  0x48   : > { %820 = vmatprep.subr.bf16.mxu0 %v6018_v54  ;;  %861 = vmatprep.subr.bf16.mxu1 %v6020_v55  ;;  %v6116_v54 = vld [vmem:[%s9024_s4 + $0x16c] ss:$16 sps:$4 sm:$0xff]   ;;  %v6111_v55 = vld [vmem:[%s9024_s4 + $0x160] ss:$16 sps:$4 sm:$0xff]  }
  0x4b   : > { %821 = vmatpush2.bf16.msra.mxu0 %v6022_v56  ;;  %862 = vmatpush2.bf16.msra.mxu1 %v6023_v57  ;;  %v6114_v56 = vld [vmem:[%s9024_s4 + $0x168] ss:$16 sps:$4 sm:$0xff]   ;;  %v6119_v57 = vld [vmem:[%s9024_s4 + $0x144] ss:$16 sps:$4 sm:$0xff]  }
  0x4c   : > { %822 = vmatprep.subr.bf16.mxu0 %v6024_v58  ;;  %863 = vmatprep.subr.bf16.mxu1 %v6026_v59  ;;  %v6122_v58 = vld [vmem:[%s9024_s4 + $0x14c] ss:$16 sps:$4 sm:$0xff]   ;;  %v6117_v59 = vld [vmem:[%s9024_s4 + $0x140] ss:$16 sps:$4 sm:$0xff]  }
  0x4f   : > { %823 = vmatpush2.bf16.msra.mxu0 %v6028_v60  ;;  %864 = vmatpush2.bf16.msra.mxu1 %v6029_v61  ;;  %v6120_v60 = vld [vmem:[%s9024_s4 + $0x148] ss:$16 sps:$4 sm:$0xff]   ;;  %v6125_v61 = vld [vmem:[%s9024_s4 + $0x124] ss:$16 sps:$4 sm:$0xff]  }
  0x50   : > { %824 = vmatprep.subr.bf16.mxu0 %v6030_v62  ;;  %865 = vmatprep.subr.bf16.mxu1 %v6032_v63  ;;  %v6128_v62 = vld [vmem:[%s9024_s4 + $0x12c] ss:$16 sps:$4 sm:$0xff]   ;;  %v6123_v63 = vld [vmem:[%s9024_s4 + $0x120] ss:$16 sps:$4 sm:$0xff]  }
  0x53   : > { %825 = vmatpush2.bf16.msra.mxu0 %v6034_v0  ;;  %866 = vmatpush2.bf16.msra.mxu1 %v6035_v1  ;;  %v6126_v0 = vld [vmem:[%s9024_s4 + $0x128] ss:$16 sps:$4 sm:$0xff]   ;;  %v6131_v1 = vld [vmem:[%s9024_s4 + $0x104] ss:$16 sps:$4 sm:$0xff]  }
  0x54   : > { %1203 = vmatprep.subr.bf16.mxu0 %v6041_v2  ;;  %1244 = vmatprep.subr.bf16.mxu1 %v6044_v3  ;;  %v6134_v2 = vld [vmem:[%s9024_s4 + $0x10c] ss:$16 sps:$4 sm:$0xff]   ;;  %v6129_v3 = vld [vmem:[%s9024_s4 + $0x100] ss:$16 sps:$4 sm:$0xff]  }
  0x56   : > { %827 = vmatmul.mubr.bf16.vlgmr.msra.gmra.mxu0 %v5222_v4  ;;  %868 = vmatmul.mubr.bf16.vlgmr.msra.gmra.mxu1 %v5222_v4  ;;  %v6132_v4 = vld [vmem:[%s9024_s4 + $0x108] ss:$16 sps:$4 sm:$0xff]  }
  0x57   : > { %1204 = vmatpush1.bf16.msra.mxu0 %v6039_v5  ;;  %1245 = vmatpush1.bf16.msra.mxu1 %v6042_v6  ;;  %v6139_v5 = vld [vmem:[%s9024_s4 + $0x4e4] ss:$16 sps:$4 sm:$0xff]   ;;  %v6142_v6 = vld [vmem:[%s9024_s4 + $0x4ec] ss:$16 sps:$4 sm:$0xff]  }
  0x58   : > { %1205 = vmatprep.subr.bf16.mxu0 %v6047_v7  ;;  %1246 = vmatprep.subr.bf16.mxu1 %v6050_v8  ;;  %v5288_v7 = vcombine.low %v7293_v29, %v7293_v29  ;;  %v6137_v8 = vld [vmem:[%s9024_s4 + $0x4e0] ss:$16 sps:$4 sm:$0xff]   ;;  %v6166_v29 = vld [vmem:[%s9024_s4 + $0x46c] ss:$16 sps:$4 sm:$0xff]  }
  0x59   : > { %1235 = vmatprep.mubr.bf16.mxu0 %v5289_v31  ;;  %1276 = vmatprep.mubr.bf16.mxu1 %v5289_v31  ;;  %v6164_v31 = vld [vmem:[%s9024_s4 + $0x468] ss:$16 sps:$4 sm:$0xff]  }
  0x5b   : > { %1206 = vmatpush1.bf16.msra.mxu0 %v6045_v9  ;;  %1247 = vmatpush1.bf16.msra.mxu1 %v6048_v10  ;;  %v6140_v9 = vld [vmem:[%s9024_s4 + $0x4e8] ss:$16 sps:$4 sm:$0xff]   ;;  %v6145_v10 = vld [vmem:[%s9024_s4 + $0x4c4] ss:$16 sps:$4 sm:$0xff]  }
  0x5c   : > { %1207 = vmatprep.subr.bf16.mxu0 %v6053_v11  ;;  %1248 = vmatprep.subr.bf16.mxu1 %v6056_v12  ;;  %v6148_v11 = vld [vmem:[%s9024_s4 + $0x4cc] ss:$16 sps:$4 sm:$0xff]   ;;  %v7432_v12 = vld [vmem:[%s7278_s29] sm:$0x33] }
  0x5f   : > { %1208 = vmatpush1.bf16.msra.mxu0 %v6051_v13  ;;  %1249 = vmatpush1.bf16.msra.mxu1 %v6054_v14  ;;  %v5355_v13 = vcombine.high %v7432_v12, %v7432_v12  ;;  %v6143_v14 = vld [vmem:[%s9024_s4 + $0x4c0] ss:$16 sps:$4 sm:$0xff]  }
  0x60   : > { %1209 = vmatprep.subr.bf16.mxu0 %v6059_v15  ;;  %1250 = vmatprep.subr.bf16.mxu1 %v6062_v16  ;;  %v6146_v15 = vld [vmem:[%s9024_s4 + $0x4c8] ss:$16 sps:$4 sm:$0xff]  }
  0x61   : > { %v1363_v16 = vshrl.u32 %v5355_v13, 16 }
  0x63   : > { %1210 = vmatpush1.bf16.msra.mxu0 %v6057_v17  ;;  %1251 = vmatpush1.bf16.msra.mxu1 %v6060_v18  ;;  %v1365_v17 = vshll.u32 %v5355_v13, 16  ;;  %v6151_v18 = vld [vmem:[%s9024_s4 + $0x4a4] ss:$16 sps:$4 sm:$0xff]  }
  0x64   : > { %1211 = vmatprep.subr.bf16.mxu0 %v6065_v19  ;;  %1252 = vmatprep.subr.bf16.mxu1 %v6068_v20  ;;  %v6154_v19 = vld [vmem:[%s9024_s4 + $0x4ac] ss:$16 sps:$4 sm:$0xff]  }
  0x65   : > { %v1367_v20 = vrot.slane %v1365_v17, 1  ;;  %v6240_v17 = vld [vmem:[%s9024_s4 + $0x6ec] ss:$16 sps:$4 sm:$0xff]  }
  0x67   : > { %1212 = vmatpush1.bf16.msra.mxu0 %v6063_v21  ;;  %1253 = vmatpush1.bf16.msra.mxu1 %v6066_v22  ;;  %v6149_v21 = vld [vmem:[%s9024_s4 + $0x4a0] ss:$16 sps:$4 sm:$0xff]   ;;  %v6152_v22 = vld [vmem:[%s9024_s4 + $0x4a8] ss:$16 sps:$4 sm:$0xff]  }
  0x68   : > { %1213 = vmatprep.subr.bf16.mxu0 %v6071_v23  ;;  %1254 = vmatprep.subr.bf16.mxu1 %v6074_v24  ;;  %v1368_v23 = vor.u32 %v1367_v20, %v1363_v16  ;;  %v6157_v24 = vld [vmem:[%s9024_s4 + $0x484] ss:$16 sps:$4 sm:$0xff]  }
  0x69   : > { %v6237_v16 = vld [vmem:[%s9024_s4 + $0x6e4] ss:$16 sps:$4 sm:$0xff]  }
  0x6a   : > { %v7628_v20 = vld [vmem:[%s7619_s20] sm:$0x11] }
  0x6b   : > { %1214 = vmatpush1.bf16.msra.mxu0 %v6069_v25  ;;  %1255 = vmatpush1.bf16.msra.mxu1 %v6072_v26  ;;  %v6160_v25 = vld [vmem:[%s9024_s4 + $0x48c] ss:$16 sps:$4 sm:$0xff]   ;;  %v6155_v26 = vld [vmem:[%s9024_s4 + $0x480] ss:$16 sps:$4 sm:$0xff]  }
  0x6c   : > { %1215 = vmatprep.subr.bf16.mxu0 %v6077_v27  ;;  %1256 = vmatprep.subr.bf16.mxu1 %v6080_v28  ;;  %v6158_v27 = vld [vmem:[%s9024_s4 + $0x488] ss:$16 sps:$4 sm:$0xff]   ;;  %v6163_v28 = vld [vmem:[%s9024_s4 + $0x464] ss:$16 sps:$4 sm:$0xff]  }
  0x6f   : > { %1216 = vmatpush1.bf16.msra.mxu0 %v6075_v30  ;;  %1257 = vmatpush1.bf16.msra.mxu1 %v6078_v32  ;;  %v6161_v30 = vld [vmem:[%s9024_s4 + $0x460] ss:$16 sps:$4 sm:$0xff]   ;;  %v6169_v32 = vld [vmem:[%s9024_s4 + $0x444] ss:$16 sps:$4 sm:$0xff]  }
  0x70   : > { %1217 = vmatprep.subr.bf16.mxu0 %v6083_v33  ;;  %1258 = vmatprep.subr.bf16.mxu1 %v6086_v34  ;;  %v6172_v33 = vld [vmem:[%s9024_s4 + $0x44c] ss:$16 sps:$4 sm:$0xff]   ;;  %v6167_v34 = vld [vmem:[%s9024_s4 + $0x440] ss:$16 sps:$4 sm:$0xff]  }
  0x73   : > { %1218 = vmatpush1.bf16.msra.mxu0 %v6081_v35  ;;  %1259 = vmatpush1.bf16.msra.mxu1 %v6084_v36  ;;  %v6170_v35 = vld [vmem:[%s9024_s4 + $0x448] ss:$16 sps:$4 sm:$0xff]   ;;  %v6175_v36 = vld [vmem:[%s9024_s4 + $0x424] ss:$16 sps:$4 sm:$0xff]  }
  0x74   : > { %1219 = vmatprep.subr.bf16.mxu0 %v6089_v37  ;;  %1260 = vmatprep.subr.bf16.mxu1 %v6092_v38  ;;  %v6178_v37 = vld [vmem:[%s9024_s4 + $0x42c] ss:$16 sps:$4 sm:$0xff]   ;;  %v6173_v38 = vld [vmem:[%s9024_s4 + $0x420] ss:$16 sps:$4 sm:$0xff]  }
  0x77   : > { %1220 = vmatpush2.bf16.msra.mxu0 %v6087_v39  ;;  %1261 = vmatpush2.bf16.msra.mxu1 %v6090_v40  ;;  %v6176_v39 = vld [vmem:[%s9024_s4 + $0x428] ss:$16 sps:$4 sm:$0xff]   ;;  %v6181_v40 = vld [vmem:[%s9024_s4 + $0x404] ss:$16 sps:$4 sm:$0xff]  }
  0x78   : > { %1221 = vmatprep.subr.bf16.mxu0 %v6095_v41  ;;  %1262 = vmatprep.subr.bf16.mxu1 %v6098_v42  ;;  %v6184_v41 = vld [vmem:[%s9024_s4 + $0x40c] ss:$16 sps:$4 sm:$0xff]   ;;  %v6179_v42 = vld [vmem:[%s9024_s4 + $0x400] ss:$16 sps:$4 sm:$0xff]  }
  0x7b   : > { %1222 = vmatpush2.bf16.msra.mxu0 %v6093_v43  ;;  %1263 = vmatpush2.bf16.msra.mxu1 %v6096_v44  ;;  %v6182_v43 = vld [vmem:[%s9024_s4 + $0x408] ss:$16 sps:$4 sm:$0xff]   ;;  %v6187_v44 = vld [vmem:[%s9024_s4 + $0x5e4] ss:$16 sps:$4 sm:$0xff]  }
  0x7c   : > { %1223 = vmatprep.subr.bf16.mxu0 %v6101_v45  ;;  %1264 = vmatprep.subr.bf16.mxu1 %v6104_v46  ;;  %v6190_v45 = vld [vmem:[%s9024_s4 + $0x5ec] ss:$16 sps:$4 sm:$0xff]   ;;  %v6185_v46 = vld [vmem:[%s9024_s4 + $0x5e0] ss:$16 sps:$4 sm:$0xff]  }
  0x7f   : > { %1224 = vmatpush2.bf16.msra.mxu0 %v6099_v47  ;;  %1265 = vmatpush2.bf16.msra.mxu1 %v6102_v48  ;;  %v6188_v47 = vld [vmem:[%s9024_s4 + $0x5e8] ss:$16 sps:$4 sm:$0xff]   ;;  %v6193_v48 = vld [vmem:[%s9024_s4 + $0x5c4] ss:$16 sps:$4 sm:$0xff]  }
  0x80   : > { %1225 = vmatprep.subr.bf16.mxu0 %v6107_v49  ;;  %1266 = vmatprep.subr.bf16.mxu1 %v6110_v50  ;;  %v6196_v49 = vld [vmem:[%s9024_s4 + $0x5cc] ss:$16 sps:$4 sm:$0xff]   ;;  %v6191_v50 = vld [vmem:[%s9024_s4 + $0x5c0] ss:$16 sps:$4 sm:$0xff]  }
  0x83   : > { %1226 = vmatpush2.bf16.msra.mxu0 %v6105_v51  ;;  %1267 = vmatpush2.bf16.msra.mxu1 %v6108_v52  ;;  %v6194_v51 = vld [vmem:[%s9024_s4 + $0x5c8] ss:$16 sps:$4 sm:$0xff]   ;;  %v6199_v52 = vld [vmem:[%s9024_s4 + $0x5a4] ss:$16 sps:$4 sm:$0xff]  }
  0x84   : > { %1227 = vmatprep.subr.bf16.mxu0 %v6113_v53  ;;  %1268 = vmatprep.subr.bf16.mxu1 %v6116_v54  ;;  %v6202_v53 = vld [vmem:[%s9024_s4 + $0x5ac] ss:$16 sps:$4 sm:$0xff]   ;;  %v6197_v54 = vld [vmem:[%s9024_s4 + $0x5a0] ss:$16 sps:$4 sm:$0xff]  }
  0x87   : > { %1228 = vmatpush2.bf16.msra.mxu0 %v6111_v55  ;;  %1269 = vmatpush2.bf16.msra.mxu1 %v6114_v56  ;;  %v6200_v55 = vld [vmem:[%s9024_s4 + $0x5a8] ss:$16 sps:$4 sm:$0xff]   ;;  %v6205_v56 = vld [vmem:[%s9024_s4 + $0x584] ss:$16 sps:$4 sm:$0xff]  }
  0x88   : > { %1229 = vmatprep.subr.bf16.mxu0 %v6119_v57  ;;  %1270 = vmatprep.subr.bf16.mxu1 %v6122_v58  ;;  %v6208_v57 = vld [vmem:[%s9024_s4 + $0x58c] ss:$16 sps:$4 sm:$0xff]   ;;  %v6203_v58 = vld [vmem:[%s9024_s4 + $0x580] ss:$16 sps:$4 sm:$0xff]  }
  0x8b   : > { %1230 = vmatpush2.bf16.msra.mxu0 %v6117_v59  ;;  %1271 = vmatpush2.bf16.msra.mxu1 %v6120_v60  ;;  %v6206_v59 = vld [vmem:[%s9024_s4 + $0x588] ss:$16 sps:$4 sm:$0xff]   ;;  %v6211_v60 = vld [vmem:[%s9024_s4 + $0x564] ss:$16 sps:$4 sm:$0xff]  }
  0x8c   : > { %1231 = vmatprep.subr.bf16.mxu0 %v6125_v61  ;;  %1272 = vmatprep.subr.bf16.mxu1 %v6128_v62  ;;  %v6214_v61 = vld [vmem:[%s9024_s4 + $0x56c] ss:$16 sps:$4 sm:$0xff]   ;;  %v6209_v62 = vld [vmem:[%s9024_s4 + $0x560] ss:$16 sps:$4 sm:$0xff]  }
  0x8f   : > { %1232 = vmatpush2.bf16.msra.mxu0 %v6123_v63  ;;  %1273 = vmatpush2.bf16.msra.mxu1 %v6126_v0  ;;  %v6212_v63 = vld [vmem:[%s9024_s4 + $0x568] ss:$16 sps:$4 sm:$0xff]   ;;  %v6217_v0 = vld [vmem:[%s9024_s4 + $0x544] ss:$16 sps:$4 sm:$0xff]  }
  0x90   : > { %1233 = vmatprep.subr.bf16.mxu0 %v6131_v1  ;;  %1274 = vmatprep.subr.bf16.mxu1 %v6134_v2  ;;  %v6220_v1 = vld [vmem:[%s9024_s4 + $0x54c] ss:$16 sps:$4 sm:$0xff]   ;;  %v6215_v2 = vld [vmem:[%s9024_s4 + $0x540] ss:$16 sps:$4 sm:$0xff]  }
  0x93   : > { %1234 = vmatpush2.bf16.msra.mxu0 %v6129_v3  ;;  %1275 = vmatpush2.bf16.msra.mxu1 %v6132_v4  ;;  %v5354_v3 = vcombine.low %v7432_v12, %v7432_v12  ;;  %v6218_v4 = vld [vmem:[%s9024_s4 + $0x548] ss:$16 sps:$4 sm:$0xff]   ;;  %v6227_v12 = vld [vmem:[%s9024_s4 + $0x500] ss:$16 sps:$4 sm:$0xff]  }
  0x94   : > { %1691 = vmatprep.subr.bf16.mxu0 %v6139_v5  ;;  %1732 = vmatprep.subr.bf16.mxu1 %v6142_v6  ;;  %v6223_v5 = vld [vmem:[%s9024_s4 + $0x524] ss:$16 sps:$4 sm:$0xff]   ;;  %v6226_v6 = vld [vmem:[%s9024_s4 + $0x52c] ss:$16 sps:$4 sm:$0xff]  }
  0x95   : > { %v1356_v13 = vshrl.u32 %v5354_v3, 16 }
  0x96   : > { %1236 = vmatmul.mubr.bf16.vlgmr.msra.gmra.mxu0 %v5288_v7  ;;  %1277 = vmatmul.mubr.bf16.vlgmr.msra.gmra.mxu1 %v5288_v7  ;;  %v6221_v7 = vld [vmem:[%s9024_s4 + $0x520] ss:$16 sps:$4 sm:$0xff]  }
  0x97   : > { %1692 = vmatpush1.bf16.msra.mxu0 %v6137_v8  ;;  %1733 = vmatpush1.bf16.msra.mxu1 %v6140_v9  ;;  %v1358_v8 = vshll.u32 %v5354_v3, 16  ;;  %v6224_v9 = vld [vmem:[%s9024_s4 + $0x528] ss:$16 sps:$4 sm:$0xff]   ;;  %v6309_v3 = vld [vmem:[%s9024_s4 + $0x764] ss:$16 sps:$4 sm:$0xff]  }
  0x98   : > { %1693 = vmatprep.subr.bf16.mxu0 %v6145_v10  ;;  %1734 = vmatprep.subr.bf16.mxu1 %v6148_v11  ;;  %v6229_v10 = vld [vmem:[%s9024_s4 + $0x504] ss:$16 sps:$4 sm:$0xff]   ;;  %v6232_v11 = vld [vmem:[%s9024_s4 + $0x50c] ss:$16 sps:$4 sm:$0xff]  }
  0x99   : > { %1723 = vmatprep.mubr.bf16.mxu0 %v1368_v23  ;;  %1764 = vmatprep.mubr.bf16.mxu1 %v1368_v23  ;;  %v6246_v23 = vld [vmem:[%s9024_s4 + $0x6cc] ss:$16 sps:$4 sm:$0xff]  }
  0x9b   : > { %1694 = vmatpush1.bf16.msra.mxu0 %v6143_v14  ;;  %1735 = vmatpush1.bf16.msra.mxu1 %v6146_v15  ;;  %v1360_v14 = vrot.slane %v1358_v8, 1  ;;  %v6230_v15 = vld [vmem:[%s9024_s4 + $0x508] ss:$16 sps:$4 sm:$0xff]   ;;  %v6318_v8 = vld [vmem:[%s9024_s4 + $0x74c] ss:$16 sps:$4 sm:$0xff]  }
  0x9c   : > { %1695 = vmatprep.subr.bf16.mxu0 %v6151_v18  ;;  %1736 = vmatprep.subr.bf16.mxu1 %v6154_v19  ;;  %v6235_v19 = vld [vmem:[%s9024_s4 + $0x6e0] ss:$16 sps:$4 sm:$0xff]  }
  0x9d   : > { %v1361_v18 = vor.u32 %v1360_v14, %v1356_v13  ;;  %v6319_v13 = vld [vmem:[%s9024_s4 + $0x720] ss:$16 sps:$4 sm:$0xff]   ;;  %v6322_v14 = vld [vmem:[%s9024_s4 + $0x728] ss:$16 sps:$4 sm:$0xff]  }
  0x9f   : > { %1696 = vmatpush1.bf16.msra.mxu0 %v6149_v21  ;;  %1737 = vmatpush1.bf16.msra.mxu1 %v6152_v22  ;;  %v6238_v21 = vld [vmem:[%s9024_s4 + $0x6e8] ss:$16 sps:$4 sm:$0xff]   ;;  %v6243_v22 = vld [vmem:[%s9024_s4 + $0x6c4] ss:$16 sps:$4 sm:$0xff]  }
  0xa0   : > { %1697 = vmatprep.subr.bf16.mxu0 %v6157_v24  ;;  %1738 = vmatprep.subr.bf16.mxu1 %v6160_v25  ;;  %v5421_v24 = vcombine.high %v7628_v20, %v7628_v20  ;;  %v6241_v25 = vld [vmem:[%s9024_s4 + $0x6c0] ss:$16 sps:$4 sm:$0xff]  }
  0xa3   : > { %1698 = vmatpush1.bf16.msra.mxu0 %v6155_v26  ;;  %1739 = vmatpush1.bf16.msra.mxu1 %v6158_v27  ;;  %v6244_v26 = vld [vmem:[%s9024_s4 + $0x6c8] ss:$16 sps:$4 sm:$0xff]   ;;  %v6249_v27 = vld [vmem:[%s9024_s4 + $0x6a4] ss:$16 sps:$4 sm:$0xff]  }
  0xa4   : > { %1699 = vmatprep.subr.bf16.mxu0 %v6163_v28  ;;  %1740 = vmatprep.subr.bf16.mxu1 %v6166_v29  ;;  %v6252_v28 = vld [vmem:[%s9024_s4 + $0x6ac] ss:$16 sps:$4 sm:$0xff]   ;;  %v6247_v29 = vld [vmem:[%s9024_s4 + $0x6a0] ss:$16 sps:$4 sm:$0xff]  }
  0xa7   : > { %1700 = vmatpush1.bf16.msra.mxu0 %v6161_v30  ;;  %1741 = vmatpush1.bf16.msra.mxu1 %v6164_v31  ;;  %v6250_v30 = vld [vmem:[%s9024_s4 + $0x6a8] ss:$16 sps:$4 sm:$0xff]   ;;  %v6255_v31 = vld [vmem:[%s9024_s4 + $0x684] ss:$16 sps:$4 sm:$0xff]  }
  0xa8   : > { %1701 = vmatprep.subr.bf16.mxu0 %v6169_v32  ;;  %1742 = vmatprep.subr.bf16.mxu1 %v6172_v33  ;;  %v6258_v32 = vld [vmem:[%s9024_s4 + $0x68c] ss:$16 sps:$4 sm:$0xff]   ;;  %v6253_v33 = vld [vmem:[%s9024_s4 + $0x680] ss:$16 sps:$4 sm:$0xff]  }
  0xab   : > { %1702 = vmatpush1.bf16.msra.mxu0 %v6167_v34  ;;  %1743 = vmatpush1.bf16.msra.mxu1 %v6170_v35  ;;  %v6256_v34 = vld [vmem:[%s9024_s4 + $0x688] ss:$16 sps:$4 sm:$0xff]   ;;  %v6261_v35 = vld [vmem:[%s9024_s4 + $0x664] ss:$16 sps:$4 sm:$0xff]  }
  0xac   : > { %1703 = vmatprep.subr.bf16.mxu0 %v6175_v36  ;;  %1744 = vmatprep.subr.bf16.mxu1 %v6178_v37  ;;  %v6264_v36 = vld [vmem:[%s9024_s4 + $0x66c] ss:$16 sps:$4 sm:$0xff]   ;;  %v6259_v37 = vld [vmem:[%s9024_s4 + $0x660] ss:$16 sps:$4 sm:$0xff]  }
  0xaf   : > { %1704 = vmatpush1.bf16.msra.mxu0 %v6173_v38  ;;  %1745 = vmatpush1.bf16.msra.mxu1 %v6176_v39  ;;  %v6262_v38 = vld [vmem:[%s9024_s4 + $0x668] ss:$16 sps:$4 sm:$0xff]   ;;  %v6267_v39 = vld [vmem:[%s9024_s4 + $0x644] ss:$16 sps:$4 sm:$0xff]  }
  0xb0   : > { %1705 = vmatprep.subr.bf16.mxu0 %v6181_v40  ;;  %1746 = vmatprep.subr.bf16.mxu1 %v6184_v41  ;;  %v6270_v40 = vld [vmem:[%s9024_s4 + $0x64c] ss:$16 sps:$4 sm:$0xff]   ;;  %v6265_v41 = vld [vmem:[%s9024_s4 + $0x640] ss:$16 sps:$4 sm:$0xff]  }
  0xb3   : > { %1706 = vmatpush1.bf16.msra.mxu0 %v6179_v42  ;;  %1747 = vmatpush1.bf16.msra.mxu1 %v6182_v43  ;;  %v6268_v42 = vld [vmem:[%s9024_s4 + $0x648] ss:$16 sps:$4 sm:$0xff]   ;;  %v6273_v43 = vld [vmem:[%s9024_s4 + $0x624] ss:$16 sps:$4 sm:$0xff]  }
  0xb4   : > { %1707 = vmatprep.subr.bf16.mxu0 %v6187_v44  ;;  %1748 = vmatprep.subr.bf16.mxu1 %v6190_v45  ;;  %v6276_v44 = vld [vmem:[%s9024_s4 + $0x62c] ss:$16 sps:$4 sm:$0xff]   ;;  %v6271_v45 = vld [vmem:[%s9024_s4 + $0x620] ss:$16 sps:$4 sm:$0xff]  }
  0xb7   : > { %1708 = vmatpush2.bf16.msra.mxu0 %v6185_v46  ;;  %1749 = vmatpush2.bf16.msra.mxu1 %v6188_v47  ;;  %v6274_v46 = vld [vmem:[%s9024_s4 + $0x628] ss:$16 sps:$4 sm:$0xff]   ;;  %v6279_v47 = vld [vmem:[%s9024_s4 + $0x604] ss:$16 sps:$4 sm:$0xff]  }
  0xb8   : > { %1709 = vmatprep.subr.bf16.mxu0 %v6193_v48  ;;  %1750 = vmatprep.subr.bf16.mxu1 %v6196_v49  ;;  %v6282_v48 = vld [vmem:[%s9024_s4 + $0x60c] ss:$16 sps:$4 sm:$0xff]   ;;  %v6277_v49 = vld [vmem:[%s9024_s4 + $0x600] ss:$16 sps:$4 sm:$0xff]  }
  0xbb   : > { %1710 = vmatpush2.bf16.msra.mxu0 %v6191_v50  ;;  %1751 = vmatpush2.bf16.msra.mxu1 %v6194_v51  ;;  %v6280_v50 = vld [vmem:[%s9024_s4 + $0x608] ss:$16 sps:$4 sm:$0xff]   ;;  %v6285_v51 = vld [vmem:[%s9024_s4 + $0x7e4] ss:$16 sps:$4 sm:$0xff]  }
  0xbc   : > { %1711 = vmatprep.subr.bf16.mxu0 %v6199_v52  ;;  %1752 = vmatprep.subr.bf16.mxu1 %v6202_v53  ;;  %v6288_v52 = vld [vmem:[%s9024_s4 + $0x7ec] ss:$16 sps:$4 sm:$0xff]   ;;  %v6283_v53 = vld [vmem:[%s9024_s4 + $0x7e0] ss:$16 sps:$4 sm:$0xff]  }
  0xbf   : > { %1712 = vmatpush2.bf16.msra.mxu0 %v6197_v54  ;;  %1753 = vmatpush2.bf16.msra.mxu1 %v6200_v55  ;;  %v6286_v54 = vld [vmem:[%s9024_s4 + $0x7e8] ss:$16 sps:$4 sm:$0xff]   ;;  %v6291_v55 = vld [vmem:[%s9024_s4 + $0x7c4] ss:$16 sps:$4 sm:$0xff]  }
  0xc0   : > { %1713 = vmatprep.subr.bf16.mxu0 %v6205_v56  ;;  %1754 = vmatprep.subr.bf16.mxu1 %v6208_v57  ;;  %v6294_v56 = vld [vmem:[%s9024_s4 + $0x7cc] ss:$16 sps:$4 sm:$0xff]   ;;  %v6289_v57 = vld [vmem:[%s9024_s4 + $0x7c0] ss:$16 sps:$4 sm:$0xff]  }
  0xc3   : > { %1714 = vmatpush2.bf16.msra.mxu0 %v6203_v58  ;;  %1755 = vmatpush2.bf16.msra.mxu1 %v6206_v59  ;;  %v6292_v58 = vld [vmem:[%s9024_s4 + $0x7c8] ss:$16 sps:$4 sm:$0xff]   ;;  %v6297_v59 = vld [vmem:[%s9024_s4 + $0x7a4] ss:$16 sps:$4 sm:$0xff]  }
  0xc4   : > { %1715 = vmatprep.subr.bf16.mxu0 %v6211_v60  ;;  %1756 = vmatprep.subr.bf16.mxu1 %v6214_v61  ;;  %v6300_v60 = vld [vmem:[%s9024_s4 + $0x7ac] ss:$16 sps:$4 sm:$0xff]   ;;  %v6295_v61 = vld [vmem:[%s9024_s4 + $0x7a0] ss:$16 sps:$4 sm:$0xff]  }
  0xc7   : > { %1716 = vmatpush2.bf16.msra.mxu0 %v6209_v62  ;;  %1757 = vmatpush2.bf16.msra.mxu1 %v6212_v63  ;;  %v6298_v62 = vld [vmem:[%s9024_s4 + $0x7a8] ss:$16 sps:$4 sm:$0xff]   ;;  %v6303_v63 = vld [vmem:[%s9024_s4 + $0x784] ss:$16 sps:$4 sm:$0xff]  }
  0xc8   : > { %1717 = vmatprep.subr.bf16.mxu0 %v6217_v0  ;;  %1758 = vmatprep.subr.bf16.mxu1 %v6220_v1  ;;  %v6306_v0 = vld [vmem:[%s9024_s4 + $0x78c] ss:$16 sps:$4 sm:$0xff]   ;;  %v6301_v1 = vld [vmem:[%s9024_s4 + $0x780] ss:$16 sps:$4 sm:$0xff]  }
  0xcb   : > { %1718 = vmatpush2.bf16.msra.mxu0 %v6215_v2  ;;  %1759 = vmatpush2.bf16.msra.mxu1 %v6218_v4  ;;  %v6304_v2 = vld [vmem:[%s9024_s4 + $0x788] ss:$16 sps:$4 sm:$0xff]   ;;  %v6312_v4 = vld [vmem:[%s9024_s4 + $0x76c] ss:$16 sps:$4 sm:$0xff]  }
  0xcc   : > { %1719 = vmatprep.subr.bf16.mxu0 %v6223_v5  ;;  %1760 = vmatprep.subr.bf16.mxu1 %v6226_v6  ;;  %v6307_v5 = vld [vmem:[%s9024_s4 + $0x760] ss:$16 sps:$4 sm:$0xff]   ;;  %v6310_v6 = vld [vmem:[%s9024_s4 + $0x768] ss:$16 sps:$4 sm:$0xff]  }
  0xcf   : > { %1720 = vmatpush2.bf16.msra.mxu0 %v6221_v7  ;;  %1761 = vmatpush2.bf16.msra.mxu1 %v6224_v9  ;;  %v6315_v7 = vld [vmem:[%s9024_s4 + $0x744] ss:$16 sps:$4 sm:$0xff]   ;;  %v6313_v9 = vld [vmem:[%s9024_s4 + $0x740] ss:$16 sps:$4 sm:$0xff]  }
  0xd0   : > { %1721 = vmatprep.subr.bf16.mxu0 %v6229_v10  ;;  %1762 = vmatprep.subr.bf16.mxu1 %v6232_v11  ;;  %v6316_v10 = vld [vmem:[%s9024_s4 + $0x748] ss:$16 sps:$4 sm:$0xff]   ;;  %v6321_v11 = vld [vmem:[%s9024_s4 + $0x724] ss:$16 sps:$4 sm:$0xff]  }
  0xd3   : > { %1722 = vmatpush2.bf16.msra.mxu0 %v6227_v12  ;;  %1763 = vmatpush2.bf16.msra.mxu1 %v6230_v15  ;;  %v6324_v12 = vld [vmem:[%s9024_s4 + $0x72c] ss:$16 sps:$4 sm:$0xff]   ;;  %v6327_v15 = vld [vmem:[%s9024_s4 + $0x704] ss:$16 sps:$4 sm:$0xff]  }
  0xd4   : > { %2169 = vmatprep.subr.bf16.mxu0 %v6237_v16  ;;  %2210 = vmatprep.subr.bf16.mxu1 %v6240_v17  ;;  %v6330_v16 = vld [vmem:[%s9024_s4 + $0x70c] ss:$16 sps:$4 sm:$0xff]   ;;  %v6325_v17 = vld [vmem:[%s9024_s4 + $0x700] ss:$16 sps:$4 sm:$0xff]  }
  0xd6   : > { %1724 = vmatmul.mubr.bf16.vlgmr.msra.gmra.mxu0 %v1361_v18  ;;  %1765 = vmatmul.mubr.bf16.vlgmr.msra.gmra.mxu1 %v1361_v18  ;;  %v6328_v18 = vld [vmem:[%s9024_s4 + $0x708] ss:$16 sps:$4 sm:$0xff]  }
  0xd7   : > { %2170 = vmatpush1.bf16.msra.mxu0 %v6235_v19  ;;  %2211 = vmatpush1.bf16.msra.mxu1 %v6238_v21  ;;  %v6336_v19 = vld [vmem:[%s9024_s4 + $0x8e4] ss:$16 sps:$4 sm:$0xff]   ;;  %v6339_v21 = vld [vmem:[%s9024_s4 + $0x8ec] ss:$16 sps:$4 sm:$0xff]  }
  0xd8   : > { %2171 = vmatprep.subr.bf16.mxu0 %v6243_v22  ;;  %2212 = vmatprep.subr.bf16.mxu1 %v6246_v23  ;;  %v6334_v22 = vld [vmem:[%s9024_s4 + $0x8e0] ss:$16 sps:$4 sm:$0xff]   ;;  %v5420_v23 = vcombine.low %v7628_v20, %v7628_v20 }
  0xd9   : > { %2201 = vmatprep.mubr.bf16.mxu0 %v5421_v24  ;;  %2242 = vmatprep.mubr.bf16.mxu1 %v5421_v24  ;;  %v6337_v24 = vld [vmem:[%s9024_s4 + $0x8e8] ss:$16 sps:$4 sm:$0xff]  }
  0xdb   : > { %2172 = vmatpush1.bf16.msra.mxu0 %v6241_v25  ;;  %2213 = vmatpush1.bf16.msra.mxu1 %v6244_v26  ;;  %v7833_v25 = vld [vmem:[%s335_s0] sm:$0x11] }
  0xdc   : > { %2173 = vmatprep.subr.bf16.mxu0 %v6249_v27  ;;  %2214 = vmatprep.subr.bf16.mxu1 %v6252_v28  ;;  %v6342_v26 = vld [vmem:[%s9024_s4 + $0x8c4] ss:$16 sps:$4 sm:$0xff]   ;;  %v6345_v27 = vld [vmem:[%s9024_s4 + $0x8cc] ss:$16 sps:$4 sm:$0xff]   ;;  %v5487_v20 = vcombine.high %v7833_v25, %v7833_v25 }
  0xdf   : > { %2174 = vmatpush1.bf16.msra.mxu0 %v6247_v29  ;;  %2215 = vmatpush1.bf16.msra.mxu1 %v6250_v30  ;;  %v6340_v30 = vld [vmem:[%s9024_s4 + $0x8c0] ss:$16 sps:$4 sm:$0xff]  }
  0xe0   : > { %2175 = vmatprep.subr.bf16.mxu0 %v6255_v31  ;;  %2216 = vmatprep.subr.bf16.mxu1 %v6258_v32  ;;  %v6343_v31 = vld [vmem:[%s9024_s4 + $0x8c8] ss:$16 sps:$4 sm:$0xff]   ;;  %v6348_v32 = vld [vmem:[%s9024_s4 + $0x8a4] ss:$16 sps:$4 sm:$0xff]  }
  0xe3   : > { %2176 = vmatpush1.bf16.msra.mxu0 %v6253_v33  ;;  %2217 = vmatpush1.bf16.msra.mxu1 %v6256_v34 }
  0xe4   : > { %2177 = vmatprep.subr.bf16.mxu0 %v6261_v35  ;;  %2218 = vmatprep.subr.bf16.mxu1 %v6264_v36  ;;  %v6351_v35 = vld [vmem:[%s9024_s4 + $0x8ac] ss:$16 sps:$4 sm:$0xff]  }
  0xe7   : > { %2178 = vmatpush1.bf16.msra.mxu0 %v6259_v37  ;;  %2219 = vmatpush1.bf16.msra.mxu1 %v6262_v38  ;;  %v6346_v38 = vld [vmem:[%s9024_s4 + $0x8a0] ss:$16 sps:$4 sm:$0xff]  }
  0xe8   : > { %2179 = vmatprep.subr.bf16.mxu0 %v6267_v39  ;;  %2220 = vmatprep.subr.bf16.mxu1 %v6270_v40  ;;  %v6349_v39 = vld [vmem:[%s9024_s4 + $0x8a8] ss:$16 sps:$4 sm:$0xff]  }
  0xeb   : > { %2180 = vmatpush1.bf16.msra.mxu0 %v6265_v41  ;;  %2221 = vmatpush1.bf16.msra.mxu1 %v6268_v42  ;;  %v6354_v42 = vld [vmem:[%s9024_s4 + $0x884] ss:$16 sps:$4 sm:$0xff]  }
  0xec   : > { %2181 = vmatprep.subr.bf16.mxu0 %v6273_v43  ;;  %2222 = vmatprep.subr.bf16.mxu1 %v6276_v44  ;;  %v6357_v43 = vld [vmem:[%s9024_s4 + $0x88c] ss:$16 sps:$4 sm:$0xff]   ;;  %v6352_v44 = vld [vmem:[%s9024_s4 + $0x880] ss:$16 sps:$4 sm:$0xff]  }
  0xef   : > { %2182 = vmatpush1.bf16.msra.mxu0 %v6271_v45  ;;  %2223 = vmatpush1.bf16.msra.mxu1 %v6274_v46  ;;  %v6355_v45 = vld [vmem:[%s9024_s4 + $0x888] ss:$16 sps:$4 sm:$0xff]   ;;  %v6360_v46 = vld [vmem:[%s9024_s4 + $0x864] ss:$16 sps:$4 sm:$0xff]  }
  0xf0   : > { %2183 = vmatprep.subr.bf16.mxu0 %v6279_v47  ;;  %2224 = vmatprep.subr.bf16.mxu1 %v6282_v48  ;;  %v6363_v47 = vld [vmem:[%s9024_s4 + $0x86c] ss:$16 sps:$4 sm:$0xff]   ;;  %v6358_v48 = vld [vmem:[%s9024_s4 + $0x860] ss:$16 sps:$4 sm:$0xff]  }
  0xf3   : > { %2184 = vmatpush1.bf16.msra.mxu0 %v6277_v49  ;;  %2225 = vmatpush1.bf16.msra.mxu1 %v6280_v50  ;;  %v6361_v49 = vld [vmem:[%s9024_s4 + $0x868] ss:$16 sps:$4 sm:$0xff]   ;;  %v6366_v50 = vld [vmem:[%s9024_s4 + $0x844] ss:$16 sps:$4 sm:$0xff]  }
  0xf4   : > { %2185 = vmatprep.subr.bf16.mxu0 %v6285_v51  ;;  %2226 = vmatprep.subr.bf16.mxu1 %v6288_v52  ;;  %v6369_v51 = vld [vmem:[%s9024_s4 + $0x84c] ss:$16 sps:$4 sm:$0xff]   ;;  %v6364_v52 = vld [vmem:[%s9024_s4 + $0x840] ss:$16 sps:$4 sm:$0xff]  }
  0xf7   : > { %2186 = vmatpush2.bf16.msra.mxu0 %v6283_v53  ;;  %2227 = vmatpush2.bf16.msra.mxu1 %v6286_v54  ;;  %v6367_v53 = vld [vmem:[%s9024_s4 + $0x848] ss:$16 sps:$4 sm:$0xff]   ;;  %v6372_v54 = vld [vmem:[%s9024_s4 + $0x824] ss:$16 sps:$4 sm:$0xff]  }
  0xf8   : > { %2187 = vmatprep.subr.bf16.mxu0 %v6291_v55  ;;  %2228 = vmatprep.subr.bf16.mxu1 %v6294_v56  ;;  %v6375_v55 = vld [vmem:[%s9024_s4 + $0x82c] ss:$16 sps:$4 sm:$0xff]   ;;  %v6370_v56 = vld [vmem:[%s9024_s4 + $0x820] ss:$16 sps:$4 sm:$0xff]  }
  0xfb   : > { %2188 = vmatpush2.bf16.msra.mxu0 %v6289_v57  ;;  %2229 = vmatpush2.bf16.msra.mxu1 %v6292_v58  ;;  %v6373_v57 = vld [vmem:[%s9024_s4 + $0x828] ss:$16 sps:$4 sm:$0xff]   ;;  %v6378_v58 = vld [vmem:[%s9024_s4 + $0x804] ss:$16 sps:$4 sm:$0xff]  }
  0xfc   : > { %2189 = vmatprep.subr.bf16.mxu0 %v6297_v59  ;;  %2230 = vmatprep.subr.bf16.mxu1 %v6300_v60  ;;  %v6381_v59 = vld [vmem:[%s9024_s4 + $0x80c] ss:$16 sps:$4 sm:$0xff]   ;;  %v6376_v60 = vld [vmem:[%s9024_s4 + $0x800] ss:$16 sps:$4 sm:$0xff]  }
  0xff   : > { %2190 = vmatpush2.bf16.msra.mxu0 %v6295_v61  ;;  %2231 = vmatpush2.bf16.msra.mxu1 %v6298_v62  ;;  %v6379_v61 = vld [vmem:[%s9024_s4 + $0x808] ss:$16 sps:$4 sm:$0xff]   ;;  %v6384_v62 = vld [vmem:[%s9024_s4 + $0x9e4] ss:$16 sps:$4 sm:$0xff]  }
 0x100   : > { %2191 = vmatprep.subr.bf16.mxu0 %v6303_v63  ;;  %2232 = vmatprep.subr.bf16.mxu1 %v6306_v0  ;;  %v6387_v63 = vld [vmem:[%s9024_s4 + $0x9ec] ss:$16 sps:$4 sm:$0xff]   ;;  %v6382_v0 = vld [vmem:[%s9024_s4 + $0x9e0] ss:$16 sps:$4 sm:$0xff]  }
 0x103   : > { %2192 = vmatpush2.bf16.msra.mxu0 %v6301_v1  ;;  %2233 = vmatpush2.bf16.msra.mxu1 %v6304_v2  ;;  %v6385_v1 = vld [vmem:[%s9024_s4 + $0x9e8] ss:$16 sps:$4 sm:$0xff]   ;;  %v6390_v2 = vld [vmem:[%s9024_s4 + $0x9c4] ss:$16 sps:$4 sm:$0xff]  }
 0x104   : > { %2193 = vmatprep.subr.bf16.mxu0 %v6309_v3  ;;  %2234 = vmatprep.subr.bf16.mxu1 %v6312_v4  ;;  %v6393_v3 = vld [vmem:[%s9024_s4 + $0x9cc] ss:$16 sps:$4 sm:$0xff]   ;;  %v6388_v4 = vld [vmem:[%s9024_s4 + $0x9c0] ss:$16 sps:$4 sm:$0xff]  }
 0x107   : > { %2194 = vmatpush2.bf16.msra.mxu0 %v6307_v5  ;;  %2235 = vmatpush2.bf16.msra.mxu1 %v6310_v6  ;;  %v6391_v5 = vld [vmem:[%s9024_s4 + $0x9c8] ss:$16 sps:$4 sm:$0xff]   ;;  %v6396_v6 = vld [vmem:[%s9024_s4 + $0x9a4] ss:$16 sps:$4 sm:$0xff]  }
 0x108   : > { %2195 = vmatprep.subr.bf16.mxu0 %v6315_v7  ;;  %2236 = vmatprep.subr.bf16.mxu1 %v6318_v8  ;;  %v6399_v7 = vld [vmem:[%s9024_s4 + $0x9ac] ss:$16 sps:$4 sm:$0xff]   ;;  %v6394_v8 = vld [vmem:[%s9024_s4 + $0x9a0] ss:$16 sps:$4 sm:$0xff]  }
 0x10b   : > { %2196 = vmatpush2.bf16.msra.mxu0 %v6313_v9  ;;  %2237 = vmatpush2.bf16.msra.mxu1 %v6316_v10  ;;  %v6397_v9 = vld [vmem:[%s9024_s4 + $0x9a8] ss:$16 sps:$4 sm:$0xff]   ;;  %v6402_v10 = vld [vmem:[%s9024_s4 + $0x984] ss:$16 sps:$4 sm:$0xff]  }
 0x10c   : > { %2197 = vmatprep.subr.bf16.mxu0 %v6321_v11  ;;  %2238 = vmatprep.subr.bf16.mxu1 %v6324_v12  ;;  %v6405_v11 = vld [vmem:[%s9024_s4 + $0x98c] ss:$16 sps:$4 sm:$0xff]   ;;  %v6400_v12 = vld [vmem:[%s9024_s4 + $0x980] ss:$16 sps:$4 sm:$0xff]  }
 0x10f   : > { %2198 = vmatpush2.bf16.msra.mxu0 %v6319_v13  ;;  %2239 = vmatpush2.bf16.msra.mxu1 %v6322_v14  ;;  %v6403_v13 = vld [vmem:[%s9024_s4 + $0x988] ss:$16 sps:$4 sm:$0xff]   ;;  %v6408_v14 = vld [vmem:[%s9024_s4 + $0x964] ss:$16 sps:$4 sm:$0xff]  }
 0x110   : > { %2199 = vmatprep.subr.bf16.mxu0 %v6327_v15  ;;  %2240 = vmatprep.subr.bf16.mxu1 %v6330_v16  ;;  %v6411_v15 = vld [vmem:[%s9024_s4 + $0x96c] ss:$16 sps:$4 sm:$0xff]   ;;  %v6406_v16 = vld [vmem:[%s9024_s4 + $0x960] ss:$16 sps:$4 sm:$0xff]  }
 0x113   : > { %2200 = vmatpush2.bf16.msra.mxu0 %v6325_v17  ;;  %2241 = vmatpush2.bf16.msra.mxu1 %v6328_v18  ;;  %v6409_v17 = vld [vmem:[%s9024_s4 + $0x968] ss:$16 sps:$4 sm:$0xff]   ;;  %v7990_v18 = vld [vmem:[%s7619_s20] sm:$0x33] }
 0x114   : > { %2647 = vmatprep.subr.bf16.mxu0 %v6336_v19  ;;  %2688 = vmatprep.subr.bf16.mxu1 %v6339_v21  ;;  %v6414_v19 = vld [vmem:[%s9024_s4 + $0x944] ss:$16 sps:$4 sm:$0xff]   ;;  %v6417_v21 = vld [vmem:[%s9024_s4 + $0x94c] ss:$16 sps:$4 sm:$0xff]  }
 0x116   : > { %v7843_v28 = vpop.f32.mrf.mxu0  ;;  %v7845_v29 = vpop.f32.mrf.mxu1  ;;  %2202 = vmatmul.mubr.bf16.vlgmr.msra.gmra.mxu0 %v5420_v23  ;;  %2243 = vmatmul.mubr.bf16.vlgmr.msra.gmra.mxu1 %v5420_v23  ;;  %v6415_v23 = vld [vmem:[%s9024_s4 + $0x948] ss:$16 sps:$4 sm:$0xff]  }
 0x117   : > { %2648 = vmatpush1.bf16.msra.mxu0 %v6334_v22  ;;  %2689 = vmatpush1.bf16.msra.mxu1 %v6337_v24  ;;  %v6412_v22 = vld [vmem:[%s9024_s4 + $0x940] ss:$16 sps:$4 sm:$0xff]   ;;  %v6420_v24 = vld [vmem:[%s9024_s4 + $0x924] ss:$16 sps:$4 sm:$0xff]  }
 0x118   : > { %v7856_v33 = vpop.f32.mrf.mxu0  ;;  %v7858_v34 = vpop.f32.mrf.mxu1  ;;  %2649 = vmatprep.subr.bf16.mxu0 %v6342_v26  ;;  %2690 = vmatprep.subr.bf16.mxu1 %v6345_v27  ;;  %v6423_v26 = vld [vmem:[%s9024_s4 + $0x92c] ss:$16 sps:$4 sm:$0xff]   ;;  %v5553_v27 = vcombine.high %v7990_v18, %v7990_v18 }
 0x119   : > { %2679 = vmatprep.mubr.bf16.mxu0 %v5487_v20  ;;  %2720 = vmatprep.mubr.bf16.mxu1 %v5487_v20  ;;  %v6418_v20 = vld [vmem:[%s9024_s4 + $0x920] ss:$16 sps:$4 sm:$0xff]  }
 0x11a   : > { %v832_v36 = vpop.f32.mrf.mxu0  ;;  %v873_v37 = vpop.f32.mrf.mxu1 }
 0x11b   : > { %2650 = vmatpush1.bf16.msra.mxu0 %v6340_v30  ;;  %2691 = vmatpush1.bf16.msra.mxu1 %v6343_v31  ;;  %v6421_v30 = vld [vmem:[%s9024_s4 + $0x928] ss:$16 sps:$4 sm:$0xff]   ;;  %v6426_v31 = vld [vmem:[%s9024_s4 + $0x904] ss:$16 sps:$4 sm:$0xff]   ;;  %v6424_v36 = vld [vmem:[%s9024_s4 + $0x900] ss:$16 sps:$4 sm:$0xff]  }
 0x11c   : > { %v833_v40 = vpop.f32.mrf.mxu0  ;;  %v874_v41 = vpop.f32.mrf.mxu1  ;;  %2651 = vmatprep.subr.bf16.mxu0 %v6348_v32  ;;  %2692 = vmatprep.subr.bf16.mxu1 %v6351_v35  ;;  %v6429_v32 = vld [vmem:[%s9024_s4 + $0x90c] ss:$16 sps:$4 sm:$0xff]   ;;  %v2813_v35 = vshll.u32 %v5553_v27, 16  ;;  %v6427_v37 = vld [vmem:[%s9024_s4 + $0x908] ss:$16 sps:$4 sm:$0xff]  }
 0x11d   : > { %v6432_v40 = vld [vmem:[%s9024_s4 + $0xae0] ss:$16 sps:$4 sm:$0xff]   ;;  %v6435_v41 = vld [vmem:[%s9024_s4 + $0xae8] ss:$16 sps:$4 sm:$0xff]  }
 0x11f   : > { %2652 = vmatpush1.bf16.msra.mxu0 %v6346_v38  ;;  %2693 = vmatpush1.bf16.msra.mxu1 %v6349_v39  ;;  %v6434_v38 = vld [vmem:[%s9024_s4 + $0xae4] ss:$16 sps:$4 sm:$0xff]   ;;  %v6437_v39 = vld [vmem:[%s9024_s4 + $0xaec] ss:$16 sps:$4 sm:$0xff]  }
 0x120   : > { %2653 = vmatprep.subr.bf16.mxu0 %v6354_v42  ;;  %2694 = vmatprep.subr.bf16.mxu1 %v6357_v43  ;;  %v2811_v42 = vshrl.u32 %v5553_v27, 16  ;;  %v2815_v43 = vrot.slane %v2813_v35, 1  ;;  %v6489_v27 = vld [vmem:[%s9024_s4 + $0xbc8] ss:$16 sps:$4 sm:$0xff]   ;;  %v6500_v35 = vld [vmem:[%s9024_s4 + $0xb84] ss:$16 sps:$4 sm:$0xff]  }
 0x123   : > { %2654 = vmatpush1.bf16.msra.mxu0 %v6352_v44  ;;  %2695 = vmatpush1.bf16.msra.mxu1 %v6355_v45  ;;  %v5486_v44 = vcombine.low %v7833_v25, %v7833_v25  ;;  %v6440_v45 = vld [vmem:[%s9024_s4 + $0xac4] ss:$16 sps:$4 sm:$0xff]   ;;  %v6441_v25 = vld [vmem:[%s9024_s4 + $0xac8] ss:$16 sps:$4 sm:$0xff]  }
 0x124   : > { %2655 = vmatprep.subr.bf16.mxu0 %v6360_v46  ;;  %2696 = vmatprep.subr.bf16.mxu1 %v6363_v47  ;;  %v6443_v46 = vld [vmem:[%s9024_s4 + $0xacc] ss:$16 sps:$4 sm:$0xff]   ;;  %v6438_v47 = vld [vmem:[%s9024_s4 + $0xac0] ss:$16 sps:$4 sm:$0xff]  }
 0x127   : > { %2656 = vmatpush1.bf16.msra.mxu0 %v6358_v48  ;;  %2697 = vmatpush1.bf16.msra.mxu1 %v6361_v49  ;;  %v2816_v48 = vor.u32 %v2815_v43, %v2811_v42  ;;  %v6504_v42 = vld [vmem:[%s9024_s4 + $0xb60] ss:$16 sps:$4 sm:$0xff]   ;;  %v6507_v43 = vld [vmem:[%s9024_s4 + $0xb68] ss:$16 sps:$4 sm:$0xff]  }
 0x128   : > { %2657 = vmatprep.subr.bf16.mxu0 %v6366_v50  ;;  %2698 = vmatprep.subr.bf16.mxu1 %v6369_v51 }
 0x12b   : > { %2658 = vmatpush1.bf16.msra.mxu0 %v6364_v52  ;;  %2699 = vmatpush1.bf16.msra.mxu1 %v6367_v53 }
 0x12c   : > { %2659 = vmatprep.subr.bf16.mxu0 %v6372_v54  ;;  %2700 = vmatprep.subr.bf16.mxu1 %v6375_v55  ;;  %v6446_v55 = vld [vmem:[%s9024_s4 + $0xaa4] ss:$16 sps:$4 sm:$0xff]  }
 0x12f   : > { %2660 = vmatpush1.bf16.msra.mxu0 %v6370_v56  ;;  %2701 = vmatpush1.bf16.msra.mxu1 %v6373_v57  ;;  %v6449_v56 = vld [vmem:[%s9024_s4 + $0xaac] ss:$16 sps:$4 sm:$0xff]   ;;  %v6444_v57 = vld [vmem:[%s9024_s4 + $0xaa0] ss:$16 sps:$4 sm:$0xff]  }
 0x130   : > { %2661 = vmatprep.subr.bf16.mxu0 %v6378_v58  ;;  %2702 = vmatprep.subr.bf16.mxu1 %v6381_v59  ;;  %v6447_v58 = vld [vmem:[%s9024_s4 + $0xaa8] ss:$16 sps:$4 sm:$0xff]  }
 0x133   : > { %2662 = vmatpush1.bf16.msra.mxu0 %v6376_v60  ;;  %2703 = vmatpush1.bf16.msra.mxu1 %v6379_v61 }
 0x134   : > { %2663 = vmatprep.subr.bf16.mxu0 %v6384_v62  ;;  %2704 = vmatprep.subr.bf16.mxu1 %v6387_v63  ;;  %v6455_v62 = vld [vmem:[%s9024_s4 + $0xa8c] ss:$16 sps:$4 sm:$0xff]   ;;  %v6450_v63 = vld [vmem:[%s9024_s4 + $0xa80] ss:$16 sps:$4 sm:$0xff]  }
 0x137   : > { %2664 = vmatpush2.bf16.msra.mxu0 %v6382_v0  ;;  %2705 = vmatpush2.bf16.msra.mxu1 %v6385_v1  ;;  %v6453_v0 = vld [vmem:[%s9024_s4 + $0xa88] ss:$16 sps:$4 sm:$0xff]   ;;  %v6458_v1 = vld [vmem:[%s9024_s4 + $0xa64] ss:$16 sps:$4 sm:$0xff]  }
 0x138   : > { %2665 = vmatprep.subr.bf16.mxu0 %v6390_v2  ;;  %2706 = vmatprep.subr.bf16.mxu1 %v6393_v3  ;;  %v6461_v2 = vld [vmem:[%s9024_s4 + $0xa6c] ss:$16 sps:$4 sm:$0xff]   ;;  %v6456_v3 = vld [vmem:[%s9024_s4 + $0xa60] ss:$16 sps:$4 sm:$0xff]  }
 0x13b   : > { %2666 = vmatpush2.bf16.msra.mxu0 %v6388_v4  ;;  %2707 = vmatpush2.bf16.msra.mxu1 %v6391_v5  ;;  %v6459_v4 = vld [vmem:[%s9024_s4 + $0xa68] ss:$16 sps:$4 sm:$0xff]   ;;  %v6464_v5 = vld [vmem:[%s9024_s4 + $0xa44] ss:$16 sps:$4 sm:$0xff]  }
 0x13c   : > { %2667 = vmatprep.subr.bf16.mxu0 %v6396_v6  ;;  %2708 = vmatprep.subr.bf16.mxu1 %v6399_v7  ;;  %v6467_v6 = vld [vmem:[%s9024_s4 + $0xa4c] ss:$16 sps:$4 sm:$0xff]   ;;  %v6462_v7 = vld [vmem:[%s9024_s4 + $0xa40] ss:$16 sps:$4 sm:$0xff]  }
 0x13f   : > { %2668 = vmatpush2.bf16.msra.mxu0 %v6394_v8  ;;  %2709 = vmatpush2.bf16.msra.mxu1 %v6397_v9  ;;  %v6465_v8 = vld [vmem:[%s9024_s4 + $0xa48] ss:$16 sps:$4 sm:$0xff]   ;;  %v6470_v9 = vld [vmem:[%s9024_s4 + $0xa24] ss:$16 sps:$4 sm:$0xff]  }
 0x140   : > { %2669 = vmatprep.subr.bf16.mxu0 %v6402_v10  ;;  %2710 = vmatprep.subr.bf16.mxu1 %v6405_v11  ;;  %v6473_v10 = vld [vmem:[%s9024_s4 + $0xa2c] ss:$16 sps:$4 sm:$0xff]   ;;  %v6468_v11 = vld [vmem:[%s9024_s4 + $0xa20] ss:$16 sps:$4 sm:$0xff]  }
 0x143   : > { %2670 = vmatpush2.bf16.msra.mxu0 %v6400_v12  ;;  %2711 = vmatpush2.bf16.msra.mxu1 %v6403_v13  ;;  %v6471_v12 = vld [vmem:[%s9024_s4 + $0xa28] ss:$16 sps:$4 sm:$0xff]   ;;  %v6476_v13 = vld [vmem:[%s9024_s4 + $0xa04] ss:$16 sps:$4 sm:$0xff]  }
 0x144   : > { %2671 = vmatprep.subr.bf16.mxu0 %v6408_v14  ;;  %2712 = vmatprep.subr.bf16.mxu1 %v6411_v15  ;;  %v6479_v14 = vld [vmem:[%s9024_s4 + $0xa0c] ss:$16 sps:$4 sm:$0xff]   ;;  %v6474_v15 = vld [vmem:[%s9024_s4 + $0xa00] ss:$16 sps:$4 sm:$0xff]  }
 0x147   : > { %2672 = vmatpush2.bf16.msra.mxu0 %v6406_v16  ;;  %2713 = vmatpush2.bf16.msra.mxu1 %v6409_v17  ;;  %v6477_v16 = vld [vmem:[%s9024_s4 + $0xa08] ss:$16 sps:$4 sm:$0xff]   ;;  %v6482_v17 = vld [vmem:[%s9024_s4 + $0xbe4] ss:$16 sps:$4 sm:$0xff]  }
 0x148   : > { %2673 = vmatprep.subr.bf16.mxu0 %v6414_v19  ;;  %2714 = vmatprep.subr.bf16.mxu1 %v6417_v21  ;;  %v6485_v19 = vld [vmem:[%s9024_s4 + $0xbec] ss:$16 sps:$4 sm:$0xff]   ;;  %v6480_v21 = vld [vmem:[%s9024_s4 + $0xbe0] ss:$16 sps:$4 sm:$0xff]  }
 0x14b   : > { %2674 = vmatpush2.bf16.msra.mxu0 %v6412_v22  ;;  %2715 = vmatpush2.bf16.msra.mxu1 %v6415_v23  ;;  %v6483_v22 = vld [vmem:[%s9024_s4 + $0xbe8] ss:$16 sps:$4 sm:$0xff]   ;;  %v6488_v23 = vld [vmem:[%s9024_s4 + $0xbc4] ss:$16 sps:$4 sm:$0xff]  }
 0x14c   : > { %2675 = vmatprep.subr.bf16.mxu0 %v6420_v24  ;;  %2716 = vmatprep.subr.bf16.mxu1 %v6423_v26  ;;  %v6491_v24 = vld [vmem:[%s9024_s4 + $0xbcc] ss:$16 sps:$4 sm:$0xff]   ;;  %v6486_v26 = vld [vmem:[%s9024_s4 + $0xbc0] ss:$16 sps:$4 sm:$0xff]  }
 0x14f   : > { %2676 = vmatpush2.bf16.msra.mxu0 %v6418_v20  ;;  %2717 = vmatpush2.bf16.msra.mxu1 %v6421_v30  ;;  %v6494_v20 = vld [vmem:[%s9024_s4 + $0xba4] ss:$16 sps:$4 sm:$0xff]   ;;  %v6497_v30 = vld [vmem:[%s9024_s4 + $0xbac] ss:$16 sps:$4 sm:$0xff]  }
 0x150   : > { %2677 = vmatprep.subr.bf16.mxu0 %v6426_v31  ;;  %2718 = vmatprep.subr.bf16.mxu1 %v6429_v32  ;;  %v6492_v31 = vld [vmem:[%s9024_s4 + $0xba0] ss:$16 sps:$4 sm:$0xff]   ;;  %v6495_v32 = vld [vmem:[%s9024_s4 + $0xba8] ss:$16 sps:$4 sm:$0xff]  }
 0x153   : > { %2678 = vmatpush2.bf16.msra.mxu0 %v6424_v36  ;;  %2719 = vmatpush2.bf16.msra.mxu1 %v6427_v37  ;;  %v6503_v36 = vld [vmem:[%s9024_s4 + $0xb8c] ss:$16 sps:$4 sm:$0xff]   ;;  %v6498_v37 = vld [vmem:[%s9024_s4 + $0xb80] ss:$16 sps:$4 sm:$0xff]  }
 0x154   : > { %3139 = vmatprep.subr.bf16.mxu0 %v6434_v38  ;;  %3180 = vmatprep.subr.bf16.mxu1 %v6437_v39  ;;  %v6501_v38 = vld [vmem:[%s9024_s4 + $0xb88] ss:$16 sps:$4 sm:$0xff]   ;;  %v6506_v39 = vld [vmem:[%s9024_s4 + $0xb64] ss:$16 sps:$4 sm:$0xff]  }
 0x156   : > { %v1237_v49 = vpop.f32.mrf.mxu0  ;;  %v1278_v50 = vpop.f32.mrf.mxu1  ;;  %2680 = vmatmul.mubr.bf16.vlgmr.msra.gmra.mxu0 %v5486_v44  ;;  %2721 = vmatmul.mubr.bf16.vlgmr.msra.gmra.mxu1 %v5486_v44  ;;  %v6512_v44 = vld [vmem:[%s9024_s4 + $0xb44] ss:$16 sps:$4 sm:$0xff]  }
 0x157   : > { %v8057_v51 = vadd.f32 %v1237_v49, %v7843_v28  ;;  %v8060_v52 = vadd.f32 %v1278_v50, %v7845_v29  ;;  %3140 = vmatpush1.bf16.msra.mxu0 %v6432_v40  ;;  %3181 = vmatpush1.bf16.msra.mxu1 %v6435_v41  ;;  %v6509_v40 = vld [vmem:[%s9024_s4 + $0xb6c] ss:$16 sps:$4 sm:$0xff]   ;;  %v5552_v41 = vcombine.low %v7990_v18, %v7990_v18  ;;  %v6516_v49 = vld [vmem:[%s9024_s4 + $0xb20] ss:$16 sps:$4 sm:$0xff]   ;;  %v6519_v50 = vld [vmem:[%s9024_s4 + $0xb28] ss:$16 sps:$4 sm:$0xff]  }
 0x158   : > { %v1239_v53 = vpop.f32.mrf.mxu0  ;;  %v1280_v54 = vpop.f32.mrf.mxu1  ;;  %3141 = vmatprep.subr.bf16.mxu0 %v6440_v45  ;;  %3182 = vmatprep.subr.bf16.mxu1 %v6443_v46  ;;  %v6515_v18 = vld [vmem:[%s9024_s4 + $0xb4c] ss:$16 sps:$4 sm:$0xff]   ;;  %v6510_v45 = vld [vmem:[%s9024_s4 + $0xb40] ss:$16 sps:$4 sm:$0xff]   ;;  %v6513_v46 = vld [vmem:[%s9024_s4 + $0xb48] ss:$16 sps:$4 sm:$0xff]  }
 0x159   : > { %v8069_v28 = vadd.f32 %v1239_v53, %v7856_v33  ;;  %v8072_v29 = vadd.f32 %v1280_v54, %v7858_v34  ;;  %3171 = vmatprep.mubr.bf16.mxu0 %v2816_v48  ;;  %3212 = vmatprep.mubr.bf16.mxu1 %v2816_v48  ;;  %v6452_v34 = vld [vmem:[%s9024_s4 + $0xa84] ss:$16 sps:$4 sm:$0xff]   ;;  %v6521_v48 = vld [vmem:[%s9024_s4 + $0xb2c] ss:$16 sps:$4 sm:$0xff]   ;;  %v2804_v54 = vshrl.u32 %v5552_v41, 16 }
 0x15a   : > { %v1241_v59 = vpop.f32.mrf.mxu0  ;;  %v1282_v60 = vpop.f32.mrf.mxu1  ;;  %v6524_v53 = vld [vmem:[%s9024_s4 + $0xb04] ss:$16 sps:$4 sm:$0xff]  }
 0x15b   : > { %3142 = vmatpush1.bf16.msra.mxu0 %v6438_v47  ;;  %3183 = vmatpush1.bf16.msra.mxu1 %v6441_v25  ;;  %v2806_v47 = vshll.u32 %v5552_v41, 16  ;;  %v6518_v25 = vld [vmem:[%s9024_s4 + $0xb24] ss:$16 sps:$4 sm:$0xff]   ;;  %v6525_v59 = vld [vmem:[%s9024_s4 + $0xb08] ss:$16 sps:$4 sm:$0xff]  }
 0x15c   : > { %v1242_v61 = vpop.f32.mrf.mxu0  ;;  %v1283_v33 = vpop.f32.mrf.mxu1  ;;  %3143 = vmatprep.subr.bf16.mxu0 %v6446_v55  ;;  %3184 = vmatprep.subr.bf16.mxu1 %v6449_v56  ;;  %v6527_v56 = vld [vmem:[%s9024_s4 + $0xb0c] ss:$16 sps:$4 sm:$0xff]   ;;  %v6531_v60 = vld [vmem:[%s9024_s4 + $0xce4] ss:$16 sps:$4 sm:$0xff]   ;;  %v6571_v41 = vld [vmem:[%s9024_s4 + $0xc00] ss:$16 sps:$4 sm:$0xff]  }
 0x15d   : > { %v2808_v55 = vrot.slane %v2806_v47, 1  ;;  %v6534_v61 = vld [vmem:[%s9024_s4 + $0xcec] ss:$16 sps:$4 sm:$0xff]   ;;  %v6529_v33 = vld [vmem:[%s9024_s4 + $0xce0] ss:$16 sps:$4 sm:$0xff]  }
 0x15e   : > { %v6588_v47 = vld [vmem:[%s9024_s4 + $0xdcc] ss:$16 sps:$4 sm:$0xff]  }
 0x15f   : > { %3144 = vmatpush1.bf16.msra.mxu0 %v6444_v57  ;;  %3185 = vmatpush1.bf16.msra.mxu1 %v6447_v58  ;;  %v8233_v57 = vld [vmem:[%s7278_s29] sm:$0x22] }
 0x160   : > { %3145 = vmatprep.subr.bf16.mxu0 %v6452_v34  ;;  %3186 = vmatprep.subr.bf16.mxu1 %v6455_v62  ;;  %v6522_v58 = vld [vmem:[%s9024_s4 + $0xb00] ss:$16 sps:$4 sm:$0xff]   ;;  %v5619_v34 = vcombine.high %v8233_v57, %v8233_v57  ;;  %v2809_v62 = vor.u32 %v2808_v55, %v2804_v54  ;;  %v6592_v54 = vld [vmem:[%s9024_s4 + $0xda8] ss:$16 sps:$4 sm:$0xff]   ;;  %v6597_v55 = vld [vmem:[%s9024_s4 + $0xd84] ss:$16 sps:$4 sm:$0xff]  }
 0x163   : > { %3146 = vmatpush1.bf16.msra.mxu0 %v6450_v63  ;;  %3187 = vmatpush1.bf16.msra.mxu1 %v6453_v0  ;;  %v6532_v63 = vld [vmem:[%s9024_s4 + $0xce8] ss:$16 sps:$4 sm:$0xff]   ;;  %v6537_v0 = vld [vmem:[%s9024_s4 + $0xcc4] ss:$16 sps:$4 sm:$0xff]  }
 0x164   : > { %3147 = vmatprep.subr.bf16.mxu0 %v6458_v1  ;;  %3188 = vmatprep.subr.bf16.mxu1 %v6461_v2  ;;  %v6540_v1 = vld [vmem:[%s9024_s4 + $0xccc] ss:$16 sps:$4 sm:$0xff]   ;;  %v6535_v2 = vld [vmem:[%s9024_s4 + $0xcc0] ss:$16 sps:$4 sm:$0xff]  }
 0x167   : > { %3148 = vmatpush1.bf16.msra.mxu0 %v6456_v3  ;;  %3189 = vmatpush1.bf16.msra.mxu1 %v6459_v4  ;;  %v3296_v3 = vrot.slane %v5619_v34, 1  ;;  %v6604_v34 = vld [vmem:[%s9024_s4 + $0xd68] ss:$16 sps:$4 sm:$0xff]  }
 0x168   : > { %3149 = vmatprep.subr.bf16.mxu0 %v6464_v5  ;;  %3190 = vmatprep.subr.bf16.mxu1 %v6467_v6 }
 0x16b   : > { %3150 = vmatpush1.bf16.msra.mxu0 %v6462_v7  ;;  %3191 = vmatpush1.bf16.msra.mxu1 %v6465_v8  ;;  %v6538_v8 = vld [vmem:[%s9024_s4 + $0xcc8] ss:$16 sps:$4 sm:$0xff]  }
 0x16c   : > { %3151 = vmatprep.subr.bf16.mxu0 %v6470_v9  ;;  %3192 = vmatprep.subr.bf16.mxu1 %v6473_v10 }
 0x16f   : > { %3152 = vmatpush1.bf16.msra.mxu0 %v6468_v11  ;;  %3193 = vmatpush1.bf16.msra.mxu1 %v6471_v12  ;;  %v6543_v11 = vld [vmem:[%s9024_s4 + $0xca4] ss:$16 sps:$4 sm:$0xff]  }
 0x170   : > { %3153 = vmatprep.subr.bf16.mxu0 %v6476_v13  ;;  %3194 = vmatprep.subr.bf16.mxu1 %v6479_v14 }
 0x173   : > { %3154 = vmatpush1.bf16.msra.mxu0 %v6474_v15  ;;  %3195 = vmatpush1.bf16.msra.mxu1 %v6477_v16  ;;  %v6541_v15 = vld [vmem:[%s9024_s4 + $0xca0] ss:$16 sps:$4 sm:$0xff]   ;;  %v6544_v16 = vld [vmem:[%s9024_s4 + $0xca8] ss:$16 sps:$4 sm:$0xff]  }
 0x174   : > { %3155 = vmatprep.subr.bf16.mxu0 %v6482_v17  ;;  %3196 = vmatprep.subr.bf16.mxu1 %v6485_v19  ;;  %v6552_v19 = vld [vmem:[%s9024_s4 + $0xc8c] ss:$16 sps:$4 sm:$0xff]  }
 0x177   : > { %3156 = vmatpush2.bf16.msra.mxu0 %v6480_v21  ;;  %3197 = vmatpush2.bf16.msra.mxu1 %v6483_v22  ;;  %v6547_v21 = vld [vmem:[%s9024_s4 + $0xc80] ss:$16 sps:$4 sm:$0xff]   ;;  %v6550_v22 = vld [vmem:[%s9024_s4 + $0xc88] ss:$16 sps:$4 sm:$0xff]  }
 0x178   : > { %3157 = vmatprep.subr.bf16.mxu0 %v6488_v23  ;;  %3198 = vmatprep.subr.bf16.mxu1 %v6491_v24  ;;  %v6555_v23 = vld [vmem:[%s9024_s4 + $0xc64] ss:$16 sps:$4 sm:$0xff]   ;;  %v6558_v24 = vld [vmem:[%s9024_s4 + $0xc6c] ss:$16 sps:$4 sm:$0xff]  }
 0x17b   : > { %3158 = vmatpush2.bf16.msra.mxu0 %v6486_v26  ;;  %3199 = vmatpush2.bf16.msra.mxu1 %v6489_v27  ;;  %v6553_v26 = vld [vmem:[%s9024_s4 + $0xc60] ss:$16 sps:$4 sm:$0xff]   ;;  %v6556_v27 = vld [vmem:[%s9024_s4 + $0xc68] ss:$16 sps:$4 sm:$0xff]  }
 0x17c   : > { %3159 = vmatprep.subr.bf16.mxu0 %v6494_v20  ;;  %3200 = vmatprep.subr.bf16.mxu1 %v6497_v30  ;;  %v6561_v20 = vld [vmem:[%s9024_s4 + $0xc44] ss:$16 sps:$4 sm:$0xff]   ;;  %v6564_v30 = vld [vmem:[%s9024_s4 + $0xc4c] ss:$16 sps:$4 sm:$0xff]  }
 0x17f   : > { %3160 = vmatpush2.bf16.msra.mxu0 %v6492_v31  ;;  %3201 = vmatpush2.bf16.msra.mxu1 %v6495_v32  ;;  %v6559_v31 = vld [vmem:[%s9024_s4 + $0xc40] ss:$16 sps:$4 sm:$0xff]   ;;  %v6562_v32 = vld [vmem:[%s9024_s4 + $0xc48] ss:$16 sps:$4 sm:$0xff]  }
 0x180   : > { %3161 = vmatprep.subr.bf16.mxu0 %v6500_v35  ;;  %3202 = vmatprep.subr.bf16.mxu1 %v6503_v36  ;;  %v6567_v35 = vld [vmem:[%s9024_s4 + $0xc24] ss:$16 sps:$4 sm:$0xff]   ;;  %v6570_v36 = vld [vmem:[%s9024_s4 + $0xc2c] ss:$16 sps:$4 sm:$0xff]  }
 0x183   : > { %3162 = vmatpush2.bf16.msra.mxu0 %v6498_v37  ;;  %3203 = vmatpush2.bf16.msra.mxu1 %v6501_v38  ;;  %v6565_v37 = vld [vmem:[%s9024_s4 + $0xc20] ss:$16 sps:$4 sm:$0xff]   ;;  %v6568_v38 = vld [vmem:[%s9024_s4 + $0xc28] ss:$16 sps:$4 sm:$0xff]  }
 0x184   : > { %3163 = vmatprep.subr.bf16.mxu0 %v6506_v39  ;;  %3204 = vmatprep.subr.bf16.mxu1 %v6509_v40  ;;  %v6573_v39 = vld [vmem:[%s9024_s4 + $0xc04] ss:$16 sps:$4 sm:$0xff]   ;;  %v6576_v40 = vld [vmem:[%s9024_s4 + $0xc0c] ss:$16 sps:$4 sm:$0xff]  }
 0x187   : > { %3164 = vmatpush2.bf16.msra.mxu0 %v6504_v42  ;;  %3205 = vmatpush2.bf16.msra.mxu1 %v6507_v43  ;;  %v6574_v42 = vld [vmem:[%s9024_s4 + $0xc08] ss:$16 sps:$4 sm:$0xff]   ;;  %v6579_v43 = vld [vmem:[%s9024_s4 + $0xde4] ss:$16 sps:$4 sm:$0xff]  }
 0x188   : > { %3165 = vmatprep.subr.bf16.mxu0 %v6512_v44  ;;  %3206 = vmatprep.subr.bf16.mxu1 %v6515_v18  ;;  %v6582_v44 = vld [vmem:[%s9024_s4 + $0xdec] ss:$16 sps:$4 sm:$0xff]   ;;  %v6577_v18 = vld [vmem:[%s9024_s4 + $0xde0] ss:$16 sps:$4 sm:$0xff]  }
 0x18b   : > { %3166 = vmatpush2.bf16.msra.mxu0 %v6510_v45  ;;  %3207 = vmatpush2.bf16.msra.mxu1 %v6513_v46  ;;  %v6580_v45 = vld [vmem:[%s9024_s4 + $0xde8] ss:$16 sps:$4 sm:$0xff]   ;;  %v6585_v46 = vld [vmem:[%s9024_s4 + $0xdc4] ss:$16 sps:$4 sm:$0xff]  }
 0x18c   : > { %3167 = vmatprep.subr.bf16.mxu0 %v6518_v25  ;;  %3208 = vmatprep.subr.bf16.mxu1 %v6521_v48  ;;  %v6583_v25 = vld [vmem:[%s9024_s4 + $0xdc0] ss:$16 sps:$4 sm:$0xff]   ;;  %v6586_v48 = vld [vmem:[%s9024_s4 + $0xdc8] ss:$16 sps:$4 sm:$0xff]  }
 0x18f   : > { %3168 = vmatpush2.bf16.msra.mxu0 %v6516_v49  ;;  %3209 = vmatpush2.bf16.msra.mxu1 %v6519_v50  ;;  %v6591_v49 = vld [vmem:[%s9024_s4 + $0xda4] ss:$16 sps:$4 sm:$0xff]   ;;  %v6594_v50 = vld [vmem:[%s9024_s4 + $0xdac] ss:$16 sps:$4 sm:$0xff]  }
 0x190   : > { %3169 = vmatprep.subr.bf16.mxu0 %v6524_v53  ;;  %3210 = vmatprep.subr.bf16.mxu1 %v6527_v56  ;;  %v6589_v53 = vld [vmem:[%s9024_s4 + $0xda0] ss:$16 sps:$4 sm:$0xff]   ;;  %v6600_v56 = vld [vmem:[%s9024_s4 + $0xd8c] ss:$16 sps:$4 sm:$0xff]  }
 0x193   : > { %3170 = vmatpush2.bf16.msra.mxu0 %v6522_v58  ;;  %3211 = vmatpush2.bf16.msra.mxu1 %v6525_v59  ;;  %v6595_v58 = vld [vmem:[%s9024_s4 + $0xd80] ss:$16 sps:$4 sm:$0xff]   ;;  %v6598_v59 = vld [vmem:[%s9024_s4 + $0xd88] ss:$16 sps:$4 sm:$0xff]  }
 0x194   : > { %3619 = vmatprep.subr.bf16.mxu0 %v6531_v60  ;;  %3660 = vmatprep.subr.bf16.mxu1 %v6534_v61  ;;  %v6603_v60 = vld [vmem:[%s9024_s4 + $0xd64] ss:$16 sps:$4 sm:$0xff]   ;;  %v6606_v61 = vld [vmem:[%s9024_s4 + $0xd6c] ss:$16 sps:$4 sm:$0xff]  }
 0x196   : > { %v1725_v4 = vpop.f32.mrf.mxu0  ;;  %v1766_v5 = vpop.f32.mrf.mxu1  ;;  %3172 = vmatmul.mubr.bf16.vlgmr.msra.gmra.mxu0 %v2809_v62  ;;  %3213 = vmatmul.mubr.bf16.vlgmr.msra.gmra.mxu1 %v2809_v62  ;;  %v6609_v62 = vld [vmem:[%s9024_s4 + $0xd44] ss:$16 sps:$4 sm:$0xff]  }
 0x197   : > { %v8265_v6 = vadd.f32 %v1725_v4, %v8057_v51  ;;  %v8268_v7 = vadd.f32 %v1766_v5, %v8060_v52  ;;  %3620 = vmatpush1.bf16.msra.mxu0 %v6529_v33  ;;  %3661 = vmatpush1.bf16.msra.mxu1 %v6532_v63  ;;  %v6546_v51 = vld [vmem:[%s9024_s4 + $0xcac] ss:$16 sps:$4 sm:$0xff]   ;;  %v6601_v33 = vld [vmem:[%s9024_s4 + $0xd60] ss:$16 sps:$4 sm:$0xff]   ;;  %v6616_v5 = vld [vmem:[%s9024_s4 + $0xd28] ss:$16 sps:$4 sm:$0xff]  }
 0x198   : > { %v1727_v9 = vpop.f32.mrf.mxu0  ;;  %v1768_v10 = vpop.f32.mrf.mxu1  ;;  %3621 = vmatprep.subr.bf16.mxu0 %v6537_v0  ;;  %3662 = vmatprep.subr.bf16.mxu1 %v6540_v1  ;;  %v6612_v63 = vld [vmem:[%s9024_s4 + $0xd4c] ss:$16 sps:$4 sm:$0xff]   ;;  %v6607_v0 = vld [vmem:[%s9024_s4 + $0xd40] ss:$16 sps:$4 sm:$0xff]   ;;  %v6610_v1 = vld [vmem:[%s9024_s4 + $0xd48] ss:$16 sps:$4 sm:$0xff]  }
 0x199   : > { %v8280_v52 = vadd.f32 %v1727_v9, %v8069_v28  ;;  %v8283_v12 = vadd.f32 %v1768_v10, %v8072_v29  ;;  %3651 = vmatprep.mubr.bf16.mxu0 %v3296_v3  ;;  %3692 = vmatprep.mubr.bf16.mxu1 %v3296_v3  ;;  %v6549_v29 = vld [vmem:[%s9024_s4 + $0xc84] ss:$16 sps:$4 sm:$0xff]   ;;  %v6618_v3 = vld [vmem:[%s9024_s4 + $0xd2c] ss:$16 sps:$4 sm:$0xff]   ;;  %v6613_v4 = vld [vmem:[%s9024_s4 + $0xd20] ss:$16 sps:$4 sm:$0xff]  }
 0x19a   : > { %v1729_v13 = vpop.f32.mrf.mxu0  ;;  %v1770_v14 = vpop.f32.mrf.mxu1  ;;  %v6624_v9 = vld [vmem:[%s9024_s4 + $0xd0c] ss:$16 sps:$4 sm:$0xff]   ;;  %v8442_v10 = vld [vmem:[%s7145_s17] sm:$0x22] }
 0x19b   : > { %3622 = vmatpush1.bf16.msra.mxu0 %v6535_v2  ;;  %3663 = vmatpush1.bf16.msra.mxu1 %v6538_v8  ;;  %v6615_v2 = vld [vmem:[%s9024_s4 + $0xd24] ss:$16 sps:$4 sm:$0xff]   ;;  %v6622_v13 = vld [vmem:[%s9024_s4 + $0xd08] ss:$16 sps:$4 sm:$0xff]  }
 0x19c   : > { %v1730_v17 = vpop.f32.mrf.mxu0  ;;  %v1771_v28 = vpop.f32.mrf.mxu1  ;;  %3623 = vmatprep.subr.bf16.mxu0 %v6543_v11  ;;  %3664 = vmatprep.subr.bf16.mxu1 %v6546_v51  ;;  %v6621_v8 = vld [vmem:[%s9024_s4 + $0xd04] ss:$16 sps:$4 sm:$0xff]   ;;  %v5618_v11 = vcombine.low %v8233_v57, %v8233_v57  ;;  %v6619_v51 = vld [vmem:[%s9024_s4 + $0xd00] ss:$16 sps:$4 sm:$0xff]   ;;  %v6632_v57 = vld [vmem:[%s9024_s4 + $0xeec] ss:$16 sps:$4 sm:$0xff]  }
 0x19d   : > { %v6629_v14 = vld [vmem:[%s9024_s4 + $0xee4] ss:$16 sps:$4 sm:$0xff]   ;;  %v6627_v17 = vld [vmem:[%s9024_s4 + $0xee0] ss:$16 sps:$4 sm:$0xff]   ;;  %v6630_v28 = vld [vmem:[%s9024_s4 + $0xee8] ss:$16 sps:$4 sm:$0xff]  }
 0x19f   : > { %3624 = vmatpush1.bf16.msra.mxu0 %v6541_v15  ;;  %3665 = vmatpush1.bf16.msra.mxu1 %v6544_v16  ;;  %v5685_v15 = vcombine.high %v8442_v10, %v8442_v10  ;;  %v3295_v16 = vrot.slane %v5618_v11, 1  ;;  %v6698_v11 = vld [vmem:[%s9024_s4 + $0xf8c] ss:$16 sps:$4 sm:$0xff]  }
 0x1a0   : > { %3625 = vmatprep.subr.bf16.mxu0 %v6549_v29  ;;  %3666 = vmatprep.subr.bf16.mxu1 %v6552_v19  ;;  %v6635_v29 = vld [vmem:[%s9024_s4 + $0xec4] ss:$16 sps:$4 sm:$0xff]   ;;  %v6638_v19 = vld [vmem:[%s9024_s4 + $0xecc] ss:$16 sps:$4 sm:$0xff]  }
 0x1a3   : > { %3626 = vmatpush1.bf16.msra.mxu0 %v6547_v21  ;;  %3667 = vmatpush1.bf16.msra.mxu1 %v6550_v22  ;;  %v3776_v21 = vrot.slane %v5685_v15, 1  ;;  %v6699_v15 = vld [vmem:[%s9024_s4 + $0xf60] ss:$16 sps:$4 sm:$0xff]  }
 0x1a4   : > { %3627 = vmatprep.subr.bf16.mxu0 %v6555_v23  ;;  %3668 = vmatprep.subr.bf16.mxu1 %v6558_v24 }
 0x1a7   : > { %3628 = vmatpush1.bf16.msra.mxu0 %v6553_v26  ;;  %3669 = vmatpush1.bf16.msra.mxu1 %v6556_v27  ;;  %v6633_v27 = vld [vmem:[%s9024_s4 + $0xec0] ss:$16 sps:$4 sm:$0xff]  }
 0x1a8   : > { %3629 = vmatprep.subr.bf16.mxu0 %v6561_v20  ;;  %3670 = vmatprep.subr.bf16.mxu1 %v6564_v30  ;;  %v6636_v20 = vld [vmem:[%s9024_s4 + $0xec8] ss:$16 sps:$4 sm:$0xff]  }
 0x1ab   : > { %3630 = vmatpush1.bf16.msra.mxu0 %v6559_v31  ;;  %3671 = vmatpush1.bf16.msra.mxu1 %v6562_v32 }
 0x1ac   : > { %3631 = vmatprep.subr.bf16.mxu0 %v6567_v35  ;;  %3672 = vmatprep.subr.bf16.mxu1 %v6570_v36 }
 0x1af   : > { %3632 = vmatpush1.bf16.msra.mxu0 %v6565_v37  ;;  %3673 = vmatpush1.bf16.msra.mxu1 %v6568_v38  ;;  %v6639_v38 = vld [vmem:[%s9024_s4 + $0xea0] ss:$16 sps:$4 sm:$0xff]  }
 0x1b0   : > { %3633 = vmatprep.subr.bf16.mxu0 %v6573_v39  ;;  %3674 = vmatprep.subr.bf16.mxu1 %v6576_v40  ;;  %v6642_v39 = vld [vmem:[%s9024_s4 + $0xea8] ss:$16 sps:$4 sm:$0xff]  }
 0x1b3   : > { %3634 = vmatpush1.bf16.msra.mxu0 %v6571_v41  ;;  %3675 = vmatpush1.bf16.msra.mxu1 %v6574_v42  ;;  %v6650_v41 = vld [vmem:[%s9024_s4 + $0xe8c] ss:$16 sps:$4 sm:$0xff]   ;;  %v6645_v42 = vld [vmem:[%s9024_s4 + $0xe80] ss:$16 sps:$4 sm:$0xff]  }
 0x1b4   : > { %3635 = vmatprep.subr.bf16.mxu0 %v6579_v43  ;;  %3676 = vmatprep.subr.bf16.mxu1 %v6582_v44  ;;  %v6648_v43 = vld [vmem:[%s9024_s4 + $0xe88] ss:$16 sps:$4 sm:$0xff]   ;;  %v6653_v44 = vld [vmem:[%s9024_s4 + $0xe64] ss:$16 sps:$4 sm:$0xff]  }
 0x1b7   : > { %3636 = vmatpush2.bf16.msra.mxu0 %v6577_v18  ;;  %3677 = vmatpush2.bf16.msra.mxu1 %v6580_v45  ;;  %v6656_v18 = vld [vmem:[%s9024_s4 + $0xe6c] ss:$16 sps:$4 sm:$0xff]   ;;  %v6651_v45 = vld [vmem:[%s9024_s4 + $0xe60] ss:$16 sps:$4 sm:$0xff]  }
 0x1b8   : > { %3637 = vmatprep.subr.bf16.mxu0 %v6585_v46  ;;  %3678 = vmatprep.subr.bf16.mxu1 %v6588_v47  ;;  %v6654_v46 = vld [vmem:[%s9024_s4 + $0xe68] ss:$16 sps:$4 sm:$0xff]   ;;  %v6659_v47 = vld [vmem:[%s9024_s4 + $0xe44] ss:$16 sps:$4 sm:$0xff]  }
 0x1bb   : > { %3638 = vmatpush2.bf16.msra.mxu0 %v6583_v25  ;;  %3679 = vmatpush2.bf16.msra.mxu1 %v6586_v48  ;;  %v6662_v25 = vld [vmem:[%s9024_s4 + $0xe4c] ss:$16 sps:$4 sm:$0xff]   ;;  %v6657_v48 = vld [vmem:[%s9024_s4 + $0xe40] ss:$16 sps:$4 sm:$0xff]  }
 0x1bc   : > { %3639 = vmatprep.subr.bf16.mxu0 %v6591_v49  ;;  %3680 = vmatprep.subr.bf16.mxu1 %v6594_v50  ;;  %v6660_v49 = vld [vmem:[%s9024_s4 + $0xe48] ss:$16 sps:$4 sm:$0xff]   ;;  %v6665_v50 = vld [vmem:[%s9024_s4 + $0xe24] ss:$16 sps:$4 sm:$0xff]  }
 0x1bf   : > { %3640 = vmatpush2.bf16.msra.mxu0 %v6589_v53  ;;  %3681 = vmatpush2.bf16.msra.mxu1 %v6592_v54  ;;  %v6668_v53 = vld [vmem:[%s9024_s4 + $0xe2c] ss:$16 sps:$4 sm:$0xff]   ;;  %v6663_v54 = vld [vmem:[%s9024_s4 + $0xe20] ss:$16 sps:$4 sm:$0xff]  }
 0x1c0   : > { %3641 = vmatprep.subr.bf16.mxu0 %v6597_v55  ;;  %3682 = vmatprep.subr.bf16.mxu1 %v6600_v56  ;;  %v6666_v55 = vld [vmem:[%s9024_s4 + $0xe28] ss:$16 sps:$4 sm:$0xff]   ;;  %v6671_v56 = vld [vmem:[%s9024_s4 + $0xe04] ss:$16 sps:$4 sm:$0xff]  }
 0x1c3   : > { %3642 = vmatpush2.bf16.msra.mxu0 %v6595_v58  ;;  %3683 = vmatpush2.bf16.msra.mxu1 %v6598_v59  ;;  %v6674_v58 = vld [vmem:[%s9024_s4 + $0xe0c] ss:$16 sps:$4 sm:$0xff]   ;;  %v6669_v59 = vld [vmem:[%s9024_s4 + $0xe00] ss:$16 sps:$4 sm:$0xff]  }
 0x1c4   : > { %3643 = vmatprep.subr.bf16.mxu0 %v6603_v60  ;;  %3684 = vmatprep.subr.bf16.mxu1 %v6606_v61  ;;  %v6672_v60 = vld [vmem:[%s9024_s4 + $0xe08] ss:$16 sps:$4 sm:$0xff]   ;;  %v6677_v61 = vld [vmem:[%s9024_s4 + $0xfe4] ss:$16 sps:$4 sm:$0xff]  }
 0x1c7   : > { %3644 = vmatpush2.bf16.msra.mxu0 %v6601_v33  ;;  %3685 = vmatpush2.bf16.msra.mxu1 %v6604_v34  ;;  %v6680_v33 = vld [vmem:[%s9024_s4 + $0xfec] ss:$16 sps:$4 sm:$0xff]   ;;  %v6675_v34 = vld [vmem:[%s9024_s4 + $0xfe0] ss:$16 sps:$4 sm:$0xff]  }
 0x1c8   : > { %3645 = vmatprep.subr.bf16.mxu0 %v6609_v62  ;;  %3686 = vmatprep.subr.bf16.mxu1 %v6612_v63  ;;  %v6678_v62 = vld [vmem:[%s9024_s4 + $0xfe8] ss:$16 sps:$4 sm:$0xff]   ;;  %v6683_v63 = vld [vmem:[%s9024_s4 + $0xfc4] ss:$16 sps:$4 sm:$0xff]  }
 0x1cb   : > { %3646 = vmatpush2.bf16.msra.mxu0 %v6607_v0  ;;  %3687 = vmatpush2.bf16.msra.mxu1 %v6610_v1  ;;  %v6686_v0 = vld [vmem:[%s9024_s4 + $0xfcc] ss:$16 sps:$4 sm:$0xff]   ;;  %v6681_v1 = vld [vmem:[%s9024_s4 + $0xfc0] ss:$16 sps:$4 sm:$0xff]  }
 0x1cc   : > { %3647 = vmatprep.subr.bf16.mxu0 %v6615_v2  ;;  %3688 = vmatprep.subr.bf16.mxu1 %v6618_v3  ;;  %v6684_v2 = vld [vmem:[%s9024_s4 + $0xfc8] ss:$16 sps:$4 sm:$0xff]   ;;  %v6689_v3 = vld [vmem:[%s9024_s4 + $0xfa4] ss:$16 sps:$4 sm:$0xff]  }
 0x1cf   : > { %3648 = vmatpush2.bf16.msra.mxu0 %v6613_v4  ;;  %3689 = vmatpush2.bf16.msra.mxu1 %v6616_v5  ;;  %v6692_v4 = vld [vmem:[%s9024_s4 + $0xfac] ss:$16 sps:$4 sm:$0xff]   ;;  %v6687_v5 = vld [vmem:[%s9024_s4 + $0xfa0] ss:$16 sps:$4 sm:$0xff]  }
 0x1d0   : > { %3649 = vmatprep.subr.bf16.mxu0 %v6621_v8  ;;  %3690 = vmatprep.subr.bf16.mxu1 %v6624_v9  ;;  %v6690_v8 = vld [vmem:[%s9024_s4 + $0xfa8] ss:$16 sps:$4 sm:$0xff]   ;;  %v6695_v9 = vld [vmem:[%s9024_s4 + $0xf84] ss:$16 sps:$4 sm:$0xff]  }
 0x1d3   : > { %3650 = vmatpush2.bf16.msra.mxu0 %v6619_v51  ;;  %3691 = vmatpush2.bf16.msra.mxu1 %v6622_v13  ;;  %v6693_v51 = vld [vmem:[%s9024_s4 + $0xf80] ss:$16 sps:$4 sm:$0xff]   ;;  %v6696_v13 = vld [vmem:[%s9024_s4 + $0xf88] ss:$16 sps:$4 sm:$0xff]  }
 0x1d4   : > { %4099 = vmatprep.subr.bf16.mxu0 %v6629_v14  ;;  %4140 = vmatprep.subr.bf16.mxu1 %v6632_v57  ;;  %v6701_v14 = vld [vmem:[%s9024_s4 + $0xf64] ss:$16 sps:$4 sm:$0xff]   ;;  %v6704_v57 = vld [vmem:[%s9024_s4 + $0xf6c] ss:$16 sps:$4 sm:$0xff]  }
 0x1d6   : > { %v2203_v22 = vpop.f32.mrf.mxu0  ;;  %v2244_v23 = vpop.f32.mrf.mxu1  ;;  %3652 = vmatmul.mubr.bf16.vlgmr.msra.gmra.mxu0 %v3295_v16  ;;  %3693 = vmatmul.mubr.bf16.vlgmr.msra.gmra.mxu1 %v3295_v16  ;;  %v6702_v16 = vld [vmem:[%s9024_s4 + $0xf68] ss:$16 sps:$4 sm:$0xff]  }
 0x1d7   : > { %v8473_v24 = vadd.f32 %v2203_v22, %v8265_v6  ;;  %v8476_v26 = vadd.f32 %v2244_v23, %v8268_v7  ;;  %4100 = vmatpush1.bf16.msra.mxu0 %v6627_v17  ;;  %4141 = vmatpush1.bf16.msra.mxu1 %v6630_v28  ;;  %v6641_v6 = vld [vmem:[%s9024_s4 + $0xea4] ss:$16 sps:$4 sm:$0xff]   ;;  %v6644_v7 = vld [vmem:[%s9024_s4 + $0xeac] ss:$16 sps:$4 sm:$0xff]  }
 0x1d8   : > { %v2205_v30 = vpop.f32.mrf.mxu0  ;;  %v2246_v31 = vpop.f32.mrf.mxu1  ;;  %4101 = vmatprep.subr.bf16.mxu0 %v6635_v29  ;;  %4142 = vmatprep.subr.bf16.mxu1 %v6638_v19  ;;  %v6707_v17 = vld [vmem:[%s9024_s4 + $0xf44] ss:$16 sps:$4 sm:$0xff]   ;;  %v6710_v28 = vld [vmem:[%s9024_s4 + $0xf4c] ss:$16 sps:$4 sm:$0xff]   ;;  %v6705_v19 = vld [vmem:[%s9024_s4 + $0xf40] ss:$16 sps:$4 sm:$0xff]  }
 0x1d9   : > { %v8491_v32 = vadd.f32 %v2205_v30, %v8280_v52  ;;  %v8494_v35 = vadd.f32 %v2246_v31, %v8283_v12  ;;  %4131 = vmatprep.mubr.bf16.mxu0 %v3776_v21  ;;  %4172 = vmatprep.mubr.bf16.mxu1 %v3776_v21  ;;  %v6647_v12 = vld [vmem:[%s9024_s4 + $0xe84] ss:$16 sps:$4 sm:$0xff]   ;;  %v6708_v21 = vld [vmem:[%s9024_s4 + $0xf48] ss:$16 sps:$4 sm:$0xff]   ;;  %v6716_v23 = vld [vmem:[%s9024_s4 + $0xf2c] ss:$16 sps:$4 sm:$0xff]  }
 0x1da   : > { %v2207_v36 = vpop.f32.mrf.mxu0  ;;  %v2248_v37 = vpop.f32.mrf.mxu1  ;;  %v8629_v29 = vld [vmem:[%s7278_s29] sm:$0x66]  ;;  %v6714_v30 = vld [vmem:[%s9024_s4 + $0xf28] ss:$16 sps:$4 sm:$0xff]   ;;  %s314_s29 = sand.u32 1, %s6906_s25  }
 0x1db   : > { %4102 = vmatpush1.bf16.msra.mxu0 %v6633_v27  ;;  %4143 = vmatpush1.bf16.msra.mxu1 %v6636_v20  ;;  %v6713_v22 = vld [vmem:[%s9024_s4 + $0xf24] ss:$16 sps:$4 sm:$0xff]   ;;  %v5751_v27 = vcombine.high %v8629_v29, %v8629_v29  ;;  %v6711_v20 = vld [vmem:[%s9024_s4 + $0xf20] ss:$16 sps:$4 sm:$0xff]   ;;  %v5684_v37 = vcombine.low %v8442_v10, %v8442_v10  ;;  %v6729_v10 = vld [vmem:[%s9024_s4 + $0x10ec] ss:$16 sps:$4 sm:$0xff]  }
 0x1dc   : > { %v2208_v40 = vpop.f32.mrf.mxu0  ;;  %v2249_v52 = vpop.f32.mrf.mxu1  ;;  %4103 = vmatprep.subr.bf16.mxu0 %v6641_v6  ;;  %4144 = vmatprep.subr.bf16.mxu1 %v6644_v7  ;;  %v6719_v31 = vld [vmem:[%s9024_s4 + $0xf04] ss:$16 sps:$4 sm:$0xff]   ;;  %v6722_v6 = vld [vmem:[%s9024_s4 + $0xf0c] ss:$16 sps:$4 sm:$0xff]   ;;  %s315_s13 = scalar_lea.vmem [#allocation3], %s314_s29  ;;  %s5107_s18 = scalar_lea.sflag [#allocation4], %s314_s29 }
 0x1dd   : > { %v4264_v7 = vshrl.u32 %v5751_v27, 16  ;;  %v4267_v36 = vshll.u32 %v5751_v27, 16  ;;  %v6726_v40 = vld [vmem:[%s9024_s4 + $0x10e4] ss:$16 sps:$4 sm:$0xff]   ;;  %v6783_v27 = vld [vmem:[%s9024_s4 + $0x11cc] ss:$16 sps:$4 sm:$0xff]  }
 0x1de   : > { %s5119_s14 = sshll.u32 %s315_s13, 4  ;;  %s5120_s14 = int_to_ptr.vmem [resolvable:$true] %s5119_s14 }
 0x1df   : > { %4104 = vmatpush1.bf16.msra.mxu0 %v6639_v38  ;;  %4145 = vmatpush1.bf16.msra.mxu1 %v6642_v39  ;;  %v6717_v38 = vld [vmem:[%s9024_s4 + $0xf00] ss:$16 sps:$4 sm:$0xff]   ;;  %v6720_v39 = vld [vmem:[%s9024_s4 + $0xf08] ss:$16 sps:$4 sm:$0xff]   ;;  %v4266_v52 = vrot.slane %v4264_v7, 1  ;;  %s6854_s0 = scalar_lea.vmem %s5120_s14, 16  ;;  %p6861_p0 = scmp.lt.s32.totalorder %s5120_s14, %s6859_s21 }
 0x1e0   : > { %4105 = vmatprep.subr.bf16.mxu0 %v6647_v12  ;;  %4146 = vmatprep.subr.bf16.mxu1 %v6650_v41  ;;  %v4269_v12 = vrot.slane %v4267_v36, 2  ;;  %v3775_v41 = vrot.slane %v5684_v37, 1  ;;  %v6784_v7 = vld [vmem:[%s9024_s4 + $0x11a0] ss:$16 sps:$4 sm:$0xff]   ;;  %v6787_v36 = vld [vmem:[%s9024_s4 + $0x11a8] ss:$16 sps:$4 sm:$0xff]   ;;  %p6855_p11 = scmp.ne.s32.totalorder %s5120_s14, %s6854_s0  ;;  %p6862_p1 = scmp.lt.s32.totalorder %s6860_s28, %s6854_s0 }
 0x1e1   : > { %v6792_v37 = vld [vmem:[%s9024_s4 + $0x1184] ss:$16 sps:$4 sm:$0xff]  }
 0x1e2   : > { %p6856_p12 = pnand %p6855_p11, %p6995_p5  ;;  %p6863_p2 = por %p6862_p1, %p6861_p0 }
 0x1e3   : > { %4106 = vmatpush1.bf16.msra.mxu0 %v6645_v42  ;;  %4147 = vmatpush1.bf16.msra.mxu1 %v6648_v43  ;;  %v6724_v42 = vld [vmem:[%s9024_s4 + $0x10e0] ss:$16 sps:$4 sm:$0xff]   ;;  %v6727_v43 = vld [vmem:[%s9024_s4 + $0x10e8] ss:$16 sps:$4 sm:$0xff]  }
 0x1e4   : > { %4107 = vmatprep.subr.bf16.mxu0 %v6653_v44  ;;  %4148 = vmatprep.subr.bf16.mxu1 %v6656_v18  ;;  %v6732_v44 = vld [vmem:[%s9024_s4 + $0x10c4] ss:$16 sps:$4 sm:$0xff]   ;;  %v6735_v18 = vld [vmem:[%s9024_s4 + $0x10cc] ss:$16 sps:$4 sm:$0xff]   ;;  %p6857_p13 = pneg %p6856_p12 }
 0x1e6   : > { %p6864_p3 = pnand %p6863_p2, %p6857_p13 }
 0x1e7   : > { %4108 = vmatpush1.bf16.msra.mxu0 %v6651_v45  ;;  %4149 = vmatpush1.bf16.msra.mxu1 %v6654_v46  ;;  %v4270_v45 = vor.u32 %v4269_v12, %v4266_v52  ;;  %v6801_v52 = vld [vmem:[%s9024_s4 + $0x116c] ss:$16 sps:$4 sm:$0xff]   ;;  %v6796_v12 = vld [vmem:[%s9024_s4 + $0x1160] ss:$16 sps:$4 sm:$0xff]  }
 0x1e8   : > { %4109 = vmatprep.subr.bf16.mxu0 %v6659_v47  ;;  %4150 = vmatprep.subr.bf16.mxu1 %v6662_v25 }
 0x1eb   : > { %4110 = vmatpush1.bf16.msra.mxu0 %v6657_v48  ;;  %4151 = vmatpush1.bf16.msra.mxu1 %v6660_v49  ;;  %v6730_v49 = vld [vmem:[%s9024_s4 + $0x10c0] ss:$16 sps:$4 sm:$0xff]  }
 0x1ec   : > { %4111 = vmatprep.subr.bf16.mxu0 %v6665_v50  ;;  %4152 = vmatprep.subr.bf16.mxu1 %v6668_v53  ;;  %v6733_v50 = vld [vmem:[%s9024_s4 + $0x10c8] ss:$16 sps:$4 sm:$0xff]  }
 0x1ef   : > { %4112 = vmatpush1.bf16.msra.mxu0 %v6663_v54  ;;  %4153 = vmatpush1.bf16.msra.mxu1 %v6666_v55 }
 0x1f0   : > { %4113 = vmatprep.subr.bf16.mxu0 %v6671_v56  ;;  %4154 = vmatprep.subr.bf16.mxu1 %v6674_v58 }
 0x1f3   : > { %4114 = vmatpush1.bf16.msra.mxu0 %v6669_v59  ;;  %4155 = vmatpush1.bf16.msra.mxu1 %v6672_v60  ;;  %v6736_v60 = vld [vmem:[%s9024_s4 + $0x10a0] ss:$16 sps:$4 sm:$0xff]  }
 0x1f4   : > { %4115 = vmatprep.subr.bf16.mxu0 %v6677_v61  ;;  %4156 = vmatprep.subr.bf16.mxu1 %v6680_v33  ;;  %v6739_v61 = vld [vmem:[%s9024_s4 + $0x10a8] ss:$16 sps:$4 sm:$0xff]  }
 0x1f7   : > { %4116 = vmatpush2.bf16.msra.mxu0 %v6675_v34  ;;  %4157 = vmatpush2.bf16.msra.mxu1 %v6678_v62  ;;  %v6747_v34 = vld [vmem:[%s9024_s4 + $0x108c] ss:$16 sps:$4 sm:$0xff]   ;;  %v6742_v62 = vld [vmem:[%s9024_s4 + $0x1080] ss:$16 sps:$4 sm:$0xff]  }
 0x1f8   : > { %4117 = vmatprep.subr.bf16.mxu0 %v6683_v63  ;;  %4158 = vmatprep.subr.bf16.mxu1 %v6686_v0  ;;  %v6745_v63 = vld [vmem:[%s9024_s4 + $0x1088] ss:$16 sps:$4 sm:$0xff]   ;;  %v6750_v0 = vld [vmem:[%s9024_s4 + $0x1064] ss:$16 sps:$4 sm:$0xff]  }
 0x1fb   : > { %4118 = vmatpush2.bf16.msra.mxu0 %v6681_v1  ;;  %4159 = vmatpush2.bf16.msra.mxu1 %v6684_v2  ;;  %v6753_v1 = vld [vmem:[%s9024_s4 + $0x106c] ss:$16 sps:$4 sm:$0xff]   ;;  %v6748_v2 = vld [vmem:[%s9024_s4 + $0x1060] ss:$16 sps:$4 sm:$0xff]  }
 0x1fc   : > { %4119 = vmatprep.subr.bf16.mxu0 %v6689_v3  ;;  %4160 = vmatprep.subr.bf16.mxu1 %v6692_v4  ;;  %v6751_v3 = vld [vmem:[%s9024_s4 + $0x1068] ss:$16 sps:$4 sm:$0xff]   ;;  %v6756_v4 = vld [vmem:[%s9024_s4 + $0x1044] ss:$16 sps:$4 sm:$0xff]  }
 0x1ff   : > { %4120 = vmatpush2.bf16.msra.mxu0 %v6687_v5  ;;  %4161 = vmatpush2.bf16.msra.mxu1 %v6690_v8  ;;  %v6759_v5 = vld [vmem:[%s9024_s4 + $0x104c] ss:$16 sps:$4 sm:$0xff]   ;;  %v6754_v8 = vld [vmem:[%s9024_s4 + $0x1040] ss:$16 sps:$4 sm:$0xff]  }
 0x200   : > { %4121 = vmatprep.subr.bf16.mxu0 %v6695_v9  ;;  %4162 = vmatprep.subr.bf16.mxu1 %v6698_v11  ;;  %v6757_v9 = vld [vmem:[%s9024_s4 + $0x1048] ss:$16 sps:$4 sm:$0xff]   ;;  %v6762_v11 = vld [vmem:[%s9024_s4 + $0x1024] ss:$16 sps:$4 sm:$0xff]  }
 0x203   : > { %4122 = vmatpush2.bf16.msra.mxu0 %v6693_v51  ;;  %4163 = vmatpush2.bf16.msra.mxu1 %v6696_v13  ;;  %v6765_v51 = vld [vmem:[%s9024_s4 + $0x102c] ss:$16 sps:$4 sm:$0xff]   ;;  %v6760_v13 = vld [vmem:[%s9024_s4 + $0x1020] ss:$16 sps:$4 sm:$0xff]  }
 0x204   : > { %4123 = vmatprep.subr.bf16.mxu0 %v6701_v14  ;;  %4164 = vmatprep.subr.bf16.mxu1 %v6704_v57  ;;  %v6763_v14 = vld [vmem:[%s9024_s4 + $0x1028] ss:$16 sps:$4 sm:$0xff]   ;;  %v6768_v57 = vld [vmem:[%s9024_s4 + $0x1004] ss:$16 sps:$4 sm:$0xff]  }
 0x207   : > { %4124 = vmatpush2.bf16.msra.mxu0 %v6699_v15  ;;  %4165 = vmatpush2.bf16.msra.mxu1 %v6702_v16  ;;  %v6771_v15 = vld [vmem:[%s9024_s4 + $0x100c] ss:$16 sps:$4 sm:$0xff]   ;;  %v6766_v16 = vld [vmem:[%s9024_s4 + $0x1000] ss:$16 sps:$4 sm:$0xff]  }
 0x208   : > { %4125 = vmatprep.subr.bf16.mxu0 %v6707_v17  ;;  %4166 = vmatprep.subr.bf16.mxu1 %v6710_v28  ;;  %v6769_v17 = vld [vmem:[%s9024_s4 + $0x1008] ss:$16 sps:$4 sm:$0xff]   ;;  %v6774_v28 = vld [vmem:[%s9024_s4 + $0x11e4] ss:$16 sps:$4 sm:$0xff]  }
 0x20b   : > { %4126 = vmatpush2.bf16.msra.mxu0 %v6705_v19  ;;  %4167 = vmatpush2.bf16.msra.mxu1 %v6708_v21  ;;  %v6777_v19 = vld [vmem:[%s9024_s4 + $0x11ec] ss:$16 sps:$4 sm:$0xff]   ;;  %v6772_v21 = vld [vmem:[%s9024_s4 + $0x11e0] ss:$16 sps:$4 sm:$0xff]  }
 0x20c   : > { %4127 = vmatprep.subr.bf16.mxu0 %v6713_v22  ;;  %4168 = vmatprep.subr.bf16.mxu1 %v6716_v23  ;;  %v6775_v22 = vld [vmem:[%s9024_s4 + $0x11e8] ss:$16 sps:$4 sm:$0xff]   ;;  %v6780_v23 = vld [vmem:[%s9024_s4 + $0x11c4] ss:$16 sps:$4 sm:$0xff]  }
 0x20f   : > { %4128 = vmatpush2.bf16.msra.mxu0 %v6711_v20  ;;  %4169 = vmatpush2.bf16.msra.mxu1 %v6714_v30  ;;  %v6778_v20 = vld [vmem:[%s9024_s4 + $0x11c0] ss:$16 sps:$4 sm:$0xff]   ;;  %v6781_v30 = vld [vmem:[%s9024_s4 + $0x11c8] ss:$16 sps:$4 sm:$0xff]  }
 0x210   : > { %4129 = vmatprep.subr.bf16.mxu0 %v6719_v31  ;;  %4170 = vmatprep.subr.bf16.mxu1 %v6722_v6  ;;  %v6786_v31 = vld [vmem:[%s9024_s4 + $0x11a4] ss:$16 sps:$4 sm:$0xff]   ;;  %v6789_v6 = vld [vmem:[%s9024_s4 + $0x11ac] ss:$16 sps:$4 sm:$0xff]  }
 0x213   : > { %4130 = vmatpush2.bf16.msra.mxu0 %v6717_v38  ;;  %4171 = vmatpush2.bf16.msra.mxu1 %v6720_v39  ;;  %v6795_v38 = vld [vmem:[%s9024_s4 + $0x118c] ss:$16 sps:$4 sm:$0xff]   ;;  %v6790_v39 = vld [vmem:[%s9024_s4 + $0x1180] ss:$16 sps:$4 sm:$0xff]  }
 0x214   : > { %4593 = vmatprep.subr.bf16.mxu0 %v6726_v40  ;;  %4634 = vmatprep.subr.bf16.mxu1 %v6729_v10  ;;  %v6793_v40 = vld [vmem:[%s9024_s4 + $0x1188] ss:$16 sps:$4 sm:$0xff]   ;;  %v6798_v10 = vld [vmem:[%s9024_s4 + $0x1164] ss:$16 sps:$4 sm:$0xff]  }
 0x216   : > { %v2681_v46 = vpop.f32.mrf.mxu0  ;;  %v2722_v47 = vpop.f32.mrf.mxu1  ;;  %4132 = vmatmul.mubr.bf16.vlgmr.msra.gmra.mxu0 %v3775_v41  ;;  %4173 = vmatmul.mubr.bf16.vlgmr.msra.gmra.mxu1 %v3775_v41  ;;  %v6799_v41 = vld [vmem:[%s9024_s4 + $0x1168] ss:$16 sps:$4 sm:$0xff]  }
 0x217   : > { %v8684_v25 = vadd.f32 %v2681_v46, %v8473_v24  ;;  %v8687_v48 = vadd.f32 %v2722_v47, %v8476_v26  ;;  %4594 = vmatpush1.bf16.msra.mxu0 %v6724_v42  ;;  %4635 = vmatpush1.bf16.msra.mxu1 %v6727_v43  ;;  %v6738_v24 = vld [vmem:[%s9024_s4 + $0x10a4] ss:$16 sps:$4 sm:$0xff]   ;;  %v6741_v26 = vld [vmem:[%s9024_s4 + $0x10ac] ss:$16 sps:$4 sm:$0xff]  }
 0x218   : > { %v2683_v53 = vpop.f32.mrf.mxu0  ;;  %v2724_v54 = vpop.f32.mrf.mxu1  ;;  %4595 = vmatprep.subr.bf16.mxu0 %v6732_v44  ;;  %4636 = vmatprep.subr.bf16.mxu1 %v6735_v18  ;;  %v6804_v42 = vld [vmem:[%s9024_s4 + $0x1144] ss:$16 sps:$4 sm:$0xff]   ;;  %v6807_v43 = vld [vmem:[%s9024_s4 + $0x114c] ss:$16 sps:$4 sm:$0xff]   ;;  %v5750_v44 = vcombine.low %v8629_v29, %v8629_v29  ;;  %v6802_v18 = vld [vmem:[%s9024_s4 + $0x1140] ss:$16 sps:$4 sm:$0xff]  }
 0x219   : > { %v8702_v55 = vadd.f32 %v2683_v53, %v8491_v32  ;;  %v8705_v56 = vadd.f32 %v2724_v54, %v8494_v35  ;;  %4625 = vmatprep.mubr.bf16.mxu0 %v4270_v45  ;;  %4666 = vmatprep.mubr.bf16.mxu1 %v4270_v45  ;;  %v6744_v35 = vld [vmem:[%s9024_s4 + $0x1084] ss:$16 sps:$4 sm:$0xff]   ;;  %v6805_v45 = vld [vmem:[%s9024_s4 + $0x1148] ss:$16 sps:$4 sm:$0xff]   ;;  %v6813_v29 = vld [vmem:[%s9024_s4 + $0x112c] ss:$16 sps:$4 sm:$0xff]  }
 0x21a   : > { %v2685_v58 = vpop.f32.mrf.mxu0  ;;  %v2726_v59 = vpop.f32.mrf.mxu1  ;;  %v6810_v46 = vld [vmem:[%s9024_s4 + $0x1124] ss:$16 sps:$4 sm:$0xff]   ;;  %v4256_v47 = vshrl.u32 %v5750_v44, 16  ;;  %v6811_v53 = vld [vmem:[%s9024_s4 + $0x1128] ss:$16 sps:$4 sm:$0xff]  }
 0x21b   : > { %4596 = vmatpush1.bf16.msra.mxu0 %v6730_v49  ;;  %4637 = vmatpush1.bf16.msra.mxu1 %v6733_v50  ;;  %v4259_v49 = vshll.u32 %v5750_v44, 16  ;;  %v6808_v50 = vld [vmem:[%s9024_s4 + $0x1120] ss:$16 sps:$4 sm:$0xff]   ;;  %v6816_v54 = vld [vmem:[%s9024_s4 + $0x1104] ss:$16 sps:$4 sm:$0xff]   ;;  %v6846_v44 = vld [vmem:[%s9026_s6 + $0x48] sm:$0xff]  }
 0x21c   : > { %v2686_v33 = vpop.f32.mrf.mxu0  ;;  %v2727_v32 = vpop.f32.mrf.mxu1  ;;  %4597 = vmatprep.subr.bf16.mxu0 %v6738_v24  ;;  %4638 = vmatprep.subr.bf16.mxu1 %v6741_v26  ;;  %v6819_v24 = vld [vmem:[%s9024_s4 + $0x110c] ss:$16 sps:$4 sm:$0xff]   ;;  %v4258_v26 = vrot.slane %v4256_v47, 1  ;;  %v6814_v59 = vld [vmem:[%s9024_s4 + $0x1100] ss:$16 sps:$4 sm:$0xff]  }
 0x21d   : > { %v4261_v58 = vrot.slane %v4259_v49, 2  ;;  %v6851_v47 = vld [vmem:[%s9026_s6 + $0xc0] sm:$0xff]  }
 0x21e   : > { %v6852_v49 = vld [vmem:[%s9026_s6] sm:$0xff]  }
 0x21f   : > { %4598 = vmatpush1.bf16.msra.mxu0 %v6736_v60  ;;  %4639 = vmatpush1.bf16.msra.mxu1 %v6739_v61  ;;  %v6817_v60 = vld [vmem:[%s9024_s4 + $0x1108] ss:$16 sps:$4 sm:$0xff]   ;;  %v4262_v61 = vor.u32 %v4261_v58, %v4258_v26 }
 0x220   : > { %4599 = vmatprep.subr.bf16.mxu0 %v6744_v35  ;;  %4640 = vmatprep.subr.bf16.mxu1 %v6747_v34 }
 0x223   : > { %4600 = vmatpush1.bf16.msra.mxu0 %v6742_v62  ;;  %4641 = vmatpush1.bf16.msra.mxu1 %v6745_v63 }
 0x224   : > { %4601 = vmatprep.subr.bf16.mxu0 %v6750_v0  ;;  %4642 = vmatprep.subr.bf16.mxu1 %v6753_v1 }
 0x227   : > { %4602 = vmatpush1.bf16.msra.mxu0 %v6748_v2  ;;  %4643 = vmatpush1.bf16.msra.mxu1 %v6751_v3 }
 0x228   : > { %4603 = vmatprep.subr.bf16.mxu0 %v6756_v4  ;;  %4644 = vmatprep.subr.bf16.mxu1 %v6759_v5 }
 0x22b   : > { %4604 = vmatpush1.bf16.msra.mxu0 %v6754_v8  ;;  %4645 = vmatpush1.bf16.msra.mxu1 %v6757_v9  ;;  %v6822_v8 = vld [vmem:[%s9026_s6 + $0x78] sm:$0xff]   ;;  %v6827_v9 = vld [vmem:[%s9026_s6 + $0xf0] sm:$0xff]  }
 0x22c   : > { %4605 = vmatprep.subr.bf16.mxu0 %v6762_v11  ;;  %4646 = vmatprep.subr.bf16.mxu1 %v6765_v51  ;;  %v6828_v11 = vld [vmem:[%s9026_s6 + $0x30] sm:$0xff]  }
 0x22d   : > { %v6829_v51 = vld [vmem:[%s9026_s6 + $0xb0] sm:$0xff]  }
 0x22f   : > { %4606 = vmatpush1.bf16.msra.mxu0 %v6760_v13  ;;  %4647 = vmatpush1.bf16.msra.mxu1 %v6763_v14  ;;  %v6830_v13 = vld [vmem:[%s9026_s6 + $0x68] sm:$0xff]  }
 0x230   : > { %4607 = vmatprep.subr.bf16.mxu0 %v6768_v57  ;;  %4648 = vmatprep.subr.bf16.mxu1 %v6771_v15  ;;  %v6831_v14 = vld [vmem:[%s9026_s6 + $0xe8] sm:$0xff]  }
 0x231   : > { %v6832_v57 = vld [vmem:[%s9026_s6 + $0x28] sm:$0xff]  }
 0x232   : > { %v6833_v15 = vld [vmem:[%s9026_s6 + $0xa8] sm:$0xff]  }
 0x233   : > { %4608 = vmatpush1.bf16.msra.mxu0 %v6766_v16  ;;  %4649 = vmatpush1.bf16.msra.mxu1 %v6769_v17  ;;  %v6834_v16 = vld [vmem:[%s9026_s6 + $0x60] sm:$0xff]  }
 0x234   : > { %4609 = vmatprep.subr.bf16.mxu0 %v6774_v28  ;;  %4650 = vmatprep.subr.bf16.mxu1 %v6777_v19  ;;  %v6835_v17 = vld [vmem:[%s9026_s6 + $0xe0] sm:$0xff]  }
 0x235   : > { %v6836_v28 = vld [vmem:[%s9026_s6 + $0x20] sm:$0xff]  }
 0x236   : > { %v6837_v19 = vld [vmem:[%s9026_s6 + $0xa0] sm:$0xff]  }
 0x237   : > { %4610 = vmatpush2.bf16.msra.mxu0 %v6772_v21  ;;  %4651 = vmatpush2.bf16.msra.mxu1 %v6775_v22  ;;  %v6838_v21 = vld [vmem:[%s9026_s6 + $0x58] sm:$0xff]  }
 0x238   : > { %4611 = vmatprep.subr.bf16.mxu0 %v6780_v23  ;;  %4652 = vmatprep.subr.bf16.mxu1 %v6783_v27  ;;  %v6839_v22 = vld [vmem:[%s9026_s6 + $0xd8] sm:$0xff]  }
 0x239   : > { %v6840_v23 = vld [vmem:[%s9026_s6 + $0x18] sm:$0xff]  }
 0x23a   : > { %v6841_v27 = vld [vmem:[%s9026_s6 + $0x98] sm:$0xff]  }
 0x23b   : > { %4612 = vmatpush2.bf16.msra.mxu0 %v6778_v20  ;;  %4653 = vmatpush2.bf16.msra.mxu1 %v6781_v30 }
 0x23c   : > { %4613 = vmatprep.subr.bf16.mxu0 %v6786_v31  ;;  %4654 = vmatprep.subr.bf16.mxu1 %v6789_v6 }
 0x23f   : > { %4614 = vmatpush2.bf16.msra.mxu0 %v6784_v7  ;;  %4655 = vmatpush2.bf16.msra.mxu1 %v6787_v36 }
 0x240   : > { %4615 = vmatprep.subr.bf16.mxu0 %v6792_v37  ;;  %4656 = vmatprep.subr.bf16.mxu1 %v6795_v38  ;;  %v6842_v37 = vld [vmem:[%s9026_s6 + $0x50] sm:$0xff]  }
 0x241   : > { %v6843_v38 = vld [vmem:[%s9026_s6 + $0xd0] sm:$0xff]  }
 0x243   : > { %4616 = vmatpush2.bf16.msra.mxu0 %v6790_v39  ;;  %4657 = vmatpush2.bf16.msra.mxu1 %v6793_v40 }
 0x244   : > { %4617 = vmatprep.subr.bf16.mxu0 %v6798_v10  ;;  %4658 = vmatprep.subr.bf16.mxu1 %v6801_v52  ;;  %v6844_v10 = vld [vmem:[%s9026_s6 + $0x10] sm:$0xff]  }
 0x245   : > { %v6845_v52 = vld [vmem:[%s9026_s6 + $0x90] sm:$0xff]  }
 0x247   : > { %4618 = vmatpush2.bf16.msra.mxu0 %v6796_v12  ;;  %4659 = vmatpush2.bf16.msra.mxu1 %v6799_v41 }
 0x248   : > { %4619 = vmatprep.subr.bf16.mxu0 %v6804_v42  ;;  %4660 = vmatprep.subr.bf16.mxu1 %v6807_v43 }
 0x24b   : > { %4620 = vmatpush2.bf16.msra.mxu0 %v6802_v18  ;;  %4661 = vmatpush2.bf16.msra.mxu1 %v6805_v45  ;;  %v6847_v18 = vld [vmem:[%s9026_s6 + $0xc8] sm:$0xff]  }
 0x24c   : > { %4621 = vmatprep.subr.bf16.mxu0 %v6810_v46  ;;  %4662 = vmatprep.subr.bf16.mxu1 %v6813_v29  ;;  %v6848_v45 = vld [vmem:[%s9026_s6 + $0x8] sm:$0xff]   ;;  %v6850_v29 = vld [vmem:[%s9026_s6 + $0x40] sm:$0xff]  }
 0x24d   : > { %v6849_v46 = vld [vmem:[%s9026_s6 + $0x88] sm:$0xff]  }
 0x24f   : > { %4622 = vmatpush2.bf16.msra.mxu0 %v6808_v50  ;;  %4663 = vmatpush2.bf16.msra.mxu1 %v6811_v53  ;;  %v6853_v50 = vld [vmem:[%s9026_s6 + $0x80] sm:$0xff]  }
 0x250   : > { %4623 = vmatprep.subr.bf16.mxu0 %v6816_v54  ;;  %4664 = vmatprep.subr.bf16.mxu1 %v6819_v24 }
 0x253   : > { %4624 = vmatpush2.bf16.msra.mxu0 %v6814_v59  ;;  %4665 = vmatpush2.bf16.msra.mxu1 %v6817_v60 }
 0x254   : > { %5857 = vmatprep.subr.bf16.mxu0 %v6822_v8 }
 0x256   : > { %v3173_v33 = vpop.f32.mrf.mxu0  ;;  %v3214_v32 = vpop.f32.mrf.mxu1  ;;  %4626 = vmatmul.mubr.bf16.vlgmr.msra.gmra.mxu0 %v4262_v61  ;;  %4667 = vmatmul.mubr.bf16.vlgmr.msra.gmra.mxu1 %v4262_v61 }
 0x257   : > { %v3221_v35 = vadd.f32 %v3173_v33, %v8684_v25  ;;  %v3223_v34 = vadd.f32 %v3214_v32, %v8687_v48  ;;  %v6823_v25 = vld [vmem:[%s9026_s6 + $0xf8] sm:$0xff]  }
 0x258   : > { %v3175_v62 = vpop.f32.mrf.mxu0  ;;  %v3216_v63 = vpop.f32.mrf.mxu1  ;;  %v6824_v48 = vld [vmem:[%s9026_s6 + $0x38] sm:$0xff]   ;;  %5879 = vmatprep.subr.bf16.mxu1 %v6823_v25 }
 0x259   : > { %v3222_v0 = vadd.f32 %v3175_v62, %v8702_v55  ;;  %v3224_v1 = vadd.f32 %v3216_v63, %v8705_v56  ;;  %v6825_v55 = vld [vmem:[%s9026_s6 + $0xb8] sm:$0xff]   ;;  %v6826_v56 = vld [vmem:[%s9026_s6 + $0x70] sm:$0xff]   ;;  %5858 = vmatpush3.bf16.msra.mxu0 %v6824_v48 }
 0x25a   : > { %v3177_v2 = vpop.f32.mrf.mxu0  ;;  %v3218_v3 = vpop.f32.mrf.mxu1  ;;  %5880 = vmatpush3.bf16.msra.mxu1 %v6825_v55  ;;  %5859 = vmatprep.subr.bf16.mxu0 %v6826_v56 }
 0x25b   : > { %5881 = vmatprep.subr.bf16.mxu1 %v6827_v9 }
 0x25c   : > { %v3178_v4 = vpop.f32.mrf.mxu0  ;;  %v3219_v5 = vpop.f32.mrf.mxu1 }
 0x25d   : > { %5860 = vmatpush3.bf16.msra.mxu0 %v6828_v11  ;;  %v5816_v4 = vld [vmem:[%s9025_s5 + $0x1] ss:$8 sm:$0xf] }
 0x25e   : > { %5882 = vmatpush3.bf16.msra.mxu1 %v6829_v51  ;;  %5861 = vmatprep.subr.bf16.mxu0 %v6830_v13 }
 0x25f   : > { %5883 = vmatprep.subr.bf16.mxu1 %v6831_v14 }
 0x261   : > { %5862 = vmatpush3.bf16.msra.mxu0 %v6832_v57 }
 0x262   : > { %5884 = vmatpush3.bf16.msra.mxu1 %v6833_v15  ;;  %5863 = vmatprep.subr.bf16.mxu0 %v6834_v16 }
 0x263   : > { %5885 = vmatprep.subr.bf16.mxu1 %v6835_v17  ;;  %v5817_v17 = vld [vmem:[%s9025_s5 + $0x2] ss:$8 sm:$0xf] }
 0x265   : > { %5864 = vmatpush3.bf16.msra.mxu0 %v6836_v28 }
 0x266   : > { %5886 = vmatpush3.bf16.msra.mxu1 %v6837_v19  ;;  %5865 = vmatprep.subr.bf16.mxu0 %v6838_v21 }
 0x267   : > { %5887 = vmatprep.subr.bf16.mxu1 %v6839_v22 }
 0x269   : > { %5866 = vmatpush3.bf16.msra.mxu0 %v6840_v23 }
 0x26a   : > { %5888 = vmatpush3.bf16.msra.mxu1 %v6841_v27  ;;  %5867 = vmatprep.subr.bf16.mxu0 %v6842_v37 }
 0x26b   : > { %5889 = vmatprep.subr.bf16.mxu1 %v6843_v38 }
 0x26d   : > { %5868 = vmatpush3.bf16.msra.mxu0 %v6844_v10 }
 0x26e   : > { %5890 = vmatpush3.bf16.msra.mxu1 %v6845_v52  ;;  %5869 = vmatprep.subr.bf16.mxu0 %v6846_v44 }
 0x26f   : > { %5891 = vmatprep.subr.bf16.mxu1 %v6847_v18 }
 0x271   : > { %5870 = vmatpush3.bf16.msra.mxu0 %v6848_v45 }
 0x272   : > { %5892 = vmatpush3.bf16.msra.mxu1 %v6849_v46  ;;  %5871 = vmatprep.subr.bf16.mxu0 %v6850_v29 }
 0x273   : > { %5893 = vmatprep.subr.bf16.mxu1 %v6851_v47 }
 0x275   : > { %5872 = vmatpush3.bf16.msra.mxu0 %v6852_v49 }
 0x276   : > { %5894 = vmatpush3.bf16.msra.mxu1 %v6853_v50 }
 0x296   : > { %v3653_v20 = vpop.f32.mrf.mxu0  ;;  %v3694_v30 = vpop.f32.mrf.mxu1 }
 0x297   : > { %v3701_v31 = vadd.f32 %v3653_v20, %v3221_v35  ;;  %v3703_v6 = vadd.f32 %v3694_v30, %v3223_v34  ;;  %v4681_v35 = vlaneseq }
 0x298   : > { %v3655_v7 = vpop.f32.mrf.mxu0  ;;  %v3696_v36 = vpop.f32.mrf.mxu1 }
 0x299   : > { %v3702_v39 = vadd.f32 %v3655_v7, %v3222_v0  ;;  %v3704_v40 = vadd.f32 %v3696_v36, %v3224_v1  ;;  %v4682_v34 = vshrl.u32 %v4681_v35, 7  ;;  %v4679_v0 = vld [vmem:[%s9025_s5] ss:$8 sm:$0xf] }
 0x29a   : > { %v3657_v12 = vpop.f32.mrf.mxu0  ;;  %v3698_v41 = vpop.f32.mrf.mxu1 }
 0x29b   : > { %v4683_v62 = vsub.s32 0, %v4682_v34  ;;  %v4691_v63 = vsub.s32 2, %v4682_v34  ;;  %v4687_v1 = vsub.s32 1, %v4682_v34  ;;  %v4695_v2 = vsub.s32 3, %v4682_v34 }
 0x29c   : > { %v3658_v42 = vpop.f32.mrf.mxu0  ;;  %v3699_v43 = vpop.f32.mrf.mxu1 }
 0x29d   : > { %v4684_v3 = vrot.slane %v4679_v0, %v4683_v62  ;;  %v4692_v5 = vrot.slane %v4679_v0, %v4691_v63  ;;  %v4688_v48 = vrot.slane %v4679_v0, %v4687_v1  ;;  %v4696_v55 = vrot.slane %v4679_v0, %v4695_v2 }
 0x29e   : > { %v4715_v13 = vrot.slane %v5816_v4, %v4683_v62  ;;  %v4723_v14 = vrot.slane %v5816_v4, %v4691_v63  ;;  %v4719_v22 = vrot.slane %v5816_v4, %v4687_v1  ;;  %v4727_v23 = vrot.slane %v5816_v4, %v4695_v2 }
 0x29f   : > { %v4742_v36 = vrot.slane %v5817_v17, %v4683_v62  ;;  %v4750_v37 = vrot.slane %v5817_v17, %v4691_v63  ;;  %v4754_v10 = vrot.slane %v5817_v17, %v4695_v2 }
 0x2d6   : > { %v4133_v53 = vpop.f32.mrf.mxu0  ;;  %v4174_v54 = vpop.f32.mrf.mxu1 }
 0x2d7   : > { %v4181_v24 = vadd.f32 %v4133_v53, %v3701_v31  ;;  %v4183_v26 = vadd.f32 %v4174_v54, %v3703_v6 }
 0x2d8   : > { %v4135_v58 = vpop.f32.mrf.mxu0  ;;  %v4176_v59 = vpop.f32.mrf.mxu1 }
 0x2d9   : > { %v4182_v56 = vadd.f32 %v4135_v58, %v3702_v39  ;;  %v4184_v9 = vadd.f32 %v4176_v59, %v3704_v40  ;;  %v4746_v40 = vrot.slane %v5817_v17, %v4687_v1 }
 0x2da   : > { %v4137_v60 = vpop.f32.mrf.mxu0  ;;  %v4178_v61 = vpop.f32.mrf.mxu1 }
 0x2dc   : > { %v4138_v33 = vpop.f32.mrf.mxu0  ;;  %v4179_v32 = vpop.f32.mrf.mxu1 }
 0x316   : > { %v4627_v8 = vpop.f32.mrf.mxu0  ;;  %v4668_v25 = vpop.f32.mrf.mxu1 }
 0x317   : > { %v4675_v11 = vadd.f32 %v4627_v8, %v4181_v24  ;;  %v4677_v51 = vadd.f32 %v4668_v25, %v4183_v26 }
 0x318   : > { %v4629_v57 = vpop.f32.mrf.mxu0  ;;  %v4670_v15 = vpop.f32.mrf.mxu1 }
 0x319   : > { %v4701_v16 = vadd.f32 %v4684_v3, %v4675_v11  ;;  %v4703_v28 = vadd.f32 %v4692_v5, %v4677_v51  ;;  %v4676_v19 = vadd.f32 %v4629_v57, %v4182_v56  ;;  %v4678_v21 = vadd.f32 %v4670_v15, %v4184_v9 }
 0x31a   : > { %v4631_v27 = vpop.f32.mrf.mxu0  ;;  %v4672_v20 = vpop.f32.mrf.mxu1 }
 0x31b   : > { %v4705_v30 = vmax.f32 %v4701_v16, 0.0  ;;  %v4707_v31 = vmax.f32 %v4703_v28, 0.0  ;;  %v4702_v6 = vadd.f32 %v4688_v48, %v4676_v19  ;;  %v4704_v7 = vadd.f32 %v4696_v55, %v4678_v21 }
 0x31c   : > { %v4632_v38 = vpop.f32.mrf.mxu0  ;;  %v4673_v39 = vpop.f32.mrf.mxu1 }
 0x31d   : > { %v4732_v52 = vmul.f32 %v4715_v13, %v4705_v30  ;;  %v4734_v12 = vmul.f32 %v4723_v14, %v4707_v31  ;;  %v4706_v41 = vmax.f32 %v4702_v6, 0.0  ;;  %v4708_v42 = vmax.f32 %v4704_v7, 0.0 }
 0x31f   : > { %v4733_v43 = vmul.f32 %v4719_v22, %v4706_v41  ;;  %v4735_v44 = vmul.f32 %v4727_v23, %v4708_v42  ;;  %v4759_v18 = vadd.f32 %v4742_v36, %v4732_v52  ;;  %v4761_v45 = vadd.f32 %v4750_v37, %v4734_v12 }
 0x321   : > { %v4760_v46 = vadd.f32 %v4746_v40, %v4733_v43  ;;  %v4762_v29 = vadd.f32 %v4754_v10, %v4735_v44  ;;  %v4763_v50 = vpack.c.bf16 %v4759_v18, %v4759_v18  ;;  %v4765_v53 = vpack.c.bf16 %v4761_v45, %v4761_v45 }
 0x323   : > { %v4764_v47 = vpack.c.bf16 %v4760_v46, %v4760_v46  ;;  %v4766_v49 = vpack.c.bf16 %v4762_v29, %v4762_v29 }
 0x325   : > { %5055 = vmatprep.mubr.bf16.mxu0 %v4764_v47  ;;  %5095 = vmatprep.mubr.bf16.mxu1 %v4766_v49 }
 0x326   : > { %5056 = vmatmul.mubr.bf16.vlgmr.msra.gmra.mxu0 %v4763_v50  ;;  %5096 = vmatmul.mubr.bf16.vlgmr.msra.gmra.mxu1 %v4765_v53 }
 0x3e6   : > { %v5873_v54 = vpop.f32.mrf.mxu0  ;;  %v5895_v24 = vpop.f32.mrf.mxu1 }
 0x3e8   : > { %v5874_v26 = vpop.f32.mrf.mxu0  ;;  %v5896_v58 = vpop.f32.mrf.mxu1 }
 0x3e9   : > { %v5875_v59 = vadd.f32 %v5874_v26, %v5873_v54  ;;  %v5897_v60 = vadd.f32 %v5896_v58, %v5895_v24 }
 0x3ea   : > { %v5876_v61 = vpop.f32.mrf.mxu0  ;;  %v5898_v33 = vpop.f32.mrf.mxu1 }
 0x3eb   : > { %v5098_v32 = vadd.f32 %v5897_v60, %v5875_v59 }
 0x3ec   : > { %v5877_v35 = vpop.f32.mrf.mxu0  ;;  %v5899_v34 = vpop.f32.mrf.mxu1 }
 0x3ed   : > { %5103 = vst [vmem:[#allocation2] sm:$0x3] %v5098_v32 }
 0x3f4   : > { %v5104_v62 = vld [vmem:[#allocation2] sm:$0x1] }
 0x3f5   : > { %5105 = vst [vmem:[%s315_s13] sm:$0x1] %v5104_v62 }
 0x3f6   : > { %6867 = shalt.err (!%p6864_p3)
}
 0x3f7   : > { %s6868_s22 = scalar_lea.hbm %s8985_s16, 16  ;;  %s6872_s23 = scalar_lea.hbm %s9027_s7, 32 }
 0x3f8   : > { %p6869_p4 = scmp.ne.s32.totalorder %s8985_s16, %s6868_s22  ;;  %p6873_p9 = scmp.lt.s32.totalorder %s8985_s16, %s9027_s7 }
 0x3f9   : > { %p6874_p10 = scmp.lt.s32.totalorder %s6872_s23, %s6868_s22 }
 0x3fa   : > { %p6870_p7 = pnand %p6869_p4, %p6995_p5 }
 0x3fb   : > { %p6875_p11 = por %p6874_p10, %p6873_p9 }
 0x3fc   : > { %p6871_p8 = pneg %p6870_p7 }
 0x3fe   : > { %p6876_p12 = pnand %p6875_p11, %p6871_p8 }
 0x400   : > { %6879 = shalt.err (!%p6876_p12)
}
 0x401   : > { %5901 = dma.vmem_to_hbm [thread:$0]  (%p6995_p5), %s5120_s14, 16, %s8985_s16, %s5107_s18  }
 0x402 PF: > { %p5907_p13 = scmp.ge.s32.totalorder %s6914_s27, 2  ;;  %s5131_s13 = sand.u32 1, %s6902_s24  }
 0x403   : > { %s5132_s9 = scalar_lea.sflag [#allocation4], %s5131_s13 }
 0x404   : > { %p5904_p0 = pnand %p5907_p13, %p6999_p6 }
 0x406   : > { %p5905_p1 = pneg %p5904_p0 }
 0x408   : > { %6897 = dma.done.wait (%p5905_p1), %s5132_s9, 16  }
 0x409   : > { %6899 = vsyncadd (%p5905_p1), %s5132_s9, 4294967280  ;;  %p17_p2 = scmp.ge.s32.totalorder %s6982_s30, 4   ;;  %s9032_s24 = smov %s6906_s25 }
 0x40a   : > { %s9033_s25 = smov %s6910_s26  ;;  %s9034_s26 = smov %s6993_s10 }
 0x40b   : > { %s9035_s27 = smov %s6982_s30  ;;  %19 = sbr.rel (!%p17_p2) target bundleno = 5 (0x5), region = 94 }
 0x410   :  { %5136 = vsyncpa [#allocation4], 1 }
 0x411   :  { %5138 = vsyncpa [#allocation4 + $0x1], 1 }

</bundles_post_ra>
